<compile_context>
chip_gen: v5e
topology: v5e:2x2
jax: 0.10.0
libtpu: 0.0.40
codegen_flags: <defaults>
</compile_context>

<pallas_src>
import functools

import jax
import jax.numpy as jnp
from jax import lax
from jax.experimental import pallas as pl
from jax.experimental.pallas import tpu as pltpu


# ------------------------------- Pallas kernel -------------------------------

def _fad_kernel(H0, W0, Cin, C,
                x_ref, wpre_ref, wsep_ref, wskip_ref, bias_ref,
                seg_ref, out_ref, scr):
    """One image per grid step: preconv + XBlock1 + XBlock2, all in VMEM."""
    f32 = jnp.float32
    bf16 = jnp.bfloat16

    def sel(ho, wo, src_row_w, src_rows):
        # (ho*wo, src_rows) 0/1 matrix selecting flat source index (2i)*src_row_w + 2j
        # for output p = i*wo + j.  wo is a power of two -> shift/mask, no integer div.
        assert wo > 0 and (wo & (wo - 1)) == 0
        shift = (wo - 1).bit_length()
        p = lax.broadcasted_iota(jnp.int32, (ho * wo, src_rows), 0)
        q = lax.broadcasted_iota(jnp.int32, (ho * wo, src_rows), 1)
        i = p >> shift
        j = p & (wo - 1)
        return (q == 2 * i * src_row_w + 2 * j).astype(f32)

    def conv9(plane_bf, m_ext, wp, wsel):
        # 3x3 conv (stride 1) on a zero-padded plane flattened row-major with row width wp.
        # Output is "extended": m_ext rows, only the first (wp-2) columns of each row valid.
        acc = None
        for k in range(9):
            off = (k // 3) * wp + (k % 3)
            d = jnp.dot(plane_bf[off:off + m_ext, :], wsel(k),
                        preferred_element_type=f32)
            acc = d if acc is None else acc + d
        return acc

    # ---------------- preconv: Conv2d(Cin,C,3,s=2,p=1) + BN + ReLU ----------------
    Wp0 = W0 + 2
    M0 = (H0 - 1) * Wp0 + W0                        # extended stride-1 output length
    xin = x_ref[...].astype(bf16)                   # (Hp0*Wp0, Cin) zero-padded input plane
    y = conv9(xin, M0, Wp0, lambda k: wpre_ref[k]) + bias_ref[0:1, :]
    feas_ext = jnp.maximum(y, 0.0)                  # ReLU (extended layout)
    H1, W1 = H0 // 2, W0 // 2
    # stride-2 decimation -> compact (H1*W1, C) preconv output
    feas = jnp.dot(sel(H1, W1, Wp0, M0), feas_ext, preferred_element_type=f32)

    # -------------- Xception Block(C, C, reps=2, strides=2), fully fused ---------
    def block(x, h, w, bidx):
        # x: compact (h*w, C) block input (pre-ReLU).  Returns compact (h/2*w/2, C).
        wp = w + 2
        m_ext = (h - 1) * wp + w
        ho, wo = h // 2, w // 2
        bi = 3 * bidx

        def pad_interior(vals, src_row_w):
            # write the valid w columns of each row into the padded plane held in `scr`
            for r in range(h):
                dst = (r + 1) * wp + 1
                scr[dst:dst + w, :] = vals[r * src_row_w:r * src_row_w + w, :]

        # main path: ReLU -> SepConv -> BN -> ReLU -> SepConv -> BN
        scr[...] = jnp.zeros(scr.shape, f32)                       # zero borders
        pad_interior(jnp.maximum(x, 0.0), w)                       # compact input, row width w
        t1 = conv9(scr[...].astype(bf16), m_ext, wp,
                   lambda k: wsep_ref[2 * bidx, k]) + bias_ref[1 + bi:2 + bi, :]
        pad_interior(jnp.maximum(t1, 0.0), wp)                     # borders still zero
        t2 = conv9(scr[...].astype(bf16), m_ext, wp,
                   lambda k: wsep_ref[2 * bidx + 1, k]) + bias_ref[2 + bi:3 + bi, :]

        # MaxPool2d(3, stride=2, pad=1): 9-tap max on a NEG-padded plane, then decimate
        scr[...] = jnp.full(scr.shape, -1e30, f32)
        pad_interior(t2, wp)
        plane = scr[...]
        pooled = None
        for k in range(9):
            off = (k // 3) * wp + (k % 3)
            tap = plane[off:off + m_ext, :]
            pooled = tap if pooled is None else jnp.maximum(pooled, tap)
        pooled_c = jnp.dot(sel(ho, wo, wp, m_ext), pooled, preferred_element_type=f32)

        # skip branch: Conv1x1 stride-2 + BN on the raw block input, residual add
        xs = jnp.dot(sel(ho, wo, w, h * w), x, preferred_element_type=f32)
        skip = jnp.dot(xs.astype(bf16), wskip_ref[bidx],
                       preferred_element_type=f32) + bias_ref[3 + bi:4 + bi, :]
        return pooled_c + skip

    seg = block(feas, H1, W1, 0)                    # (H1/2*W1/2, C)
    seg_ref[...] = seg
    out_ref[...] = block(seg, H1 // 2, W1 // 2, 1)  # (H1/4*W1/4, C)


# ------------------------------- weight packing -------------------------------

def _bn_affine(gamma, beta, mean, var, eps=1e-5):
    s = gamma / jnp.sqrt(var + eps)
    return s, beta - mean * s


def _pack_params(params, Cin, C=32):
    s_pre, b_pre = _bn_affine(*params['pre_bn'])
    w_pre = jnp.transpose(params['pre_w'], (2, 3, 1, 0)).reshape(9, Cin, C)
    w_pre = (w_pre * s_pre[None, None, :]).astype(jnp.bfloat16)      # BN scale folded

    def block_pack(bp):
        s1, b1 = _bn_affine(*bp['bn1'])
        s2, b2 = _bn_affine(*bp['bn2'])
        ss, bs = _bn_affine(*bp['skip_bn'])
        dw1 = jnp.transpose(bp['dw1'][:, 0], (1, 2, 0)).reshape(9, C)     # (9, ci)
        dw2 = jnp.transpose(bp['dw2'][:, 0], (1, 2, 0)).reshape(9, C)
        pw1 = jnp.transpose(bp['pw1'][:, :, 0, 0], (1, 0))                # (ci, co)
        pw2 = jnp.transpose(bp['pw2'][:, :, 0, 0], (1, 0))
        # depthwise folded into pointwise (+ BN scale) -> 9 per-tap (ci,co) MXU weights
        w1 = dw1[:, :, None] * pw1[None, :, :] * s1[None, None, :]
        w2 = dw2[:, :, None] * pw2[None, :, :] * s2[None, None, :]
        wsk = jnp.transpose(bp['skip_w'][:, :, 0, 0], (1, 0)) * ss[None, :]
        return (w1, w2, wsk), (b1, b2, bs)

    (w11, w12, wsk1), (b11, b12, bs1) = block_pack(params['block1'])
    (w21, w22, wsk2), (b21, b22, bs2) = block_pack(params['block2'])
    w_sep = jnp.stack([w11, w12, w21, w22]).astype(jnp.bfloat16)     # (4, 9, C, C)
    w_skip = jnp.stack([wsk1, wsk2]).astype(jnp.bfloat16)            # (2, C, C)
    bias = jnp.stack([b_pre, b11, b12, bs1, b21, b22, bs2]).astype(jnp.float32)  # (7, C)
    return w_pre, w_sep, w_skip, bias


# ------------------------------- model forward --------------------------------

def fad_conv_forward(x_nchw, params):
    x = jnp.transpose(x_nchw, (0, 2, 3, 1)).astype(jnp.float32)      # NCHW -> NHWC
    n, H0, W0, Cin = x.shape
    assert H0 % 8 == 0 and W0 % 8 == 0
    C = 32
    Hp0, Wp0 = H0 + 2, W0 + 2
    # pad the network input once and flatten row-major; everything else stays in VMEM
    xp = jnp.pad(x, ((0, 0), (1, 1), (1, 1), (0, 0))).reshape(n, Hp0 * Wp0, Cin)
    w_pre, w_sep, w_skip, bias = _pack_params(params, Cin, C)

    H1, W1 = H0 // 2, W0 // 2                 # preconv output
    Hs, Ws = H1 // 2, W1 // 2                 # seg_FAD spatial
    Ho, Wo = H1 // 4, W1 // 4                 # final output spatial
    scr_rows = (H1 + 2) * (W1 + 2)            # largest padded plane needed in scratch

    bc = lambda shape: pl.BlockSpec(shape, lambda i, _n=len(shape): (0,) * _n)

    seg_flat, out_flat = pl.pallas_call(
        functools.partial(_fad_kernel, H0, W0, Cin, C),
        out_shape=(jax.ShapeDtypeStruct((n, Hs * Ws, C), jnp.float32),
                   jax.ShapeDtypeStruct((n, Ho * Wo, C), jnp.float32)),
        grid=(n,),
        in_specs=[pl.BlockSpec((None, Hp0 * Wp0, Cin), lambda i: (i, 0, 0)),
                  bc((9, Cin, C)),
                  bc((4, 9, C, C)),
                  bc((2, C, C)),
                  bc((7, C))],
        out_specs=(pl.BlockSpec((None, Hs * Ws, C), lambda i: (i, 0, 0)),
                   pl.BlockSpec((None, Ho * Wo, C), lambda i: (i, 0, 0))),
        scratch_shapes=[pltpu.VMEM((scr_rows, C), jnp.float32)],
        compiler_params=pltpu.CompilerParams(dimension_semantics=("parallel",)),
    )(xp, w_pre, w_sep, w_skip, bias)

    seg = jnp.transpose(seg_flat.reshape(n, Hs, Ws, C), (0, 3, 1, 2))
    out = jnp.transpose(out_flat.reshape(n, Ho, Wo, C), (0, 3, 1, 2))
    return seg, out


# ------------------------ deterministic parameter init ------------------------

def init_params(key, in_channel=12):
    keys = iter(jax.random.split(key, 64))

    def nrm(shape, fan_in):
        return jax.random.normal(next(keys), shape, jnp.float32) * (1.0 / fan_in) ** 0.5

    def bn_params(c):
        gamma = 1.0 + 0.1 * jax.random.normal(next(keys), (c,), jnp.float32)
        beta = 0.1 * jax.random.normal(next(keys), (c,), jnp.float32)
        return (gamma, beta, jnp.zeros((c,), jnp.float32), jnp.ones((c,), jnp.float32))

    def block_params(cin, cout):
        return dict(
            dw1=nrm((cin, 1, 3, 3), 9), pw1=nrm((cout, cin, 1, 1), cin), bn1=bn_params(cout),
            dw2=nrm((cout, 1, 3, 3), 9), pw2=nrm((cout, cout, 1, 1), cout), bn2=bn_params(cout),
            skip_w=nrm((cout, cin, 1, 1), cin), skip_bn=bn_params(cout),
        )

    return dict(
        pre_w=nrm((32, in_channel, 3, 3), in_channel * 9),
        pre_bn=bn_params(32),
        block1=block_params(32, 32),
        block2=block_params(32, 32),
    )


# ----------------------------- pure-JAX reference ------------------------------

def ref_forward(x, p):
    def conv(x, w, stride, pad, groups=1):
        return lax.conv_general_dilated(
            x, w, (stride, stride), [(pad, pad), (pad, pad)],
            dimension_numbers=('NCHW', 'OIHW', 'NCHW'),
            feature_group_count=groups, precision=lax.Precision.HIGHEST)

    def bn(x, prm, eps=1e-5):
        g, b, m, v = prm
        s = g / jnp.sqrt(v + eps)
        bb = b - m * s
        return x * s[None, :, None, None] + bb[None, :, None, None]

    relu = lambda t: jnp.maximum(t, 0.0)

    def block(x, bp):
        c = x.shape[1]
        t = relu(x)
        t = bn(conv(conv(t, bp['dw1'], 1, 1, groups=c), bp['pw1'], 1, 0), bp['bn1'])
        t = relu(t)
        t = bn(conv(conv(t, bp['dw2'], 1, 1, groups=t.shape[1]), bp['pw2'], 1, 0), bp['bn2'])
        t = lax.reduce_window(t, -jnp.inf, lax.max, (1, 1, 3, 3), (1, 1, 2, 2),
                              [(0, 0), (0, 0), (1, 1), (1, 1)])
        skip = bn(conv(x, bp['skip_w'], 2, 0), bp['skip_bn'])
        return t + skip

    feas = relu(bn(conv(x, p['pre_w'], 2, 1), p['pre_bn']))
    seg = block(feas, p['block1'])
    out = block(seg, p['block2'])
    return seg, out


# ------------------------------------ main -------------------------------------

if __name__ == "__main__":
    key = jax.random.PRNGKey(0)
    kx, kp = jax.random.split(key)
    x = jax.random.normal(kx, (2, 12, 16, 16), jnp.float32)   # NCHW, in_channel=12
    params = init_params(kp, in_channel=12)

    seg, out = jax.jit(fad_conv_forward)(x, params)
    jax.block_until_ready((seg, out))

    assert seg.shape == (2, 32, 4, 4), seg.shape
    assert out.shape == (2, 32, 2, 2), out.shape

    ref_seg, ref_out = ref_forward(x, params)
    err_seg = float(jnp.abs(seg - ref_seg).max())
    err_out = float(jnp.abs(out - ref_out).max())
    # Conv/skip matmuls use bf16 operands (f32 accumulation) per the performance guidance,
    # so tolerance is looser than the f32-HIGHEST reference; real indexing bugs give O(1) errors.
    assert jnp.allclose(seg, ref_seg, atol=5e-2, rtol=5e-2), err_seg
    assert jnp.allclose(out, ref_out, atol=5e-2, rtol=5e-2), err_out

    print("KERNEL_OK")
</pallas_src>

<mosaic_0001>
module attributes {stable_mosaic.version = 11 : i64} {
  func.func @_fad_kernel(%arg0: i32, %arg1: memref<1x324x12xf32, #tpu.memory_space<vmem>>, %arg2: memref<9x12x32xbf16, #tpu.memory_space<vmem>>, %arg3: memref<4x9x32x32xbf16, #tpu.memory_space<vmem>>, %arg4: memref<2x32x32xbf16, #tpu.memory_space<vmem>>, %arg5: memref<7x32xf32, #tpu.memory_space<vmem>>, %arg6: memref<1x16x32xf32, #tpu.memory_space<vmem>>, %arg7: memref<1x4x32xf32, #tpu.memory_space<vmem>>, %arg8: memref<100x32xf32, #tpu.memory_space<vmem>>) attributes {dimension_semantics = [#tpu.dimension_semantics<parallel>], iteration_bounds = array<i64: 2>, scalar_prefetch = 0 : i64, scratch_operands = 1 : i64, tpu.core_type = #tpu.core_type<tc>, window_params = [{transform_indices = @transform_0, window_bounds = array<i64: 1, 324, 12>}, {pipeline_mode = #tpu.pipeline_mode<synchronous>, transform_indices = @transform_1, window_bounds = array<i64: 9, 12, 32>}, {pipeline_mode = #tpu.pipeline_mode<synchronous>, transform_indices = @transform_2, window_bounds = array<i64: 4, 9, 32, 32>}, {pipeline_mode = #tpu.pipeline_mode<synchronous>, transform_indices = @transform_3, window_bounds = array<i64: 2, 32, 32>}, {pipeline_mode = #tpu.pipeline_mode<synchronous>, transform_indices = @transform_4, window_bounds = array<i64: 7, 32>}, {transform_indices = @transform_5, window_bounds = array<i64: 1, 16, 32>}, {transform_indices = @transform_6, window_bounds = array<i64: 1, 4, 32>}]} {
    %c0 = arith.constant 0 : index
    %c0_0 = arith.constant 0 : index
    %c0_1 = arith.constant 0 : index
    %0 = vector.load %arg1[%c0, %c0_0, %c0_1] : memref<1x324x12xf32, #tpu.memory_space<vmem>>, vector<1x324x12xf32>
    %1 = vector.shape_cast %0 : vector<1x324x12xf32> to vector<324x12xf32>
    %2 = arith.truncf %1 : vector<324x12xf32> to vector<324x12xbf16>
    %3 = vector.extract_strided_slice %2 {offsets = [0, 0], sizes = [286, 12], strides = [1, 1]} : vector<324x12xbf16> to vector<286x12xbf16>
    %c0_2 = arith.constant 0 : index
    %c0_3 = arith.constant 0 : index
    %c0_4 = arith.constant 0 : index
    %4 = vector.load %arg2[%c0_2, %c0_3, %c0_4] : memref<9x12x32xbf16, #tpu.memory_space<vmem>>, vector<1x12x32xbf16>
    %5 = vector.shape_cast %4 : vector<1x12x32xbf16> to vector<12x32xbf16>
    %cst = arith.constant dense<0.000000e+00> : vector<286x32xf32>
    %6 = tpu.matmul %3, %5, %cst {dimension_numbers = #tpu.dot_dimension_numbers<[1], [0], [0], [1], [0, 0, 1, 1], [], []>} : vector<286x12xbf16>, vector<12x32xbf16>, vector<286x32xf32> -> vector<286x32xf32>
    %7 = vector.extract_strided_slice %2 {offsets = [1, 0], sizes = [286, 12], strides = [1, 1]} : vector<324x12xbf16> to vector<286x12xbf16>
    %c1 = arith.constant 1 : index
    %c0_5 = arith.constant 0 : index
    %c0_6 = arith.constant 0 : index
    %8 = vector.load %arg2[%c1, %c0_5, %c0_6] : memref<9x12x32xbf16, #tpu.memory_space<vmem>>, vector<1x12x32xbf16>
    %9 = vector.shape_cast %8 : vector<1x12x32xbf16> to vector<12x32xbf16>
    %cst_7 = arith.constant dense<0.000000e+00> : vector<286x32xf32>
    %10 = tpu.matmul %7, %9, %cst_7 {dimension_numbers = #tpu.dot_dimension_numbers<[1], [0], [0], [1], [0, 0, 1, 1], [], []>} : vector<286x12xbf16>, vector<12x32xbf16>, vector<286x32xf32> -> vector<286x32xf32>
    %11 = arith.addf %6, %10 : vector<286x32xf32>
    %12 = vector.extract_strided_slice %2 {offsets = [2, 0], sizes = [286, 12], strides = [1, 1]} : vector<324x12xbf16> to vector<286x12xbf16>
    %c2 = arith.constant 2 : index
    %c0_8 = arith.constant 0 : index
    %c0_9 = arith.constant 0 : index
    %13 = vector.load %arg2[%c2, %c0_8, %c0_9] : memref<9x12x32xbf16, #tpu.memory_space<vmem>>, vector<1x12x32xbf16>
    %14 = vector.shape_cast %13 : vector<1x12x32xbf16> to vector<12x32xbf16>
    %cst_10 = arith.constant dense<0.000000e+00> : vector<286x32xf32>
    %15 = tpu.matmul %12, %14, %cst_10 {dimension_numbers = #tpu.dot_dimension_numbers<[1], [0], [0], [1], [0, 0, 1, 1], [], []>} : vector<286x12xbf16>, vector<12x32xbf16>, vector<286x32xf32> -> vector<286x32xf32>
    %16 = arith.addf %11, %15 : vector<286x32xf32>
    %17 = vector.extract_strided_slice %2 {offsets = [18, 0], sizes = [286, 12], strides = [1, 1]} : vector<324x12xbf16> to vector<286x12xbf16>
    %c3 = arith.constant 3 : index
    %c0_11 = arith.constant 0 : index
    %c0_12 = arith.constant 0 : index
    %18 = vector.load %arg2[%c3, %c0_11, %c0_12] : memref<9x12x32xbf16, #tpu.memory_space<vmem>>, vector<1x12x32xbf16>
    %19 = vector.shape_cast %18 : vector<1x12x32xbf16> to vector<12x32xbf16>
    %cst_13 = arith.constant dense<0.000000e+00> : vector<286x32xf32>
    %20 = tpu.matmul %17, %19, %cst_13 {dimension_numbers = #tpu.dot_dimension_numbers<[1], [0], [0], [1], [0, 0, 1, 1], [], []>} : vector<286x12xbf16>, vector<12x32xbf16>, vector<286x32xf32> -> vector<286x32xf32>
    %21 = arith.addf %16, %20 : vector<286x32xf32>
    %22 = vector.extract_strided_slice %2 {offsets = [19, 0], sizes = [286, 12], strides = [1, 1]} : vector<324x12xbf16> to vector<286x12xbf16>
    %c4 = arith.constant 4 : index
    %c0_14 = arith.constant 0 : index
    %c0_15 = arith.constant 0 : index
    %23 = vector.load %arg2[%c4, %c0_14, %c0_15] : memref<9x12x32xbf16, #tpu.memory_space<vmem>>, vector<1x12x32xbf16>
    %24 = vector.shape_cast %23 : vector<1x12x32xbf16> to vector<12x32xbf16>
    %cst_16 = arith.constant dense<0.000000e+00> : vector<286x32xf32>
    %25 = tpu.matmul %22, %24, %cst_16 {dimension_numbers = #tpu.dot_dimension_numbers<[1], [0], [0], [1], [0, 0, 1, 1], [], []>} : vector<286x12xbf16>, vector<12x32xbf16>, vector<286x32xf32> -> vector<286x32xf32>
    %26 = arith.addf %21, %25 : vector<286x32xf32>
    %27 = vector.extract_strided_slice %2 {offsets = [20, 0], sizes = [286, 12], strides = [1, 1]} : vector<324x12xbf16> to vector<286x12xbf16>
    %c5 = arith.constant 5 : index
    %c0_17 = arith.constant 0 : index
    %c0_18 = arith.constant 0 : index
    %28 = vector.load %arg2[%c5, %c0_17, %c0_18] : memref<9x12x32xbf16, #tpu.memory_space<vmem>>, vector<1x12x32xbf16>
    %29 = vector.shape_cast %28 : vector<1x12x32xbf16> to vector<12x32xbf16>
    %cst_19 = arith.constant dense<0.000000e+00> : vector<286x32xf32>
    %30 = tpu.matmul %27, %29, %cst_19 {dimension_numbers = #tpu.dot_dimension_numbers<[1], [0], [0], [1], [0, 0, 1, 1], [], []>} : vector<286x12xbf16>, vector<12x32xbf16>, vector<286x32xf32> -> vector<286x32xf32>
    %31 = arith.addf %26, %30 : vector<286x32xf32>
    %32 = vector.extract_strided_slice %2 {offsets = [36, 0], sizes = [286, 12], strides = [1, 1]} : vector<324x12xbf16> to vector<286x12xbf16>
    %c6 = arith.constant 6 : index
    %c0_20 = arith.constant 0 : index
    %c0_21 = arith.constant 0 : index
    %33 = vector.load %arg2[%c6, %c0_20, %c0_21] : memref<9x12x32xbf16, #tpu.memory_space<vmem>>, vector<1x12x32xbf16>
    %34 = vector.shape_cast %33 : vector<1x12x32xbf16> to vector<12x32xbf16>
    %cst_22 = arith.constant dense<0.000000e+00> : vector<286x32xf32>
    %35 = tpu.matmul %32, %34, %cst_22 {dimension_numbers = #tpu.dot_dimension_numbers<[1], [0], [0], [1], [0, 0, 1, 1], [], []>} : vector<286x12xbf16>, vector<12x32xbf16>, vector<286x32xf32> -> vector<286x32xf32>
    %36 = arith.addf %31, %35 : vector<286x32xf32>
    %37 = vector.extract_strided_slice %2 {offsets = [37, 0], sizes = [286, 12], strides = [1, 1]} : vector<324x12xbf16> to vector<286x12xbf16>
    %c7 = arith.constant 7 : index
    %c0_23 = arith.constant 0 : index
    %c0_24 = arith.constant 0 : index
    %38 = vector.load %arg2[%c7, %c0_23, %c0_24] : memref<9x12x32xbf16, #tpu.memory_space<vmem>>, vector<1x12x32xbf16>
    %39 = vector.shape_cast %38 : vector<1x12x32xbf16> to vector<12x32xbf16>
    %cst_25 = arith.constant dense<0.000000e+00> : vector<286x32xf32>
    %40 = tpu.matmul %37, %39, %cst_25 {dimension_numbers = #tpu.dot_dimension_numbers<[1], [0], [0], [1], [0, 0, 1, 1], [], []>} : vector<286x12xbf16>, vector<12x32xbf16>, vector<286x32xf32> -> vector<286x32xf32>
    %41 = arith.addf %36, %40 : vector<286x32xf32>
    %42 = vector.extract_strided_slice %2 {offsets = [38, 0], sizes = [286, 12], strides = [1, 1]} : vector<324x12xbf16> to vector<286x12xbf16>
    %c8 = arith.constant 8 : index
    %c0_26 = arith.constant 0 : index
    %c0_27 = arith.constant 0 : index
    %43 = vector.load %arg2[%c8, %c0_26, %c0_27] : memref<9x12x32xbf16, #tpu.memory_space<vmem>>, vector<1x12x32xbf16>
    %44 = vector.shape_cast %43 : vector<1x12x32xbf16> to vector<12x32xbf16>
    %cst_28 = arith.constant dense<0.000000e+00> : vector<286x32xf32>
    %45 = tpu.matmul %42, %44, %cst_28 {dimension_numbers = #tpu.dot_dimension_numbers<[1], [0], [0], [1], [0, 0, 1, 1], [], []>} : vector<286x12xbf16>, vector<12x32xbf16>, vector<286x32xf32> -> vector<286x32xf32>
    %46 = arith.addf %41, %45 : vector<286x32xf32>
    %c0_29 = arith.constant 0 : index
    %c0_30 = arith.constant 0 : index
    %47 = vector.load %arg5[%c0_29, %c0_30] : memref<7x32xf32, #tpu.memory_space<vmem>>, vector<1x32xf32>
    %48 = vector.broadcast %47 : vector<1x32xf32> to vector<286x32xf32>
    %49 = arith.addf %46, %48 : vector<286x32xf32>
    %cst_31 = arith.constant 0.000000e+00 : f32
    %50 = vector.broadcast %cst_31 : f32 to vector<286x32xf32>
    %51 = arith.maximumf %49, %50 : vector<286x32xf32>
    %52 = tpu.iota {dimensions = array<i32: 0>} : vector<64x286xi32>
    %53 = tpu.iota {dimensions = array<i32: 1>} : vector<64x286xi32>
    %c3_i32 = arith.constant 3 : i32
    %54 = vector.broadcast %c3_i32 : i32 to vector<64x286xi32>
    %55 = arith.shrsi %52, %54 : vector<64x286xi32>
    %c7_i32 = arith.constant 7 : i32
    %56 = vector.broadcast %c7_i32 : i32 to vector<64x286xi32>
    %57 = arith.andi %52, %56 : vector<64x286xi32>
    %c2_i32 = arith.constant 2 : i32
    %58 = vector.broadcast %c2_i32 : i32 to vector<64x286xi32>
    %59 = arith.muli %58, %55 : vector<64x286xi32>
    %c18_i32 = arith.constant 18 : i32
    %60 = vector.broadcast %c18_i32 : i32 to vector<64x286xi32>
    %61 = arith.muli %59, %60 : vector<64x286xi32>
    %c2_i32_32 = arith.constant 2 : i32
    %62 = vector.broadcast %c2_i32_32 : i32 to vector<64x286xi32>
    %63 = arith.muli %62, %57 : vector<64x286xi32>
    %64 = arith.addi %61, %63 : vector<64x286xi32>
    %65 = arith.cmpi eq, %53, %64 : vector<64x286xi32>
    %66 = arith.extui %65 : vector<64x286xi1> to vector<64x286xi32>
    %67 = arith.sitofp %66 : vector<64x286xi32> to vector<64x286xf32>
    %cst_33 = arith.constant dense<0.000000e+00> : vector<64x32xf32>
    %68 = tpu.matmul %67, %51, %cst_33 {dimension_numbers = #tpu.dot_dimension_numbers<[1], [0], [0], [1], [0, 0, 1, 1], [], []>} : vector<64x286xf32>, vector<286x32xf32>, vector<64x32xf32> -> vector<64x32xf32>
    %cst_34 = arith.constant 0.000000e+00 : f32
    %69 = vector.broadcast %cst_34 : f32 to vector<100x32xf32>
    %c0_35 = arith.constant 0 : index
    %c0_36 = arith.constant 0 : index
    %70 = vector.load %arg8[%c0_35, %c0_36] : memref<100x32xf32, #tpu.memory_space<vmem>>, vector<100x32xf32>
    tpu.vector_store %arg8[%c0_35, %c0_36], %69 {strides = array<i32>} : memref<100x32xf32, #tpu.memory_space<vmem>>, vector<100x32xf32>,
    %cst_37 = arith.constant 0.000000e+00 : f32
    %71 = vector.broadcast %cst_37 : f32 to vector<64x32xf32>
    %72 = arith.maximumf %68, %71 : vector<64x32xf32>
    %73 = vector.extract_strided_slice %72 {offsets = [0, 0], sizes = [8, 32], strides = [1, 1]} : vector<64x32xf32> to vector<8x32xf32>
    %c11 = arith.constant 11 : index
    %c0_38 = arith.constant 0 : index
    %74 = vector.load %arg8[%c11, %c0_38] : memref<100x32xf32, #tpu.memory_space<vmem>>, vector<8x32xf32>
    tpu.vector_store %arg8[%c11, %c0_38], %73 {strides = array<i32>} : memref<100x32xf32, #tpu.memory_space<vmem>>, vector<8x32xf32>,
    %75 = vector.extract_strided_slice %72 {offsets = [8, 0], sizes = [8, 32], strides = [1, 1]} : vector<64x32xf32> to vector<8x32xf32>
    %c21 = arith.constant 21 : index
    %c0_39 = arith.constant 0 : index
    %76 = vector.load %arg8[%c21, %c0_39] : memref<100x32xf32, #tpu.memory_space<vmem>>, vector<8x32xf32>
    tpu.vector_store %arg8[%c21, %c0_39], %75 {strides = array<i32>} : memref<100x32xf32, #tpu.memory_space<vmem>>, vector<8x32xf32>,
    %77 = vector.extract_strided_slice %72 {offsets = [16, 0], sizes = [8, 32], strides = [1, 1]} : vector<64x32xf32> to vector<8x32xf32>
    %c31 = arith.constant 31 : index
    %c0_40 = arith.constant 0 : index
    %78 = vector.load %arg8[%c31, %c0_40] : memref<100x32xf32, #tpu.memory_space<vmem>>, vector<8x32xf32>
    tpu.vector_store %arg8[%c31, %c0_40], %77 {strides = array<i32>} : memref<100x32xf32, #tpu.memory_space<vmem>>, vector<8x32xf32>,
    %79 = vector.extract_strided_slice %72 {offsets = [24, 0], sizes = [8, 32], strides = [1, 1]} : vector<64x32xf32> to vector<8x32xf32>
    %c41 = arith.constant 41 : index
    %c0_41 = arith.constant 0 : index
    %80 = vector.load %arg8[%c41, %c0_41] : memref<100x32xf32, #tpu.memory_space<vmem>>, vector<8x32xf32>
    tpu.vector_store %arg8[%c41, %c0_41], %79 {strides = array<i32>} : memref<100x32xf32, #tpu.memory_space<vmem>>, vector<8x32xf32>,
    %81 = vector.extract_strided_slice %72 {offsets = [32, 0], sizes = [8, 32], strides = [1, 1]} : vector<64x32xf32> to vector<8x32xf32>
    %c51 = arith.constant 51 : index
    %c0_42 = arith.constant 0 : index
    %82 = vector.load %arg8[%c51, %c0_42] : memref<100x32xf32, #tpu.memory_space<vmem>>, vector<8x32xf32>
    tpu.vector_store %arg8[%c51, %c0_42], %81 {strides = array<i32>} : memref<100x32xf32, #tpu.memory_space<vmem>>, vector<8x32xf32>,
    %83 = vector.extract_strided_slice %72 {offsets = [40, 0], sizes = [8, 32], strides = [1, 1]} : vector<64x32xf32> to vector<8x32xf32>
    %c61 = arith.constant 61 : index
    %c0_43 = arith.constant 0 : index
    %84 = vector.load %arg8[%c61, %c0_43] : memref<100x32xf32, #tpu.memory_space<vmem>>, vector<8x32xf32>
    tpu.vector_store %arg8[%c61, %c0_43], %83 {strides = array<i32>} : memref<100x32xf32, #tpu.memory_space<vmem>>, vector<8x32xf32>,
    %85 = vector.extract_strided_slice %72 {offsets = [48, 0], sizes = [8, 32], strides = [1, 1]} : vector<64x32xf32> to vector<8x32xf32>
    %c71 = arith.constant 71 : index
    %c0_44 = arith.constant 0 : index
    %86 = vector.load %arg8[%c71, %c0_44] : memref<100x32xf32, #tpu.memory_space<vmem>>, vector<8x32xf32>
    tpu.vector_store %arg8[%c71, %c0_44], %85 {strides = array<i32>} : memref<100x32xf32, #tpu.memory_space<vmem>>, vector<8x32xf32>,
    %87 = vector.extract_strided_slice %72 {offsets = [56, 0], sizes = [8, 32], strides = [1, 1]} : vector<64x32xf32> to vector<8x32xf32>
    %c81 = arith.constant 81 : index
    %c0_45 = arith.constant 0 : index
    %88 = vector.load %arg8[%c81, %c0_45] : memref<100x32xf32, #tpu.memory_space<vmem>>, vector<8x32xf32>
    tpu.vector_store %arg8[%c81, %c0_45], %87 {strides = array<i32>} : memref<100x32xf32, #tpu.memory_space<vmem>>, vector<8x32xf32>,
    %c0_46 = arith.constant 0 : index
    %c0_47 = arith.constant 0 : index
    %89 = vector.load %arg8[%c0_46, %c0_47] : memref<100x32xf32, #tpu.memory_space<vmem>>, vector<100x32xf32>
    %90 = arith.truncf %89 : vector<100x32xf32> to vector<100x32xbf16>
    %91 = vector.extract_strided_slice %90 {offsets = [0, 0], sizes = [78, 32], strides = [1, 1]} : vector<100x32xbf16> to vector<78x32xbf16>
    %c0_48 = arith.constant 0 : index
    %c0_49 = arith.constant 0 : index
    %c0_50 = arith.constant 0 : index
    %c0_51 = arith.constant 0 : index
    %92 = vector.load %arg3[%c0_48, %c0_49, %c0_50, %c0_51] : memref<4x9x32x32xbf16, #tpu.memory_space<vmem>>, vector<1x1x32x32xbf16>
    %93 = vector.shape_cast %92 : vector<1x1x32x32xbf16> to vector<32x32xbf16>
    %cst_52 = arith.constant dense<0.000000e+00> : vector<78x32xf32>
    %94 = tpu.matmul %91, %93, %cst_52 {dimension_numbers = #tpu.dot_dimension_numbers<[1], [0], [0], [1], [0, 0, 1, 1], [], []>} : vector<78x32xbf16>, vector<32x32xbf16>, vector<78x32xf32> -> vector<78x32xf32>
    %95 = vector.extract_strided_slice %90 {offsets = [1, 0], sizes = [78, 32], strides = [1, 1]} : vector<100x32xbf16> to vector<78x32xbf16>
    %c0_53 = arith.constant 0 : index
    %c1_54 = arith.constant 1 : index
    %c0_55 = arith.constant 0 : index
    %c0_56 = arith.constant 0 : index
    %96 = vector.load %arg3[%c0_53, %c1_54, %c0_55, %c0_56] : memref<4x9x32x32xbf16, #tpu.memory_space<vmem>>, vector<1x1x32x32xbf16>
    %97 = vector.shape_cast %96 : vector<1x1x32x32xbf16> to vector<32x32xbf16>
    %cst_57 = arith.constant dense<0.000000e+00> : vector<78x32xf32>
    %98 = tpu.matmul %95, %97, %cst_57 {dimension_numbers = #tpu.dot_dimension_numbers<[1], [0], [0], [1], [0, 0, 1, 1], [], []>} : vector<78x32xbf16>, vector<32x32xbf16>, vector<78x32xf32> -> vector<78x32xf32>
    %99 = arith.addf %94, %98 : vector<78x32xf32>
    %100 = vector.extract_strided_slice %90 {offsets = [2, 0], sizes = [78, 32], strides = [1, 1]} : vector<100x32xbf16> to vector<78x32xbf16>
    %c0_58 = arith.constant 0 : index
    %c2_59 = arith.constant 2 : index
    %c0_60 = arith.constant 0 : index
    %c0_61 = arith.constant 0 : index
    %101 = vector.load %arg3[%c0_58, %c2_59, %c0_60, %c0_61] : memref<4x9x32x32xbf16, #tpu.memory_space<vmem>>, vector<1x1x32x32xbf16>
    %102 = vector.shape_cast %101 : vector<1x1x32x32xbf16> to vector<32x32xbf16>
    %cst_62 = arith.constant dense<0.000000e+00> : vector<78x32xf32>
    %103 = tpu.matmul %100, %102, %cst_62 {dimension_numbers = #tpu.dot_dimension_numbers<[1], [0], [0], [1], [0, 0, 1, 1], [], []>} : vector<78x32xbf16>, vector<32x32xbf16>, vector<78x32xf32> -> vector<78x32xf32>
    %104 = arith.addf %99, %103 : vector<78x32xf32>
    %105 = vector.extract_strided_slice %90 {offsets = [10, 0], sizes = [78, 32], strides = [1, 1]} : vector<100x32xbf16> to vector<78x32xbf16>
    %c0_63 = arith.constant 0 : index
    %c3_64 = arith.constant 3 : index
    %c0_65 = arith.constant 0 : index
    %c0_66 = arith.constant 0 : index
    %106 = vector.load %arg3[%c0_63, %c3_64, %c0_65, %c0_66] : memref<4x9x32x32xbf16, #tpu.memory_space<vmem>>, vector<1x1x32x32xbf16>
    %107 = vector.shape_cast %106 : vector<1x1x32x32xbf16> to vector<32x32xbf16>
    %cst_67 = arith.constant dense<0.000000e+00> : vector<78x32xf32>
    %108 = tpu.matmul %105, %107, %cst_67 {dimension_numbers = #tpu.dot_dimension_numbers<[1], [0], [0], [1], [0, 0, 1, 1], [], []>} : vector<78x32xbf16>, vector<32x32xbf16>, vector<78x32xf32> -> vector<78x32xf32>
    %109 = arith.addf %104, %108 : vector<78x32xf32>
    %110 = vector.extract_strided_slice %90 {offsets = [11, 0], sizes = [78, 32], strides = [1, 1]} : vector<100x32xbf16> to vector<78x32xbf16>
    %c0_68 = arith.constant 0 : index
    %c4_69 = arith.constant 4 : index
    %c0_70 = arith.constant 0 : index
    %c0_71 = arith.constant 0 : index
    %111 = vector.load %arg3[%c0_68, %c4_69, %c0_70, %c0_71] : memref<4x9x32x32xbf16, #tpu.memory_space<vmem>>, vector<1x1x32x32xbf16>
    %112 = vector.shape_cast %111 : vector<1x1x32x32xbf16> to vector<32x32xbf16>
    %cst_72 = arith.constant dense<0.000000e+00> : vector<78x32xf32>
    %113 = tpu.matmul %110, %112, %cst_72 {dimension_numbers = #tpu.dot_dimension_numbers<[1], [0], [0], [1], [0, 0, 1, 1], [], []>} : vector<78x32xbf16>, vector<32x32xbf16>, vector<78x32xf32> -> vector<78x32xf32>
    %114 = arith.addf %109, %113 : vector<78x32xf32>
    %115 = vector.extract_strided_slice %90 {offsets = [12, 0], sizes = [78, 32], strides = [1, 1]} : vector<100x32xbf16> to vector<78x32xbf16>
    %c0_73 = arith.constant 0 : index
    %c5_74 = arith.constant 5 : index
    %c0_75 = arith.constant 0 : index
    %c0_76 = arith.constant 0 : index
    %116 = vector.load %arg3[%c0_73, %c5_74, %c0_75, %c0_76] : memref<4x9x32x32xbf16, #tpu.memory_space<vmem>>, vector<1x1x32x32xbf16>
    %117 = vector.shape_cast %116 : vector<1x1x32x32xbf16> to vector<32x32xbf16>
    %cst_77 = arith.constant dense<0.000000e+00> : vector<78x32xf32>
    %118 = tpu.matmul %115, %117, %cst_77 {dimension_numbers = #tpu.dot_dimension_numbers<[1], [0], [0], [1], [0, 0, 1, 1], [], []>} : vector<78x32xbf16>, vector<32x32xbf16>, vector<78x32xf32> -> vector<78x32xf32>
    %119 = arith.addf %114, %118 : vector<78x32xf32>
    %120 = vector.extract_strided_slice %90 {offsets = [20, 0], sizes = [78, 32], strides = [1, 1]} : vector<100x32xbf16> to vector<78x32xbf16>
    %c0_78 = arith.constant 0 : index
    %c6_79 = arith.constant 6 : index
    %c0_80 = arith.constant 0 : index
    %c0_81 = arith.constant 0 : index
    %121 = vector.load %arg3[%c0_78, %c6_79, %c0_80, %c0_81] : memref<4x9x32x32xbf16, #tpu.memory_space<vmem>>, vector<1x1x32x32xbf16>
    %122 = vector.shape_cast %121 : vector<1x1x32x32xbf16> to vector<32x32xbf16>
    %cst_82 = arith.constant dense<0.000000e+00> : vector<78x32xf32>
    %123 = tpu.matmul %120, %122, %cst_82 {dimension_numbers = #tpu.dot_dimension_numbers<[1], [0], [0], [1], [0, 0, 1, 1], [], []>} : vector<78x32xbf16>, vector<32x32xbf16>, vector<78x32xf32> -> vector<78x32xf32>
    %124 = arith.addf %119, %123 : vector<78x32xf32>
    %125 = vector.extract_strided_slice %90 {offsets = [21, 0], sizes = [78, 32], strides = [1, 1]} : vector<100x32xbf16> to vector<78x32xbf16>
    %c0_83 = arith.constant 0 : index
    %c7_84 = arith.constant 7 : index
    %c0_85 = arith.constant 0 : index
    %c0_86 = arith.constant 0 : index
    %126 = vector.load %arg3[%c0_83, %c7_84, %c0_85, %c0_86] : memref<4x9x32x32xbf16, #tpu.memory_space<vmem>>, vector<1x1x32x32xbf16>
    %127 = vector.shape_cast %126 : vector<1x1x32x32xbf16> to vector<32x32xbf16>
    %cst_87 = arith.constant dense<0.000000e+00> : vector<78x32xf32>
    %128 = tpu.matmul %125, %127, %cst_87 {dimension_numbers = #tpu.dot_dimension_numbers<[1], [0], [0], [1], [0, 0, 1, 1], [], []>} : vector<78x32xbf16>, vector<32x32xbf16>, vector<78x32xf32> -> vector<78x32xf32>
    %129 = arith.addf %124, %128 : vector<78x32xf32>
    %130 = vector.extract_strided_slice %90 {offsets = [22, 0], sizes = [78, 32], strides = [1, 1]} : vector<100x32xbf16> to vector<78x32xbf16>
    %c0_88 = arith.constant 0 : index
    %c8_89 = arith.constant 8 : index
    %c0_90 = arith.constant 0 : index
    %c0_91 = arith.constant 0 : index
    %131 = vector.load %arg3[%c0_88, %c8_89, %c0_90, %c0_91] : memref<4x9x32x32xbf16, #tpu.memory_space<vmem>>, vector<1x1x32x32xbf16>
    %132 = vector.shape_cast %131 : vector<1x1x32x32xbf16> to vector<32x32xbf16>
    %cst_92 = arith.constant dense<0.000000e+00> : vector<78x32xf32>
    %133 = tpu.matmul %130, %132, %cst_92 {dimension_numbers = #tpu.dot_dimension_numbers<[1], [0], [0], [1], [0, 0, 1, 1], [], []>} : vector<78x32xbf16>, vector<32x32xbf16>, vector<78x32xf32> -> vector<78x32xf32>
    %134 = arith.addf %129, %133 : vector<78x32xf32>
    %c1_93 = arith.constant 1 : index
    %c0_94 = arith.constant 0 : index
    %135 = vector.load %arg5[%c1_93, %c0_94] : memref<7x32xf32, #tpu.memory_space<vmem>>, vector<1x32xf32>
    %136 = vector.broadcast %135 : vector<1x32xf32> to vector<78x32xf32>
    %137 = arith.addf %134, %136 : vector<78x32xf32>
    %cst_95 = arith.constant 0.000000e+00 : f32
    %138 = vector.broadcast %cst_95 : f32 to vector<78x32xf32>
    %139 = arith.maximumf %137, %138 : vector<78x32xf32>
    %140 = vector.extract_strided_slice %139 {offsets = [0, 0], sizes = [8, 32], strides = [1, 1]} : vector<78x32xf32> to vector<8x32xf32>
    %c11_96 = arith.constant 11 : index
    %c0_97 = arith.constant 0 : index
    %141 = vector.load %arg8[%c11_96, %c0_97] : memref<100x32xf32, #tpu.memory_space<vmem>>, vector<8x32xf32>
    tpu.vector_store %arg8[%c11_96, %c0_97], %140 {strides = array<i32>} : memref<100x32xf32, #tpu.memory_space<vmem>>, vector<8x32xf32>,
    %142 = vector.extract_strided_slice %139 {offsets = [10, 0], sizes = [8, 32], strides = [1, 1]} : vector<78x32xf32> to vector<8x32xf32>
    %c21_98 = arith.constant 21 : index
    %c0_99 = arith.constant 0 : index
    %143 = vector.load %arg8[%c21_98, %c0_99] : memref<100x32xf32, #tpu.memory_space<vmem>>, vector<8x32xf32>
    tpu.vector_store %arg8[%c21_98, %c0_99], %142 {strides = array<i32>} : memref<100x32xf32, #tpu.memory_space<vmem>>, vector<8x32xf32>,
    %144 = vector.extract_strided_slice %139 {offsets = [20, 0], sizes = [8, 32], strides = [1, 1]} : vector<78x32xf32> to vector<8x32xf32>
    %c31_100 = arith.constant 31 : index
    %c0_101 = arith.constant 0 : index
    %145 = vector.load %arg8[%c31_100, %c0_101] : memref<100x32xf32, #tpu.memory_space<vmem>>, vector<8x32xf32>
    tpu.vector_store %arg8[%c31_100, %c0_101], %144 {strides = array<i32>} : memref<100x32xf32, #tpu.memory_space<vmem>>, vector<8x32xf32>,
    %146 = vector.extract_strided_slice %139 {offsets = [30, 0], sizes = [8, 32], strides = [1, 1]} : vector<78x32xf32> to vector<8x32xf32>
    %c41_102 = arith.constant 41 : index
    %c0_103 = arith.constant 0 : index
    %147 = vector.load %arg8[%c41_102, %c0_103] : memref<100x32xf32, #tpu.memory_space<vmem>>, vector<8x32xf32>
    tpu.vector_store %arg8[%c41_102, %c0_103], %146 {strides = array<i32>} : memref<100x32xf32, #tpu.memory_space<vmem>>, vector<8x32xf32>,
    %148 = vector.extract_strided_slice %139 {offsets = [40, 0], sizes = [8, 32], strides = [1, 1]} : vector<78x32xf32> to vector<8x32xf32>
    %c51_104 = arith.constant 51 : index
    %c0_105 = arith.constant 0 : index
    %149 = vector.load %arg8[%c51_104, %c0_105] : memref<100x32xf32, #tpu.memory_space<vmem>>, vector<8x32xf32>
    tpu.vector_store %arg8[%c51_104, %c0_105], %148 {strides = array<i32>} : memref<100x32xf32, #tpu.memory_space<vmem>>, vector<8x32xf32>,
    %150 = vector.extract_strided_slice %139 {offsets = [50, 0], sizes = [8, 32], strides = [1, 1]} : vector<78x32xf32> to vector<8x32xf32>
    %c61_106 = arith.constant 61 : index
    %c0_107 = arith.constant 0 : index
    %151 = vector.load %arg8[%c61_106, %c0_107] : memref<100x32xf32, #tpu.memory_space<vmem>>, vector<8x32xf32>
    tpu.vector_store %arg8[%c61_106, %c0_107], %150 {strides = array<i32>} : memref<100x32xf32, #tpu.memory_space<vmem>>, vector<8x32xf32>,
    %152 = vector.extract_strided_slice %139 {offsets = [60, 0], sizes = [8, 32], strides = [1, 1]} : vector<78x32xf32> to vector<8x32xf32>
    %c71_108 = arith.constant 71 : index
    %c0_109 = arith.constant 0 : index
    %153 = vector.load %arg8[%c71_108, %c0_109] : memref<100x32xf32, #tpu.memory_space<vmem>>, vector<8x32xf32>
    tpu.vector_store %arg8[%c71_108, %c0_109], %152 {strides = array<i32>} : memref<100x32xf32, #tpu.memory_space<vmem>>, vector<8x32xf32>,
    %154 = vector.extract_strided_slice %139 {offsets = [70, 0], sizes = [8, 32], strides = [1, 1]} : vector<78x32xf32> to vector<8x32xf32>
    %c81_110 = arith.constant 81 : index
    %c0_111 = arith.constant 0 : index
    %155 = vector.load %arg8[%c81_110, %c0_111] : memref<100x32xf32, #tpu.memory_space<vmem>>, vector<8x32xf32>
    tpu.vector_store %arg8[%c81_110, %c0_111], %154 {strides = array<i32>} : memref<100x32xf32, #tpu.memory_space<vmem>>, vector<8x32xf32>,
    %c0_112 = arith.constant 0 : index
    %c0_113 = arith.constant 0 : index
    %156 = vector.load %arg8[%c0_112, %c0_113] : memref<100x32xf32, #tpu.memory_space<vmem>>, vector<100x32xf32>
    %157 = arith.truncf %156 : vector<100x32xf32> to vector<100x32xbf16>
    %158 = vector.extract_strided_slice %157 {offsets = [0, 0], sizes = [78, 32], strides = [1, 1]} : vector<100x32xbf16> to vector<78x32xbf16>
    %c1_114 = arith.constant 1 : index
    %c0_115 = arith.constant 0 : index
    %c0_116 = arith.constant 0 : index
    %c0_117 = arith.constant 0 : index
    %159 = vector.load %arg3[%c1_114, %c0_115, %c0_116, %c0_117] : memref<4x9x32x32xbf16, #tpu.memory_space<vmem>>, vector<1x1x32x32xbf16>
    %160 = vector.shape_cast %159 : vector<1x1x32x32xbf16> to vector<32x32xbf16>
    %cst_118 = arith.constant dense<0.000000e+00> : vector<78x32xf32>
    %161 = tpu.matmul %158, %160, %cst_118 {dimension_numbers = #tpu.dot_dimension_numbers<[1], [0], [0], [1], [0, 0, 1, 1], [], []>} : vector<78x32xbf16>, vector<32x32xbf16>, vector<78x32xf32> -> vector<78x32xf32>
    %162 = vector.extract_strided_slice %157 {offsets = [1, 0], sizes = [78, 32], strides = [1, 1]} : vector<100x32xbf16> to vector<78x32xbf16>
    %c1_119 = arith.constant 1 : index
    %c1_120 = arith.constant 1 : index
    %c0_121 = arith.constant 0 : index
    %c0_122 = arith.constant 0 : index
    %163 = vector.load %arg3[%c1_119, %c1_120, %c0_121, %c0_122] : memref<4x9x32x32xbf16, #tpu.memory_space<vmem>>, vector<1x1x32x32xbf16>
    %164 = vector.shape_cast %163 : vector<1x1x32x32xbf16> to vector<32x32xbf16>
    %cst_123 = arith.constant dense<0.000000e+00> : vector<78x32xf32>
    %165 = tpu.matmul %162, %164, %cst_123 {dimension_numbers = #tpu.dot_dimension_numbers<[1], [0], [0], [1], [0, 0, 1, 1], [], []>} : vector<78x32xbf16>, vector<32x32xbf16>, vector<78x32xf32> -> vector<78x32xf32>
    %166 = arith.addf %161, %165 : vector<78x32xf32>
    %167 = vector.extract_strided_slice %157 {offsets = [2, 0], sizes = [78, 32], strides = [1, 1]} : vector<100x32xbf16> to vector<78x32xbf16>
    %c1_124 = arith.constant 1 : index
    %c2_125 = arith.constant 2 : index
    %c0_126 = arith.constant 0 : index
    %c0_127 = arith.constant 0 : index
    %168 = vector.load %arg3[%c1_124, %c2_125, %c0_126, %c0_127] : memref<4x9x32x32xbf16, #tpu.memory_space<vmem>>, vector<1x1x32x32xbf16>
    %169 = vector.shape_cast %168 : vector<1x1x32x32xbf16> to vector<32x32xbf16>
    %cst_128 = arith.constant dense<0.000000e+00> : vector<78x32xf32>
    %170 = tpu.matmul %167, %169, %cst_128 {dimension_numbers = #tpu.dot_dimension_numbers<[1], [0], [0], [1], [0, 0, 1, 1], [], []>} : vector<78x32xbf16>, vector<32x32xbf16>, vector<78x32xf32> -> vector<78x32xf32>
    %171 = arith.addf %166, %170 : vector<78x32xf32>
    %172 = vector.extract_strided_slice %157 {offsets = [10, 0], sizes = [78, 32], strides = [1, 1]} : vector<100x32xbf16> to vector<78x32xbf16>
    %c1_129 = arith.constant 1 : index
    %c3_130 = arith.constant 3 : index
    %c0_131 = arith.constant 0 : index
    %c0_132 = arith.constant 0 : index
    %173 = vector.load %arg3[%c1_129, %c3_130, %c0_131, %c0_132] : memref<4x9x32x32xbf16, #tpu.memory_space<vmem>>, vector<1x1x32x32xbf16>
    %174 = vector.shape_cast %173 : vector<1x1x32x32xbf16> to vector<32x32xbf16>
    %cst_133 = arith.constant dense<0.000000e+00> : vector<78x32xf32>
    %175 = tpu.matmul %172, %174, %cst_133 {dimension_numbers = #tpu.dot_dimension_numbers<[1], [0], [0], [1], [0, 0, 1, 1], [], []>} : vector<78x32xbf16>, vector<32x32xbf16>, vector<78x32xf32> -> vector<78x32xf32>
    %176 = arith.addf %171, %175 : vector<78x32xf32>
    %177 = vector.extract_strided_slice %157 {offsets = [11, 0], sizes = [78, 32], strides = [1, 1]} : vector<100x32xbf16> to vector<78x32xbf16>
    %c1_134 = arith.constant 1 : index
    %c4_135 = arith.constant 4 : index
    %c0_136 = arith.constant 0 : index
    %c0_137 = arith.constant 0 : index
    %178 = vector.load %arg3[%c1_134, %c4_135, %c0_136, %c0_137] : memref<4x9x32x32xbf16, #tpu.memory_space<vmem>>, vector<1x1x32x32xbf16>
    %179 = vector.shape_cast %178 : vector<1x1x32x32xbf16> to vector<32x32xbf16>
    %cst_138 = arith.constant dense<0.000000e+00> : vector<78x32xf32>
    %180 = tpu.matmul %177, %179, %cst_138 {dimension_numbers = #tpu.dot_dimension_numbers<[1], [0], [0], [1], [0, 0, 1, 1], [], []>} : vector<78x32xbf16>, vector<32x32xbf16>, vector<78x32xf32> -> vector<78x32xf32>
    %181 = arith.addf %176, %180 : vector<78x32xf32>
    %182 = vector.extract_strided_slice %157 {offsets = [12, 0], sizes = [78, 32], strides = [1, 1]} : vector<100x32xbf16> to vector<78x32xbf16>
    %c1_139 = arith.constant 1 : index
    %c5_140 = arith.constant 5 : index
    %c0_141 = arith.constant 0 : index
    %c0_142 = arith.constant 0 : index
    %183 = vector.load %arg3[%c1_139, %c5_140, %c0_141, %c0_142] : memref<4x9x32x32xbf16, #tpu.memory_space<vmem>>, vector<1x1x32x32xbf16>
    %184 = vector.shape_cast %183 : vector<1x1x32x32xbf16> to vector<32x32xbf16>
    %cst_143 = arith.constant dense<0.000000e+00> : vector<78x32xf32>
    %185 = tpu.matmul %182, %184, %cst_143 {dimension_numbers = #tpu.dot_dimension_numbers<[1], [0], [0], [1], [0, 0, 1, 1], [], []>} : vector<78x32xbf16>, vector<32x32xbf16>, vector<78x32xf32> -> vector<78x32xf32>
    %186 = arith.addf %181, %185 : vector<78x32xf32>
    %187 = vector.extract_strided_slice %157 {offsets = [20, 0], sizes = [78, 32], strides = [1, 1]} : vector<100x32xbf16> to vector<78x32xbf16>
    %c1_144 = arith.constant 1 : index
    %c6_145 = arith.constant 6 : index
    %c0_146 = arith.constant 0 : index
    %c0_147 = arith.constant 0 : index
    %188 = vector.load %arg3[%c1_144, %c6_145, %c0_146, %c0_147] : memref<4x9x32x32xbf16, #tpu.memory_space<vmem>>, vector<1x1x32x32xbf16>
    %189 = vector.shape_cast %188 : vector<1x1x32x32xbf16> to vector<32x32xbf16>
    %cst_148 = arith.constant dense<0.000000e+00> : vector<78x32xf32>
    %190 = tpu.matmul %187, %189, %cst_148 {dimension_numbers = #tpu.dot_dimension_numbers<[1], [0], [0], [1], [0, 0, 1, 1], [], []>} : vector<78x32xbf16>, vector<32x32xbf16>, vector<78x32xf32> -> vector<78x32xf32>
    %191 = arith.addf %186, %190 : vector<78x32xf32>
    %192 = vector.extract_strided_slice %157 {offsets = [21, 0], sizes = [78, 32], strides = [1, 1]} : vector<100x32xbf16> to vector<78x32xbf16>
    %c1_149 = arith.constant 1 : index
    %c7_150 = arith.constant 7 : index
    %c0_151 = arith.constant 0 : index
    %c0_152 = arith.constant 0 : index
    %193 = vector.load %arg3[%c1_149, %c7_150, %c0_151, %c0_152] : memref<4x9x32x32xbf16, #tpu.memory_space<vmem>>, vector<1x1x32x32xbf16>
    %194 = vector.shape_cast %193 : vector<1x1x32x32xbf16> to vector<32x32xbf16>
    %cst_153 = arith.constant dense<0.000000e+00> : vector<78x32xf32>
    %195 = tpu.matmul %192, %194, %cst_153 {dimension_numbers = #tpu.dot_dimension_numbers<[1], [0], [0], [1], [0, 0, 1, 1], [], []>} : vector<78x32xbf16>, vector<32x32xbf16>, vector<78x32xf32> -> vector<78x32xf32>
    %196 = arith.addf %191, %195 : vector<78x32xf32>
    %197 = vector.extract_strided_slice %157 {offsets = [22, 0], sizes = [78, 32], strides = [1, 1]} : vector<100x32xbf16> to vector<78x32xbf16>
    %c1_154 = arith.constant 1 : index
    %c8_155 = arith.constant 8 : index
    %c0_156 = arith.constant 0 : index
    %c0_157 = arith.constant 0 : index
    %198 = vector.load %arg3[%c1_154, %c8_155, %c0_156, %c0_157] : memref<4x9x32x32xbf16, #tpu.memory_space<vmem>>, vector<1x1x32x32xbf16>
    %199 = vector.shape_cast %198 : vector<1x1x32x32xbf16> to vector<32x32xbf16>
    %cst_158 = arith.constant dense<0.000000e+00> : vector<78x32xf32>
    %200 = tpu.matmul %197, %199, %cst_158 {dimension_numbers = #tpu.dot_dimension_numbers<[1], [0], [0], [1], [0, 0, 1, 1], [], []>} : vector<78x32xbf16>, vector<32x32xbf16>, vector<78x32xf32> -> vector<78x32xf32>
    %201 = arith.addf %196, %200 : vector<78x32xf32>
    %c2_159 = arith.constant 2 : index
    %c0_160 = arith.constant 0 : index
    %202 = vector.load %arg5[%c2_159, %c0_160] : memref<7x32xf32, #tpu.memory_space<vmem>>, vector<1x32xf32>
    %203 = vector.broadcast %202 : vector<1x32xf32> to vector<78x32xf32>
    %204 = arith.addf %201, %203 : vector<78x32xf32>
    %cst_161 = arith.constant -1.000000e+30 : f32
    %205 = vector.broadcast %cst_161 : f32 to vector<100x32xf32>
    %c0_162 = arith.constant 0 : index
    %c0_163 = arith.constant 0 : index
    %206 = vector.load %arg8[%c0_162, %c0_163] : memref<100x32xf32, #tpu.memory_space<vmem>>, vector<100x32xf32>
    tpu.vector_store %arg8[%c0_162, %c0_163], %205 {strides = array<i32>} : memref<100x32xf32, #tpu.memory_space<vmem>>, vector<100x32xf32>,
    %207 = vector.extract_strided_slice %204 {offsets = [0, 0], sizes = [8, 32], strides = [1, 1]} : vector<78x32xf32> to vector<8x32xf32>
    %c11_164 = arith.constant 11 : index
    %c0_165 = arith.constant 0 : index
    %208 = vector.load %arg8[%c11_164, %c0_165] : memref<100x32xf32, #tpu.memory_space<vmem>>, vector<8x32xf32>
    tpu.vector_store %arg8[%c11_164, %c0_165], %207 {strides = array<i32>} : memref<100x32xf32, #tpu.memory_space<vmem>>, vector<8x32xf32>,
    %209 = vector.extract_strided_slice %204 {offsets = [10, 0], sizes = [8, 32], strides = [1, 1]} : vector<78x32xf32> to vector<8x32xf32>
    %c21_166 = arith.constant 21 : index
    %c0_167 = arith.constant 0 : index
    %210 = vector.load %arg8[%c21_166, %c0_167] : memref<100x32xf32, #tpu.memory_space<vmem>>, vector<8x32xf32>
    tpu.vector_store %arg8[%c21_166, %c0_167], %209 {strides = array<i32>} : memref<100x32xf32, #tpu.memory_space<vmem>>, vector<8x32xf32>,
    %211 = vector.extract_strided_slice %204 {offsets = [20, 0], sizes = [8, 32], strides = [1, 1]} : vector<78x32xf32> to vector<8x32xf32>
    %c31_168 = arith.constant 31 : index
    %c0_169 = arith.constant 0 : index
    %212 = vector.load %arg8[%c31_168, %c0_169] : memref<100x32xf32, #tpu.memory_space<vmem>>, vector<8x32xf32>
    tpu.vector_store %arg8[%c31_168, %c0_169], %211 {strides = array<i32>} : memref<100x32xf32, #tpu.memory_space<vmem>>, vector<8x32xf32>,
    %213 = vector.extract_strided_slice %204 {offsets = [30, 0], sizes = [8, 32], strides = [1, 1]} : vector<78x32xf32> to vector<8x32xf32>
    %c41_170 = arith.constant 41 : index
    %c0_171 = arith.constant 0 : index
    %214 = vector.load %arg8[%c41_170, %c0_171] : memref<100x32xf32, #tpu.memory_space<vmem>>, vector<8x32xf32>
    tpu.vector_store %arg8[%c41_170, %c0_171], %213 {strides = array<i32>} : memref<100x32xf32, #tpu.memory_space<vmem>>, vector<8x32xf32>,
    %215 = vector.extract_strided_slice %204 {offsets = [40, 0], sizes = [8, 32], strides = [1, 1]} : vector<78x32xf32> to vector<8x32xf32>
    %c51_172 = arith.constant 51 : index
    %c0_173 = arith.constant 0 : index
    %216 = vector.load %arg8[%c51_172, %c0_173] : memref<100x32xf32, #tpu.memory_space<vmem>>, vector<8x32xf32>
    tpu.vector_store %arg8[%c51_172, %c0_173], %215 {strides = array<i32>} : memref<100x32xf32, #tpu.memory_space<vmem>>, vector<8x32xf32>,
    %217 = vector.extract_strided_slice %204 {offsets = [50, 0], sizes = [8, 32], strides = [1, 1]} : vector<78x32xf32> to vector<8x32xf32>
    %c61_174 = arith.constant 61 : index
    %c0_175 = arith.constant 0 : index
    %218 = vector.load %arg8[%c61_174, %c0_175] : memref<100x32xf32, #tpu.memory_space<vmem>>, vector<8x32xf32>
    tpu.vector_store %arg8[%c61_174, %c0_175], %217 {strides = array<i32>} : memref<100x32xf32, #tpu.memory_space<vmem>>, vector<8x32xf32>,
    %219 = vector.extract_strided_slice %204 {offsets = [60, 0], sizes = [8, 32], strides = [1, 1]} : vector<78x32xf32> to vector<8x32xf32>
    %c71_176 = arith.constant 71 : index
    %c0_177 = arith.constant 0 : index
    %220 = vector.load %arg8[%c71_176, %c0_177] : memref<100x32xf32, #tpu.memory_space<vmem>>, vector<8x32xf32>
    tpu.vector_store %arg8[%c71_176, %c0_177], %219 {strides = array<i32>} : memref<100x32xf32, #tpu.memory_space<vmem>>, vector<8x32xf32>,
    %221 = vector.extract_strided_slice %204 {offsets = [70, 0], sizes = [8, 32], strides = [1, 1]} : vector<78x32xf32> to vector<8x32xf32>
    %c81_178 = arith.constant 81 : index
    %c0_179 = arith.constant 0 : index
    %222 = vector.load %arg8[%c81_178, %c0_179] : memref<100x32xf32, #tpu.memory_space<vmem>>, vector<8x32xf32>
    tpu.vector_store %arg8[%c81_178, %c0_179], %221 {strides = array<i32>} : memref<100x32xf32, #tpu.memory_space<vmem>>, vector<8x32xf32>,
    %c0_180 = arith.constant 0 : index
    %c0_181 = arith.constant 0 : index
    %223 = vector.load %arg8[%c0_180, %c0_181] : memref<100x32xf32, #tpu.memory_space<vmem>>, vector<100x32xf32>
    %224 = vector.extract_strided_slice %223 {offsets = [0, 0], sizes = [78, 32], strides = [1, 1]} : vector<100x32xf32> to vector<78x32xf32>
    %225 = vector.extract_strided_slice %223 {offsets = [1, 0], sizes = [78, 32], strides = [1, 1]} : vector<100x32xf32> to vector<78x32xf32>
    %226 = arith.maximumf %224, %225 : vector<78x32xf32>
    %227 = vector.extract_strided_slice %223 {offsets = [2, 0], sizes = [78, 32], strides = [1, 1]} : vector<100x32xf32> to vector<78x32xf32>
    %228 = arith.maximumf %226, %227 : vector<78x32xf32>
    %229 = vector.extract_strided_slice %223 {offsets = [10, 0], sizes = [78, 32], strides = [1, 1]} : vector<100x32xf32> to vector<78x32xf32>
    %230 = arith.maximumf %228, %229 : vector<78x32xf32>
    %231 = vector.extract_strided_slice %223 {offsets = [11, 0], sizes = [78, 32], strides = [1, 1]} : vector<100x32xf32> to vector<78x32xf32>
    %232 = arith.maximumf %230, %231 : vector<78x32xf32>
    %233 = vector.extract_strided_slice %223 {offsets = [12, 0], sizes = [78, 32], strides = [1, 1]} : vector<100x32xf32> to vector<78x32xf32>
    %234 = arith.maximumf %232, %233 : vector<78x32xf32>
    %235 = vector.extract_strided_slice %223 {offsets = [20, 0], sizes = [78, 32], strides = [1, 1]} : vector<100x32xf32> to vector<78x32xf32>
    %236 = arith.maximumf %234, %235 : vector<78x32xf32>
    %237 = vector.extract_strided_slice %223 {offsets = [21, 0], sizes = [78, 32], strides = [1, 1]} : vector<100x32xf32> to vector<78x32xf32>
    %238 = arith.maximumf %236, %237 : vector<78x32xf32>
    %239 = vector.extract_strided_slice %223 {offsets = [22, 0], sizes = [78, 32], strides = [1, 1]} : vector<100x32xf32> to vector<78x32xf32>
    %240 = arith.maximumf %238, %239 : vector<78x32xf32>
    %241 = tpu.iota {dimensions = array<i32: 0>} : vector<16x78xi32>
    %242 = tpu.iota {dimensions = array<i32: 1>} : vector<16x78xi32>
    %c2_i32_182 = arith.constant 2 : i32
    %243 = vector.broadcast %c2_i32_182 : i32 to vector<16x78xi32>
    %244 = arith.shrsi %241, %243 : vector<16x78xi32>
    %c3_i32_183 = arith.constant 3 : i32
    %245 = vector.broadcast %c3_i32_183 : i32 to vector<16x78xi32>
    %246 = arith.andi %241, %245 : vector<16x78xi32>
    %c2_i32_184 = arith.constant 2 : i32
    %247 = vector.broadcast %c2_i32_184 : i32 to vector<16x78xi32>
    %248 = arith.muli %247, %244 : vector<16x78xi32>
    %c10_i32 = arith.constant 10 : i32
    %249 = vector.broadcast %c10_i32 : i32 to vector<16x78xi32>
    %250 = arith.muli %248, %249 : vector<16x78xi32>
    %c2_i32_185 = arith.constant 2 : i32
    %251 = vector.broadcast %c2_i32_185 : i32 to vector<16x78xi32>
    %252 = arith.muli %251, %246 : vector<16x78xi32>
    %253 = arith.addi %250, %252 : vector<16x78xi32>
    %254 = arith.cmpi eq, %242, %253 : vector<16x78xi32>
    %255 = arith.extui %254 : vector<16x78xi1> to vector<16x78xi32>
    %256 = arith.sitofp %255 : vector<16x78xi32> to vector<16x78xf32>
    %cst_186 = arith.constant dense<0.000000e+00> : vector<16x32xf32>
    %257 = tpu.matmul %256, %240, %cst_186 {dimension_numbers = #tpu.dot_dimension_numbers<[1], [0], [0], [1], [0, 0, 1, 1], [], []>} : vector<16x78xf32>, vector<78x32xf32>, vector<16x32xf32> -> vector<16x32xf32>
    %258 = tpu.iota {dimensions = array<i32: 0>} : vector<16x64xi32>
    %259 = tpu.iota {dimensions = array<i32: 1>} : vector<16x64xi32>
    %c2_i32_187 = arith.constant 2 : i32
    %260 = vector.broadcast %c2_i32_187 : i32 to vector<16x64xi32>
    %261 = arith.shrsi %258, %260 : vector<16x64xi32>
    %c3_i32_188 = arith.constant 3 : i32
    %262 = vector.broadcast %c3_i32_188 : i32 to vector<16x64xi32>
    %263 = arith.andi %258, %262 : vector<16x64xi32>
    %c2_i32_189 = arith.constant 2 : i32
    %264 = vector.broadcast %c2_i32_189 : i32 to vector<16x64xi32>
    %265 = arith.muli %264, %261 : vector<16x64xi32>
    %c8_i32 = arith.constant 8 : i32
    %266 = vector.broadcast %c8_i32 : i32 to vector<16x64xi32>
    %267 = arith.muli %265, %266 : vector<16x64xi32>
    %c2_i32_190 = arith.constant 2 : i32
    %268 = vector.broadcast %c2_i32_190 : i32 to vector<16x64xi32>
    %269 = arith.muli %268, %263 : vector<16x64xi32>
    %270 = arith.addi %267, %269 : vector<16x64xi32>
    %271 = arith.cmpi eq, %259, %270 : vector<16x64xi32>
    %272 = arith.extui %271 : vector<16x64xi1> to vector<16x64xi32>
    %273 = arith.sitofp %272 : vector<16x64xi32> to vector<16x64xf32>
    %cst_191 = arith.constant dense<0.000000e+00> : vector<16x32xf32>
    %274 = tpu.matmul %273, %68, %cst_191 {dimension_numbers = #tpu.dot_dimension_numbers<[1], [0], [0], [1], [0, 0, 1, 1], [], []>} : vector<16x64xf32>, vector<64x32xf32>, vector<16x32xf32> -> vector<16x32xf32>
    %275 = arith.truncf %274 : vector<16x32xf32> to vector<16x32xbf16>
    %c0_192 = arith.constant 0 : index
    %c0_193 = arith.constant 0 : index
    %c0_194 = arith.constant 0 : index
    %276 = vector.load %arg4[%c0_192, %c0_193, %c0_194] : memref<2x32x32xbf16, #tpu.memory_space<vmem>>, vector<1x32x32xbf16>
    %277 = vector.shape_cast %276 : vector<1x32x32xbf16> to vector<32x32xbf16>
    %cst_195 = arith.constant dense<0.000000e+00> : vector<16x32xf32>
    %278 = tpu.matmul %275, %277, %cst_195 {dimension_numbers = #tpu.dot_dimension_numbers<[1], [0], [0], [1], [0, 0, 1, 1], [], []>} : vector<16x32xbf16>, vector<32x32xbf16>, vector<16x32xf32> -> vector<16x32xf32>
    %c3_196 = arith.constant 3 : index
    %c0_197 = arith.constant 0 : index
    %279 = vector.load %arg5[%c3_196, %c0_197] : memref<7x32xf32, #tpu.memory_space<vmem>>, vector<1x32xf32>
    %280 = vector.broadcast %279 : vector<1x32xf32> to vector<16x32xf32>
    %281 = arith.addf %278, %280 : vector<16x32xf32>
    %282 = arith.addf %257, %281 : vector<16x32xf32>
    %c0_198 = arith.constant 0 : index
    %c0_199 = arith.constant 0 : index
    %c0_200 = arith.constant 0 : index
    %283 = vector.load %arg6[%c0_198, %c0_199, %c0_200] : memref<1x16x32xf32, #tpu.memory_space<vmem>>, vector<1x16x32xf32>
    %284 = vector.shape_cast %283 : vector<1x16x32xf32> to vector<16x32xf32>
    %285 = vector.shape_cast %282 : vector<16x32xf32> to vector<1x16x32xf32>
    tpu.vector_store %arg6[%c0_198, %c0_199, %c0_200], %285 {strides = array<i32>} : memref<1x16x32xf32, #tpu.memory_space<vmem>>, vector<1x16x32xf32>,
    %cst_201 = arith.constant 0.000000e+00 : f32
    %286 = vector.broadcast %cst_201 : f32 to vector<100x32xf32>
    %c0_202 = arith.constant 0 : index
    %c0_203 = arith.constant 0 : index
    %287 = vector.load %arg8[%c0_202, %c0_203] : memref<100x32xf32, #tpu.memory_space<vmem>>, vector<100x32xf32>
    tpu.vector_store %arg8[%c0_202, %c0_203], %286 {strides = array<i32>} : memref<100x32xf32, #tpu.memory_space<vmem>>, vector<100x32xf32>,
    %cst_204 = arith.constant 0.000000e+00 : f32
    %288 = vector.broadcast %cst_204 : f32 to vector<16x32xf32>
    %289 = arith.maximumf %282, %288 : vector<16x32xf32>
    %290 = vector.extract_strided_slice %289 {offsets = [0, 0], sizes = [4, 32], strides = [1, 1]} : vector<16x32xf32> to vector<4x32xf32>
    %c7_205 = arith.constant 7 : index
    %c0_206 = arith.constant 0 : index
    %291 = vector.load %arg8[%c7_205, %c0_206] : memref<100x32xf32, #tpu.memory_space<vmem>>, vector<4x32xf32>
    tpu.vector_store %arg8[%c7_205, %c0_206], %290 {strides = array<i32>} : memref<100x32xf32, #tpu.memory_space<vmem>>, vector<4x32xf32>,
    %292 = vector.extract_strided_slice %289 {offsets = [4, 0], sizes = [4, 32], strides = [1, 1]} : vector<16x32xf32> to vector<4x32xf32>
    %c13 = arith.constant 13 : index
    %c0_207 = arith.constant 0 : index
    %293 = vector.load %arg8[%c13, %c0_207] : memref<100x32xf32, #tpu.memory_space<vmem>>, vector<4x32xf32>
    tpu.vector_store %arg8[%c13, %c0_207], %292 {strides = array<i32>} : memref<100x32xf32, #tpu.memory_space<vmem>>, vector<4x32xf32>,
    %294 = vector.extract_strided_slice %289 {offsets = [8, 0], sizes = [4, 32], strides = [1, 1]} : vector<16x32xf32> to vector<4x32xf32>
    %c19 = arith.constant 19 : index
    %c0_208 = arith.constant 0 : index
    %295 = vector.load %arg8[%c19, %c0_208] : memref<100x32xf32, #tpu.memory_space<vmem>>, vector<4x32xf32>
    tpu.vector_store %arg8[%c19, %c0_208], %294 {strides = array<i32>} : memref<100x32xf32, #tpu.memory_space<vmem>>, vector<4x32xf32>,
    %296 = vector.extract_strided_slice %289 {offsets = [12, 0], sizes = [4, 32], strides = [1, 1]} : vector<16x32xf32> to vector<4x32xf32>
    %c25 = arith.constant 25 : index
    %c0_209 = arith.constant 0 : index
    %297 = vector.load %arg8[%c25, %c0_209] : memref<100x32xf32, #tpu.memory_space<vmem>>, vector<4x32xf32>
    tpu.vector_store %arg8[%c25, %c0_209], %296 {strides = array<i32>} : memref<100x32xf32, #tpu.memory_space<vmem>>, vector<4x32xf32>,
    %c0_210 = arith.constant 0 : index
    %c0_211 = arith.constant 0 : index
    %298 = vector.load %arg8[%c0_210, %c0_211] : memref<100x32xf32, #tpu.memory_space<vmem>>, vector<100x32xf32>
    %299 = arith.truncf %298 : vector<100x32xf32> to vector<100x32xbf16>
    %300 = vector.extract_strided_slice %299 {offsets = [0, 0], sizes = [22, 32], strides = [1, 1]} : vector<100x32xbf16> to vector<22x32xbf16>
    %c2_212 = arith.constant 2 : index
    %c0_213 = arith.constant 0 : index
    %c0_214 = arith.constant 0 : index
    %c0_215 = arith.constant 0 : index
    %301 = vector.load %arg3[%c2_212, %c0_213, %c0_214, %c0_215] : memref<4x9x32x32xbf16, #tpu.memory_space<vmem>>, vector<1x1x32x32xbf16>
    %302 = vector.shape_cast %301 : vector<1x1x32x32xbf16> to vector<32x32xbf16>
    %cst_216 = arith.constant dense<0.000000e+00> : vector<22x32xf32>
    %303 = tpu.matmul %300, %302, %cst_216 {dimension_numbers = #tpu.dot_dimension_numbers<[1], [0], [0], [1], [0, 0, 1, 1], [], []>} : vector<22x32xbf16>, vector<32x32xbf16>, vector<22x32xf32> -> vector<22x32xf32>
    %304 = vector.extract_strided_slice %299 {offsets = [1, 0], sizes = [22, 32], strides = [1, 1]} : vector<100x32xbf16> to vector<22x32xbf16>
    %c2_217 = arith.constant 2 : index
    %c1_218 = arith.constant 1 : index
    %c0_219 = arith.constant 0 : index
    %c0_220 = arith.constant 0 : index
    %305 = vector.load %arg3[%c2_217, %c1_218, %c0_219, %c0_220] : memref<4x9x32x32xbf16, #tpu.memory_space<vmem>>, vector<1x1x32x32xbf16>
    %306 = vector.shape_cast %305 : vector<1x1x32x32xbf16> to vector<32x32xbf16>
    %cst_221 = arith.constant dense<0.000000e+00> : vector<22x32xf32>
    %307 = tpu.matmul %304, %306, %cst_221 {dimension_numbers = #tpu.dot_dimension_numbers<[1], [0], [0], [1], [0, 0, 1, 1], [], []>} : vector<22x32xbf16>, vector<32x32xbf16>, vector<22x32xf32> -> vector<22x32xf32>
    %308 = arith.addf %303, %307 : vector<22x32xf32>
    %309 = vector.extract_strided_slice %299 {offsets = [2, 0], sizes = [22, 32], strides = [1, 1]} : vector<100x32xbf16> to vector<22x32xbf16>
    %c2_222 = arith.constant 2 : index
    %c2_223 = arith.constant 2 : index
    %c0_224 = arith.constant 0 : index
    %c0_225 = arith.constant 0 : index
    %310 = vector.load %arg3[%c2_222, %c2_223, %c0_224, %c0_225] : memref<4x9x32x32xbf16, #tpu.memory_space<vmem>>, vector<1x1x32x32xbf16>
    %311 = vector.shape_cast %310 : vector<1x1x32x32xbf16> to vector<32x32xbf16>
    %cst_226 = arith.constant dense<0.000000e+00> : vector<22x32xf32>
    %312 = tpu.matmul %309, %311, %cst_226 {dimension_numbers = #tpu.dot_dimension_numbers<[1], [0], [0], [1], [0, 0, 1, 1], [], []>} : vector<22x32xbf16>, vector<32x32xbf16>, vector<22x32xf32> -> vector<22x32xf32>
    %313 = arith.addf %308, %312 : vector<22x32xf32>
    %314 = vector.extract_strided_slice %299 {offsets = [6, 0], sizes = [22, 32], strides = [1, 1]} : vector<100x32xbf16> to vector<22x32xbf16>
    %c2_227 = arith.constant 2 : index
    %c3_228 = arith.constant 3 : index
    %c0_229 = arith.constant 0 : index
    %c0_230 = arith.constant 0 : index
    %315 = vector.load %arg3[%c2_227, %c3_228, %c0_229, %c0_230] : memref<4x9x32x32xbf16, #tpu.memory_space<vmem>>, vector<1x1x32x32xbf16>
    %316 = vector.shape_cast %315 : vector<1x1x32x32xbf16> to vector<32x32xbf16>
    %cst_231 = arith.constant dense<0.000000e+00> : vector<22x32xf32>
    %317 = tpu.matmul %314, %316, %cst_231 {dimension_numbers = #tpu.dot_dimension_numbers<[1], [0], [0], [1], [0, 0, 1, 1], [], []>} : vector<22x32xbf16>, vector<32x32xbf16>, vector<22x32xf32> -> vector<22x32xf32>
    %318 = arith.addf %313, %317 : vector<22x32xf32>
    %319 = vector.extract_strided_slice %299 {offsets = [7, 0], sizes = [22, 32], strides = [1, 1]} : vector<100x32xbf16> to vector<22x32xbf16>
    %c2_232 = arith.constant 2 : index
    %c4_233 = arith.constant 4 : index
    %c0_234 = arith.constant 0 : index
    %c0_235 = arith.constant 0 : index
    %320 = vector.load %arg3[%c2_232, %c4_233, %c0_234, %c0_235] : memref<4x9x32x32xbf16, #tpu.memory_space<vmem>>, vector<1x1x32x32xbf16>
    %321 = vector.shape_cast %320 : vector<1x1x32x32xbf16> to vector<32x32xbf16>
    %cst_236 = arith.constant dense<0.000000e+00> : vector<22x32xf32>
    %322 = tpu.matmul %319, %321, %cst_236 {dimension_numbers = #tpu.dot_dimension_numbers<[1], [0], [0], [1], [0, 0, 1, 1], [], []>} : vector<22x32xbf16>, vector<32x32xbf16>, vector<22x32xf32> -> vector<22x32xf32>
    %323 = arith.addf %318, %322 : vector<22x32xf32>
    %324 = vector.extract_strided_slice %299 {offsets = [8, 0], sizes = [22, 32], strides = [1, 1]} : vector<100x32xbf16> to vector<22x32xbf16>
    %c2_237 = arith.constant 2 : index
    %c5_238 = arith.constant 5 : index
    %c0_239 = arith.constant 0 : index
    %c0_240 = arith.constant 0 : index
    %325 = vector.load %arg3[%c2_237, %c5_238, %c0_239, %c0_240] : memref<4x9x32x32xbf16, #tpu.memory_space<vmem>>, vector<1x1x32x32xbf16>
    %326 = vector.shape_cast %325 : vector<1x1x32x32xbf16> to vector<32x32xbf16>
    %cst_241 = arith.constant dense<0.000000e+00> : vector<22x32xf32>
    %327 = tpu.matmul %324, %326, %cst_241 {dimension_numbers = #tpu.dot_dimension_numbers<[1], [0], [0], [1], [0, 0, 1, 1], [], []>} : vector<22x32xbf16>, vector<32x32xbf16>, vector<22x32xf32> -> vector<22x32xf32>
    %328 = arith.addf %323, %327 : vector<22x32xf32>
    %329 = vector.extract_strided_slice %299 {offsets = [12, 0], sizes = [22, 32], strides = [1, 1]} : vector<100x32xbf16> to vector<22x32xbf16>
    %c2_242 = arith.constant 2 : index
    %c6_243 = arith.constant 6 : index
    %c0_244 = arith.constant 0 : index
    %c0_245 = arith.constant 0 : index
    %330 = vector.load %arg3[%c2_242, %c6_243, %c0_244, %c0_245] : memref<4x9x32x32xbf16, #tpu.memory_space<vmem>>, vector<1x1x32x32xbf16>
    %331 = vector.shape_cast %330 : vector<1x1x32x32xbf16> to vector<32x32xbf16>
    %cst_246 = arith.constant dense<0.000000e+00> : vector<22x32xf32>
    %332 = tpu.matmul %329, %331, %cst_246 {dimension_numbers = #tpu.dot_dimension_numbers<[1], [0], [0], [1], [0, 0, 1, 1], [], []>} : vector<22x32xbf16>, vector<32x32xbf16>, vector<22x32xf32> -> vector<22x32xf32>
    %333 = arith.addf %328, %332 : vector<22x32xf32>
    %334 = vector.extract_strided_slice %299 {offsets = [13, 0], sizes = [22, 32], strides = [1, 1]} : vector<100x32xbf16> to vector<22x32xbf16>
    %c2_247 = arith.constant 2 : index
    %c7_248 = arith.constant 7 : index
    %c0_249 = arith.constant 0 : index
    %c0_250 = arith.constant 0 : index
    %335 = vector.load %arg3[%c2_247, %c7_248, %c0_249, %c0_250] : memref<4x9x32x32xbf16, #tpu.memory_space<vmem>>, vector<1x1x32x32xbf16>
    %336 = vector.shape_cast %335 : vector<1x1x32x32xbf16> to vector<32x32xbf16>
    %cst_251 = arith.constant dense<0.000000e+00> : vector<22x32xf32>
    %337 = tpu.matmul %334, %336, %cst_251 {dimension_numbers = #tpu.dot_dimension_numbers<[1], [0], [0], [1], [0, 0, 1, 1], [], []>} : vector<22x32xbf16>, vector<32x32xbf16>, vector<22x32xf32> -> vector<22x32xf32>
    %338 = arith.addf %333, %337 : vector<22x32xf32>
    %339 = vector.extract_strided_slice %299 {offsets = [14, 0], sizes = [22, 32], strides = [1, 1]} : vector<100x32xbf16> to vector<22x32xbf16>
    %c2_252 = arith.constant 2 : index
    %c8_253 = arith.constant 8 : index
    %c0_254 = arith.constant 0 : index
    %c0_255 = arith.constant 0 : index
    %340 = vector.load %arg3[%c2_252, %c8_253, %c0_254, %c0_255] : memref<4x9x32x32xbf16, #tpu.memory_space<vmem>>, vector<1x1x32x32xbf16>
    %341 = vector.shape_cast %340 : vector<1x1x32x32xbf16> to vector<32x32xbf16>
    %cst_256 = arith.constant dense<0.000000e+00> : vector<22x32xf32>
    %342 = tpu.matmul %339, %341, %cst_256 {dimension_numbers = #tpu.dot_dimension_numbers<[1], [0], [0], [1], [0, 0, 1, 1], [], []>} : vector<22x32xbf16>, vector<32x32xbf16>, vector<22x32xf32> -> vector<22x32xf32>
    %343 = arith.addf %338, %342 : vector<22x32xf32>
    %c4_257 = arith.constant 4 : index
    %c0_258 = arith.constant 0 : index
    %344 = vector.load %arg5[%c4_257, %c0_258] : memref<7x32xf32, #tpu.memory_space<vmem>>, vector<1x32xf32>
    %345 = vector.broadcast %344 : vector<1x32xf32> to vector<22x32xf32>
    %346 = arith.addf %343, %345 : vector<22x32xf32>
    %cst_259 = arith.constant 0.000000e+00 : f32
    %347 = vector.broadcast %cst_259 : f32 to vector<22x32xf32>
    %348 = arith.maximumf %346, %347 : vector<22x32xf32>
    %349 = vector.extract_strided_slice %348 {offsets = [0, 0], sizes = [4, 32], strides = [1, 1]} : vector<22x32xf32> to vector<4x32xf32>
    %c7_260 = arith.constant 7 : index
    %c0_261 = arith.constant 0 : index
    %350 = vector.load %arg8[%c7_260, %c0_261] : memref<100x32xf32, #tpu.memory_space<vmem>>, vector<4x32xf32>
    tpu.vector_store %arg8[%c7_260, %c0_261], %349 {strides = array<i32>} : memref<100x32xf32, #tpu.memory_space<vmem>>, vector<4x32xf32>,
    %351 = vector.extract_strided_slice %348 {offsets = [6, 0], sizes = [4, 32], strides = [1, 1]} : vector<22x32xf32> to vector<4x32xf32>
    %c13_262 = arith.constant 13 : index
    %c0_263 = arith.constant 0 : index
    %352 = vector.load %arg8[%c13_262, %c0_263] : memref<100x32xf32, #tpu.memory_space<vmem>>, vector<4x32xf32>
    tpu.vector_store %arg8[%c13_262, %c0_263], %351 {strides = array<i32>} : memref<100x32xf32, #tpu.memory_space<vmem>>, vector<4x32xf32>,
    %353 = vector.extract_strided_slice %348 {offsets = [12, 0], sizes = [4, 32], strides = [1, 1]} : vector<22x32xf32> to vector<4x32xf32>
    %c19_264 = arith.constant 19 : index
    %c0_265 = arith.constant 0 : index
    %354 = vector.load %arg8[%c19_264, %c0_265] : memref<100x32xf32, #tpu.memory_space<vmem>>, vector<4x32xf32>
    tpu.vector_store %arg8[%c19_264, %c0_265], %353 {strides = array<i32>} : memref<100x32xf32, #tpu.memory_space<vmem>>, vector<4x32xf32>,
    %355 = vector.extract_strided_slice %348 {offsets = [18, 0], sizes = [4, 32], strides = [1, 1]} : vector<22x32xf32> to vector<4x32xf32>
    %c25_266 = arith.constant 25 : index
    %c0_267 = arith.constant 0 : index
    %356 = vector.load %arg8[%c25_266, %c0_267] : memref<100x32xf32, #tpu.memory_space<vmem>>, vector<4x32xf32>
    tpu.vector_store %arg8[%c25_266, %c0_267], %355 {strides = array<i32>} : memref<100x32xf32, #tpu.memory_space<vmem>>, vector<4x32xf32>,
    %c0_268 = arith.constant 0 : index
    %c0_269 = arith.constant 0 : index
    %357 = vector.load %arg8[%c0_268, %c0_269] : memref<100x32xf32, #tpu.memory_space<vmem>>, vector<100x32xf32>
    %358 = arith.truncf %357 : vector<100x32xf32> to vector<100x32xbf16>
    %359 = vector.extract_strided_slice %358 {offsets = [0, 0], sizes = [22, 32], strides = [1, 1]} : vector<100x32xbf16> to vector<22x32xbf16>
    %c3_270 = arith.constant 3 : index
    %c0_271 = arith.constant 0 : index
    %c0_272 = arith.constant 0 : index
    %c0_273 = arith.constant 0 : index
    %360 = vector.load %arg3[%c3_270, %c0_271, %c0_272, %c0_273] : memref<4x9x32x32xbf16, #tpu.memory_space<vmem>>, vector<1x1x32x32xbf16>
    %361 = vector.shape_cast %360 : vector<1x1x32x32xbf16> to vector<32x32xbf16>
    %cst_274 = arith.constant dense<0.000000e+00> : vector<22x32xf32>
    %362 = tpu.matmul %359, %361, %cst_274 {dimension_numbers = #tpu.dot_dimension_numbers<[1], [0], [0], [1], [0, 0, 1, 1], [], []>} : vector<22x32xbf16>, vector<32x32xbf16>, vector<22x32xf32> -> vector<22x32xf32>
    %363 = vector.extract_strided_slice %358 {offsets = [1, 0], sizes = [22, 32], strides = [1, 1]} : vector<100x32xbf16> to vector<22x32xbf16>
    %c3_275 = arith.constant 3 : index
    %c1_276 = arith.constant 1 : index
    %c0_277 = arith.constant 0 : index
    %c0_278 = arith.constant 0 : index
    %364 = vector.load %arg3[%c3_275, %c1_276, %c0_277, %c0_278] : memref<4x9x32x32xbf16, #tpu.memory_space<vmem>>, vector<1x1x32x32xbf16>
    %365 = vector.shape_cast %364 : vector<1x1x32x32xbf16> to vector<32x32xbf16>
    %cst_279 = arith.constant dense<0.000000e+00> : vector<22x32xf32>
    %366 = tpu.matmul %363, %365, %cst_279 {dimension_numbers = #tpu.dot_dimension_numbers<[1], [0], [0], [1], [0, 0, 1, 1], [], []>} : vector<22x32xbf16>, vector<32x32xbf16>, vector<22x32xf32> -> vector<22x32xf32>
    %367 = arith.addf %362, %366 : vector<22x32xf32>
    %368 = vector.extract_strided_slice %358 {offsets = [2, 0], sizes = [22, 32], strides = [1, 1]} : vector<100x32xbf16> to vector<22x32xbf16>
    %c3_280 = arith.constant 3 : index
    %c2_281 = arith.constant 2 : index
    %c0_282 = arith.constant 0 : index
    %c0_283 = arith.constant 0 : index
    %369 = vector.load %arg3[%c3_280, %c2_281, %c0_282, %c0_283] : memref<4x9x32x32xbf16, #tpu.memory_space<vmem>>, vector<1x1x32x32xbf16>
    %370 = vector.shape_cast %369 : vector<1x1x32x32xbf16> to vector<32x32xbf16>
    %cst_284 = arith.constant dense<0.000000e+00> : vector<22x32xf32>
    %371 = tpu.matmul %368, %370, %cst_284 {dimension_numbers = #tpu.dot_dimension_numbers<[1], [0], [0], [1], [0, 0, 1, 1], [], []>} : vector<22x32xbf16>, vector<32x32xbf16>, vector<22x32xf32> -> vector<22x32xf32>
    %372 = arith.addf %367, %371 : vector<22x32xf32>
    %373 = vector.extract_strided_slice %358 {offsets = [6, 0], sizes = [22, 32], strides = [1, 1]} : vector<100x32xbf16> to vector<22x32xbf16>
    %c3_285 = arith.constant 3 : index
    %c3_286 = arith.constant 3 : index
    %c0_287 = arith.constant 0 : index
    %c0_288 = arith.constant 0 : index
    %374 = vector.load %arg3[%c3_285, %c3_286, %c0_287, %c0_288] : memref<4x9x32x32xbf16, #tpu.memory_space<vmem>>, vector<1x1x32x32xbf16>
    %375 = vector.shape_cast %374 : vector<1x1x32x32xbf16> to vector<32x32xbf16>
    %cst_289 = arith.constant dense<0.000000e+00> : vector<22x32xf32>
    %376 = tpu.matmul %373, %375, %cst_289 {dimension_numbers = #tpu.dot_dimension_numbers<[1], [0], [0], [1], [0, 0, 1, 1], [], []>} : vector<22x32xbf16>, vector<32x32xbf16>, vector<22x32xf32> -> vector<22x32xf32>
    %377 = arith.addf %372, %376 : vector<22x32xf32>
    %378 = vector.extract_strided_slice %358 {offsets = [7, 0], sizes = [22, 32], strides = [1, 1]} : vector<100x32xbf16> to vector<22x32xbf16>
    %c3_290 = arith.constant 3 : index
    %c4_291 = arith.constant 4 : index
    %c0_292 = arith.constant 0 : index
    %c0_293 = arith.constant 0 : index
    %379 = vector.load %arg3[%c3_290, %c4_291, %c0_292, %c0_293] : memref<4x9x32x32xbf16, #tpu.memory_space<vmem>>, vector<1x1x32x32xbf16>
    %380 = vector.shape_cast %379 : vector<1x1x32x32xbf16> to vector<32x32xbf16>
    %cst_294 = arith.constant dense<0.000000e+00> : vector<22x32xf32>
    %381 = tpu.matmul %378, %380, %cst_294 {dimension_numbers = #tpu.dot_dimension_numbers<[1], [0], [0], [1], [0, 0, 1, 1], [], []>} : vector<22x32xbf16>, vector<32x32xbf16>, vector<22x32xf32> -> vector<22x32xf32>
    %382 = arith.addf %377, %381 : vector<22x32xf32>
    %383 = vector.extract_strided_slice %358 {offsets = [8, 0], sizes = [22, 32], strides = [1, 1]} : vector<100x32xbf16> to vector<22x32xbf16>
    %c3_295 = arith.constant 3 : index
    %c5_296 = arith.constant 5 : index
    %c0_297 = arith.constant 0 : index
    %c0_298 = arith.constant 0 : index
    %384 = vector.load %arg3[%c3_295, %c5_296, %c0_297, %c0_298] : memref<4x9x32x32xbf16, #tpu.memory_space<vmem>>, vector<1x1x32x32xbf16>
    %385 = vector.shape_cast %384 : vector<1x1x32x32xbf16> to vector<32x32xbf16>
    %cst_299 = arith.constant dense<0.000000e+00> : vector<22x32xf32>
    %386 = tpu.matmul %383, %385, %cst_299 {dimension_numbers = #tpu.dot_dimension_numbers<[1], [0], [0], [1], [0, 0, 1, 1], [], []>} : vector<22x32xbf16>, vector<32x32xbf16>, vector<22x32xf32> -> vector<22x32xf32>
    %387 = arith.addf %382, %386 : vector<22x32xf32>
    %388 = vector.extract_strided_slice %358 {offsets = [12, 0], sizes = [22, 32], strides = [1, 1]} : vector<100x32xbf16> to vector<22x32xbf16>
    %c3_300 = arith.constant 3 : index
    %c6_301 = arith.constant 6 : index
    %c0_302 = arith.constant 0 : index
    %c0_303 = arith.constant 0 : index
    %389 = vector.load %arg3[%c3_300, %c6_301, %c0_302, %c0_303] : memref<4x9x32x32xbf16, #tpu.memory_space<vmem>>, vector<1x1x32x32xbf16>
    %390 = vector.shape_cast %389 : vector<1x1x32x32xbf16> to vector<32x32xbf16>
    %cst_304 = arith.constant dense<0.000000e+00> : vector<22x32xf32>
    %391 = tpu.matmul %388, %390, %cst_304 {dimension_numbers = #tpu.dot_dimension_numbers<[1], [0], [0], [1], [0, 0, 1, 1], [], []>} : vector<22x32xbf16>, vector<32x32xbf16>, vector<22x32xf32> -> vector<22x32xf32>
    %392 = arith.addf %387, %391 : vector<22x32xf32>
    %393 = vector.extract_strided_slice %358 {offsets = [13, 0], sizes = [22, 32], strides = [1, 1]} : vector<100x32xbf16> to vector<22x32xbf16>
    %c3_305 = arith.constant 3 : index
    %c7_306 = arith.constant 7 : index
    %c0_307 = arith.constant 0 : index
    %c0_308 = arith.constant 0 : index
    %394 = vector.load %arg3[%c3_305, %c7_306, %c0_307, %c0_308] : memref<4x9x32x32xbf16, #tpu.memory_space<vmem>>, vector<1x1x32x32xbf16>
    %395 = vector.shape_cast %394 : vector<1x1x32x32xbf16> to vector<32x32xbf16>
    %cst_309 = arith.constant dense<0.000000e+00> : vector<22x32xf32>
    %396 = tpu.matmul %393, %395, %cst_309 {dimension_numbers = #tpu.dot_dimension_numbers<[1], [0], [0], [1], [0, 0, 1, 1], [], []>} : vector<22x32xbf16>, vector<32x32xbf16>, vector<22x32xf32> -> vector<22x32xf32>
    %397 = arith.addf %392, %396 : vector<22x32xf32>
    %398 = vector.extract_strided_slice %358 {offsets = [14, 0], sizes = [22, 32], strides = [1, 1]} : vector<100x32xbf16> to vector<22x32xbf16>
    %c3_310 = arith.constant 3 : index
    %c8_311 = arith.constant 8 : index
    %c0_312 = arith.constant 0 : index
    %c0_313 = arith.constant 0 : index
    %399 = vector.load %arg3[%c3_310, %c8_311, %c0_312, %c0_313] : memref<4x9x32x32xbf16, #tpu.memory_space<vmem>>, vector<1x1x32x32xbf16>
    %400 = vector.shape_cast %399 : vector<1x1x32x32xbf16> to vector<32x32xbf16>
    %cst_314 = arith.constant dense<0.000000e+00> : vector<22x32xf32>
    %401 = tpu.matmul %398, %400, %cst_314 {dimension_numbers = #tpu.dot_dimension_numbers<[1], [0], [0], [1], [0, 0, 1, 1], [], []>} : vector<22x32xbf16>, vector<32x32xbf16>, vector<22x32xf32> -> vector<22x32xf32>
    %402 = arith.addf %397, %401 : vector<22x32xf32>
    %c5_315 = arith.constant 5 : index
    %c0_316 = arith.constant 0 : index
    %403 = vector.load %arg5[%c5_315, %c0_316] : memref<7x32xf32, #tpu.memory_space<vmem>>, vector<1x32xf32>
    %404 = vector.broadcast %403 : vector<1x32xf32> to vector<22x32xf32>
    %405 = arith.addf %402, %404 : vector<22x32xf32>
    %cst_317 = arith.constant -1.000000e+30 : f32
    %406 = vector.broadcast %cst_317 : f32 to vector<100x32xf32>
    %c0_318 = arith.constant 0 : index
    %c0_319 = arith.constant 0 : index
    %407 = vector.load %arg8[%c0_318, %c0_319] : memref<100x32xf32, #tpu.memory_space<vmem>>, vector<100x32xf32>
    tpu.vector_store %arg8[%c0_318, %c0_319], %406 {strides = array<i32>} : memref<100x32xf32, #tpu.memory_space<vmem>>, vector<100x32xf32>,
    %408 = vector.extract_strided_slice %405 {offsets = [0, 0], sizes = [4, 32], strides = [1, 1]} : vector<22x32xf32> to vector<4x32xf32>
    %c7_320 = arith.constant 7 : index
    %c0_321 = arith.constant 0 : index
    %409 = vector.load %arg8[%c7_320, %c0_321] : memref<100x32xf32, #tpu.memory_space<vmem>>, vector<4x32xf32>
    tpu.vector_store %arg8[%c7_320, %c0_321], %408 {strides = array<i32>} : memref<100x32xf32, #tpu.memory_space<vmem>>, vector<4x32xf32>,
    %410 = vector.extract_strided_slice %405 {offsets = [6, 0], sizes = [4, 32], strides = [1, 1]} : vector<22x32xf32> to vector<4x32xf32>
    %c13_322 = arith.constant 13 : index
    %c0_323 = arith.constant 0 : index
    %411 = vector.load %arg8[%c13_322, %c0_323] : memref<100x32xf32, #tpu.memory_space<vmem>>, vector<4x32xf32>
    tpu.vector_store %arg8[%c13_322, %c0_323], %410 {strides = array<i32>} : memref<100x32xf32, #tpu.memory_space<vmem>>, vector<4x32xf32>,
    %412 = vector.extract_strided_slice %405 {offsets = [12, 0], sizes = [4, 32], strides = [1, 1]} : vector<22x32xf32> to vector<4x32xf32>
    %c19_324 = arith.constant 19 : index
    %c0_325 = arith.constant 0 : index
    %413 = vector.load %arg8[%c19_324, %c0_325] : memref<100x32xf32, #tpu.memory_space<vmem>>, vector<4x32xf32>
    tpu.vector_store %arg8[%c19_324, %c0_325], %412 {strides = array<i32>} : memref<100x32xf32, #tpu.memory_space<vmem>>, vector<4x32xf32>,
    %414 = vector.extract_strided_slice %405 {offsets = [18, 0], sizes = [4, 32], strides = [1, 1]} : vector<22x32xf32> to vector<4x32xf32>
    %c25_326 = arith.constant 25 : index
    %c0_327 = arith.constant 0 : index
    %415 = vector.load %arg8[%c25_326, %c0_327] : memref<100x32xf32, #tpu.memory_space<vmem>>, vector<4x32xf32>
    tpu.vector_store %arg8[%c25_326, %c0_327], %414 {strides = array<i32>} : memref<100x32xf32, #tpu.memory_space<vmem>>, vector<4x32xf32>,
    %c0_328 = arith.constant 0 : index
    %c0_329 = arith.constant 0 : index
    %416 = vector.load %arg8[%c0_328, %c0_329] : memref<100x32xf32, #tpu.memory_space<vmem>>, vector<100x32xf32>
    %417 = vector.extract_strided_slice %416 {offsets = [0, 0], sizes = [22, 32], strides = [1, 1]} : vector<100x32xf32> to vector<22x32xf32>
    %418 = vector.extract_strided_slice %416 {offsets = [1, 0], sizes = [22, 32], strides = [1, 1]} : vector<100x32xf32> to vector<22x32xf32>
    %419 = arith.maximumf %417, %418 : vector<22x32xf32>
    %420 = vector.extract_strided_slice %416 {offsets = [2, 0], sizes = [22, 32], strides = [1, 1]} : vector<100x32xf32> to vector<22x32xf32>
    %421 = arith.maximumf %419, %420 : vector<22x32xf32>
    %422 = vector.extract_strided_slice %416 {offsets = [6, 0], sizes = [22, 32], strides = [1, 1]} : vector<100x32xf32> to vector<22x32xf32>
    %423 = arith.maximumf %421, %422 : vector<22x32xf32>
    %424 = vector.extract_strided_slice %416 {offsets = [7, 0], sizes = [22, 32], strides = [1, 1]} : vector<100x32xf32> to vector<22x32xf32>
    %425 = arith.maximumf %423, %424 : vector<22x32xf32>
    %426 = vector.extract_strided_slice %416 {offsets = [8, 0], sizes = [22, 32], strides = [1, 1]} : vector<100x32xf32> to vector<22x32xf32>
    %427 = arith.maximumf %425, %426 : vector<22x32xf32>
    %428 = vector.extract_strided_slice %416 {offsets = [12, 0], sizes = [22, 32], strides = [1, 1]} : vector<100x32xf32> to vector<22x32xf32>
    %429 = arith.maximumf %427, %428 : vector<22x32xf32>
    %430 = vector.extract_strided_slice %416 {offsets = [13, 0], sizes = [22, 32], strides = [1, 1]} : vector<100x32xf32> to vector<22x32xf32>
    %431 = arith.maximumf %429, %430 : vector<22x32xf32>
    %432 = vector.extract_strided_slice %416 {offsets = [14, 0], sizes = [22, 32], strides = [1, 1]} : vector<100x32xf32> to vector<22x32xf32>
    %433 = arith.maximumf %431, %432 : vector<22x32xf32>
    %434 = tpu.iota {dimensions = array<i32: 0>} : vector<4x22xi32>
    %435 = tpu.iota {dimensions = array<i32: 1>} : vector<4x22xi32>
    %c1_i32 = arith.constant 1 : i32
    %436 = vector.broadcast %c1_i32 : i32 to vector<4x22xi32>
    %437 = arith.shrsi %434, %436 : vector<4x22xi32>
    %c1_i32_330 = arith.constant 1 : i32
    %438 = vector.broadcast %c1_i32_330 : i32 to vector<4x22xi32>
    %439 = arith.andi %434, %438 : vector<4x22xi32>
    %c2_i32_331 = arith.constant 2 : i32
    %440 = vector.broadcast %c2_i32_331 : i32 to vector<4x22xi32>
    %441 = arith.muli %440, %437 : vector<4x22xi32>
    %c6_i32 = arith.constant 6 : i32
    %442 = vector.broadcast %c6_i32 : i32 to vector<4x22xi32>
    %443 = arith.muli %441, %442 : vector<4x22xi32>
    %c2_i32_332 = arith.constant 2 : i32
    %444 = vector.broadcast %c2_i32_332 : i32 to vector<4x22xi32>
    %445 = arith.muli %444, %439 : vector<4x22xi32>
    %446 = arith.addi %443, %445 : vector<4x22xi32>
    %447 = arith.cmpi eq, %435, %446 : vector<4x22xi32>
    %448 = arith.extui %447 : vector<4x22xi1> to vector<4x22xi32>
    %449 = arith.sitofp %448 : vector<4x22xi32> to vector<4x22xf32>
    %cst_333 = arith.constant dense<0.000000e+00> : vector<4x32xf32>
    %450 = tpu.matmul %449, %433, %cst_333 {dimension_numbers = #tpu.dot_dimension_numbers<[1], [0], [0], [1], [0, 0, 1, 1], [], []>} : vector<4x22xf32>, vector<22x32xf32>, vector<4x32xf32> -> vector<4x32xf32>
    %451 = tpu.iota {dimensions = array<i32: 0>} : vector<4x16xi32>
    %452 = tpu.iota {dimensions = array<i32: 1>} : vector<4x16xi32>
    %c1_i32_334 = arith.constant 1 : i32
    %453 = vector.broadcast %c1_i32_334 : i32 to vector<4x16xi32>
    %454 = arith.shrsi %451, %453 : vector<4x16xi32>
    %c1_i32_335 = arith.constant 1 : i32
    %455 = vector.broadcast %c1_i32_335 : i32 to vector<4x16xi32>
    %456 = arith.andi %451, %455 : vector<4x16xi32>
    %c2_i32_336 = arith.constant 2 : i32
    %457 = vector.broadcast %c2_i32_336 : i32 to vector<4x16xi32>
    %458 = arith.muli %457, %454 : vector<4x16xi32>
    %c4_i32 = arith.constant 4 : i32
    %459 = vector.broadcast %c4_i32 : i32 to vector<4x16xi32>
    %460 = arith.muli %458, %459 : vector<4x16xi32>
    %c2_i32_337 = arith.constant 2 : i32
    %461 = vector.broadcast %c2_i32_337 : i32 to vector<4x16xi32>
    %462 = arith.muli %461, %456 : vector<4x16xi32>
    %463 = arith.addi %460, %462 : vector<4x16xi32>
    %464 = arith.cmpi eq, %452, %463 : vector<4x16xi32>
    %465 = arith.extui %464 : vector<4x16xi1> to vector<4x16xi32>
    %466 = arith.sitofp %465 : vector<4x16xi32> to vector<4x16xf32>
    %cst_338 = arith.constant dense<0.000000e+00> : vector<4x32xf32>
    %467 = tpu.matmul %466, %282, %cst_338 {dimension_numbers = #tpu.dot_dimension_numbers<[1], [0], [0], [1], [0, 0, 1, 1], [], []>} : vector<4x16xf32>, vector<16x32xf32>, vector<4x32xf32> -> vector<4x32xf32>
    %468 = arith.truncf %467 : vector<4x32xf32> to vector<4x32xbf16>
    %c1_339 = arith.constant 1 : index
    %c0_340 = arith.constant 0 : index
    %c0_341 = arith.constant 0 : index
    %469 = vector.load %arg4[%c1_339, %c0_340, %c0_341] : memref<2x32x32xbf16, #tpu.memory_space<vmem>>, vector<1x32x32xbf16>
    %470 = vector.shape_cast %469 : vector<1x32x32xbf16> to vector<32x32xbf16>
    %cst_342 = arith.constant dense<0.000000e+00> : vector<4x32xf32>
    %471 = tpu.matmul %468, %470, %cst_342 {dimension_numbers = #tpu.dot_dimension_numbers<[1], [0], [0], [1], [0, 0, 1, 1], [], []>} : vector<4x32xbf16>, vector<32x32xbf16>, vector<4x32xf32> -> vector<4x32xf32>
    %c6_343 = arith.constant 6 : index
    %c0_344 = arith.constant 0 : index
    %472 = vector.load %arg5[%c6_343, %c0_344] : memref<7x32xf32, #tpu.memory_space<vmem>>, vector<1x32xf32>
    %473 = vector.broadcast %472 : vector<1x32xf32> to vector<4x32xf32>
    %474 = arith.addf %471, %473 : vector<4x32xf32>
    %475 = arith.addf %450, %474 : vector<4x32xf32>
    %c0_345 = arith.constant 0 : index
    %c0_346 = arith.constant 0 : index
    %c0_347 = arith.constant 0 : index
    %476 = vector.load %arg7[%c0_345, %c0_346, %c0_347] : memref<1x4x32xf32, #tpu.memory_space<vmem>>, vector<1x4x32xf32>
    %477 = vector.shape_cast %476 : vector<1x4x32xf32> to vector<4x32xf32>
    %478 = vector.shape_cast %475 : vector<4x32xf32> to vector<1x4x32xf32>
    tpu.vector_store %arg7[%c0_345, %c0_346, %c0_347], %478 {strides = array<i32>} : memref<1x4x32xf32, #tpu.memory_space<vmem>>, vector<1x4x32xf32>,
    return
  }
  func.func @transform_0(%arg0: i32) -> (i32, i32, i32) {
    %c0_i32 = arith.constant 0 : i32
    %c0_i32_0 = arith.constant 0 : i32
    %c0_i32_1 = arith.constant 0 : i32
    return %arg0, %c0_i32, %c0_i32_0 : i32, i32, i32
  }
  func.func @transform_1(%arg0: i32) -> (i32, i32, i32) {
    %c0_i32 = arith.constant 0 : i32
    %c0_i32_0 = arith.constant 0 : i32
    %c0_i32_1 = arith.constant 0 : i32
    %c0_i32_2 = arith.constant 0 : i32
    return %c0_i32, %c0_i32_0, %c0_i32_1 : i32, i32, i32
  }
  func.func @transform_2(%arg0: i32) -> (i32, i32, i32, i32) {
    %c0_i32 = arith.constant 0 : i32
    %c0_i32_0 = arith.constant 0 : i32
    %c0_i32_1 = arith.constant 0 : i32
    %c0_i32_2 = arith.constant 0 : i32
    %c0_i32_3 = arith.constant 0 : i32
    return %c0_i32, %c0_i32_0, %c0_i32_1, %c0_i32_2 : i32, i32, i32, i32
  }
  func.func @transform_3(%arg0: i32) -> (i32, i32, i32) {
    %c0_i32 = arith.constant 0 : i32
    %c0_i32_0 = arith.constant 0 : i32
    %c0_i32_1 = arith.constant 0 : i32
    %c0_i32_2 = arith.constant 0 : i32
    return %c0_i32, %c0_i32_0, %c0_i32_1 : i32, i32, i32
  }
  func.func @transform_4(%arg0: i32) -> (i32, i32) {
    %c0_i32 = arith.constant 0 : i32
    %c0_i32_0 = arith.constant 0 : i32
    %c0_i32_1 = arith.constant 0 : i32
    return %c0_i32, %c0_i32_0 : i32, i32
  }
  func.func @transform_5(%arg0: i32) -> (i32, i32, i32) {
    %c0_i32 = arith.constant 0 : i32
    %c0_i32_0 = arith.constant 0 : i32
    %c0_i32_1 = arith.constant 0 : i32
    return %arg0, %c0_i32, %c0_i32_0 : i32, i32, i32
  }
  func.func @transform_6(%arg0: i32) -> (i32, i32, i32) {
    %c0_i32 = arith.constant 0 : i32
    %c0_i32_0 = arith.constant 0 : i32
    %c0_i32_1 = arith.constant 0 : i32
    return %arg0, %c0_i32, %c0_i32_0 : i32, i32, i32
  }
}

</mosaic_0001>

<bundles_post_ra>
// kernel: mul.72
= control target key start
LH: loop header
LB: loop body
LE: loop exit
PB: predicated region body
PF: predicated region fallthrough
CT: control target
= control target key end

     0   :  { %vm15_vm0 = vcmask 261120   ;;  %s59_s0 = inlined_call_operand.vmem [shape: f32[3,3,32], index: 0, kind: input, shape index: {}]   ;;  %s60_s1 = inlined_call_operand.vmem [shape: f32[9,32], index: 1, kind: output, shape index: {}]  }
   0x1   :  { %v27_v0 = vld [vmem:[%s59_s0 + $0x8] sm:$0xf]  ;;  %v28_v1 = vld [vmem:[%s59_s0 + $0x4] sm:$0xf]  ;;  %v12_v2 = vld [vmem:[%s59_s0] sm:$0xf] }
   0x2   :  { %7 = vst [vmem:[#allocation0] sm:$0xf] %v27_v0 }
   0x3   :  { %11 = vst [vmem:[#allocation0 + $0x10] sm:$0xf] %v28_v1 }
   0x4   :  { %13 = vst [vmem:[#allocation0 + $0x8] sm:$0xf] %v12_v2 }
   0x9   :  { %v23_v3 = vld [vmem:[#allocation0] sm:$0x7]  }
   0xa   :  { %v18_v4 = vld [vmem:[#allocation0 + $0x10] sm:$0x7]   ;;  %30 = vst.msk [vmem:[%s60_s1 + $0x6] sm:$0x7] %vm15_vm0, %v23_v3  }
   0xb   :  { %v14_v5 = vld [vmem:[#allocation0 + $0x8] sm:$0x7]   ;;  %29 = vst.msk [vmem:[%s60_s1 + $0x3] sm:$0x7] %vm15_vm0, %v18_v4  }
   0xc   :  { %16 = vst.msk [vmem:[%s60_s1] sm:$0x7] %vm15_vm0, %v14_v5  }

// kernel: fad_conv_forward.1
= control target key start
LH: loop header
LB: loop body
LE: loop exit
PB: predicated region body
PF: predicated region fallthrough
CT: control target
= control target key end

     0   :  { %s10523_s0 = inlined_call_operand.vmem [shape: f32[2,324,12], index: 0, kind: input, shape index: {}]   ;;  %s10524_s1 = inlined_call_operand.vmem [shape: bf16[9,12,32], index: 1, kind: input, shape index: {}]   ;;  %s10525_s2 = inlined_call_operand.vmem [shape: bf16[4,9,32,32], index: 2, kind: input, shape index: {}]   ;;  %s10526_s3 = inlined_call_operand.vmem [shape: bf16[2,32,32], index: 3, kind: input, shape index: {}]   ;;  %s10527_s4 = inlined_call_operand.vmem [shape: f32[7,32], index: 4, kind: input, shape index: {}]   ;;  %s10528_s5 = inlined_call_operand.hbm [shape: f32[2,16,32], index: 5, kind: output, shape index: {0}]   ;;  %s10529_s6 = inlined_call_operand.hbm [shape: f32[2,4,32], index: 6, kind: output, shape index: {1}]  }
   0x1   :  { %10559 = sst [smem:[#allocation44_spill]] %s10523_s0 }
   0x2   :  { %12 = vsyncpa [#allocation4], 0 }
   0x3   :  { %14 = vsyncpa [#allocation4 + $0x1], 0 }
   0x4   :  { %15 = vsyncpa [#allocation6], 0 }
   0x5   :  { %17 = vsyncpa [#allocation6 + $0x1], 0  ;;  %s7649_s21 = smov 0   ;;  %s7651_s22 = smov 0  }
   0x6   :  { %s7653_s23 = smov 0   ;;  %s7655_s24 = smov 0  }
   0x7 LB: > { %s7670_s25 = sadd.s32 4294967295, %s7607_s24   ;;  %s6503_s26 = sadd.s32 4294967294, %s7607_s24   ;;  %s7607_s24 = sphi %s7655_s24, %s10694_s24   ;;  %s7603_s23 = sphi %s7653_s23, %s10693_s23   ;;  %s7599_s22 = sphi %s7651_s22, %s10692_s22   ;;  %s7595_s21 = sphi %s7649_s21, %s10691_s21  }
   0x8   : > { %s7674_s27 = sadd.s32 1, %s7607_s24   ;;  %s140_s28 = sadd.s32 1, %s7603_s23 }
   0x9   : > { %s137_s29 = ssub.s32 %s7607_s24, %s7674_s27  ;;  %p150_p0 = scmp.ne.s32.totalorder %s7603_s23, %s7599_s22 }
   0xa   : > { %p138_p1 = scmp.eq.s32.totalorder %s137_s29, 0  ;;  %p151_p2 = scmp.eq.s32.totalorder %s7670_s25, 1 }
   0xb   : > { %p156_p3 = scmp.ne.s32.totalorder %s7599_s22, %s7595_s21  ;;  %p157_p4 = scmp.eq.s32.totalorder %s6503_s26, 1 }
   0xc   : > { %s7685_s30 = scalar_select %p138_p1, %s7603_s23, %s140_s28  }
   0xd   : > { %p7687_p5 = por %p151_p2, %p150_p0  ;;  %p7691_p6 = por %p157_p4, %p156_p3 }
   0xe   : > { %p6506_p7 = scmp.ge.s32.totalorder %s7607_s24, 1  ;;  %p221_p8 = scmp.lt.s32.totalorder %s7607_s24, 3 }
  0x10   : > { %p222_p9 = pnand %p6506_p7, %p221_p8 }
  0x12   : > { %225 = sbr.rel (%p222_p9) target bundleno = 2715 (0xa9b), region = 40 }
  0x17   : > { %vm643_vm0 = vcmask 1045504   ;;  %v6560_v0 = vld [vmem:[%s10524_s1 + $0x10] sm:$0xf]  ;;  %v7372_v1 = vld [vmem:[%s10524_s1 + $0x10] sm:$0x30]  ;;  %p256_p10 = scmp.lt.s32.totalorder %s7670_s25, 1 }
  0x18   : > { %v6561_v2 = vor.u32 %v7372_v1, %v6560_v0  ;;  %v6584_v3 = vld [vmem:[%s10524_s1 + $0x18] sm:$0xf]  ;;  %v7373_v4 = vld [vmem:[%s10524_s1 + $0x18] sm:$0x30]  ;;  %v6514_v6 = vld [vmem:[%s10524_s1 + $0x8] sm:$0xf] }
  0x19   : > { %v6585_v5 = vor.u32 %v7373_v4, %v6584_v3  ;;  %s257_s17 = scalar_select %p256_p10, %s7670_s25, 1  ;;  %v7371_v7 = vld [vmem:[%s10524_s1 + $0x8] sm:$0x30]  ;;  %v6536_v10 = vld [vmem:[%s10524_s1] sm:$0xf]  ;;  %vm588_vm1 = vcmask 97280  }
  0x1a   : > { %v988_v8 = vsel %vm643_vm0, %v6561_v2, 0  ;;  %v6515_v9 = vor.u32 %v7371_v7, %v6514_v6  ;;  %v7370_v11 = vld [vmem:[%s10524_s1] sm:$0x30]  ;;  %s10562_s0 = sld [smem:[#allocation44_spill]]  ;;  %vm892_vm2 = vcmask 1046528   ;;  %vm2258_vm6 = vcmask 1044480  }
  0x1b   : > { %997 = vmatpush.bf16.msra.mxu2 %v988_v8  ;;  %v1147_v12 = vsel %vm643_vm0, %v6585_v5, 0  ;;  %s7456_s11 = smul.u32 328, %s257_s17  ;;  %v6537_v13 = vor.u32 %v7370_v11, %v6536_v10  ;;  %vm439_vm3 = vsmask.f32 7424  ;;  %vm1972_vm4 = vsmask.f32 5376 }
  0x1c   : > { %1156 = vmatpush.bf16.msra.mxu3 %v1147_v12  ;;  %v645_v14 = vsel %vm643_vm0, %v6515_v9, 0  ;;  %vm1290_vm5 = vsmask.f32 6400  ;;  %vm2700_vm13 = vcmask 244736   ;;  %s10183_s20 = sand.u32 1, %s7599_s22   ;;  %s7455_s18 = sshll.u32 %s7670_s25, 4 }
  0x1d   : > { %654 = vmatpush.bf16.msra.mxu0 %v645_v14  ;;  %v788_v15 = vsel %vm643_vm0, %v6537_v13, 0  ;;  %s6507_s29 = sshll.u32 %s10183_s20, 4  ;;  %s6390_s28 = scalar_lea.hbm %s10528_s5, %s7455_s18 }
  0x1e   : > { %797 = vmatpush.bf16.msra.mxu1 %v788_v15  ;;  %s10203_s17 = scalar_lea.vmem [#allocation3], %s6507_s29  ;;  %s6374_s29 = scalar_lea.sflag [#allocation4], %s10183_s20 }
  0x1f   : > { %s7533_s13 = scalar_lea.hbm %s10528_s5, 32 }
  0x20   : > { %s7729_s14 = scalar_lea.vmem %s10562_s0, %s7456_s11 }
  0x21   : > { %v262_v16 = vld [vmem:[%s7729_s14] sm:$0xff]  ;;  %v263_v17 = vld [vmem:[%s7729_s14 + $0x8] sm:$0xff]  ;;  %v264_v18 = vld [vmem:[%s7729_s14 + $0x10] sm:$0xff] }
  0x22   : > { %v265_v19 = vld [vmem:[%s7729_s14 + $0x18] sm:$0xff]  ;;  %v303_v20 = vpack.c.bf16 %v262_v16, %v262_v16  ;;  %v304_v21 = vpack.c.bf16 %v263_v17, %v263_v17  ;;  %v305_v22 = vpack.c.bf16 %v264_v18, %v264_v18  ;;  %v266_v23 = vld [vmem:[%s7729_s14 + $0x20] sm:$0xff]  ;;  %v267_v24 = vld [vmem:[%s7729_s14 + $0x28] sm:$0xff] }
  0x23   : > { %v306_v25 = vpack.c.bf16 %v265_v19, %v265_v19  ;;  %v307_v26 = vpack.c.bf16 %v266_v23, %v266_v23  ;;  %v308_v27 = vpack.c.bf16 %v267_v24, %v267_v24  ;;  %v268_v34 = vld [vmem:[%s7729_s14 + $0x30] sm:$0xff]  ;;  %v269_v36 = vld [vmem:[%s7729_s14 + $0x38] sm:$0xff]  ;;  %v270_v59 = vld [vmem:[%s7729_s14 + $0x40] sm:$0xff] }
  0x24   : > { %v385_v28 = vunpack.c.l.b16 %v303_v20  ;;  %v386_v29 = vunpack.c.l.b16 %v304_v21  ;;  %v387_v30 = vunpack.c.l.b16 %v305_v22  ;;  %v309_v42 = vpack.c.bf16 %v268_v34, %v268_v34  ;;  %v271_v60 = vld [vmem:[%s7729_s14 + $0x48] sm:$0xff]  ;;  %v272_v9 = vld [vmem:[%s7729_s14 + $0x50] sm:$0xff]  ;;  %v273_v10 = vld [vmem:[%s7729_s14 + $0x58] sm:$0xff] }
  0x25   : > { %v388_v31 = vunpack.c.l.b16 %v306_v25  ;;  %v389_v32 = vunpack.c.l.b16 %v307_v26  ;;  %v390_v33 = vunpack.c.l.b16 %v308_v27  ;;  %v310_v46 = vpack.c.bf16 %v269_v36, %v269_v36  ;;  %v274_v23 = vld [vmem:[%s7729_s14 + $0x60] sm:$0xff]  ;;  %v275_v24 = vld [vmem:[%s7729_s14 + $0x68] sm:$0xff] }
  0x26   : > { %v421_v35 = vpack.c.b16 %v386_v29, %v385_v28  ;;  %v391_v52 = vunpack.c.l.b16 %v309_v42  ;;  %v311_v0 = vpack.c.bf16 %v270_v59, %v270_v59  ;;  %v312_v1 = vpack.c.bf16 %v271_v60, %v271_v60 }
  0x27   : > { %v7740_v37 = vpack.c.b16 %v388_v31, %v387_v30  ;;  %v7742_v38 = vpack.c.b16 %v390_v33, %v389_v32  ;;  %v392_v53 = vunpack.c.l.b16 %v310_v46  ;;  %v313_v14 = vpack.c.bf16 %v272_v9, %v272_v9 }
  0x28   : > { %v893_v39 = vrot.slane %v421_v35, 1  ;;  %v441_v40 = vshrl.u32 %v421_v35, 16  ;;  %v443_v41 = vshll.u32 %v421_v35, 16  ;;  %6538 = vmatmul.msk.bf16.vlgmr.msra.gmra.mxu1 %vm588_vm1, %v421_v35  ;;  %v393_v3 = vunpack.c.l.b16 %v311_v0 }
  0x29   : > { %10563 = vst [vmem:[#allocation9_spill] sm:$0xff] %v7742_v38  ;;  %v894_v43 = vrot.slane %v7740_v37, 1  ;;  %v896_v44 = vrot.slane %v7742_v38, 1  ;;  %v10531_v45 = vshll.u32 %v7740_v37, 16  ;;  %v7756_v55 = vpack.c.b16 %v392_v53, %v391_v52 }
  0x2a   : > { %v445_v47 = vrot.slane %v443_v41, 1  ;;  %v10530_v56 = vshrl.u32 %v7740_v37, 16  ;;  %v7760_v57 = vshll.u32 %v7742_v38, 16  ;;  %v394_v4 = vunpack.c.l.b16 %v312_v1 }
  0x2b   : > { %v895_v48 = vsel %vm892_vm2, %v893_v39, %v894_v43  ;;  %v897_v49 = vsel %vm892_vm2, %v894_v43, %v896_v44  ;;  %v450_v50 = vrot.slane %v10531_v45, 1  ;;  %10564 = vst [vmem:[#allocation10_spill] sm:$0xff] %v7756_v55  ;;  %v898_v58 = vrot.slane %v7756_v55, 1  ;;  %v276_v39 = vld [vmem:[%s7729_s14 + $0x70] sm:$0xff] }
  0x2c   : > { %6562 = vmatmul.msk.bf16.vlgmr.msra.gmra.mxu2 %vm588_vm1, %v895_v48  ;;  %6586 = vmatmul.msk.bf16.vlgmr.msra.gmra.mxu3 %vm588_vm1, %v897_v49  ;;  %v446_v51 = vor.u32 %v445_v47, %v441_v40  ;;  %v458_v62 = vrot.slane %v7760_v57, 1  ;;  %v7775_v5 = vpack.c.b16 %v394_v4, %v393_v3  ;;  %v7778_v6 = vshrl.u32 %v7742_v38, 16  ;;  %v277_v40 = vld [vmem:[%s7729_s14 + $0x78] sm:$0xff] }
  0x2d   : > { %v454_v61 = vor.u32 %v10530_v56, %v450_v50  ;;  %v899_v63 = vsel %vm892_vm2, %v896_v44, %v898_v58  ;;  %v7781_v7 = vshll.u32 %v7756_v55, 16  ;;  %v314_v15 = vpack.c.bf16 %v273_v10, %v273_v10  ;;  %v280_v10 = vld [vmem:[%s7729_s14 + $0x90] sm:$0xff] }
  0x2e   : > { %v451_v54 = vsel %vm439_vm3, %v446_v51, %v450_v50  ;;  %v900_v8 = vrot.slane %v7775_v5, 1  ;;  %v462_v11 = vor.u32 %v7778_v6, %v458_v62  ;;  %v395_v17 = vunpack.c.l.b16 %v313_v14 }
  0x2f   : > { %6516 = vmatmul.msk.bf16.vlgmr.msra.gmra.mxu0 %vm588_vm1, %v451_v54  ;;  %v459_v2 = vsel %vm439_vm3, %v454_v61, %v458_v62  ;;  %v466_v12 = vrot.slane %v7781_v7, 1  ;;  %v396_v18 = vunpack.c.l.b16 %v314_v15  ;;  %v7798_v20 = vshrl.u32 %v7756_v55, 16  ;;  %v278_v54 = vld [vmem:[%s7729_s14 + $0x80] sm:$0xff] }
  0x30   : > { %v901_v13 = vsel %vm892_vm2, %v898_v58, %v900_v8  ;;  %v7801_v21 = vshll.u32 %v7775_v5, 16  ;;  %v315_v28 = vpack.c.bf16 %v274_v23, %v274_v23  ;;  %v316_v29 = vpack.c.bf16 %v275_v24, %v275_v24  ;;  %v279_v58 = vld [vmem:[%s7729_s14 + $0x88] sm:$0xff] }
  0x31   : > { %v467_v16 = vsel %vm439_vm3, %v462_v11, %v466_v12  ;;  %v7795_v19 = vpack.c.b16 %v396_v18, %v395_v17  ;;  %v470_v25 = vor.u32 %v7798_v20, %v466_v12  ;;  %v7818_v34 = vshrl.u32 %v7775_v5, 16  ;;  %v281_v11 = vld [vmem:[%s7729_s14 + $0x98] sm:$0xff] }
  0x32   : > { %v474_v26 = vrot.slane %v7801_v21, 1  ;;  %v397_v31 = vunpack.c.l.b16 %v315_v28  ;;  %v398_v32 = vunpack.c.l.b16 %v316_v29  ;;  %v317_v44 = vpack.c.bf16 %v276_v39, %v276_v39  ;;  %v283_v28 = vld [vmem:[%s7729_s14 + $0xa8] sm:$0xff] }
  0x33   : > { %v902_v22 = vrot.slane %v7795_v19, 1  ;;  %v7821_v35 = vshll.u32 %v7795_v19, 16  ;;  %v318_v46 = vpack.c.bf16 %v277_v40, %v277_v40  ;;  %v7838_v51 = vshrl.u32 %v7795_v19, 16 }
  0x34   : > { %v475_v30 = vsel %vm439_vm3, %v470_v25, %v474_v26  ;;  %v7815_v33 = vpack.c.b16 %v398_v32, %v397_v31  ;;  %v478_v41 = vor.u32 %v7818_v34, %v474_v26  ;;  %v399_v48 = vunpack.c.l.b16 %v317_v44 }
  0x35   : > { %v903_v27 = vsel %vm892_vm2, %v900_v8, %v902_v22  ;;  %v482_v42 = vrot.slane %v7821_v35, 1  ;;  %v319_v62 = vpack.c.bf16 %v278_v54, %v278_v54  ;;  %v321_v15 = vpack.c.bf16 %v280_v10, %v280_v10 }
  0x36   : > { %v904_v36 = vrot.slane %v7815_v33, 1  ;;  %v7841_v52 = vshll.u32 %v7815_v33, 16  ;;  %v7858_v4 = vshrl.u32 %v7815_v33, 16 }
  0x37   : > { %v483_v47 = vsel %vm439_vm3, %v478_v41, %v482_v42  ;;  %v486_v59 = vor.u32 %v7838_v51, %v482_v42  ;;  %v401_v1 = vunpack.c.l.b16 %v319_v62  ;;  %v403_v18 = vunpack.c.l.b16 %v321_v15 }
  0x38   : > { %6539 = vmatmul.msk.bf16.gmra.mxu1 %vm588_vm1, %v7740_v37  ;;  %v905_v43 = vsel %vm892_vm2, %v902_v22, %v904_v36  ;;  %v490_v60 = vrot.slane %v7841_v52, 1 }
  0x3a   : > { %v491_v0 = vsel %vm439_vm3, %v486_v59, %v490_v60  ;;  %v494_v12 = vor.u32 %v7858_v4, %v490_v60 }
  0x3c   : > { %6563 = vmatmul.msk.bf16.gmra.mxu2 %vm588_vm1, %v897_v49  ;;  %6587 = vmatmul.msk.bf16.gmra.mxu3 %vm588_vm1, %v899_v63  ;;  %v400_v49 = vunpack.c.l.b16 %v318_v46 }
  0x3e   : > { %v7835_v50 = vpack.c.b16 %v400_v49, %v399_v48  ;;  %v284_v48 = vld [vmem:[%s7729_s14 + $0xb0] sm:$0xff]  ;;  %v285_v49 = vld [vmem:[%s7729_s14 + $0xb8] sm:$0xff] }
  0x3f   : > { %6517 = vmatmul.msk.bf16.gmra.mxu0 %vm588_vm1, %v459_v2  ;;  %v325_v59 = vpack.c.bf16 %v284_v48, %v284_v48  ;;  %v326_v60 = vpack.c.bf16 %v285_v49, %v285_v49 }
  0x40   : > { %v906_v53 = vrot.slane %v7835_v50, 1  ;;  %v7861_v8 = vshll.u32 %v7835_v50, 16  ;;  %v7878_v24 = vshrl.u32 %v7835_v50, 16 }
  0x42   : > { %v907_v61 = vsel %vm892_vm2, %v904_v36, %v906_v53  ;;  %v324_v36 = vpack.c.bf16 %v283_v28, %v283_v28 }
  0x44   : > { %v406_v41 = vunpack.c.l.b16 %v324_v36 }
  0x48   : > { %6540 = vmatmul.msk.bf16.gmra.mxu1 %vm588_vm1, %v7742_v38 }
  0x4c   : > { %6564 = vmatmul.msk.bf16.gmra.mxu2 %vm588_vm1, %v899_v63  ;;  %6588 = vmatmul.msk.bf16.gmra.mxu3 %vm588_vm1, %v901_v13  ;;  %v320_v63 = vpack.c.bf16 %v279_v58, %v279_v58 }
  0x4e   : > { %v402_v2 = vunpack.c.l.b16 %v320_v63 }
  0x4f   : > { %6518 = vmatmul.msk.bf16.gmra.mxu0 %vm588_vm1, %v467_v16  ;;  %v322_v16 = vpack.c.bf16 %v281_v11, %v281_v11 }
  0x50   : > { %v7855_v3 = vpack.c.b16 %v402_v2, %v401_v1  ;;  %v407_v1 = vunpack.c.l.b16 %v325_v59  ;;  %v408_v2 = vunpack.c.l.b16 %v326_v60 }
  0x51   : > { %v404_v22 = vunpack.c.l.b16 %v322_v16 }
  0x52   : > { %v908_v9 = vrot.slane %v7855_v3, 1  ;;  %v7881_v25 = vshll.u32 %v7855_v3, 16 }
  0x53   : > { %v7875_v23 = vpack.c.b16 %v404_v22, %v403_v18 }
  0x54   : > { %v909_v14 = vsel %vm892_vm2, %v906_v53, %v908_v9 }
  0x55   : > { %v910_v26 = vrot.slane %v7875_v23, 1  ;;  %v7901_v44 = vshll.u32 %v7875_v23, 16  ;;  %v7920_v15 = vshrl.u32 %v7875_v23, 16 }
  0x57   : > { %v911_v31 = vsel %vm892_vm2, %v908_v9, %v910_v26  ;;  %v514_v54 = vrot.slane %v7901_v44, 1 }
  0x58   : > { %6541 = vmatmul.msk.bf16.gmra.mxu1 %vm588_vm1, %v7756_v55 }
  0x5c   : > { %6565 = vmatmul.msk.bf16.gmra.mxu2 %vm588_vm1, %v901_v13  ;;  %6589 = vmatmul.msk.bf16.gmra.mxu3 %vm588_vm1, %v903_v27  ;;  %v498_v13 = vrot.slane %v7861_v8, 1 }
  0x5e   : > { %v499_v17 = vsel %vm439_vm3, %v494_v12, %v498_v13  ;;  %v502_v29 = vor.u32 %v7878_v24, %v498_v13  ;;  %v7915_v12 = vpack.c.b16 %v408_v2, %v407_v1 }
  0x5f   : > { %6519 = vmatmul.msk.bf16.gmra.mxu0 %vm588_vm1, %v475_v30  ;;  %v506_v30 = vrot.slane %v7881_v25, 1 }
  0x60   : > { %v914_v22 = vrot.slane %v7915_v12, 1  ;;  %v7947_v1 = vshll.u32 %v7915_v12, 16 }
  0x61   : > { %v507_v39 = vsel %vm439_vm3, %v502_v29, %v506_v30 }
  0x68   : > { %6542 = vmatmul.msk.bf16.gmra.mxu1 %vm588_vm1, %v7775_v5 }
  0x6c   : > { %6566 = vmatmul.msk.bf16.gmra.mxu2 %vm588_vm1, %v903_v27  ;;  %6590 = vmatmul.msk.bf16.gmra.mxu3 %vm588_vm1, %v905_v43  ;;  %v282_v27 = vld [vmem:[%s7729_s14 + $0xa0] sm:$0xff] }
  0x6d   : > { %v323_v32 = vpack.c.bf16 %v282_v27, %v282_v27  ;;  %v287_v27 = vld [vmem:[%s7729_s14 + $0xc8] sm:$0xff] }
  0x6f   : > { %6520 = vmatmul.msk.bf16.gmra.mxu0 %vm588_vm1, %v483_v47  ;;  %v405_v40 = vunpack.c.l.b16 %v323_v32 }
  0x71   : > { %v7895_v42 = vpack.c.b16 %v406_v41, %v405_v40  ;;  %v328_v40 = vpack.c.bf16 %v287_v27, %v287_v27 }
  0x73   : > { %v912_v47 = vrot.slane %v7895_v42, 1  ;;  %v7923_v16 = vshll.u32 %v7895_v42, 16  ;;  %v410_v59 = vunpack.c.l.b16 %v328_v40 }
  0x75   : > { %v913_v58 = vsel %vm892_vm2, %v910_v26, %v912_v47  ;;  %v286_v26 = vld [vmem:[%s7729_s14 + $0xc0] sm:$0xff]  ;;  %v522_v32 = vrot.slane %v7923_v16, 1  ;;  %v915_v36 = vsel %vm892_vm2, %v912_v47, %v914_v22 }
  0x78   : > { %6543 = vmatmul.msk.bf16.gmra.mxu1 %vm588_vm1, %v7795_v19 }
  0x7c   : > { %6567 = vmatmul.msk.bf16.gmra.mxu2 %vm588_vm1, %v905_v43  ;;  %6591 = vmatmul.msk.bf16.gmra.mxu3 %vm588_vm1, %v907_v61  ;;  %v7898_v43 = vshrl.u32 %v7855_v3, 16 }
  0x7e   : > { %v510_v53 = vor.u32 %v7898_v43, %v506_v30 }
  0x7f   : > { %6521 = vmatmul.msk.bf16.gmra.mxu0 %vm588_vm1, %v491_v0 }
  0x80   : > { %v515_v62 = vsel %vm439_vm3, %v510_v53, %v514_v54 }
  0x88   : > { %6544 = vmatmul.msk.bf16.gmra.mxu1 %vm588_vm1, %v7815_v33 }
  0x8c   : > { %6568 = vmatmul.msk.bf16.gmra.mxu2 %vm588_vm1, %v907_v61  ;;  %6592 = vmatmul.msk.bf16.gmra.mxu3 %vm588_vm1, %v909_v14 }
  0x8f   : > { %6522 = vmatmul.msk.bf16.gmra.mxu0 %vm588_vm1, %v499_v17 }
  0x98   : > { %6545 = vmatmul.msk.bf16.gmra.mxu1 %vm588_vm1, %v7835_v50 }
  0x9c   : > { %6569 = vmatmul.msk.bf16.gmra.mxu2 %vm588_vm1, %v909_v14  ;;  %6593 = vmatmul.msk.bf16.gmra.mxu3 %vm588_vm1, %v911_v31 }
  0x9f   : > { %6523 = vmatmul.msk.bf16.gmra.mxu0 %vm588_vm1, %v507_v39  ;;  %v327_v39 = vpack.c.bf16 %v286_v26, %v286_v26 }
  0xa5   : > { %v799_v46 = vpop.f32.mrf.mxu1 }
  0xa8   : > { %6546 = vmatmul.msk.bf16.gmra.mxu1 %vm588_vm1, %v7855_v3 }
  0xac   : > { %6570 = vmatmul.msk.bf16.gmra.mxu2 %vm588_vm1, %v911_v31  ;;  %v656_v61 = vpop.f32.mrf.mxu0  ;;  %6594 = vmatmul.msk.bf16.gmra.mxu3 %vm588_vm1, %v913_v58  ;;  %v518_v31 = vor.u32 %v7920_v15, %v514_v54  ;;  %v409_v54 = vunpack.c.l.b16 %v327_v39 }
  0xad   : > { %v800_v63 = vadd.f32 %v799_v46, %v656_v61  ;;  %v801_v0 = vpop.f32.mrf.mxu1 }
  0xae   : > { %v523_v48 = vsel %vm439_vm3, %v518_v31, %v522_v32 }
  0xaf   : > { %v999_v9 = vpop.f32.mrf.mxu2  ;;  %6524 = vmatmul.msk.bf16.gmra.mxu0 %vm588_vm1, %v515_v62  ;;  %v1158_v10 = vpop.f32.mrf.mxu3  ;;  %v7939_v62 = vpack.c.b16 %v410_v59, %v409_v54 }
  0xb0   : > { %v1089_v11 = vadd.f32 %v999_v9, %v800_v63 }
  0xb2   : > { %v7917_v13 = vadd.f32 %v1158_v10, %v1089_v11  ;;  %v916_v10 = vrot.slane %v7939_v62, 1  ;;  %v288_v11 = vld [vmem:[%s7729_s14 + $0xd0] sm:$0xff] }
  0xb4   : > { %v658_v14 = vpop.f32.mrf.mxu0 }
  0xb5   : > { %v802_v17 = vadd.f32 %v801_v0, %v658_v14  ;;  %v804_v18 = vpop.f32.mrf.mxu1  ;;  %v7944_v0 = vshrl.u32 %v7895_v42, 16  ;;  %v289_v14 = vld [vmem:[%s7729_s14 + $0xd8] sm:$0xff] }
  0xb6   : > { %v330_v31 = vpack.c.bf16 %v289_v14, %v289_v14  ;;  %v290_v14 = vld [vmem:[%s7729_s14 + $0xe0] sm:$0xff] }
  0xb7   : > { %v1001_v28 = vpop.f32.mrf.mxu2  ;;  %v1160_v29 = vpop.f32.mrf.mxu3  ;;  %v526_v27 = vor.u32 %v7944_v0, %v522_v32 }
  0xb8   : > { %v1090_v30 = vadd.f32 %v1001_v28, %v802_v17  ;;  %6547 = vmatmul.msk.bf16.gmra.mxu1 %vm588_vm1, %v7875_v23  ;;  %v530_v28 = vrot.slane %v7947_v1, 1 }
  0xba   : > { %v7933_v41 = vadd.f32 %v1160_v29, %v1090_v30  ;;  %v917_v29 = vsel %vm892_vm2, %v914_v22, %v916_v10  ;;  %v329_v30 = vpack.c.bf16 %v288_v11, %v288_v11 }
  0xbc   : > { %6571 = vmatmul.msk.bf16.gmra.mxu2 %vm588_vm1, %v913_v58  ;;  %v661_v46 = vpop.f32.mrf.mxu0  ;;  %6595 = vmatmul.msk.bf16.gmra.mxu3 %vm588_vm1, %v915_v36 }
  0xbd   : > { %v805_v49 = vadd.f32 %v804_v18, %v661_v46  ;;  %v806_v53 = vpop.f32.mrf.mxu1  ;;  %v531_v46 = vsel %vm439_vm3, %v526_v27, %v530_v28 }
  0xbf   : > { %v1004_v60 = vpop.f32.mrf.mxu2  ;;  %6525 = vmatmul.msk.bf16.gmra.mxu0 %vm588_vm1, %v523_v48  ;;  %v1163_v47 = vpop.f32.mrf.mxu3 }
  0xc0   : > { %v1091_v61 = vadd.f32 %v1004_v60, %v805_v49  ;;  %v411_v49 = vunpack.c.l.b16 %v329_v30 }
  0xc2   : > { %v7941_v63 = vadd.f32 %v1163_v47, %v1091_v61  ;;  %v7968_v61 = vshrl.u32 %v7915_v12, 16 }
  0xc4   : > { %v663_v58 = vpop.f32.mrf.mxu0  ;;  %v534_v30 = vor.u32 %v7968_v61, %v530_v28 }
  0xc5   : > { %v807_v2 = vadd.f32 %v806_v53, %v663_v58  ;;  %v809_v9 = vpop.f32.mrf.mxu1  ;;  %v412_v53 = vunpack.c.l.b16 %v330_v31  ;;  %v7971_v58 = vshll.u32 %v7939_v62, 16 }
  0xc7   : > { %v1006_v17 = vpop.f32.mrf.mxu2  ;;  %v1165_v18 = vpop.f32.mrf.mxu3  ;;  %v7963_v60 = vpack.c.b16 %v412_v53, %v411_v49  ;;  %v538_v31 = vrot.slane %v7971_v58, 1 }
  0xc8   : > { %v1092_v26 = vadd.f32 %v1006_v17, %v807_v2  ;;  %6548 = vmatmul.msk.bf16.gmra.mxu1 %vm588_vm1, %v7895_v42  ;;  %v291_v17 = vld [vmem:[%s7729_s14 + $0xe8] sm:$0xff] }
  0xc9   : > { %10565 = vst [vmem:[#allocation11_spill] sm:$0xff] %v7963_v60  ;;  %v918_v11 = vrot.slane %v7963_v60, 1  ;;  %v539_v53 = vsel %vm439_vm3, %v534_v30, %v538_v31 }
  0xca   : > { %v7957_v39 = vadd.f32 %v1165_v18, %v1092_v26 }
  0xcc   : > { %6572 = vmatmul.msk.bf16.gmra.mxu2 %vm588_vm1, %v915_v36  ;;  %v666_v40 = vpop.f32.mrf.mxu0  ;;  %6596 = vmatmul.msk.bf16.gmra.mxu3 %vm588_vm1, %v917_v29 }
  0xcd   : > { %v810_v48 = vadd.f32 %v809_v9, %v666_v40  ;;  %v811_v32 = vpop.f32.mrf.mxu1  ;;  %v919_v40 = vsel %vm892_vm2, %v916_v10, %v918_v11 }
  0xcf   : > { %v1009_v54 = vpop.f32.mrf.mxu2  ;;  %6526 = vmatmul.msk.bf16.gmra.mxu0 %vm588_vm1, %v531_v46  ;;  %v1168_v22 = vpop.f32.mrf.mxu3  ;;  %v331_v46 = vpack.c.bf16 %v290_v14, %v290_v14 }
  0xd0   : > { %v1093_v59 = vadd.f32 %v1009_v54, %v810_v48  ;;  %v332_v48 = vpack.c.bf16 %v291_v17, %v291_v17 }
  0xd2   : > { %v7965_v47 = vadd.f32 %v1168_v22, %v1093_v59  ;;  %v413_v22 = vunpack.c.l.b16 %v331_v46  ;;  %v414_v59 = vunpack.c.l.b16 %v332_v48  ;;  %v292_v46 = vld [vmem:[%s7729_s14 + $0xf0] sm:$0xff]  ;;  %v293_v48 = vld [vmem:[%s7729_s14 + $0xf8] sm:$0xff] }
  0xd4   : > { %10566 = vst [vmem:[#allocation12_spill] sm:$0xff] %v7965_v47  ;;  %v668_v36 = vpop.f32.mrf.mxu0  ;;  %v7987_v14 = vpack.c.b16 %v414_v59, %v413_v22 }
  0xd5   : > { %v812_v2 = vadd.f32 %v811_v32, %v668_v36  ;;  %v814_v9 = vpop.f32.mrf.mxu1 }
  0xd6   : > { %10568 = vst [vmem:[#allocation14_spill] sm:$0xff] %v7987_v14  ;;  %v920_v30 = vrot.slane %v7987_v14, 1 }
  0xd7   : > { %v1011_v18 = vpop.f32.mrf.mxu2  ;;  %v1170_v26 = vpop.f32.mrf.mxu3 }
  0xd8   : > { %v1094_v27 = vadd.f32 %v1011_v18, %v812_v2  ;;  %6549 = vmatmul.msk.bf16.gmra.mxu1 %vm588_vm1, %v7915_v12  ;;  %v7992_v18 = vshrl.u32 %v7939_v62, 16 }
  0xda   : > { %v7981_v32 = vadd.f32 %v1170_v26, %v1094_v27  ;;  %v542_v22 = vor.u32 %v7992_v18, %v538_v31 }
  0xdc   : > { %10567 = vst [vmem:[#allocation13_spill] sm:$0xff] %v7981_v32  ;;  %6573 = vmatmul.msk.bf16.gmra.mxu2 %vm588_vm1, %v917_v29  ;;  %v671_v49 = vpop.f32.mrf.mxu0  ;;  %6597 = vmatmul.msk.bf16.gmra.mxu3 %vm588_vm1, %v919_v40 }
  0xdd   : > { %v815_v54 = vadd.f32 %v814_v9, %v671_v49  ;;  %v816_v28 = vpop.f32.mrf.mxu1  ;;  %v7995_v9 = vshll.u32 %v7963_v60, 16 }
  0xdf   : > { %v1014_v36 = vpop.f32.mrf.mxu2  ;;  %6527 = vmatmul.msk.bf16.gmra.mxu0 %vm588_vm1, %v539_v53  ;;  %v1173_v10 = vpop.f32.mrf.mxu3  ;;  %v546_v59 = vrot.slane %v7995_v9, 1 }
  0xe0   : > { %v1095_v2 = vadd.f32 %v1014_v36, %v815_v54  ;;  %v921_v36 = vsel %vm892_vm2, %v918_v11, %v920_v30 }
  0xe2   : > { %v7989_v17 = vadd.f32 %v1173_v10, %v1095_v2  ;;  %v333_v10 = vpack.c.bf16 %v292_v46, %v292_v46  ;;  %v334_v2 = vpack.c.bf16 %v293_v48, %v293_v48 }
  0xe4   : > { %10569 = vst [vmem:[#allocation15_spill] sm:$0xff] %v7989_v17  ;;  %v673_v29 = vpop.f32.mrf.mxu0  ;;  %v415_v56 = vunpack.c.l.b16 %v333_v10  ;;  %v416_v45 = vunpack.c.l.b16 %v334_v2  ;;  %v294_v2 = vld [vmem:[%s7729_s14 + $0x100] sm:$0xff] }
  0xe5   : > { %v817_v26 = vadd.f32 %v816_v28, %v673_v29  ;;  %v819_v27 = vpop.f32.mrf.mxu1 }
  0xe6   : > { %v8011_v48 = vpack.c.b16 %v416_v45, %v415_v56 }
  0xe7   : > { %v1016_v49 = vpop.f32.mrf.mxu2  ;;  %v1175_v53 = vpop.f32.mrf.mxu3 }
  0xe8   : > { %v1096_v54 = vadd.f32 %v1016_v49, %v817_v26  ;;  %6550 = vmatmul.msk.bf16.gmra.mxu1 %vm588_vm1, %v7939_v62  ;;  %v547_v26 = vsel %vm439_vm3, %v542_v22, %v546_v59  ;;  %10571 = vst [vmem:[#allocation17_spill] sm:$0xff] %v8011_v48  ;;  %v922_v10 = vrot.slane %v8011_v48, 1 }
  0xea   : > { %v8005_v28 = vadd.f32 %v1175_v53, %v1096_v54  ;;  %v8016_v54 = vshrl.u32 %v7963_v60, 16 }
  0xec   : > { %10570 = vst [vmem:[#allocation16_spill] sm:$0xff] %v8005_v28  ;;  %6574 = vmatmul.msk.bf16.gmra.mxu2 %vm588_vm1, %v919_v40  ;;  %v676_v29 = vpop.f32.mrf.mxu0  ;;  %6598 = vmatmul.msk.bf16.gmra.mxu3 %vm588_vm1, %v921_v36  ;;  %v295_v28 = vld [vmem:[%s7729_s14 + $0x108] sm:$0xff]  ;;  %v550_v45 = vor.u32 %v8016_v54, %v546_v59 }
  0xed   : > { %v820_v49 = vadd.f32 %v819_v27, %v676_v29  ;;  %v821_v31 = vpop.f32.mrf.mxu1  ;;  %v8019_v27 = vshll.u32 %v7987_v14, 16 }
  0xef   : > { %v1019_v17 = vpop.f32.mrf.mxu2  ;;  %6528 = vmatmul.msk.bf16.gmra.mxu0 %vm588_vm1, %v547_v26  ;;  %v1178_v11 = vpop.f32.mrf.mxu3  ;;  %10573 = vst [vmem:[#allocation19_spill] sm:$0xff] %v8019_v27  ;;  %v554_v56 = vrot.slane %v8019_v27, 1 }
  0xf0   : > { %v1097_v46 = vadd.f32 %v1019_v17, %v820_v49  ;;  %v923_v49 = vsel %vm892_vm2, %v920_v30, %v922_v10 }
  0xf2   : > { %v8013_v53 = vadd.f32 %v1178_v11, %v1097_v46  ;;  %v335_v11 = vpack.c.bf16 %v294_v2, %v294_v2  ;;  %v336_v46 = vpack.c.bf16 %v295_v28, %v295_v28 }
  0xf4   : > { %10572 = vst [vmem:[#allocation18_spill] sm:$0xff] %v8013_v53  ;;  %v678_v40 = vpop.f32.mrf.mxu0  ;;  %v417_v53 = vunpack.c.l.b16 %v335_v11  ;;  %v418_v27 = vunpack.c.l.b16 %v336_v46  ;;  %v296_v46 = vld [vmem:[%s7729_s14 + $0x110] sm:$0xff] }
  0xf5   : > { %v822_v22 = vadd.f32 %v821_v31, %v678_v40  ;;  %v824_v29 = vpop.f32.mrf.mxu1 }
  0xf7   : > { %v1021_v26 = vpop.f32.mrf.mxu2  ;;  %v1180_v32 = vpop.f32.mrf.mxu3 }
  0xf8   : > { %v1098_v17 = vadd.f32 %v1021_v26, %v822_v22  ;;  %6551 = vmatmul.msk.bf16.gmra.mxu1 %vm588_vm1, %v7963_v60  ;;  %v555_v22 = vsel %vm439_vm3, %v550_v45, %v554_v56 }
  0xfa   : > { %v8029_v31 = vadd.f32 %v1180_v32, %v1098_v17  ;;  %v8035_v32 = vpack.c.b16 %v418_v27, %v417_v53  ;;  %v8040_v17 = vshrl.u32 %v7987_v14, 16 }
  0xfc   : > { %10574 = vst [vmem:[#allocation20_spill] sm:$0xff] %v8029_v31  ;;  %6575 = vmatmul.msk.bf16.gmra.mxu2 %vm588_vm1, %v921_v36  ;;  %v681_v40 = vpop.f32.mrf.mxu0  ;;  %6599 = vmatmul.msk.bf16.gmra.mxu3 %vm588_vm1, %v923_v49  ;;  %v924_v11 = vrot.slane %v8035_v32, 1  ;;  %v297_v31 = vld [vmem:[%s7729_s14 + $0x118] sm:$0xff]  ;;  %v558_v53 = vor.u32 %v8040_v17, %v554_v56 }
  0xfd   : > { %v825_v26 = vadd.f32 %v824_v29, %v681_v40  ;;  %v826_v59 = vpop.f32.mrf.mxu1  ;;  %10575 = vst [vmem:[#allocation21_spill] sm:$0xff] %v8035_v32  ;;  %v8043_v29 = vshll.u32 %v8011_v48, 16 }
  0xfe   : > { %10577 = vst [vmem:[#allocation23_spill] sm:$0xff] %v8040_v17 }
  0xff   : > { %v1024_v47 = vpop.f32.mrf.mxu2  ;;  %6529 = vmatmul.msk.bf16.gmra.mxu0 %vm588_vm1, %v555_v22  ;;  %v1183_v30 = vpop.f32.mrf.mxu3  ;;  %10578 = vst [vmem:[#allocation24_spill] sm:$0xff] %v8043_v29  ;;  %v562_v27 = vrot.slane %v8043_v29, 1 }
 0x100   : > { %v1099_v28 = vadd.f32 %v1024_v47, %v825_v26  ;;  %v925_v26 = vsel %vm892_vm2, %v922_v10, %v924_v11 }
 0x102   : > { %v8037_v2 = vadd.f32 %v1183_v30, %v1099_v28  ;;  %v337_v30 = vpack.c.bf16 %v296_v46, %v296_v46  ;;  %v338_v28 = vpack.c.bf16 %v297_v31, %v297_v31 }
 0x104   : > { %10576 = vst [vmem:[#allocation22_spill] sm:$0xff] %v8037_v2  ;;  %v683_v36 = vpop.f32.mrf.mxu0  ;;  %v419_v2 = vunpack.c.l.b16 %v337_v30  ;;  %v420_v29 = vunpack.c.l.b16 %v338_v28  ;;  %v298_v28 = vld [vmem:[%s7729_s14 + $0x120] sm:$0xff] }
 0x105   : > { %v827_v45 = vadd.f32 %v826_v59, %v683_v36  ;;  %v829_v40 = vpop.f32.mrf.mxu1 }
 0x107   : > { %v1026_v22 = vpop.f32.mrf.mxu2  ;;  %v1185_v60 = vpop.f32.mrf.mxu3 }
 0x108   : > { %v1100_v47 = vadd.f32 %v1026_v22, %v827_v45  ;;  %6552 = vmatmul.msk.bf16.gmra.mxu1 %vm588_vm1, %v7987_v14  ;;  %v563_v45 = vsel %vm439_vm3, %v558_v53, %v562_v27 }
 0x10a   : > { %v8053_v59 = vadd.f32 %v1185_v60, %v1100_v47  ;;  %v8059_v60 = vpack.c.b16 %v420_v29, %v419_v2  ;;  %v8064_v47 = vshrl.u32 %v8011_v48, 16 }
 0x10c   : > { %10579 = vst [vmem:[#allocation25_spill] sm:$0xff] %v8053_v59  ;;  %6576 = vmatmul.msk.bf16.gmra.mxu2 %vm588_vm1, %v923_v49  ;;  %v686_v36 = vpop.f32.mrf.mxu0  ;;  %6600 = vmatmul.msk.bf16.gmra.mxu3 %vm588_vm1, %v925_v26  ;;  %v8070_v30 = vrot.slane %v8059_v60, 1  ;;  %v566_v29 = vor.u32 %v8064_v47, %v562_v27 }
 0x10d   : > { %v830_v22 = vadd.f32 %v829_v40, %v686_v36  ;;  %v831_v56 = vpop.f32.mrf.mxu1  ;;  %10581 = vst [vmem:[#allocation27_spill] sm:$0xff] %v8064_v47  ;;  %v8067_v40 = vshll.u32 %v8035_v32, 16 }
 0x10f   : > { %v1029_v14 = vpop.f32.mrf.mxu2  ;;  %6530 = vmatmul.msk.bf16.gmra.mxu0 %vm588_vm1, %v563_v45  ;;  %v1188_v10 = vpop.f32.mrf.mxu3  ;;  %10582 = vst [vmem:[#allocation28_spill] sm:$0xff] %v8067_v40  ;;  %v299_v45 = vld [vmem:[%s7729_s14 + $0x128] sm:$0xff] }
 0x110   : > { %v1101_v31 = vadd.f32 %v1029_v14, %v830_v22  ;;  %v570_v22 = vrot.slane %v8067_v40, 1 }
 0x112   : > { %v8061_v46 = vadd.f32 %v1188_v10, %v1101_v31  ;;  %v927_v10 = vsel %vm892_vm2, %v924_v11, %v8070_v30  ;;  %v340_v31 = vpack.c.bf16 %v299_v45, %v299_v45 }
 0x114   : > { %10580 = vst [vmem:[#allocation26_spill] sm:$0xff] %v8061_v46  ;;  %v688_v49 = vpop.f32.mrf.mxu0  ;;  %v1131_v47 = vunpack.c.l.b16 %v340_v31 }
 0x115   : > { %v832_v53 = vadd.f32 %v831_v56, %v688_v49  ;;  %v834_v36 = vpop.f32.mrf.mxu1  ;;  %v339_v56 = vpack.c.bf16 %v298_v28, %v298_v28 }
 0x117   : > { %v1031_v59 = vpop.f32.mrf.mxu2  ;;  %v1190_v14 = vpop.f32.mrf.mxu3  ;;  %v1130_v40 = vunpack.c.l.b16 %v339_v56  ;;  %v10588_v56 = vshll.u32 %v7740_v37, 16 }
 0x118   : > { %v1102_v2 = vadd.f32 %v1031_v59, %v832_v53  ;;  %6553 = vmatmul.msk.bf16.gmra.mxu1 %vm588_vm1, %v8011_v48  ;;  %v571_v59 = vsel %vm439_vm3, %v566_v29, %v570_v22 }
 0x119   : > { %v8086_v28 = vpack.c.b16 %v1131_v47, %v1130_v40  ;;  %v8099_v31 = vrot.slane %v10588_v56, 2 }
 0x11a   : > { %v8080_v49 = vadd.f32 %v1190_v14, %v1102_v2  ;;  %v8094_v2 = vshll.u32 %v8059_v60, 16 }
 0x11b   : > { %10584 = vst [vmem:[#allocation30_spill] sm:$0xff] %v8086_v28  ;;  %v1133_v29 = vrot.slane %v8086_v28, 1 }
 0x11c   : > { %10583 = vst [vmem:[#allocation29_spill] sm:$0xff] %v8080_v49  ;;  %6577 = vmatmul.msk.bf16.gmra.mxu2 %vm588_vm1, %v925_v26  ;;  %v691_v46 = vpop.f32.mrf.mxu0  ;;  %6601 = vmatmul.msk.bf16.gmra.mxu3 %vm588_vm1, %v927_v10  ;;  %v8091_v26 = vshrl.u32 %v8035_v32, 16  ;;  %v7374_v49 = vld [vmem:[%s10524_s1 + $0x20] sm:$0x30] }
 0x11d   : > { %v835_v27 = vadd.f32 %v834_v36, %v691_v46  ;;  %v836_v53 = vpop.f32.mrf.mxu1  ;;  %10587 = vst [vmem:[#allocation33_spill] sm:$0xff] %v8094_v2 }
 0x11e   : > { %10586 = vst [vmem:[#allocation32_spill] sm:$0xff] %v8091_v26 }
 0x11f   : > { %v1034_v17 = vpop.f32.mrf.mxu2  ;;  %6531 = vmatmul.msk.bf16.gmra.mxu0 %vm588_vm1, %v571_v59  ;;  %v1193_v48 = vpop.f32.mrf.mxu3  ;;  %v6656_v59 = vld [vmem:[%s10524_s1 + $0x30] sm:$0xf] }
 0x120   : > { %v1103_v11 = vadd.f32 %v1034_v17, %v835_v27  ;;  %v10589_v17 = vshrl.u32 %v7740_v37, 16  ;;  %v7376_v27 = vld [vmem:[%s10524_s1 + $0x30] sm:$0x30] }
 0x121   : > { %v6657_v56 = vor.u32 %v7376_v27, %v6656_v59  ;;  %v7377_v27 = vld [vmem:[%s10524_s1 + $0x38] sm:$0x30] }
 0x122   : > { %v8088_v45 = vadd.f32 %v1193_v48, %v1103_v11  ;;  %v8103_v47 = vrot.slane %v10589_v17, 1  ;;  %v574_v11 = vor.u32 %v8091_v26, %v570_v22  ;;  %v1134_v17 = vsel %vm892_vm2, %v8070_v30, %v1133_v29  ;;  %v6680_v22 = vld [vmem:[%s10524_s1 + $0x38] sm:$0xf] }
 0x123   : > { %v1832_v59 = vsel %vm643_vm0, %v6657_v56, 0  ;;  %v6681_v28 = vor.u32 %v7377_v27, %v6680_v22 }
 0x124   : > { %10585 = vst [vmem:[#allocation31_spill] sm:$0xff] %v8088_v45  ;;  %v693_v14 = vpop.f32.mrf.mxu0  ;;  %v6608_v45 = vld [vmem:[%s10524_s1 + $0x20] sm:$0xf]  ;;  %1841 = vmatpush.bf16.msrb.mxu2 %v1832_v59  ;;  %v1293_v27 = vor.u32 %v8099_v31, %v8103_v47 }
 0x125   : > { %v837_v46 = vadd.f32 %v836_v53, %v693_v14  ;;  %v839_v36 = vpop.f32.mrf.mxu1  ;;  %v578_v14 = vrot.slane %v8094_v2, 1  ;;  %v6632_v2 = vld [vmem:[%s10524_s1 + $0x28] sm:$0xf]  ;;  %v2118_v59 = vsel %vm643_vm0, %v6681_v28, 0  ;;  %v8150_v28 = vshrl.u32 %v8059_v60, 16 }
 0x126   : > { %2127 = vmatpush.bf16.msrb.mxu3 %v2118_v59 }
 0x127   : > { %v1036_v48 = vpop.f32.mrf.mxu2  ;;  %v1195_v40 = vpop.f32.mrf.mxu3 }
 0x128   : > { %v1104_v53 = vadd.f32 %v1036_v48, %v837_v46  ;;  %6554 = vmatmul.msk.bf16.gmra.mxu1 %vm588_vm1, %v8035_v32  ;;  %v6609_v48 = vor.u32 %v7374_v49, %v6608_v45  ;;  %v7375_v32 = vld [vmem:[%s10524_s1 + $0x28] sm:$0x30]  ;;  %v579_v49 = vsel %vm439_vm3, %v574_v11, %v578_v14 }
 0x12a   : > { %v8126_v46 = vadd.f32 %v1195_v40, %v1104_v53  ;;  %v1432_v45 = vsel %vm643_vm0, %v6609_v48, 0  ;;  %v6633_v53 = vor.u32 %v7375_v32, %v6632_v2 }
 0x12b   : > { %1441 = vmatpush.bf16.msrb.mxu0 %v1432_v45 }
 0x12c   : > { %10590 = vst [vmem:[#allocation34_spill] sm:$0xff] %v8126_v46  ;;  %6578 = vmatmul.msk.bf16.gmra.mxu2 %vm588_vm1, %v927_v10  ;;  %v696_v40 = vpop.f32.mrf.mxu0  ;;  %6602 = vmatmul.msk.bf16.gmra.mxu3 %vm588_vm1, %v1134_v17  ;;  %v1670_v46 = vsel %vm643_vm0, %v6633_v53, 0 }
 0x12d   : > { %v840_v56 = vadd.f32 %v839_v36, %v696_v40  ;;  %v841_v22 = vpop.f32.mrf.mxu1  ;;  %1679 = vmatpush.bf16.msrb.mxu1 %v1670_v46 }
 0x12f   : > { %v1039_v10 = vpop.f32.mrf.mxu2  ;;  %6532 = vmatmul.msk.bf16.gmra.mxu0 %vm588_vm1, %v579_v49  ;;  %v1198_v17 = vpop.f32.mrf.mxu3  ;;  %v582_v49 = vor.u32 %v8150_v28, %v578_v14  ;;  %v1977_v14 = vrot.slane %v7781_v7, 3 }
 0x130   : > { %v1105_v11 = vadd.f32 %v1039_v10, %v840_v56  ;;  %v1973_v10 = vrot.slane %v7778_v6, 2 }
 0x132   : > { %v8147_v26 = vadd.f32 %v1198_v17, %v1105_v11  ;;  %v1974_v17 = vrot.slane %v7760_v57, 3  ;;  %v1976_v11 = vrot.slane %v7798_v20, 2 }
 0x134   : > { %v698_v32 = vpop.f32.mrf.mxu0 }
 0x135   : > { %v842_v2 = vadd.f32 %v841_v22, %v698_v32  ;;  %v844_v36 = vpop.f32.mrf.mxu1 }
 0x137   : > { %v1041_v48 = vpop.f32.mrf.mxu2  ;;  %v1200_v40 = vpop.f32.mrf.mxu3 }
 0x138   : > { %v1106_v31 = vadd.f32 %v1041_v48, %v842_v2  ;;  %6555 = vmatmul.msk.bf16.gmra.mxu1 %vm588_vm1, %v8059_v60  ;;  %v1294_v48 = vrot.slane %v7778_v6, 1 }
 0x13a   : > { %v8154_v47 = vadd.f32 %v1200_v40, %v1106_v31  ;;  %v1295_v40 = vrot.slane %v7760_v57, 2 }
 0x13c   : > { %10591 = vst [vmem:[#allocation35_spill] sm:$0xff] %v8154_v47  ;;  %6579 = vmatmul.msk.bf16.gmra.mxu2 %vm588_vm1, %v8070_v30  ;;  %v701_v46 = vpop.f32.mrf.mxu0  ;;  %6603 = vmatmul.msk.bf16.gmra.mxu3 %vm588_vm1, %v1133_v29  ;;  %v1573_v30 = vrot.slane %v7740_v37, 2  ;;  %v1574_v29 = vrot.slane %v7742_v38, 2 }
 0x13d   : > { %v845_v45 = vadd.f32 %v844_v36, %v701_v46  ;;  %v846_v53 = vpop.f32.mrf.mxu1  ;;  %v1576_v36 = vrot.slane %v7756_v55, 2  ;;  %v1975_v46 = vor.u32 %v1974_v17, %v1973_v10 }
 0x13f   : > { %v1044_v56 = vpop.f32.mrf.mxu2  ;;  %6533 = vmatmul.msk.bf16.gmra.mxu0 %vm588_vm1, %v582_v49  ;;  %v1203_v22 = vpop.f32.mrf.mxu3  ;;  %v1577_v38 = vsel %vm643_vm0, %v1574_v29, %v1576_v36 }
 0x140   : > { %v1107_v59 = vadd.f32 %v1044_v56, %v845_v45  ;;  %v1978_v45 = vor.u32 %v1977_v14, %v1976_v11  ;;  %v1575_v56 = vsel %vm643_vm0, %v1573_v30, %v1574_v29  ;;  %v1980_v30 = vrot.slane %v7818_v34, 2 }
 0x141   : > { %v1981_v29 = vrot.slane %v7801_v21, 3 }
 0x142   : > { %v8166_v32 = vadd.f32 %v1203_v22, %v1107_v59  ;;  %v1296_v59 = vor.u32 %v1295_v40, %v1294_v48  ;;  %v1979_v6 = vsel %vm1972_vm4, %v1975_v46, %v1978_v45  ;;  %v1298_v40 = vrot.slane %v7798_v20, 1 }
 0x144   : > { %v703_v2 = vpop.f32.mrf.mxu0 }
 0x145   : > { %v847_v31 = vadd.f32 %v846_v53, %v703_v2  ;;  %v849_v49 = vpop.f32.mrf.mxu1  ;;  %v1297_v53 = vsel %vm1290_vm5, %v1293_v27, %v1296_v59  ;;  %v1299_v27 = vrot.slane %v7781_v7, 2 }
 0x147   : > { %v1046_v47 = vpop.f32.mrf.mxu2  ;;  %v1205_v37 = vpop.f32.mrf.mxu3 }
 0x148   : > { %v1108_v22 = vadd.f32 %v1046_v47, %v847_v31  ;;  %6634 = vmatmul.msk.bf16.vlgmr.msrb.gmra.mxu1 %vm588_vm1, %v1575_v56  ;;  %v1982_v56 = vor.u32 %v1981_v29, %v1980_v30 }
 0x14a   : > { %v8176_v55 = vadd.f32 %v1205_v37, %v1108_v22 }
 0x14c   : > { %v706_v57 = vpop.f32.mrf.mxu0  ;;  %6658 = vmatmul.msk.bf16.vlgmr.msrb.gmra.mxu2 %vm588_vm1, %v1577_v38  ;;  %6682 = vmatmul.msk.bf16.vlgmr.msrb.gmra.mxu3 %vm588_vm1, %v1979_v6 }
 0x14d   : > { %v850_v10 = vadd.f32 %v849_v49, %v706_v57  ;;  %v851_v17 = vpop.f32.mrf.mxu1  ;;  %v1578_v49 = vrot.slane %v7775_v5, 2  ;;  %v1300_v57 = vor.u32 %v1299_v27, %v1298_v40  ;;  %v1302_v40 = vrot.slane %v7818_v34, 1 }
 0x14f   : > { %v1049_v47 = vpop.f32.mrf.mxu2  ;;  %6610 = vmatmul.msk.bf16.vlgmr.msrb.gmra.mxu0 %vm588_vm1, %v1297_v53  ;;  %v1208_v11 = vpop.f32.mrf.mxu3  ;;  %v1579_v53 = vsel %vm643_vm0, %v1576_v36, %v1578_v49  ;;  %v1301_v7 = vsel %vm1290_vm5, %v1296_v59, %v1300_v57  ;;  %v1984_v36 = vrot.slane %v7838_v51, 2  ;;  %v1303_v59 = vrot.slane %v7801_v21, 2 }
 0x150   : > { %v1109_v14 = vadd.f32 %v1049_v47, %v850_v10  ;;  %v1983_v10 = vsel %vm1972_vm4, %v1978_v45, %v1982_v56  ;;  %v1985_v45 = vrot.slane %v7821_v35, 3 }
 0x152   : > { %v8184_v2 = vadd.f32 %v1208_v11, %v1109_v14 }
 0x154   : > { %v708_v48 = vpop.f32.mrf.mxu0 }
 0x155   : > { %v852_v31 = vadd.f32 %v851_v17, %v708_v48  ;;  %v854_v46 = vpop.f32.mrf.mxu1 }
 0x157   : > { %v1051_v37 = vpop.f32.mrf.mxu2  ;;  %v1210_v22 = vpop.f32.mrf.mxu3 }
 0x158   : > { %v1110_v6 = vadd.f32 %v1051_v37, %v852_v31  ;;  %6635 = vmatmul.msk.bf16.gmra.mxu1 %vm588_vm1, %v1577_v38  ;;  %v1986_v37 = vor.u32 %v1985_v45, %v1984_v36 }
 0x15a   : > { %v8192_v47 = vadd.f32 %v1210_v22, %v1110_v6 }
 0x15c   : > { %v711_v20 = vpop.f32.mrf.mxu0  ;;  %6659 = vmatmul.msk.bf16.gmra.mxu2 %vm588_vm1, %v1579_v53  ;;  %6683 = vmatmul.msk.bf16.gmra.mxu3 %vm588_vm1, %v1983_v10 }
 0x15d   : > { %v855_v17 = vadd.f32 %v854_v46, %v711_v20  ;;  %v856_v11 = vpop.f32.mrf.mxu1  ;;  %v1580_v46 = vrot.slane %v7795_v19, 2  ;;  %v1304_v20 = vor.u32 %v1303_v59, %v1302_v40  ;;  %v1306_v40 = vrot.slane %v7838_v51, 1 }
 0x15f   : > { %v1054_v14 = vpop.f32.mrf.mxu2  ;;  %6611 = vmatmul.msk.bf16.gmra.mxu0 %vm588_vm1, %v1301_v7  ;;  %v1213_v30 = vpop.f32.mrf.mxu3  ;;  %v1581_v7 = vsel %vm643_vm0, %v1578_v49, %v1580_v46  ;;  %v1305_v21 = vsel %vm1290_vm5, %v1300_v57, %v1304_v20  ;;  %v1988_v49 = vrot.slane %v7858_v4, 2  ;;  %v1307_v57 = vrot.slane %v7821_v35, 2 }
 0x160   : > { %v1111_v38 = vadd.f32 %v1054_v14, %v855_v17  ;;  %v1987_v17 = vsel %vm1972_vm4, %v1982_v56, %v1986_v37  ;;  %v1989_v56 = vrot.slane %v7841_v52, 3 }
 0x162   : > { %v8200_v29 = vadd.f32 %v1213_v30, %v1111_v38 }
 0x164   : > { %v713_v48 = vpop.f32.mrf.mxu0 }
 0x165   : > { %v857_v27 = vadd.f32 %v856_v11, %v713_v48  ;;  %v859_v31 = vpop.f32.mrf.mxu1 }
 0x167   : > { %v1056_v22 = vpop.f32.mrf.mxu2  ;;  %v1215_v6 = vpop.f32.mrf.mxu3 }
 0x168   : > { %v1112_v10 = vadd.f32 %v1056_v22, %v857_v27  ;;  %6636 = vmatmul.msk.bf16.gmra.mxu1 %vm588_vm1, %v1579_v53  ;;  %v1990_v22 = vor.u32 %v1989_v56, %v1988_v49 }
 0x16a   : > { %v8208_v14 = vadd.f32 %v1215_v6, %v1112_v10 }
 0x16c   : > { %v716_v34 = vpop.f32.mrf.mxu0  ;;  %6660 = vmatmul.msk.bf16.gmra.mxu2 %vm588_vm1, %v1581_v7  ;;  %6684 = vmatmul.msk.bf16.gmra.mxu3 %vm588_vm1, %v1987_v17 }
 0x16d   : > { %v860_v11 = vadd.f32 %v859_v31, %v716_v34  ;;  %v861_v30 = vpop.f32.mrf.mxu1  ;;  %v1582_v31 = vrot.slane %v7815_v33, 2  ;;  %v1308_v34 = vor.u32 %v1307_v57, %v1306_v40  ;;  %v1310_v40 = vrot.slane %v7858_v4, 1 }
 0x16f   : > { %v1059_v38 = vpop.f32.mrf.mxu2  ;;  %6612 = vmatmul.msk.bf16.gmra.mxu0 %vm588_vm1, %v1305_v21  ;;  %v1218_v36 = vpop.f32.mrf.mxu3  ;;  %v1583_v21 = vsel %vm643_vm0, %v1580_v46, %v1582_v31  ;;  %v1309_v35 = vsel %vm1290_vm5, %v1304_v20, %v1308_v34  ;;  %v1992_v46 = vrot.slane %v7878_v24, 2  ;;  %v1311_v20 = vrot.slane %v7841_v52, 2 }
 0x170   : > { %v1113_v53 = vadd.f32 %v1059_v38, %v860_v11  ;;  %v1991_v11 = vsel %vm1972_vm4, %v1986_v37, %v1990_v22  ;;  %v1993_v37 = vrot.slane %v7861_v8, 3 }
 0x172   : > { %v8216_v45 = vadd.f32 %v1218_v36, %v1113_v53 }
 0x174   : > { %v718_v48 = vpop.f32.mrf.mxu0 }
 0x175   : > { %v862_v59 = vadd.f32 %v861_v30, %v718_v48  ;;  %v864_v27 = vpop.f32.mrf.mxu1 }
 0x177   : > { %v1061_v6 = vpop.f32.mrf.mxu2  ;;  %v1220_v10 = vpop.f32.mrf.mxu3 }
 0x178   : > { %v1114_v17 = vadd.f32 %v1061_v6, %v862_v59  ;;  %6637 = vmatmul.msk.bf16.gmra.mxu1 %vm588_vm1, %v1581_v7  ;;  %v1994_v6 = vor.u32 %v1993_v37, %v1992_v46 }
 0x17a   : > { %v8224_v38 = vadd.f32 %v1220_v10, %v1114_v17 }
 0x17c   : > { %v721_v51 = vpop.f32.mrf.mxu0  ;;  %6661 = vmatmul.msk.bf16.gmra.mxu2 %vm588_vm1, %v1583_v21  ;;  %6685 = vmatmul.msk.bf16.gmra.mxu3 %vm588_vm1, %v1991_v11 }
 0x17d   : > { %v865_v30 = vadd.f32 %v864_v27, %v721_v51  ;;  %v866_v36 = vpop.f32.mrf.mxu1  ;;  %v1584_v27 = vrot.slane %v7835_v50, 2  ;;  %v1312_v51 = vor.u32 %v1311_v20, %v1310_v40  ;;  %v1314_v40 = vrot.slane %v7878_v24, 1 }
 0x17f   : > { %v1064_v53 = vpop.f32.mrf.mxu2  ;;  %6613 = vmatmul.msk.bf16.gmra.mxu0 %vm588_vm1, %v1309_v35  ;;  %v1223_v49 = vpop.f32.mrf.mxu3  ;;  %v1585_v35 = vsel %vm643_vm0, %v1582_v31, %v1584_v27  ;;  %v1313_v52 = vsel %vm1290_vm5, %v1308_v34, %v1312_v51  ;;  %v1996_v31 = vrot.slane %v7898_v43, 2  ;;  %v1315_v34 = vrot.slane %v7861_v8, 2 }
 0x180   : > { %v1115_v7 = vadd.f32 %v1064_v53, %v865_v30  ;;  %v1995_v30 = vsel %vm1972_vm4, %v1990_v22, %v1994_v6  ;;  %v1997_v22 = vrot.slane %v7881_v25, 3 }
 0x182   : > { %v8232_v56 = vadd.f32 %v1223_v49, %v1115_v7 }
 0x184   : > { %v723_v48 = vpop.f32.mrf.mxu0 }
 0x185   : > { %v867_v57 = vadd.f32 %v866_v36, %v723_v48  ;;  %v869_v59 = vpop.f32.mrf.mxu1 }
 0x187   : > { %v1066_v10 = vpop.f32.mrf.mxu2  ;;  %v1225_v17 = vpop.f32.mrf.mxu3 }
 0x188   : > { %v1116_v11 = vadd.f32 %v1066_v10, %v867_v57  ;;  %6638 = vmatmul.msk.bf16.gmra.mxu1 %vm588_vm1, %v1583_v21  ;;  %v1998_v10 = vor.u32 %v1997_v22, %v1996_v31 }
 0x18a   : > { %v8240_v53 = vadd.f32 %v1225_v17, %v1116_v11 }
 0x18c   : > { %v726_v4 = vpop.f32.mrf.mxu0  ;;  %6662 = vmatmul.msk.bf16.gmra.mxu2 %vm588_vm1, %v1585_v35  ;;  %6686 = vmatmul.msk.bf16.gmra.mxu3 %vm588_vm1, %v1995_v30 }
 0x18d   : > { %v870_v36 = vadd.f32 %v869_v59, %v726_v4  ;;  %v871_v49 = vpop.f32.mrf.mxu1  ;;  %v1586_v59 = vrot.slane %v7855_v3, 2  ;;  %v1316_v4 = vor.u32 %v1315_v34, %v1314_v40  ;;  %v1318_v40 = vrot.slane %v7898_v43, 1 }
 0x18f   : > { %v1069_v7 = vpop.f32.mrf.mxu2  ;;  %6614 = vmatmul.msk.bf16.gmra.mxu0 %vm588_vm1, %v1313_v52  ;;  %v1228_v46 = vpop.f32.mrf.mxu3  ;;  %v1587_v52 = vsel %vm643_vm0, %v1584_v27, %v1586_v59  ;;  %v1317_v8 = vsel %vm1290_vm5, %v1312_v51, %v1316_v4  ;;  %v2000_v27 = vrot.slane %v7920_v15, 2  ;;  %v1319_v51 = vrot.slane %v7881_v25, 2 }
 0x190   : > { %v1117_v21 = vadd.f32 %v1069_v7, %v870_v36  ;;  %v1999_v36 = vsel %vm1972_vm4, %v1994_v6, %v1998_v10  ;;  %v2001_v6 = vrot.slane %v7901_v44, 3 }
 0x192   : > { %v8248_v37 = vadd.f32 %v1228_v46, %v1117_v21 }
 0x194   : > { %v728_v48 = vpop.f32.mrf.mxu0 }
 0x195   : > { %v872_v20 = vadd.f32 %v871_v49, %v728_v48  ;;  %v874_v57 = vpop.f32.mrf.mxu1 }
 0x197   : > { %v1071_v17 = vpop.f32.mrf.mxu2  ;;  %v1230_v11 = vpop.f32.mrf.mxu3 }
 0x198   : > { %v1118_v30 = vadd.f32 %v1071_v17, %v872_v20  ;;  %6639 = vmatmul.msk.bf16.gmra.mxu1 %vm588_vm1, %v1585_v35  ;;  %v2002_v17 = vor.u32 %v2001_v6, %v2000_v27 }
 0x19a   : > { %v8256_v7 = vadd.f32 %v1230_v11, %v1118_v30 }
 0x19c   : > { %v731_v24 = vpop.f32.mrf.mxu0  ;;  %6663 = vmatmul.msk.bf16.gmra.mxu2 %vm588_vm1, %v1587_v52  ;;  %6687 = vmatmul.msk.bf16.gmra.mxu3 %vm588_vm1, %v1999_v36 }
 0x19d   : > { %v875_v49 = vadd.f32 %v874_v57, %v731_v24  ;;  %v876_v46 = vpop.f32.mrf.mxu1  ;;  %v1588_v57 = vrot.slane %v7875_v23, 2  ;;  %v1320_v24 = vor.u32 %v1319_v51, %v1318_v40  ;;  %v1322_v40 = vrot.slane %v7920_v15, 1 }
 0x19f   : > { %v1074_v21 = vpop.f32.mrf.mxu2  ;;  %6615 = vmatmul.msk.bf16.gmra.mxu0 %vm588_vm1, %v1317_v8  ;;  %v1233_v31 = vpop.f32.mrf.mxu3  ;;  %v1589_v8 = vsel %vm643_vm0, %v1586_v59, %v1588_v57  ;;  %v1321_v25 = vsel %vm1290_vm5, %v1316_v4, %v1320_v24  ;;  %v2004_v59 = vrot.slane %v7944_v0, 2  ;;  %v1323_v4 = vrot.slane %v7901_v44, 2 }
 0x1a0   : > { %v1119_v35 = vadd.f32 %v1074_v21, %v875_v49  ;;  %v2003_v49 = vsel %vm1972_vm4, %v1998_v10, %v2002_v17  ;;  %v2005_v10 = vrot.slane %v7923_v16, 3 }
 0x1a2   : > { %v8264_v22 = vadd.f32 %v1233_v31, %v1119_v35 }
 0x1a4   : > { %v733_v48 = vpop.f32.mrf.mxu0 }
 0x1a5   : > { %v877_v34 = vadd.f32 %v876_v46, %v733_v48  ;;  %v879_v20 = vpop.f32.mrf.mxu1 }
 0x1a7   : > { %v1076_v11 = vpop.f32.mrf.mxu2  ;;  %v1235_v30 = vpop.f32.mrf.mxu3 }
 0x1a8   : > { %v1120_v36 = vadd.f32 %v1076_v11, %v877_v34  ;;  %6640 = vmatmul.msk.bf16.gmra.mxu1 %vm588_vm1, %v1587_v52  ;;  %v2006_v11 = vor.u32 %v2005_v10, %v2004_v59 }
 0x1aa   : > { %v8272_v21 = vadd.f32 %v1235_v30, %v1120_v36 }
 0x1ac   : > { %v736_v43 = vpop.f32.mrf.mxu0  ;;  %6664 = vmatmul.msk.bf16.gmra.mxu2 %vm588_vm1, %v1589_v8  ;;  %6688 = vmatmul.msk.bf16.gmra.mxu3 %vm588_vm1, %v2003_v49 }
 0x1ad   : > { %v880_v46 = vadd.f32 %v879_v20, %v736_v43  ;;  %v881_v31 = vpop.f32.mrf.mxu1  ;;  %v1590_v20 = vrot.slane %v7895_v42, 2  ;;  %v1324_v43 = vor.u32 %v1323_v4, %v1322_v40  ;;  %v1326_v40 = vrot.slane %v7944_v0, 1 }
 0x1af   : > { %v1079_v35 = vpop.f32.mrf.mxu2  ;;  %6616 = vmatmul.msk.bf16.gmra.mxu0 %vm588_vm1, %v1321_v25  ;;  %v1238_v27 = vpop.f32.mrf.mxu3  ;;  %v1591_v25 = vsel %vm643_vm0, %v1588_v57, %v1590_v20  ;;  %v1325_v44 = vsel %vm1290_vm5, %v1320_v24, %v1324_v43  ;;  %v2008_v57 = vrot.slane %v7968_v61, 2  ;;  %v1327_v24 = vrot.slane %v7923_v16, 2 }
 0x1b0   : > { %v1121_v52 = vadd.f32 %v1079_v35, %v880_v46  ;;  %v2007_v46 = vsel %vm1972_vm4, %v2002_v17, %v2006_v11  ;;  %v2009_v17 = vrot.slane %v7947_v1, 3 }
 0x1b2   : > { %v8280_v6 = vadd.f32 %v1238_v27, %v1121_v52 }
 0x1b4   : > { %v738_v48 = vpop.f32.mrf.mxu0 }
 0x1b5   : > { %v882_v51 = vadd.f32 %v881_v31, %v738_v48  ;;  %v884_v34 = vpop.f32.mrf.mxu1 }
 0x1b7   : > { %v1081_v30 = vpop.f32.mrf.mxu2  ;;  %v1240_v36 = vpop.f32.mrf.mxu3 }
 0x1b8   : > { %v1122_v49 = vadd.f32 %v1081_v30, %v882_v51  ;;  %6641 = vmatmul.msk.bf16.gmra.mxu1 %vm588_vm1, %v1589_v8  ;;  %v1592_v51 = vrot.slane %v7915_v12, 2  ;;  %v2010_v30 = vor.u32 %v2009_v17, %v2008_v57  ;;  %v2013_v17 = vrot.slane %v7971_v58, 3 }
 0x1ba   : > { %v8288_v35 = vadd.f32 %v1240_v36, %v1122_v49 }
 0x1bc   : > { %v741_v15 = vpop.f32.mrf.mxu0  ;;  %6665 = vmatmul.msk.bf16.gmra.mxu2 %vm588_vm1, %v1591_v25  ;;  %6689 = vmatmul.msk.bf16.gmra.mxu3 %vm588_vm1, %v2007_v46 }
 0x1bd   : > { %v885_v31 = vadd.f32 %v884_v34, %v741_v15  ;;  %v886_v27 = vpop.f32.mrf.mxu1  ;;  %v1328_v15 = vor.u32 %v1327_v24, %v1326_v40  ;;  %v1331_v24 = vrot.slane %v7947_v1, 2 }
 0x1bf   : > { %v1084_v52 = vpop.f32.mrf.mxu2  ;;  %6617 = vmatmul.msk.bf16.gmra.mxu0 %vm588_vm1, %v1325_v44  ;;  %v1243_v59 = vpop.f32.mrf.mxu3  ;;  %v1593_v44 = vsel %vm643_vm0, %v1590_v20, %v1592_v51  ;;  %v1329_v16 = vsel %vm1290_vm5, %v1324_v43, %v1328_v15  ;;  %v1330_v43 = vrot.slane %v7968_v61, 1 }
 0x1c0   : > { %v1123_v8 = vadd.f32 %v1084_v52, %v885_v31  ;;  %v2011_v31 = vsel %vm1972_vm4, %v2006_v11, %v2010_v30  ;;  %v2012_v11 = vrot.slane %v7992_v18, 2 }
 0x1c2   : > { %v8296_v10 = vadd.f32 %v1243_v59, %v1123_v8 }
 0x1c4   : > { %v743_v48 = vpop.f32.mrf.mxu0 }
 0x1c5   : > { %v887_v4 = vadd.f32 %v886_v27, %v743_v48  ;;  %v1681_v34 = vpop.f32.mrf.mxu1 }
 0x1c7   : > { %v1086_v36 = vpop.f32.mrf.mxu2  ;;  %v1245_v49 = vpop.f32.mrf.mxu3 }
 0x1c8   : > { %v1124_v46 = vadd.f32 %v1086_v36, %v887_v4  ;;  %6642 = vmatmul.msk.bf16.gmra.mxu1 %vm588_vm1, %v1591_v25  ;;  %v1594_v4 = vrot.slane %v7939_v62, 2  ;;  %v2014_v36 = vor.u32 %v2013_v17, %v2012_v11  ;;  %v2017_v11 = vrot.slane %v7995_v9, 3 }
 0x1ca   : > { %v8304_v52 = vadd.f32 %v1245_v49, %v1124_v46 }
 0x1cc   : > { %v1443_v0 = vpop.f32.mrf.mxu0  ;;  %6666 = vmatmul.msk.bf16.gmra.mxu2 %vm588_vm1, %v1593_v44  ;;  %6690 = vmatmul.msk.bf16.gmra.mxu3 %vm588_vm1, %v2011_v31 }
 0x1cd   : > { %v1533_v27 = vadd.f32 %v1443_v0, %v7917_v13  ;;  %v1683_v59 = vpop.f32.mrf.mxu1  ;;  %v1332_v0 = vor.u32 %v1331_v24, %v1330_v43  ;;  %v1335_v43 = vrot.slane %v7971_v58, 2  ;;  %v10592_v24 = vld [vmem:[#allocation11_spill] sm:$0xff] }
 0x1cf   : > { %v1771_v8 = vadd.f32 %v1681_v34, %v1533_v27  ;;  %6618 = vmatmul.msk.bf16.gmra.mxu0 %vm588_vm1, %v1329_v16  ;;  %v1843_v25 = vpop.f32.mrf.mxu2  ;;  %v2129_v57 = vpop.f32.mrf.mxu3  ;;  %v1595_v27 = vsel %vm643_vm0, %v1592_v51, %v1594_v4 }
 0x1d1   : > { %v1933_v20 = vadd.f32 %v1843_v25, %v1771_v8  ;;  %v2015_v8 = vsel %vm1972_vm4, %v2010_v30, %v2014_v36  ;;  %v2016_v30 = vrot.slane %v8016_v54, 2 }
 0x1d3   : > { %v8313_v48 = vadd.f32 %v2129_v57, %v1933_v20 }
 0x1d4   : > { %v1445_v40 = vpop.f32.mrf.mxu0 }
 0x1d5   : > { %v1534_v13 = vadd.f32 %v1445_v40, %v7933_v41  ;;  %v1686_v34 = vpop.f32.mrf.mxu1  ;;  %v1333_v41 = vsel %vm1290_vm5, %v1328_v15, %v1332_v0  ;;  %v1334_v15 = vrot.slane %v7992_v18, 1 }
 0x1d7   : > { %v1772_v49 = vadd.f32 %v1683_v59, %v1534_v13  ;;  %v1845_v46 = vpop.f32.mrf.mxu2  ;;  %v2131_v31 = vpop.f32.mrf.mxu3  ;;  %v1596_v13 = vrot.slane %v10592_v24, 2 }
 0x1d8   : > { %6643 = vmatmul.msk.bf16.gmra.mxu1 %vm588_vm1, %v1593_v44 }
 0x1d9   : > { %v1934_v16 = vadd.f32 %v1845_v46, %v1772_v49  ;;  %v2018_v49 = vor.u32 %v2017_v11, %v2016_v30  ;;  %v10594_v30 = vld [vmem:[#allocation23_spill] sm:$0xff] }
 0x1da   : > { %v10595_v11 = vld [vmem:[#allocation19_spill] sm:$0xff] }
 0x1db   : > { %v8322_v61 = vadd.f32 %v2131_v31, %v1934_v16 }
 0x1dc   : > { %v1448_v1 = vpop.f32.mrf.mxu0  ;;  %6667 = vmatmul.msk.bf16.gmra.mxu2 %vm588_vm1, %v1595_v27  ;;  %6691 = vmatmul.msk.bf16.gmra.mxu3 %vm588_vm1, %v2015_v8  ;;  %v1336_v8 = vor.u32 %v1335_v43, %v1334_v15 }
 0x1dd   : > { %v1535_v59 = vadd.f32 %v1448_v1, %v7941_v63  ;;  %v1688_v25 = vpop.f32.mrf.mxu1 }
 0x1df   : > { %v1773_v57 = vadd.f32 %v1686_v34, %v1535_v59  ;;  %6619 = vmatmul.msk.bf16.gmra.mxu0 %vm588_vm1, %v1333_v41  ;;  %v1848_v44 = vpop.f32.mrf.mxu2  ;;  %v2134_v20 = vpop.f32.mrf.mxu3  ;;  %v1597_v41 = vsel %vm643_vm0, %v1594_v4, %v1596_v13  ;;  %v2019_v59 = vsel %vm1972_vm4, %v2014_v36, %v2018_v49  ;;  %v2020_v36 = vrot.slane %v10594_v30, 2 }
 0x1e1   : > { %v1935_v51 = vadd.f32 %v1848_v44, %v1773_v57 }
 0x1e3   : > { %v8331_v17 = vadd.f32 %v2134_v20, %v1935_v51 }
 0x1e4   : > { %v1450_v40 = vpop.f32.mrf.mxu0 }
 0x1e5   : > { %v1536_v63 = vadd.f32 %v1450_v40, %v7957_v39  ;;  %v1691_v34 = vpop.f32.mrf.mxu1  ;;  %v1337_v39 = vsel %vm1290_vm5, %v1332_v0, %v1336_v8  ;;  %v2021_v40 = vrot.slane %v10595_v11, 3  ;;  %v1338_v0 = vrot.slane %v8016_v54, 1 }
 0x1e7   : > { %v1774_v46 = vadd.f32 %v1688_v25, %v1536_v63  ;;  %v1850_v31 = vpop.f32.mrf.mxu2  ;;  %v2136_v16 = vpop.f32.mrf.mxu3  ;;  %v10593_v25 = vld [vmem:[#allocation12_spill] sm:$0xff]  ;;  %v1339_v63 = vrot.slane %v7995_v9, 2 }
 0x1e8   : > { %6644 = vmatmul.msk.bf16.gmra.mxu1 %vm588_vm1, %v1595_v27 }
 0x1e9   : > { %v1936_v1 = vadd.f32 %v1850_v31, %v1774_v46  ;;  %v10596_v46 = vld [vmem:[#allocation13_spill] sm:$0xff] }
 0x1eb   : > { %v8340_v18 = vadd.f32 %v2136_v16, %v1936_v1  ;;  %v10597_v16 = vld [vmem:[#allocation14_spill] sm:$0xff] }
 0x1ec   : > { %v1453_v58 = vpop.f32.mrf.mxu0  ;;  %6668 = vmatmul.msk.bf16.gmra.mxu2 %vm588_vm1, %v1597_v41  ;;  %6692 = vmatmul.msk.bf16.gmra.mxu3 %vm588_vm1, %v2019_v59  ;;  %v2022_v59 = vor.u32 %v2021_v40, %v2020_v36 }
 0x1ed   : > { %v1537_v57 = vadd.f32 %v1453_v58, %v10593_v25  ;;  %v1693_v44 = vpop.f32.mrf.mxu1 }
 0x1ef   : > { %v1775_v20 = vadd.f32 %v1691_v34, %v1537_v57  ;;  %6620 = vmatmul.msk.bf16.gmra.mxu0 %vm588_vm1, %v1337_v39  ;;  %v1853_v27 = vpop.f32.mrf.mxu2  ;;  %v2139_v51 = vpop.f32.mrf.mxu3  ;;  %v1598_v34 = vrot.slane %v10597_v16, 2  ;;  %v1340_v57 = vor.u32 %v1339_v63, %v1338_v0  ;;  %v10600_v63 = vld [vmem:[#allocation27_spill] sm:$0xff] }
 0x1f1   : > { %v1937_v4 = vadd.f32 %v1853_v27, %v1775_v20  ;;  %v1599_v27 = vsel %vm643_vm0, %v1596_v13, %v1598_v34 }
 0x1f3   : > { %v8349_v15 = vadd.f32 %v2139_v51, %v1937_v4  ;;  %v2023_v51 = vsel %vm1972_vm4, %v2018_v49, %v2022_v59  ;;  %v1341_v4 = vsel %vm1290_vm5, %v1336_v8, %v1340_v57  ;;  %v2024_v49 = vrot.slane %v10600_v63, 2 }
 0x1f4   : > { %v1455_v43 = vpop.f32.mrf.mxu0  ;;  %v1342_v8 = vrot.slane %v10594_v30, 1 }
 0x1f5   : > { %v1538_v31 = vadd.f32 %v1455_v43, %v10596_v46  ;;  %v1696_v1 = vpop.f32.mrf.mxu1  ;;  %v10601_v46 = vld [vmem:[#allocation24_spill] sm:$0xff] }
 0x1f7   : > { %v1776_v58 = vadd.f32 %v1693_v44, %v1538_v31  ;;  %v1855_v39 = vpop.f32.mrf.mxu2  ;;  %v2141_v25 = vpop.f32.mrf.mxu3  ;;  %v10599_v44 = vld [vmem:[#allocation15_spill] sm:$0xff]  ;;  %v2025_v31 = vrot.slane %v10601_v46, 3 }
 0x1f8   : > { %6645 = vmatmul.msk.bf16.gmra.mxu1 %vm588_vm1, %v1597_v41 }
 0x1f9   : > { %v1938_v20 = vadd.f32 %v1855_v39, %v1776_v58 }
 0x1fb   : > { %v8358_v54 = vadd.f32 %v2141_v25, %v1938_v20  ;;  %v1343_v25 = vrot.slane %v10595_v11, 2  ;;  %v10603_v20 = vld [vmem:[#allocation16_spill] sm:$0xff] }
 0x1fc   : > { %v1458_v9 = vpop.f32.mrf.mxu0  ;;  %6669 = vmatmul.msk.bf16.gmra.mxu2 %vm588_vm1, %v1599_v27  ;;  %6693 = vmatmul.msk.bf16.gmra.mxu3 %vm588_vm1, %v2023_v51 }
 0x1fd   : > { %10598 = vst [vmem:[#allocation11_spill] sm:$0xff] %v8358_v54  ;;  %v1539_v36 = vadd.f32 %v1458_v9, %v10599_v44  ;;  %v1698_v40 = vpop.f32.mrf.mxu1  ;;  %v10604_v9 = vld [vmem:[#allocation17_spill] sm:$0xff] }
 0x1ff   : > { %v1777_v43 = vadd.f32 %v1696_v1, %v1539_v36  ;;  %6621 = vmatmul.msk.bf16.gmra.mxu0 %vm588_vm1, %v1341_v4  ;;  %v1858_v41 = vpop.f32.mrf.mxu2  ;;  %v2144_v0 = vpop.f32.mrf.mxu3  ;;  %v1600_v1 = vrot.slane %v10604_v9, 2  ;;  %v2026_v4 = vor.u32 %v2025_v31, %v2024_v49 }
 0x201   : > { %v1939_v13 = vadd.f32 %v1858_v41, %v1777_v43  ;;  %v1344_v41 = vor.u32 %v1343_v25, %v1342_v8  ;;  %v10607_v25 = vld [vmem:[#allocation32_spill] sm:$0xff] }
 0x203   : > { %v8367_v58 = vadd.f32 %v2144_v0, %v1939_v13  ;;  %v1601_v0 = vsel %vm643_vm0, %v1598_v34, %v1600_v1  ;;  %v2027_v13 = vsel %vm1972_vm4, %v2022_v59, %v2026_v4  ;;  %v2028_v59 = vrot.slane %v10607_v25, 2 }
 0x204   : > { %v1460_v39 = vpop.f32.mrf.mxu0 }
 0x205   : > { %10602 = vst [vmem:[#allocation12_spill] sm:$0xff] %v8367_v58  ;;  %v1540_v51 = vadd.f32 %v1460_v39, %v10603_v20  ;;  %v1701_v44 = vpop.f32.mrf.mxu1  ;;  %v1345_v39 = vsel %vm1290_vm5, %v1340_v57, %v1344_v41  ;;  %v1346_v57 = vrot.slane %v10600_v63, 1 }
 0x207   : > { %v1778_v36 = vadd.f32 %v1698_v40, %v1540_v51  ;;  %v1860_v16 = vpop.f32.mrf.mxu2  ;;  %v2146_v43 = vpop.f32.mrf.mxu3  ;;  %v10606_v40 = vld [vmem:[#allocation18_spill] sm:$0xff] }
 0x208   : > { %6646 = vmatmul.msk.bf16.gmra.mxu1 %vm588_vm1, %v1599_v27 }
 0x209   : > { %v1940_v54 = vadd.f32 %v1860_v16, %v1778_v36 }
 0x20b   : > { %v8376_v30 = vadd.f32 %v2146_v43, %v1940_v54  ;;  %v10608_v54 = vld [vmem:[#allocation28_spill] sm:$0xff]  ;;  %v1347_v43 = vrot.slane %v10601_v46, 2 }
 0x20c   : > { %v1463_v11 = vpop.f32.mrf.mxu0  ;;  %6670 = vmatmul.msk.bf16.gmra.mxu2 %vm588_vm1, %v1601_v0  ;;  %6694 = vmatmul.msk.bf16.gmra.mxu3 %vm588_vm1, %v2027_v13  ;;  %v2029_v20 = vrot.slane %v10608_v54, 3  ;;  %v10609_v13 = vld [vmem:[#allocation20_spill] sm:$0xff] }
 0x20d   : > { %10605 = vst [vmem:[#allocation23_spill] sm:$0xff] %v8376_v30  ;;  %v1541_v49 = vadd.f32 %v1463_v11, %v10606_v40  ;;  %v1703_v31 = vpop.f32.mrf.mxu1  ;;  %v10610_v40 = vld [vmem:[#allocation21_spill] sm:$0xff] }
 0x20f   : > { %v1779_v8 = vadd.f32 %v1701_v44, %v1541_v49  ;;  %6622 = vmatmul.msk.bf16.gmra.mxu0 %vm588_vm1, %v1345_v39  ;;  %v1863_v16 = vpop.f32.mrf.mxu2  ;;  %v2149_v27 = vpop.f32.mrf.mxu3  ;;  %v1602_v44 = vrot.slane %v10610_v40, 2  ;;  %v2030_v39 = vor.u32 %v2029_v20, %v2028_v59 }
 0x211   : > { %v1941_v34 = vadd.f32 %v1863_v16, %v1779_v8  ;;  %v1348_v16 = vor.u32 %v1347_v43, %v1346_v57 }
 0x213   : > { %v8385_v51 = vadd.f32 %v2149_v27, %v1941_v34  ;;  %v1603_v27 = vsel %vm643_vm0, %v1600_v1, %v1602_v44  ;;  %v2031_v34 = vsel %vm1972_vm4, %v2026_v4, %v2030_v39  ;;  %v2032_v4 = vrot.slane %v8150_v28, 2 }
 0x214   : > { %v1465_v36 = vpop.f32.mrf.mxu0 }
 0x215   : > { %v1542_v11 = vadd.f32 %v1465_v36, %v10609_v13  ;;  %v1706_v49 = vpop.f32.mrf.mxu1  ;;  %v1349_v36 = vsel %vm1290_vm5, %v1344_v41, %v1348_v16  ;;  %v1350_v41 = vrot.slane %v10607_v25, 1 }
 0x217   : > { %v1780_v9 = vadd.f32 %v1703_v31, %v1542_v11  ;;  %v1865_v30 = vpop.f32.mrf.mxu2  ;;  %v2151_v8 = vpop.f32.mrf.mxu3  ;;  %v10612_v31 = vld [vmem:[#allocation22_spill] sm:$0xff]  ;;  %v1351_v11 = vrot.slane %v10608_v54, 2 }
 0x218   : > { %6647 = vmatmul.msk.bf16.gmra.mxu1 %vm588_vm1, %v1601_v0 }
 0x219   : > { %v1942_v58 = vadd.f32 %v1865_v30, %v1780_v9 }
 0x21b   : > { %v8394_v63 = vadd.f32 %v2151_v8, %v1942_v58  ;;  %v10613_v58 = vld [vmem:[#allocation33_spill] sm:$0xff] }
 0x21c   : > { %v1468_v46 = vpop.f32.mrf.mxu0  ;;  %6671 = vmatmul.msk.bf16.gmra.mxu2 %vm588_vm1, %v1603_v27  ;;  %6695 = vmatmul.msk.bf16.gmra.mxu3 %vm588_vm1, %v2031_v34  ;;  %v2033_v30 = vrot.slane %v10613_v58, 3  ;;  %v10615_v8 = vld [vmem:[#allocation25_spill] sm:$0xff] }
 0x21d   : > { %10611 = vst [vmem:[#allocation19_spill] sm:$0xff] %v8394_v63  ;;  %v1543_v59 = vadd.f32 %v1468_v46, %v10612_v31  ;;  %v1708_v20 = vpop.f32.mrf.mxu1  ;;  %v1355_v63 = vrot.slane %v10613_v58, 2 }
 0x21f   : > { %v1781_v57 = vadd.f32 %v1706_v49, %v1543_v59  ;;  %6623 = vmatmul.msk.bf16.gmra.mxu0 %vm588_vm1, %v1349_v36  ;;  %v1868_v9 = vpop.f32.mrf.mxu2  ;;  %v2154_v0 = vpop.f32.mrf.mxu3  ;;  %v1604_v49 = vrot.slane %v8059_v60, 2  ;;  %v2034_v36 = vor.u32 %v2033_v30, %v2032_v4 }
 0x221   : > { %v1943_v1 = vadd.f32 %v1868_v9, %v1781_v57  ;;  %v1352_v9 = vor.u32 %v1351_v11, %v1350_v41  ;;  %v1605_v25 = vsel %vm643_vm0, %v1602_v44, %v1604_v49  ;;  %v2035_v54 = vsel %vm1972_vm4, %v2030_v39, %v2034_v36  ;;  %v301_v39 = vld [vmem:[%s7729_s14 + $0x138] sm:$0xff] }
 0x223   : > { %v8403_v43 = vadd.f32 %v2154_v0, %v1943_v1  ;;  %v1353_v4 = vsel %vm1290_vm5, %v1348_v16, %v1352_v9 }
 0x224   : > { %v1470_v13 = vpop.f32.mrf.mxu0 }
 0x225   : > { %10614 = vst [vmem:[#allocation13_spill] sm:$0xff] %v8403_v43  ;;  %v1544_v34 = vadd.f32 %v1470_v13, %v10615_v8  ;;  %v8409_v46 = vpop.f32.mrf.mxu1  ;;  %v300_v8 = vld [vmem:[%s7729_s14 + $0x130] sm:$0xff] }
 0x226   : > { %10616 = vst [vmem:[#allocation15_spill] sm:$0xff] %v8409_v46  ;;  %v10624_v43 = vld [vmem:[#allocation29_spill] sm:$0xff] }
 0x227   : > { %v1782_v31 = vadd.f32 %v1708_v20, %v1544_v34  ;;  %v1870_v59 = vpop.f32.mrf.mxu2  ;;  %v2156_v57 = vpop.f32.mrf.mxu3  ;;  %v10618_v20 = vld [vmem:[#allocation26_spill] sm:$0xff] }
 0x228   : > { %6648 = vmatmul.msk.bf16.gmra.mxu1 %vm588_vm1, %v1603_v27  ;;  %v10621_v27 = vld [vmem:[#allocation30_spill] sm:$0xff] }
 0x229   : > { %v1944_v0 = vadd.f32 %v1870_v59, %v1782_v31  ;;  %v1359_v11 = vshrl.u32 %v10621_v27, 16  ;;  %v1362_v44 = vshll.u32 %v10621_v27, 16 }
 0x22b   : > { %v8414_v1 = vadd.f32 %v2156_v57, %v1944_v0  ;;  %v2036_v16 = vrot.slane %v1359_v11, 2  ;;  %v2037_v59 = vrot.slane %v1362_v44, 3  ;;  %v341_v57 = vpack.c.bf16 %v300_v8, %v300_v8 }
 0x22c   : > { %v1473_v13 = vpop.f32.mrf.mxu0  ;;  %6672 = vmatmul.msk.bf16.gmra.mxu2 %vm588_vm1, %v1605_v25  ;;  %6696 = vmatmul.msk.bf16.gmra.mxu3 %vm588_vm1, %v2035_v54  ;;  %v342_v0 = vpack.c.bf16 %v301_v39, %v301_v39 }
 0x22d   : > { %10617 = vst [vmem:[#allocation27_spill] sm:$0xff] %v8414_v1  ;;  %v8420_v30 = vadd.f32 %v1473_v13, %v10618_v20  ;;  %v8422_v41 = vpop.f32.mrf.mxu1  ;;  %v8434_v13 = vrot.slane %v10621_v27, 2  ;;  %v1354_v20 = vrot.slane %v8150_v28, 1  ;;  %v1288_v46 = vunpack.c.l.b16 %v341_v57 }
 0x22e   : > { %10620 = vst [vmem:[#allocation16_spill] sm:$0xff] %v8422_v41 }
 0x22f   : > { %10619 = vst [vmem:[#allocation24_spill] sm:$0xff] %v8420_v30  ;;  %6624 = vmatmul.msk.bf16.gmra.mxu0 %vm588_vm1, %v1353_v4  ;;  %v8429_v34 = vpop.f32.mrf.mxu2  ;;  %v8431_v31 = vpop.f32.mrf.mxu3  ;;  %v1356_v39 = vor.u32 %v1355_v63, %v1354_v20  ;;  %v1607_v28 = vsel %vm643_vm0, %v1604_v49, %v8434_v13 }
 0x230   : > { %10622 = vst [vmem:[#allocation18_spill] sm:$0xff] %v8429_v34  ;;  %v2038_v34 = vor.u32 %v2037_v59, %v2036_v16  ;;  %v10630_v59 = vld [vmem:[#allocation31_spill] sm:$0xff] }
 0x231   : > { %10623 = vst [vmem:[#allocation32_spill] sm:$0xff] %v8431_v31  ;;  %v1812_v31 = vunpack.c.l.b16 %v342_v0  ;;  %v1357_v16 = vsel %vm1290_vm5, %v1352_v9, %v1356_v39  ;;  %v302_v0 = vld [vmem:[%s7729_s14 + $0x140] sm:$0xf]  ;;  %s6391_s14 = sshll.u32 %s10203_s17, 4  ;;  %s10467_s14 = int_to_ptr.vmem [resolvable:$true] %s6391_s14 }
 0x232   : > { %v2039_v58 = vsel %vm1972_vm4, %v2034_v36, %v2038_v34 }
 0x234   : > { %v1475_v54 = vpop.f32.mrf.mxu0 }
 0x235   : > { %v8439_v1 = vadd.f32 %v1475_v54, %v10624_v43  ;;  %v8441_v4 = vpop.f32.mrf.mxu1  ;;  %v8451_v43 = vpack.c.b16 %v1812_v31, %v1288_v46 }
 0x236   : > { %10626 = vst [vmem:[#allocation20_spill] sm:$0xff] %v8441_v4 }
 0x237   : > { %10625 = vst [vmem:[#allocation28_spill] sm:$0xff] %v8439_v1  ;;  %v8443_v30 = vpop.f32.mrf.mxu2  ;;  %v8445_v8 = vpop.f32.mrf.mxu3  ;;  %v2044_v49 = vshll.u32 %v8451_v43, 16 }
 0x238   : > { %10627 = vst [vmem:[#allocation21_spill] sm:$0xff] %v8443_v30  ;;  %6649 = vmatmul.msk.bf16.gmra.mxu1 %vm588_vm1, %v1605_v25  ;;  %v2041_v25 = vshrl.u32 %v8451_v43, 16  ;;  %v1361_v30 = vrot.slane %v1359_v11, 1 }
 0x239   : > { %10628 = vst [vmem:[#allocation22_spill] sm:$0xff] %v8445_v8  ;;  %v2046_v9 = vrot.slane %v2044_v49, 3  ;;  %v343_v8 = vpack.c.bf16 %v302_v0, %v302_v0  ;;  %v6704_v49 = vld [vmem:[%s10524_s1 + $0x40] sm:$0xf] }
 0x23a   : > { %10629 = vst [vmem:[#allocation33_spill] sm:$0xff] %v8451_v43  ;;  %v2043_v20 = vrot.slane %v2041_v25, 2 }
 0x23c   : > { %v1478_v54 = vpop.f32.mrf.mxu0  ;;  %6673 = vmatmul.msk.bf16.gmra.mxu2 %vm588_vm1, %v1607_v28  ;;  %6697 = vmatmul.msk.bf16.gmra.mxu3 %vm588_vm1, %v2039_v58  ;;  %v2047_v4 = vor.u32 %v2046_v9, %v2043_v20 }
 0x23d   : > { %v8457_v57 = vadd.f32 %v1478_v54, %v10630_v59  ;;  %v8459_v63 = vpop.f32.mrf.mxu1  ;;  %v1364_v54 = vrot.slane %v1362_v44, 2  ;;  %v10635_v59 = vld [vmem:[#allocation34_spill] sm:$0xff] }
 0x23e   : > { %10632 = vst [vmem:[#allocation26_spill] sm:$0xff] %v8459_v63  ;;  %v1816_v63 = vrot.slane %v8451_v43, 2  ;;  %v2048_v44 = vsel %vm1972_vm4, %v2038_v34, %v2047_v4 }
 0x23f   : > { %10631 = vst [vmem:[#allocation25_spill] sm:$0xff] %v8457_v57  ;;  %6625 = vmatmul.msk.bf16.gmra.mxu0 %vm588_vm1, %v1357_v16  ;;  %v8465_v36 = vpop.f32.mrf.mxu2  ;;  %v8467_v31 = vpop.f32.mrf.mxu3  ;;  %v1813_v57 = vunpack.c.l.b16 %v343_v8  ;;  %v7378_v8 = vld [vmem:[%s10524_s1 + $0x40] sm:$0x30] }
 0x240   : > { %10633 = vst [vmem:[#allocation30_spill] sm:$0xff] %v8465_v36  ;;  %v1817_v11 = vsel %vm643_vm0, %v8434_v13, %v1816_v63  ;;  %v6705_v0 = vor.u32 %v7378_v8, %v6704_v49 }
 0x241   : > { %10634 = vst [vmem:[#allocation29_spill] sm:$0xff] %v8467_v31  ;;  %v1365_v31 = vor.u32 %v1364_v54, %v1361_v30  ;;  %v8483_v25 = vpack.c.b16 %v1813_v57, %v1813_v57 }
 0x242   : > { %v2356_v34 = vsel %vm643_vm0, %v6705_v0, 0  ;;  %v10639_v0 = vld [vmem:[#allocation35_spill] sm:$0xff] }
 0x243   : > { %v1366_v30 = vsel %vm1290_vm5, %v1356_v39, %v1365_v31  ;;  %v2050_v9 = vshrl.u32 %v8483_v25, 16  ;;  %2365 = vmatpush.bf16.msra.mxu0 %v2356_v34  ;;  %v1289_v39 = vpack.c.b16 %v1288_v46, %v1288_v46 }
 0x244   : > { %v1480_v58 = vpop.f32.mrf.mxu0 }
 0x245   : > { %v8470_v41 = vadd.f32 %v1480_v58, %v10635_v59  ;;  %v8473_v1 = vpop.f32.mrf.mxu1  ;;  %v2053_v58 = vshll.u32 %v8483_v25, 16  ;;  %v1608_v49 = vrot.slane %v1289_v39, 2 }
 0x247   : > { %v8475_v16 = vpop.f32.mrf.mxu2  ;;  %v8477_v36 = vpop.f32.mrf.mxu3 }
 0x248   : > { %6650 = vmatmul.msk.bf16.gmra.mxu1 %vm588_vm1, %v1607_v28 }
 0x24c   : > { %v1483_v20 = vpop.f32.mrf.mxu0  ;;  %6674 = vmatmul.msk.bf16.gmra.mxu2 %vm588_vm1, %v1817_v11  ;;  %6698 = vmatmul.msk.bf16.gmra.mxu3 %vm588_vm1, %v2048_v44  ;;  %v2052_v11 = vrot.slane %v2050_v9, 2  ;;  %v2055_v44 = vrot.slane %v2053_v58, 3 }
 0x24d   : > { %v8496_v28 = vadd.f32 %v1483_v20, %v8147_v26  ;;  %v8498_v57 = vpop.f32.mrf.mxu1  ;;  %v1368_v26 = vshll.u32 %v1289_v39, 16 }
 0x24e   : > { %10636 = vst [vmem:[#allocation31_spill] sm:$0xff] %v8498_v57  ;;  %v1818_v57 = vrot.slane %v8483_v25, 2  ;;  %v2056_v34 = vor.u32 %v2055_v44, %v2052_v11 }
 0x24f   : > { %6626 = vmatmul.msk.bf16.gmra.mxu0 %vm588_vm1, %v1366_v30  ;;  %v8503_v54 = vpop.f32.mrf.mxu2  ;;  %v8505_v59 = vpop.f32.mrf.mxu3  ;;  %v1609_v30 = vsel %vm643_vm0, %v8434_v13, %v1608_v49  ;;  %v1370_v46 = vrot.slane %v1368_v26, 2 }
 0x250   : > { %10637 = vst [vmem:[#allocation34_spill] sm:$0xff] %v8503_v54  ;;  %v1819_v9 = vsel %vm643_vm0, %v1816_v63, %v1818_v57  ;;  %v2057_v58 = vsel %vm1972_vm4, %v2047_v4, %v2056_v34  ;;  %v10646_v34 = vld [vmem:[#allocation10_spill] sm:$0xff] }
 0x251   : > { %10638 = vst [vmem:[#allocation36_spill] sm:$0xff] %v8505_v59 }
 0x254   : > { %v1485_v8 = vpop.f32.mrf.mxu0 }
 0x255   : > { %v8508_v20 = vadd.f32 %v1485_v8, %v10639_v0  ;;  %v8511_v43 = vpop.f32.mrf.mxu1  ;;  %v1371_v8 = vsel %vm1290_vm5, %v1365_v31, %v1370_v46  ;;  %v10645_v0 = vld [vmem:[#allocation9_spill] sm:$0xff] }
 0x257   : > { %10640 = vst [vmem:[#allocation35_spill] sm:$0xff] %v8508_v20  ;;  %v8515_v54 = vpop.f32.mrf.mxu2  ;;  %v8517_v59 = vpop.f32.mrf.mxu3 }
 0x258   : > { %10641 = vst [vmem:[#allocation37_spill] sm:$0xff] %v8515_v54  ;;  %6651 = vmatmul.msk.bf16.gmra.mxu1 %vm588_vm1, %v1609_v30  ;;  %v2260_v30 = vrot.slane %v10646_v34, 3 }
 0x259   : > { %10642 = vst [vmem:[#allocation38_spill] sm:$0xff] %v8517_v59 }
 0x25c   : > { %v1488_v39 = vpop.f32.mrf.mxu0  ;;  %6675 = vmatmul.msk.bf16.gmra.mxu2 %vm588_vm1, %v1819_v9  ;;  %6699 = vmatmul.msk.bf16.gmra.mxu3 %vm588_vm1, %v2057_v58 }
 0x25d   : > { %v8526_v13 = vadd.f32 %v1488_v39, %v8166_v32  ;;  %v8528_v11 = vpop.f32.mrf.mxu1  ;;  %v2259_v32 = vrot.slane %v10645_v0, 3 }
 0x25f   : > { %6627 = vmatmul.msk.bf16.gmra.mxu0 %vm588_vm1, %v1371_v8  ;;  %v8531_v44 = vpop.f32.mrf.mxu2  ;;  %v8533_v49 = vpop.f32.mrf.mxu3  ;;  %v2261_v9 = vsel %vm2258_vm6, %v2259_v32, %v2260_v30 }
 0x264   : > { %v1490_v63 = vpop.f32.mrf.mxu0 }
 0x265   : > { %v8536_v4 = vadd.f32 %v1490_v63, %v8176_v55  ;;  %v1731_v57 = vpop.f32.mrf.mxu1 }
 0x267   : > { %v8538_v26 = vpop.f32.mrf.mxu2  ;;  %v8540_v31 = vpop.f32.mrf.mxu3 }
 0x268   : > { %10643 = vst [vmem:[#allocation39_spill] sm:$0xff] %v8538_v26 }
 0x269   : > { %10644 = vst [vmem:[#allocation40_spill] sm:$0xff] %v8540_v31 }
 0x26c   : > { %v1493_v46 = vpop.f32.mrf.mxu0 }
 0x26d   : > { %v1553_v58 = vadd.f32 %v1493_v46, %v8184_v2  ;;  %v8546_v39 = vpop.f32.mrf.mxu1  ;;  %v2262_v2 = vrot.slane %v7775_v5, 3 }
 0x26f   : > { %v1791_v8 = vadd.f32 %v1731_v57, %v1553_v58  ;;  %6706 = vmatmul.msk.bf16.vlgmr.msra.gmra.mxu0 %vm588_vm1, %v2261_v9  ;;  %v1893_v55 = vpop.f32.mrf.mxu2  ;;  %v2179_v63 = vpop.f32.mrf.mxu3  ;;  %v2263_v57 = vsel %vm2258_vm6, %v2260_v30, %v2262_v2 }
 0x271   : > { %v1953_v59 = vadd.f32 %v1893_v55, %v1791_v8 }
 0x273   : > { %v8549_v54 = vadd.f32 %v2179_v63, %v1953_v59 }
 0x274   : > { %v1495_v31 = vpop.f32.mrf.mxu0 }
 0x275   : > { %v8552_v0 = vadd.f32 %v1495_v31, %v8192_v47  ;;  %v1736_v32 = vpop.f32.mrf.mxu1 }
 0x277   : > { %v8554_v34 = vpop.f32.mrf.mxu2  ;;  %v8556_v26 = vpop.f32.mrf.mxu3 }
 0x278   : > { %10647 = vst [vmem:[#allocation9_spill] sm:$0xff] %v8554_v34 }
 0x279   : > { %10648 = vst [vmem:[#allocation10_spill] sm:$0xff] %v8556_v26 }
 0x27c   : > { %v1498_v46 = vpop.f32.mrf.mxu0 }
 0x27d   : > { %v1555_v9 = vadd.f32 %v1498_v46, %v8200_v29  ;;  %v8562_v47 = vpop.f32.mrf.mxu1  ;;  %v2264_v29 = vrot.slane %v7795_v19, 3  ;;  %v2266_v19 = vrot.slane %v7815_v33, 3 }
 0x27f   : > { %v1793_v58 = vadd.f32 %v1736_v32, %v1555_v9  ;;  %6707 = vmatmul.msk.bf16.gmra.mxu0 %vm588_vm1, %v2263_v57  ;;  %v1898_v59 = vpop.f32.mrf.mxu2  ;;  %v2184_v8 = vpop.f32.mrf.mxu3  ;;  %v2265_v46 = vsel %vm2258_vm6, %v2262_v2, %v2264_v29  ;;  %v2267_v34 = vsel %vm2258_vm6, %v2264_v29, %v2266_v19 }
 0x281   : > { %v1955_v55 = vadd.f32 %v1898_v59, %v1793_v58 }
 0x283   : > { %v8564_v31 = vadd.f32 %v2184_v8, %v1955_v55 }
 0x284   : > { %v1500_v63 = vpop.f32.mrf.mxu0 }
 0x285   : > { %v8567_v26 = vadd.f32 %v1500_v63, %v8208_v14  ;;  %v1741_v32 = vpop.f32.mrf.mxu1 }
 0x287   : > { %v8569_v5 = vpop.f32.mrf.mxu2  ;;  %v8571_v20 = vpop.f32.mrf.mxu3 }
 0x288   : > { %10649 = vst [vmem:[#allocation41_spill] sm:$0xff] %v8571_v20 }
 0x28c   : > { %v1503_v30 = vpop.f32.mrf.mxu0 }
 0x28d   : > { %v1557_v57 = vadd.f32 %v1503_v30, %v8216_v45 }
 0x28f   : > { %v1795_v9 = vadd.f32 %v1741_v32, %v1557_v57  ;;  %6708 = vmatmul.msk.bf16.gmra.mxu0 %vm588_vm1, %v2265_v46  ;;  %v1903_v58 = vpop.f32.mrf.mxu2  ;;  %v2189_v59 = vpop.f32.mrf.mxu3  ;;  %v2268_v32 = vrot.slane %v7835_v50, 3 }
 0x291   : > { %v1957_v8 = vadd.f32 %v1903_v58, %v1795_v9  ;;  %v2272_v9 = vrot.slane %v7875_v23, 3 }
 0x293   : > { %v8577_v14 = vadd.f32 %v2189_v59, %v1957_v8  ;;  %v2274_v8 = vrot.slane %v7895_v42, 3 }
 0x294   : > { %v1505_v55 = vpop.f32.mrf.mxu0 }
 0x295   : > { %v8580_v63 = vadd.f32 %v1505_v55, %v8224_v38  ;;  %v2269_v38 = vsel %vm2258_vm6, %v2266_v19, %v2268_v32 }
 0x29c   : > { %v1508_v20 = vpop.f32.mrf.mxu0 }
 0x29d   : > { %v8585_v2 = vadd.f32 %v1508_v20, %v8232_v56  ;;  %v2270_v20 = vrot.slane %v7855_v3, 3 }
 0x29f   : > { %6709 = vmatmul.msk.bf16.gmra.mxu0 %vm588_vm1, %v2267_v34 }
 0x2a4   : > { %v1510_v45 = vpop.f32.mrf.mxu0 }
 0x2a5   : > { %v8589_v30 = vadd.f32 %v1510_v45, %v8240_v53  ;;  %v2271_v53 = vsel %vm2258_vm6, %v2268_v32, %v2270_v20  ;;  %v2276_v45 = vrot.slane %v7915_v12, 3 }
 0x2ac   : > { %v1513_v46 = vpop.f32.mrf.mxu0 }
 0x2ad   : > { %v8594_v57 = vadd.f32 %v1513_v46, %v8248_v37 }
 0x2af   : > { %6710 = vmatmul.msk.bf16.gmra.mxu0 %vm588_vm1, %v2269_v38  ;;  %v2278_v38 = vrot.slane %v7939_v62, 3 }
 0x2b4   : > { %v1515_v33 = vpop.f32.mrf.mxu0 }
 0x2b5   : > { %v8598_v56 = vadd.f32 %v1515_v33, %v8256_v7  ;;  %v2273_v7 = vsel %vm2258_vm6, %v2270_v20, %v2272_v9 }
 0x2bc   : > { %v1518_v34 = vpop.f32.mrf.mxu0 }
 0x2bd   : > { %v8603_v29 = vadd.f32 %v1518_v34, %v8264_v22  ;;  %v2280_v34 = vrot.slane %v10592_v24, 3 }
 0x2bf   : > { %6711 = vmatmul.msk.bf16.gmra.mxu0 %vm588_vm1, %v2271_v53 }
 0x2c4   : > { %v1520_v50 = vpop.f32.mrf.mxu0 }
 0x2c5   : > { %v8607_v37 = vadd.f32 %v1520_v50, %v8272_v21  ;;  %v2275_v21 = vsel %vm2258_vm6, %v2272_v9, %v2274_v8  ;;  %v10652_v9 = vld [vmem:[#allocation11_spill] sm:$0xff] }
 0x2cc   : > { %v1523_v58 = vpop.f32.mrf.mxu0 }
 0x2cd   : > { %v8612_v59 = vadd.f32 %v1523_v58, %v8280_v6  ;;  %v10653_v58 = vld [vmem:[#allocation14_spill] sm:$0xff] }
 0x2cf   : > { %10650 = vst [vmem:[#allocation42_spill] sm:$0xff] %v8612_v59  ;;  %6712 = vmatmul.msk.bf16.gmra.mxu0 %vm588_vm1, %v2273_v7  ;;  %v2282_v7 = vrot.slane %v10653_v58, 3  ;;  %v10657_v58 = vld [vmem:[#allocation25_spill] sm:$0xff] }
 0x2d4   : > { %v1525_v3 = vpop.f32.mrf.mxu0 }
 0x2d5   : > { %v8616_v22 = vadd.f32 %v1525_v3, %v8288_v35  ;;  %v2277_v35 = vsel %vm2258_vm6, %v2274_v8, %v2276_v45  ;;  %v10654_v8 = vld [vmem:[#allocation12_spill] sm:$0xff] }
 0x2dc   : > { %v1528_v55 = vpop.f32.mrf.mxu0 }
 0x2dd   : > { %v8621_v19 = vadd.f32 %v1528_v55, %v8296_v10 }
 0x2df   : > { %6713 = vmatmul.msk.bf16.gmra.mxu0 %vm588_vm1, %v2275_v21  ;;  %v10655_v21 = vld [vmem:[#allocation23_spill] sm:$0xff] }
 0x2e4   : > { %v1530_v23 = vpop.f32.mrf.mxu0 }
 0x2e5   : > { %v8625_v6 = vadd.f32 %v1530_v23, %v8304_v52  ;;  %v2279_v52 = vsel %vm2258_vm6, %v2276_v45, %v2278_v38  ;;  %v10656_v23 = vld [vmem:[#allocation17_spill] sm:$0xff] }
 0x2e6   : > { %v2284_v45 = vrot.slane %v10656_v23, 3 }
 0x2e7   : > { %10651 = vst [vmem:[#allocation43_spill] sm:$0xff] %v8625_v6  ;;  %v10668_v6 = vld [vmem:[#allocation22_spill] sm:$0xff] }
 0x2ec   : > { %v2367_v32 = vpop.f32.mrf.mxu0 }
 0x2ed   : > { %v8630_v46 = vadd.f32 %v2367_v32, %v8313_v48 }
 0x2ef   : > { %6714 = vmatmul.msk.bf16.gmra.mxu0 %vm588_vm1, %v2277_v35  ;;  %v2285_v35 = vsel %vm2258_vm6, %v2282_v7, %v2284_v45 }
 0x2f4   : > { %v2369_v42 = vpop.f32.mrf.mxu0 }
 0x2f5   : > { %v8634_v10 = vadd.f32 %v2369_v42, %v8322_v61  ;;  %v2281_v61 = vsel %vm2258_vm6, %v2278_v38, %v2280_v34 }
 0x2fc   : > { %v2372_v33 = vpop.f32.mrf.mxu0 }
 0x2fd   : > { %v8639_v20 = vadd.f32 %v2372_v33, %v8331_v17  ;;  %v2286_v33 = vrot.slane %v10610_v40, 3  ;;  %v10659_v40 = vld [vmem:[#allocation28_spill] sm:$0xff] }
 0x2ff   : > { %6715 = vmatmul.msk.bf16.gmra.mxu0 %vm588_vm1, %v2279_v52 }
 0x304   : > { %v2374_v12 = vpop.f32.mrf.mxu0 }
 0x305   : > { %v8643_v48 = vadd.f32 %v2374_v12, %v8340_v18  ;;  %v2283_v18 = vsel %vm2258_vm6, %v2280_v34, %v2282_v7  ;;  %v2287_v12 = vsel %vm2258_vm6, %v2284_v45, %v2286_v33  ;;  %v10658_v7 = vld [vmem:[#allocation20_spill] sm:$0xff] }
 0x306   : > { %v10662_v45 = vld [vmem:[#allocation24_spill] sm:$0xff] }
 0x30c   : > { %v2377_v53 = vpop.f32.mrf.mxu0 }
 0x30d   : > { %v8648_v50 = vadd.f32 %v2377_v53, %v8349_v15  ;;  %v2288_v53 = vrot.slane %v8059_v60, 3 }
 0x30f   : > { %6716 = vmatmul.msk.bf16.gmra.mxu0 %vm588_vm1, %v2281_v61 }
 0x314   : > { %v2379_v62 = vpop.f32.mrf.mxu0 }
 0x315   : > { %v8652_v17 = vadd.f32 %v2379_v62, %v10652_v9  ;;  %v2289_v62 = vsel %vm2258_vm6, %v2286_v33, %v2288_v53  ;;  %v2290_v9 = vrot.slane %v10621_v27, 3  ;;  %v10664_v33 = vld [vmem:[#allocation30_spill] sm:$0xff] }
 0x317   : > { %v2291_v60 = vsel %vm2258_vm6, %v2288_v53, %v2290_v9  ;;  %v1787_v53 = vadd.f32 %v8473_v1, %v8496_v28  ;;  %v10672_v28 = vld [vmem:[#allocation27_spill] sm:$0xff] }
 0x31c   : > { %v2382_v3 = vpop.f32.mrf.mxu0 }
 0x31d   : > { %v8657_v55 = vadd.f32 %v2382_v3, %v10654_v8  ;;  %v1785_v3 = vadd.f32 %v10658_v7, %v10657_v58  ;;  %v10666_v58 = vld [vmem:[#allocation18_spill] sm:$0xff] }
 0x31f   : > { %6717 = vmatmul.msk.bf16.gmra.mxu0 %vm588_vm1, %v2283_v18  ;;  %v10660_v18 = vld [vmem:[#allocation16_spill] sm:$0xff] }
 0x320   : > { %v1784_v8 = vadd.f32 %v10660_v18, %v10659_v40  ;;  %v10667_v40 = vld [vmem:[#allocation29_spill] sm:$0xff] }
 0x324   : > { %v2384_v24 = vpop.f32.mrf.mxu0 }
 0x325   : > { %v8661_v15 = vadd.f32 %v2384_v24, %v10655_v21  ;;  %v10661_v24 = vld [vmem:[#allocation26_spill] sm:$0xff] }
 0x326   : > { %v1786_v21 = vadd.f32 %v10661_v24, %v8470_v41 }
 0x328   : > { %v1948_v27 = vadd.f32 %v8475_v16, %v1786_v21  ;;  %v8699_v16 = vld [vmem:[%s10527_s4] ss:$0 sm:$0xff] }
 0x32a   : > { %v2234_v24 = vadd.f32 %v8477_v36, %v1948_v27 }
 0x32c   : > { %v2387_v32 = vpop.f32.mrf.mxu0 }
 0x32d   : > { %v8666_v42 = vadd.f32 %v2387_v32, %v8385_v51  ;;  %v10663_v32 = vld [vmem:[#allocation15_spill] sm:$0xff] }
 0x32f   : > { %6718 = vmatmul.msk.bf16.gmra.mxu0 %vm588_vm1, %v2285_v35  ;;  %v1783_v35 = vadd.f32 %v10663_v32, %v10662_v45 }
 0x331   : > { %v1945_v7 = vadd.f32 %v10666_v58, %v1783_v35  ;;  %v10673_v58 = vld [vmem:[#allocation36_spill] sm:$0xff] }
 0x334   : > { %v2389_v38 = vpop.f32.mrf.mxu0 }
 0x33c   : > { %v2392_v52 = vpop.f32.mrf.mxu0 }
 0x33f   : > { %6719 = vmatmul.msk.bf16.gmra.mxu0 %vm588_vm1, %v2287_v12  ;;  %v1947_v12 = vadd.f32 %v10664_v33, %v1785_v3  ;;  %v10669_v3 = vld [vmem:[#allocation32_spill] sm:$0xff] }
 0x340   : > { %v2231_v33 = vadd.f32 %v10669_v3, %v1945_v7 }
 0x341   : > { %v2233_v18 = vadd.f32 %v10667_v40, %v1947_v12  ;;  %v10674_v40 = vld [vmem:[#allocation13_spill] sm:$0xff] }
 0x344   : > { %v2394_v34 = vpop.f32.mrf.mxu0 }
 0x34c   : > { %v2397_v61 = vpop.f32.mrf.mxu0 }
 0x34d   : > { %v2469_v12 = vadd.f32 %v2397_v61, %v2231_v33 }
 0x34f   : > { %6720 = vmatmul.msk.bf16.gmra.mxu0 %vm588_vm1, %v2289_v62  ;;  %v10665_v62 = vld [vmem:[#allocation21_spill] sm:$0xff] }
 0x350   : > { %v1946_v59 = vadd.f32 %v10665_v62, %v1784_v8 }
 0x352   : > { %v2232_v41 = vadd.f32 %v10668_v6, %v1946_v59  ;;  %v10671_v6 = vld [vmem:[#allocation33_spill] sm:$0xff] }
 0x353   : > { %v2292_v1 = vrot.slane %v10671_v6, 3  ;;  %v2501_v6 = vadd.f32 %v8699_v16, %v8657_v55  ;;  %v2498_v55 = vadd.f32 %v8699_v16, %v8643_v48 }
 0x354   : > { %v2399_v51 = vpop.f32.mrf.mxu0 }
 0x355   : > { %v2470_v8 = vadd.f32 %v2399_v51, %v2232_v41  ;;  %v2507_v51 = vadd.f32 %v8699_v16, %v2469_v12  ;;  %v2502_v12 = vadd.f32 %v8699_v16, %v8661_v15  ;;  %v2499_v15 = vadd.f32 %v8699_v16, %v8648_v50 }
 0x356   : > { %v2534_v50 = vmax.f32 %v2498_v55, 0.0 }
 0x357   : > { %v2508_v62 = vadd.f32 %v8699_v16, %v2470_v8  ;;  %v2543_v8 = vmax.f32 %v2507_v51, 0.0 }
 0x35c   : > { %v2402_v23 = vpop.f32.mrf.mxu0 }
 0x35d   : > { %v2471_v45 = vadd.f32 %v2402_v23, %v2233_v18  ;;  %v2468_v23 = vadd.f32 %v2394_v34, %v10672_v28  ;;  %v2467_v18 = vadd.f32 %v2392_v52, %v10674_v40  ;;  %v2544_v34 = vmax.f32 %v2508_v62, 0.0 }
 0x35e   : > { %v2537_v62 = vmax.f32 %v2501_v6, 0.0 }
 0x35f   : > { %6721 = vmatmul.msk.bf16.gmra.mxu0 %vm588_vm1, %v2291_v60  ;;  %v10670_v60 = vld [vmem:[#allocation34_spill] sm:$0xff]  ;;  %v2509_v59 = vadd.f32 %v8699_v16, %v2471_v45  ;;  %v2505_v33 = vadd.f32 %v8699_v16, %v2467_v18 }
 0x360   : > { %v1949_v35 = vadd.f32 %v10670_v60, %v1787_v53  ;;  %v10675_v53 = vld [vmem:[#allocation19_spill] sm:$0xff] }
 0x361   : > { %v2545_v41 = vmax.f32 %v2509_v59, 0.0  ;;  %v2466_v45 = vadd.f32 %v2389_v38, %v10675_v53  ;;  %v2503_v38 = vadd.f32 %v8699_v16, %v8666_v42  ;;  %v2541_v60 = vmax.f32 %v2505_v33, 0.0  ;;  %v8754_v53 = vpop.f32.mrf.mxu3 }
 0x362   : > { %v2235_v7 = vadd.f32 %v10673_v58, %v1949_v35  ;;  %v2538_v42 = vmax.f32 %v2502_v12, 0.0 }
 0x363   : > { %v2504_v52 = vadd.f32 %v8699_v16, %v2466_v45  ;;  %v2539_v28 = vmax.f32 %v2503_v38, 0.0 }
 0x364   : > { %v2404_v32 = vpop.f32.mrf.mxu0 }
 0x365   : > { %v2472_v21 = vadd.f32 %v2404_v32, %v2234_v24  ;;  %v2293_v24 = vsel %vm2258_vm6, %v2290_v9, %v2292_v1  ;;  %v2506_v32 = vadd.f32 %v8699_v16, %v2468_v23  ;;  %v1789_v9 = vadd.f32 %v8511_v43, %v8526_v13 }
 0x366   : > { %v2540_v59 = vmax.f32 %v2504_v52, 0.0  ;;  %v2294_v43 = vrot.slane %v8483_v25, 3  ;;  %v2500_v13 = vadd.f32 %v8699_v16, %v8652_v17  ;;  %v2497_v17 = vadd.f32 %v8699_v16, %v8639_v20 }
 0x367   : > { %v2510_v36 = vadd.f32 %v8699_v16, %v2472_v21  ;;  %v2542_v21 = vmax.f32 %v2506_v32, 0.0 }
 0x368   : > { %v2536_v25 = vmax.f32 %v2500_v13, 0.0  ;;  %v2533_v48 = vmax.f32 %v2497_v17, 0.0 }
 0x369   : > { %v2546_v27 = vmax.f32 %v2510_v36, 0.0  ;;  %v1951_v36 = vadd.f32 %v8531_v44, %v1789_v9 }
 0x36b   : > { %2728 = vmatpush.msra.mxu1 %v2546_v27  ;;  %v2237_v23 = vadd.f32 %v8533_v49, %v1951_v36  ;;  %v2295_v27 = vsel %vm2258_vm6, %v2292_v1, %v2294_v43  ;;  %v2496_v49 = vadd.f32 %v8699_v16, %v8634_v10  ;;  %v2495_v1 = vadd.f32 %v8699_v16, %v8630_v46 }
 0x36c   : > { %v2407_v61 = vpop.f32.mrf.mxu0 }
 0x36d   : > { %v8713_v3 = vadd.f32 %v2407_v61, %v2235_v7  ;;  %2729 = vmatpush.msra.mxu1 %v2545_v41  ;;  %v2535_v7 = vmax.f32 %v2499_v15, 0.0  ;;  %v2532_v18 = vmax.f32 %v2496_v49, 0.0  ;;  %v2531_v51 = vmax.f32 %v2495_v1, 0.0  ;;  %v1743_v61 = vpop.f32.mrf.mxu1 }
 0x36f   : > { %10676 = vst [vmem:[#allocation11_spill] sm:$0xff] %v8713_v3  ;;  %6722 = vmatmul.msk.bf16.gmra.mxu0 %vm588_vm1, %v2293_v24  ;;  %2730 = vmatpush.msra.mxu1 %v2544_v34  ;;  %v1905_v24 = vpop.f32.mrf.mxu2 }
 0x371   : > { %2731 = vmatpush.msra.mxu1 %v2543_v8  ;;  %v2194_v8 = vpop.f32.mrf.mxu3 }
 0x373   : > { %2732 = vmatpush.msra.mxu1 %v2542_v21 }
 0x374   : > { %v8722_v35 = vpop.f32.mrf.mxu0 }
 0x375   : > { %2733 = vmatpush.msra.mxu1 %v2541_v60  ;;  %v1746_v32 = vpop.f32.mrf.mxu1 }
 0x377   : > { %2734 = vmatpush.msra.mxu1 %v2540_v59  ;;  %v1908_v34 = vpop.f32.mrf.mxu2 }
 0x379   : > { %2735 = vmatpush.msra.mxu1 %v2539_v28  ;;  %v2196_v38 = vpop.f32.mrf.mxu3 }
 0x37b   : > { %2736 = vmatpush.msra.mxu1 %v2538_v42 }
 0x37c   : > { %v2412_v44 = vpop.f32.mrf.mxu0 }
 0x37d   : > { %v8738_v58 = vadd.f32 %v2412_v44, %v2237_v23  ;;  %2737 = vmatpush.msra.mxu1 %v2537_v62  ;;  %v1748_v52 = vpop.f32.mrf.mxu1 }
 0x37f   : > { %10677 = vst [vmem:[#allocation14_spill] sm:$0xff] %v8738_v58  ;;  %6723 = vmatmul.msk.bf16.gmra.mxu0 %vm588_vm1, %v2295_v27  ;;  %2738 = vmatpush.msra.mxu1 %v2536_v25  ;;  %v1910_v21 = vpop.f32.mrf.mxu2 }
 0x381   : > { %2739 = vmatpush.msra.mxu1 %v2535_v7  ;;  %v2199_v36 = vpop.f32.mrf.mxu3 }
 0x383   : > { %2740 = vmatpush.msra.mxu1 %v2534_v50 }
 0x384   : > { %v8747_v40 = vpop.f32.mrf.mxu0 }
 0x385   : > { %2741 = vmatpush.msra.mxu1 %v2533_v48  ;;  %v1751_v60 = vpop.f32.mrf.mxu1 }
 0x386   : > { %v1799_v1 = vadd.f32 %v1751_v60, %v8594_v57 }
 0x387   : > { %2742 = vmatpush.msra.mxu1 %v2532_v18  ;;  %v1913_v59 = vpop.f32.mrf.mxu2 }
 0x388   : > { %v1961_v3 = vadd.f32 %v1913_v59, %v1799_v1 }
 0x389   : > { %2743 = vmatpush.msra.mxu1 %v2531_v51  ;;  %v2201_v43 = vpop.f32.mrf.mxu3  ;;  %v1798_v51 = vadd.f32 %v1748_v52, %v8589_v30 }
 0x38a   : > { %v2247_v30 = vadd.f32 %v2199_v36, %v1961_v3 }
 0x38c   : > { %v2417_v20 = vpop.f32.mrf.mxu0 }
 0x38d   : > { %v8750_v41 = vadd.f32 %v2417_v20, %v8549_v54  ;;  %v1753_v6 = vpop.f32.mrf.mxu1 }
 0x38e   : > { %v1800_v7 = vadd.f32 %v1753_v6, %v8598_v56  ;;  %v1960_v56 = vadd.f32 %v1910_v21, %v1798_v51  ;;  %v10678_v51 = vld [vmem:[#allocation9_spill] sm:$0xff] }
 0x38f   : > { %v1915_v28 = vpop.f32.mrf.mxu2 }
 0x390   : > { %v1962_v20 = vadd.f32 %v1915_v28, %v1800_v7 }
 0x391   : > { %v2204_v62 = vpop.f32.mrf.mxu3 }
 0x394   : > { %v8752_v10 = vpop.f32.mrf.mxu0 }
 0x395   : > { %v1756_v42 = vpop.f32.mrf.mxu1 }
 0x396   : > { %v1801_v25 = vadd.f32 %v1756_v42, %v8603_v29  ;;  %v1796_v42 = vadd.f32 %v1743_v61, %v8580_v63  ;;  %v2246_v63 = vadd.f32 %v2196_v38, %v1960_v56 }
 0x397   : > { %v1918_v23 = vpop.f32.mrf.mxu2 }
 0x398   : > { %v1963_v48 = vadd.f32 %v1918_v23, %v1801_v25  ;;  %v2567_v23 = vlaneseq }
 0x39a   : > { %v2249_v29 = vadd.f32 %v2204_v62, %v1963_v48  ;;  %v8783_v59 = vshrl.u32 %v2567_v23, 7 }
 0x39c   : > { %v2422_v46 = vpop.f32.mrf.mxu0  ;;  %v8806_v48 = vadd.s32 8, %v8783_v59 }
 0x39d   : > { %v8757_v45 = vadd.f32 %v2422_v46, %v8564_v31  ;;  %v1758_v44 = vpop.f32.mrf.mxu1 }
 0x39e   : > { %v1802_v49 = vadd.f32 %v1758_v44, %v8607_v37  ;;  %v2248_v37 = vadd.f32 %v2201_v43, %v1962_v20 }
 0x39f   : > { %v1920_v27 = vpop.f32.mrf.mxu2 }
 0x3a0   : > { %v1964_v46 = vadd.f32 %v1920_v27, %v1802_v49  ;;  %v2580_v27 = vshra.s32 %v8783_v59, 3 }
 0x3a2   : > { %v2596_v38 = vmul.u32 2, %v2580_v27 }
 0x3a4   : > { %v8759_v33 = vpop.f32.mrf.mxu0 }
 0x3a5   : > { %v8767_v17 = vpop.f32.mrf.mxu1 }
 0x3a7   : > { %v8772_v18 = vpop.f32.mrf.mxu2 }
 0x3ac   : > { %v2427_v9 = vpop.f32.mrf.mxu0 }
 0x3ad   : > { %v8762_v54 = vadd.f32 %v2427_v9, %v8577_v14  ;;  %v2206_v14 = vpop.f32.mrf.mxu3  ;;  %v1797_v9 = vadd.f32 %v1746_v32, %v8585_v2  ;;  %v8779_v57 = vpop.f32.mrf.mxu1  ;;  %v1794_v2 = vadd.f32 %v8562_v47, %v8567_v26  ;;  %v1958_v32 = vadd.f32 %v1905_v24, %v1796_v42 }
 0x3ae   : > { %v2250_v6 = vadd.f32 %v2206_v14, %v1964_v46  ;;  %v1792_v26 = vadd.f32 %v8546_v39, %v8552_v0  ;;  %v2588_v24 = vand.u32 7, %v8783_v59  ;;  %v10679_v46 = vld [vmem:[#allocation41_spill] sm:$0xff] }
 0x3af   : > { %v1959_v25 = vadd.f32 %v1908_v34, %v1797_v9  ;;  %v8787_v62 = vpop.f32.mrf.mxu2  ;;  %v1956_v47 = vadd.f32 %v8569_v5, %v1794_v2 }
 0x3b0   : > { %v2612_v1 = vmul.u32 2, %v2588_v24  ;;  %v1954_v20 = vadd.f32 %v10678_v51, %v1792_v26  ;;  %v10684_v24 = vld [vmem:[#allocation37_spill] sm:$0xff] }
 0x3b1   : > { %v2245_v34 = vadd.f32 %v2194_v8, %v1959_v25  ;;  %v2242_v9 = vadd.f32 %v10679_v46, %v1956_v47  ;;  %v2570_v47 = vadd.s32 16, %v8783_v59 }
 0x3b4   : > { %v8764_v12 = vpop.f32.mrf.mxu0 }
 0x3b5   : > { %v8777_v58 = vpop.f32.mrf.mxu3 }
 0x3bc   : > { %v2432_v31 = vpop.f32.mrf.mxu0 }
 0x3bd   : > { %v2483_v14 = vadd.f32 %v2432_v31, %v2245_v34  ;;  %v8797_v8 = vpop.f32.mrf.mxu3  ;;  %v1766_v31 = vpop.f32.mrf.mxu1 }
 0x3c4   : > { %v2434_v13 = vpop.f32.mrf.mxu0 }
 0x3c5   : > { %v2484_v3 = vadd.f32 %v2434_v13, %v2246_v63  ;;  %v2214_v26 = vpop.f32.mrf.mxu3 }
 0x3c7   : > { %v2522_v0 = vadd.f32 %v8699_v16, %v2484_v3 }
 0x3c9   : > { %v2558_v25 = vmax.f32 %v2522_v0, 0.0 }
 0x3cc   : > { %v2437_v15 = vpop.f32.mrf.mxu0 }
 0x3cd   : > { %v2485_v61 = vadd.f32 %v2437_v15, %v2247_v30  ;;  %v2244_v15 = vadd.f32 %v8754_v53, %v1958_v32  ;;  %v1790_v53 = vadd.f32 %v8528_v11, %v8536_v4  ;;  %v10681_v11 = vld [vmem:[#allocation31_spill] sm:$0xff]  ;;  %v1928_v30 = vpop.f32.mrf.mxu2  ;;  %v10683_v32 = vld [vmem:[#allocation10_spill] sm:$0xff] }
 0x3ce   : > { %v2240_v63 = vadd.f32 %v10683_v32, %v1954_v20  ;;  %v10686_v20 = vld [vmem:[#allocation38_spill] sm:$0xff] }
 0x3cf   : > { %v2523_v7 = vadd.f32 %v8699_v16, %v2485_v61  ;;  %v2482_v39 = vadd.f32 %v8764_v12, %v2244_v15  ;;  %v8811_v12 = vand.u32 127, %v2567_v23  ;;  %v2589_v23 = vand.u32 7, %v8806_v48 }
 0x3d0   : > { %v2519_v61 = vadd.f32 %v8699_v16, %v8762_v54  ;;  %v2478_v3 = vadd.f32 %v8752_v10, %v2240_v63  ;;  %v1768_v10 = vpop.f32.mrf.mxu1 }
 0x3d1   : > { %v2559_v42 = vmax.f32 %v2523_v7, 0.0  ;;  %v2613_v34 = vmul.u32 2, %v2589_v23 }
 0x3d2   : > { %v2555_v7 = vmax.f32 %v2519_v61, 0.0 }
 0x3d4   : > { %v2439_v55 = vpop.f32.mrf.mxu0 }
 0x3d5   : > { %v2486_v52 = vadd.f32 %v2439_v55, %v2248_v37  ;;  %v2581_v37 = vshra.s32 %v8806_v48, 3 }
 0x3d7   : > { %v2524_v36 = vadd.f32 %v8699_v16, %v2486_v52  ;;  %v2597_v52 = vmul.u32 2, %v2581_v37 }
 0x3d9   : > { %v2560_v5 = vmax.f32 %v2524_v36, 0.0  ;;  %v2605_v27 = vmul.u32 18, %v2597_v52  ;;  %v10689_v52 = vld [vmem:[#allocation14_spill] sm:$0xff] }
 0x3dc   : > { %v2442_v50 = vpop.f32.mrf.mxu0 }
 0x3dd   : > { %v2487_v44 = vadd.f32 %v2442_v50, %v2249_v29  ;;  %v2604_v50 = vmul.u32 18, %v2596_v38  ;;  %v2521_v29 = vadd.f32 %v8699_v16, %v2483_v14  ;;  %v10685_v38 = vld [vmem:[#allocation40_spill] sm:$0xff]  ;;  %v2517_v14 = vadd.f32 %v8699_v16, %v8757_v45 }
 0x3de   : > { %v2590_v45 = vand.u32 7, %v2570_v47 }
 0x3df   : > { %v2525_v21 = vadd.f32 %v8699_v16, %v2487_v44  ;;  %v8813_v56 = vadd.s32 %v2612_v1, %v2604_v50  ;;  %v2480_v44 = vadd.f32 %v8759_v33, %v2242_v9  ;;  %v7609_v33 = vmov 1.0  }
 0x3e0   : > { %v8839_v50 = vadd.s32 %v2613_v34, %v2605_v27  ;;  %v2582_v1 = vshra.s32 %v2570_v47, 3  ;;  %v2515_v9 = vadd.f32 %v8699_v16, %v8750_v41  ;;  %v10690_v27 = vld [vmem:[#allocation11_spill] sm:$0xff] }
 0x3e1   : > { %v2561_v49 = vmax.f32 %v2525_v21, 0.0  ;;  %vm2628_vm7 = vcmp.eq.s32.totalorder %v8811_v12, %v8813_v56  ;;  %v2557_v21 = vmax.f32 %v2521_v29, 0.0  ;;  %v2518_v36 = vadd.f32 %v8699_v16, %v2480_v44 }
 0x3e2   : > { %6748 = vmatmul.msk.f32.vlgmr.msra.gmra.mxu1 %vm2628_vm7, %v7609_v33  ;;  %vm2631_vm8 = vcmp.eq.s32.totalorder %v8811_v12, %v8839_v50  ;;  %v2598_v51 = vmul.u32 2, %v2582_v1  ;;  %v2553_v29 = vmax.f32 %v2517_v14, 0.0  ;;  %v2511_v34 = vadd.f32 %v8699_v16, %v10690_v27 }
 0x3e4   : > { %v2444_v60 = vpop.f32.mrf.mxu0 }
 0x3e5   : > { %v2488_v28 = vadd.f32 %v2444_v60, %v2250_v6  ;;  %v10680_v6 = vld [vmem:[#allocation35_spill] sm:$0xff]  ;;  %v2520_v60 = vadd.f32 %v8699_v16, %v2482_v39  ;;  %v1805_v39 = vadd.f32 %v1766_v31, %v8621_v19  ;;  %v10688_v19 = vld [vmem:[#allocation42_spill] sm:$0xff] }
 0x3e6   : > { %v1788_v4 = vadd.f32 %v10681_v11, %v10680_v6  ;;  %v2606_v6 = vmul.u32 18, %v2598_v51  ;;  %v2614_v11 = vmul.u32 2, %v2590_v45 }
 0x3e7   : > { %v2526_v43 = vadd.f32 %v8699_v16, %v2488_v28  ;;  %v10682_v28 = vld [vmem:[#allocation39_spill] sm:$0xff] }
 0x3e8   : > { %v1952_v2 = vadd.f32 %v10682_v28, %v1790_v53  ;;  %v1950_v54 = vadd.f32 %v10684_v24, %v1788_v4  ;;  %v2554_v53 = vmax.f32 %v2518_v36, 0.0  ;;  %v1967_v4 = vadd.f32 %v1928_v30, %v1805_v39 }
 0x3e9   : > { %v2562_v55 = vmax.f32 %v2526_v43, 0.0  ;;  %v2513_v28 = vadd.f32 %v8699_v16, %v10689_v52  ;;  %v8860_v32 = vadd.s32 %v2614_v11, %v2606_v6  ;;  %v8869_v24 = vadd.s32 128, %v8811_v12 }
 0x3ea   : > { %v2238_v15 = vadd.f32 %v10685_v38, %v1952_v2  ;;  %v2236_v46 = vadd.f32 %v10686_v20, %v1950_v54  ;;  %6749 = vmatmul.msk.f32.gmra.mxu1 %vm2631_vm8, %v7609_v33  ;;  %v2216_v2 = vpop.f32.mrf.mxu3  ;;  %v2253_v63 = vadd.f32 %v2214_v26, %v1967_v4  ;;  %v2574_v4 = vadd.s32 48, %v8783_v59 }
 0x3eb   : > { %2769 = vmatpush.msra.mxu2 %v2562_v55  ;;  %v2556_v55 = vmax.f32 %v2520_v60, 0.0  ;;  %vm2634_vm9 = vcmp.eq.s32.totalorder %v8811_v12, %v8860_v32  ;;  %vm2629_vm10 = vcmp.eq.s32.totalorder %v8869_v24, %v8813_v56  ;;  %vm2632_vm14 = vcmp.eq.s32.totalorder %v8869_v24, %v8839_v50 }
 0x3ec   : > { %v8799_v13 = vpop.f32.mrf.mxu0  ;;  %v2476_v0 = vadd.f32 %v8747_v40, %v2238_v15  ;;  %v1803_v40 = vadd.f32 %v8767_v17, %v10688_v19  ;;  %v2474_v44 = vadd.f32 %v8722_v35, %v2236_v46  ;;  %v2551_v17 = vmax.f32 %v2515_v9, 0.0 }
 0x3ed   : > { %2770 = vmatpush.msra.mxu2 %v2561_v49  ;;  %v1804_v49 = vadd.f32 %v8779_v57, %v8616_v22  ;;  %v10687_v22 = vld [vmem:[#allocation43_spill] sm:$0xff]  ;;  %vm2635_vm7 = vcmp.eq.s32.totalorder %v8869_v24, %v8860_v32 }
 0x3ee   : > { %v1806_v57 = vadd.f32 %v1768_v10, %v10687_v22  ;;  %v2514_v60 = vadd.f32 %v8699_v16, %v2476_v0  ;;  %v2512_v61 = vadd.f32 %v8699_v16, %v2474_v44  ;;  %v2572_v10 = vadd.s32 32, %v8783_v59 }
 0x3ef   : > { %2771 = vmatpush.msra.mxu2 %v2560_v5  ;;  %v2516_v5 = vadd.f32 %v8699_v16, %v2478_v3  ;;  %v1966_v31 = vadd.f32 %v8787_v62, %v1804_v49  ;;  %v1965_v62 = vadd.f32 %v8772_v18, %v1803_v40  ;;  %v2547_v49 = vmax.f32 %v2511_v34, 0.0 }
 0x3f0   : > { %v7610_v40 = vmov 0.0  }
 0x3f1   : > { %2772 = vmatpush.msra.mxu2 %v2559_v42  ;;  %v1930_v42 = vpop.f32.mrf.mxu2  ;;  %v2552_v41 = vmax.f32 %v2516_v5, 0.0  ;;  %v2252_v35 = vadd.f32 %v8797_v8, %v1966_v31  ;;  %v2251_v38 = vadd.f32 %v8777_v58, %v1965_v62  ;;  %v8881_v58 = vadd.s32 256, %v8811_v12 }
 0x3f2   : > { %v1968_v23 = vadd.f32 %v1930_v42, %v1806_v57  ;;  %6750 = vmatmul.msk.f32.gmra.mxu1 %vm2634_vm9, %v7609_v33  ;;  %v2584_v5 = vshra.s32 %v2572_v10, 3 }
 0x3f3   : > { %2773 = vmatpush.msra.mxu2 %v2558_v25  ;;  %v2571_v25 = vadd.s32 24, %v8783_v59  ;;  %v2489_v1 = vadd.f32 %v8799_v13, %v2251_v38  ;;  %v2592_v13 = vand.u32 7, %v2572_v10  ;;  %vm2630_vm12 = vcmp.eq.s32.totalorder %v8881_v58, %v8813_v56  ;;  %v7383_v38 = vld [vmem:[%s10525_s2 + $0x20] sm:$0xff]  ;;  %v7381_v10 = vld [vmem:[%s10525_s2 + $0x10] sm:$0xff] }
 0x3f4   : > { %v8828_v43 = vpop.f32.mrf.mxu0  ;;  %v2254_v18 = vadd.f32 %v2216_v2, %v1968_v23  ;;  %v2600_v51 = vmul.u32 2, %v2584_v5  ;;  %v6726_v31 = vsel %vm2630_vm12, 1.0, %v7610_v40  ;;  %vm2633_vm1 = vcmp.eq.s32.totalorder %v8881_v58, %v8839_v50 }
 0x3f5   : > { %2774 = vmatpush.msra.mxu2 %v2557_v21  ;;  %v2583_v30 = vshra.s32 %v2571_v25, 3  ;;  %v2550_v21 = vmax.f32 %v2514_v60, 0.0  ;;  %v2591_v3 = vand.u32 7, %v2571_v25  ;;  %v2490_v15 = vadd.f32 %v8828_v43, %v2252_v35 }
 0x3f6   : > { %v2527_v20 = vadd.f32 %v8699_v16, %v2489_v1  ;;  %v2608_v22 = vmul.u32 18, %v2600_v51  ;;  %v2616_v57 = vmul.u32 2, %v2592_v13  ;;  %v6729_v44 = vsel %vm2633_vm1, 1.0, %v7610_v40 }
 0x3f7   : > { %2775 = vmatpush.msra.mxu2 %v2556_v55  ;;  %v2599_v36 = vmul.u32 2, %v2583_v30  ;;  %v2549_v55 = vmax.f32 %v2513_v28, 0.0  ;;  %v2615_v54 = vmul.u32 2, %v2591_v3  ;;  %v2594_v25 = vand.u32 7, %v2574_v4 }
 0x3f8   : > { %v2563_v19 = vmax.f32 %v2527_v20, 0.0  ;;  %vm2636_vm9 = vcmp.eq.s32.totalorder %v8881_v58, %v8860_v32  ;;  %v2575_v28 = vadd.s32 56, %v8783_v59 }
 0x3f9   : > { %2776 = vmatpush.msra.mxu2 %v2555_v7  ;;  %v2607_v26 = vmul.u32 18, %v2599_v36  ;;  %v2548_v7 = vmax.f32 %v2512_v61, 0.0  ;;  %v2618_v52 = vmul.u32 2, %v2594_v25 }
 0x3fa   : > { %v2587_v2 = vshra.s32 %v2575_v28, 3  ;;  %v2595_v32 = vand.u32 7, %v2575_v28 }
 0x3fb   : > { %2777 = vmatpush.msra.mxu2 %v2554_v53  ;;  %v8883_v43 = vadd.s32 %v2615_v54, %v2607_v26  ;;  %v2528_v53 = vadd.f32 %v8699_v16, %v2490_v15  ;;  %v7382_v54 = vld [vmem:[%s10525_s2 + $0x18] sm:$0xff] }
 0x3fc   : > { %v2452_v37 = vpop.f32.mrf.mxu0  ;;  %v2603_v30 = vmul.u32 2, %v2587_v2  ;;  %v2619_v61 = vmul.u32 2, %v2595_v32  ;;  %3014 = vmatpush.bf16.msrb.mxu1 %v7382_v54 }
 0x3fd   : > { %2778 = vmatpush.msra.mxu2 %v2553_v29  ;;  %v2491_v47 = vadd.f32 %v2452_v37, %v2253_v63  ;;  %vm2637_vm11 = vcmp.eq.s32.totalorder %v8811_v12, %v8883_v43  ;;  %v2564_v9 = vmax.f32 %v2528_v53, 0.0  ;;  %v2573_v29 = vadd.s32 40, %v8783_v59 }
 0x3fe   : > { %6751 = vmatmul.msk.f32.gmra.mxu1 %vm2637_vm11, %v7609_v33  ;;  %vm2639_vm12 = vcmp.eq.s32.totalorder %v8881_v58, %v8883_v43  ;;  %v2611_v63 = vmul.u32 18, %v2603_v30 }
 0x3ff   : > { %2779 = vmatpush.msra.mxu2 %v2552_v41  ;;  %v2529_v39 = vadd.f32 %v8699_v16, %v2491_v47  ;;  %v2585_v42 = vshra.s32 %v2573_v29, 3  ;;  %v2593_v56 = vand.u32 7, %v2573_v29  ;;  %v2586_v41 = vshra.s32 %v2574_v4, 3 }
 0x400   : > { %v6735_v35 = vsel %vm2639_vm12, 1.0, %v7610_v40  ;;  %3015 = vmatpush.bf16.msrb.mxu1 %v7381_v10 }
 0x401   : > { %2780 = vmatpush.msra.mxu2 %v2551_v17  ;;  %v2565_v46 = vmax.f32 %v2529_v39, 0.0  ;;  %v2601_v37 = vmul.u32 2, %v2585_v42  ;;  %v2617_v11 = vmul.u32 2, %v2593_v56  ;;  %v2602_v23 = vmul.u32 2, %v2586_v41 }
 0x402   : > { %v6732_v17 = vsel %vm2636_vm9, 1.0, %v7610_v40 }
 0x403   : > { %2781 = vmatpush.msra.mxu2 %v2550_v21  ;;  %v2609_v6 = vmul.u32 18, %v2601_v37  ;;  %v2610_v50 = vmul.u32 18, %v2602_v23  ;;  %v2627_v21 = vadd.s32 %v2619_v61, %v2611_v63 }
 0x404   : > { %v2454_v8 = vpop.f32.mrf.mxu0 }
 0x405   : > { %v2492_v14 = vadd.f32 %v2454_v8, %v2254_v18  ;;  %2782 = vmatpush.msra.mxu2 %v2549_v55  ;;  %v2625_v60 = vadd.s32 %v2617_v11, %v2609_v6  ;;  %v2626_v62 = vadd.s32 %v2618_v52, %v2610_v50  ;;  %vm2649_vm1 = vcmp.eq.s32.totalorder %v8811_v12, %v2627_v21  ;;  %v7380_v18 = vld [vmem:[%s10525_s2 + $0x8] sm:$0xff]  ;;  %v7379_v55 = vld [vmem:[%s10525_s2] sm:$0xff] }
 0x406   : > { %vm2651_vm12 = vcmp.eq.s32.totalorder %v8881_v58, %v2627_v21 }
 0x407   : > { %v2530_v0 = vadd.f32 %v8699_v16, %v2492_v14  ;;  %2783 = vmatpush.msra.mxu2 %v2548_v7  ;;  %v2624_v16 = vadd.s32 %v2616_v57, %v2608_v22  ;;  %vm2643_vm8 = vcmp.eq.s32.totalorder %v8811_v12, %v2625_v60  ;;  %vm2646_vm11 = vcmp.eq.s32.totalorder %v8811_v12, %v2626_v62 }
 0x408   : > { %vm2647_vm9 = vcmp.eq.s32.totalorder %v8869_v24, %v2626_v62  ;;  %v6747_v36 = vsel %vm2651_vm12, 1.0, %v7610_v40  ;;  %vm4913_vm12 = vcmask 1043456  }
 0x409   : > { %v2566_v45 = vmax.f32 %v2530_v0, 0.0  ;;  %2784 = vmatpush.msra.mxu2 %v2547_v49  ;;  %vm2640_vm15 = vcmp.eq.s32.totalorder %v8811_v12, %v2624_v16 }
 0x40a   : > { %6756 = vmatmul.msk.f32.vlgmr.msra.gmra.mxu2 %vm2629_vm10, %v7609_v33  ;;  %6752 = vmatmul.msk.f32.gmra.mxu1 %vm2640_vm15, %v7609_v33  ;;  %vm2638_vm10 = vcmp.eq.s32.totalorder %v8869_v24, %v8883_v43  ;;  %vm2642_vm15 = vcmp.eq.s32.totalorder %v8881_v58, %v2624_v16 }
 0x40b   : > { %6764 = vmatpush.msk.msra.mxu3 %vm643_vm0, %v2566_v45  ;;  %v6738_v27 = vsel %vm2642_vm15, 1.0, %v7610_v40  ;;  %3070 = vmatpush.bf16.msrb.mxu2 %v7380_v18  ;;  %vm3800_vm15 = vcmask 261122  }
 0x40d   : > { %2823 = vmatpush.msra.mxu3 %v2565_v46 }
 0x40f   : > { %2824 = vmatpush.msra.mxu3 %v2564_v9  ;;  %3071 = vmatpush.bf16.msrb.mxu2 %v7379_v55 }
 0x411   : > { %2825 = vmatpush.msra.mxu3 %v2563_v19 }
 0x412   : > { %6765 = vmatmul.msk.f32.vlgmr.msra.gmra.mxu3 %vm2700_vm13, %v6726_v31  ;;  %6757 = vmatmul.msk.f32.gmra.mxu2 %vm2632_vm14, %v7609_v33  ;;  %vm2641_vm14 = vcmp.eq.s32.totalorder %v8869_v24, %v2624_v16 }
 0x413   : > { %6753 = vmatmul.msk.f32.gmra.mxu1 %vm2643_vm8, %v7609_v33  ;;  %vm2645_vm8 = vcmp.eq.s32.totalorder %v8881_v58, %v2625_v60 }
 0x414   : > { %v6741_v34 = vsel %vm2645_vm8, 1.0, %v7610_v40  ;;  %vm3807_vm8 = vcmask 261126  }
 0x41a   : > { %6766 = vmatmul.msk.f32.gmra.mxu3 %vm2700_vm13, %v6729_v44  ;;  %6758 = vmatmul.msk.f32.gmra.mxu2 %vm2635_vm7, %v7609_v33  ;;  %vm2644_vm7 = vcmp.eq.s32.totalorder %v8869_v24, %v2625_v60 }
 0x41b   : > { %6754 = vmatmul.msk.f32.gmra.mxu1 %vm2646_vm11, %v7609_v33  ;;  %vm2650_vm11 = vcmp.eq.s32.totalorder %v8869_v24, %v2627_v21  ;;  %v7384_v24 = vld [vmem:[%s10525_s2 + $0x28] sm:$0xff] }
 0x41c   : > { %3145 = vmatpush.bf16.msrb.mxu3 %v7384_v24 }
 0x420   : > { %3146 = vmatpush.bf16.msrb.mxu3 %v7383_v38 }
 0x422   : > { %6767 = vmatmul.msk.f32.gmra.mxu3 %vm2700_vm13, %v6732_v17  ;;  %6759 = vmatmul.msk.f32.gmra.mxu2 %vm2638_vm10, %v7609_v33  ;;  %vm2648_vm10 = vcmp.eq.s32.totalorder %v8881_v58, %v2626_v62 }
 0x423   : > { %6755 = vmatmul.msk.f32.gmra.mxu1 %vm2649_vm1, %v7609_v33  ;;  %v6744_v3 = vsel %vm2648_vm10, 1.0, %v7610_v40  ;;  %vm3802_vm1 = vcmask 254976   ;;  %vm5081_vm10 = vcmask 523264  }
 0x42a   : > { %6768 = vmatmul.msk.f32.gmra.mxu3 %vm2700_vm13, %v6735_v35  ;;  %6760 = vmatmul.msk.f32.gmra.mxu2 %vm2641_vm14, %v7609_v33  ;;  %vm2851_vm14 = vcmask 261120  }
 0x42b   : > { %2853 = vst.msk [vmem:[#allocation2 + $0x8] sm:$0xff] %vm2851_vm14, %v7610_v40 }
 0x42c   : > { %2854 = vst.msk [vmem:[#allocation2 + $0x10] sm:$0xff] %vm2851_vm14, %v7610_v40 }
 0x42d   : > { %2852 = vst.msk [vmem:[#allocation2] sm:$0xff] %vm2851_vm14, %v7610_v40 }
 0x42e   : > { %2855 = vst.msk [vmem:[#allocation2 + $0x18] sm:$0xff] %vm2851_vm14, %v7610_v40 }
 0x42f   : > { %2856 = vst.msk [vmem:[#allocation2 + $0x20] sm:$0xff] %vm2851_vm14, %v7610_v40 }
 0x430   : > { %2857 = vst.msk [vmem:[#allocation2 + $0x28] sm:$0xff] %vm2851_vm14, %v7610_v40 }
 0x431   : > { %2858 = vst.msk [vmem:[#allocation2 + $0x30] sm:$0xff] %vm2851_vm14, %v7610_v40 }
 0x432   : > { %6769 = vmatmul.msk.f32.gmra.mxu3 %vm2700_vm13, %v6738_v27  ;;  %6761 = vmatmul.msk.f32.gmra.mxu2 %vm2644_vm7, %v7609_v33  ;;  %2859 = vst.msk [vmem:[#allocation2 + $0x38] sm:$0xff] %vm2851_vm14, %v7610_v40  ;;  %vm3804_vm7 = vcmask 261124  }
 0x433   : > { %2860 = vst.msk [vmem:[#allocation2 + $0x40] sm:$0xff] %vm2851_vm14, %v7610_v40 }
 0x434   : > { %2861 = vst.msk [vmem:[#allocation2 + $0x48] sm:$0xff] %vm2851_vm14, %v7610_v40  ;;  %v2882_v0 = vld [vmem:[#allocation2] sm:$0xff] }
 0x435   : > { %2862 = vst.msk [vmem:[#allocation2 + $0x50] sm:$0xff] %vm2851_vm14, %v7610_v40  ;;  %v2895_v45 = vpack.c.bf16 %v2882_v0, %v2882_v0 }
 0x436   : > { %2863 = vst.msk [vmem:[#allocation2 + $0x58] sm:$0xff] %vm2851_vm14, %v7610_v40 }
 0x437   : > { %v8998_v22 = vunpack.c.l.b16 %v2895_v45 }
 0x43a   : > { %6770 = vmatmul.msk.f32.gmra.mxu3 %vm2700_vm13, %v6741_v34  ;;  %6762 = vmatmul.msk.f32.gmra.mxu2 %vm2647_vm9, %v7609_v33  ;;  %vm3809_vm9 = vcmask 259072  }
 0x442   : > { %6771 = vmatmul.msk.f32.gmra.mxu3 %vm2700_vm13, %v6744_v3  ;;  %6763 = vmatmul.msk.f32.gmra.mxu2 %vm2650_vm11, %v7609_v33 }
 0x44a   : > { %6772 = vmatmul.msk.f32.gmra.mxu3 %vm2700_vm13, %v6747_v36  ;;  %vm2864_vm13 = vcmask 257024  }
 0x44b   : > { %2865 = vst.msk [vmem:[#allocation2 + $0x60] sm:$0xf] %vm2864_vm13, %v7610_v40 }
 0x45f   : > { %v2745_v33 = vpop.f32.mrf.mxu1 }
 0x467   : > { %v2748_v47 = vpop.f32.mrf.mxu1 }
 0x46f   : > { %v2751_v15 = vpop.f32.mrf.mxu1 }
 0x47b   : > { %v2754_v53 = vpop.f32.mrf.mxu1 }
 0x487   : > { %v2757_v42 = vpop.f32.mrf.mxu1 }
 0x48d   : > { %v2786_v8 = vpop.f32.mrf.mxu2 }
 0x48e   : > { %v2787_v26 = vadd.f32 %v2786_v8, %v2745_v33 }
 0x490   : > { %v2760_v52 = vpop.f32.mrf.mxu1 }
 0x495   : > { %v2827_v14 = vpop.f32.mrf.mxu3  ;;  %v2789_v7 = vpop.f32.mrf.mxu2 }
 0x496   : > { %v8987_v49 = vadd.f32 %v2827_v14, %v2787_v26  ;;  %v2790_v39 = vadd.f32 %v2789_v7, %v2748_v47 }
 0x498   : > { %v2866_v1 = vmax.f32 %v8987_v49, 0.0  ;;  %v2763_v7 = vpop.f32.mrf.mxu1 }
 0x49a   : > { %2874 = vst.msk [vmem:[#allocation2 + $0xb] sm:$0xff] %vm2851_vm14, %v2866_v1 }
 0x49d   : > { %v2830_v58 = vpop.f32.mrf.mxu3  ;;  %v2792_v43 = vpop.f32.mrf.mxu2 }
 0x49e   : > { %v8994_v5 = vadd.f32 %v2830_v58, %v2790_v39  ;;  %v2793_v20 = vadd.f32 %v2792_v43, %v2751_v15 }
 0x4a0   : > { %v2867_v13 = vmax.f32 %v8994_v5, 0.0 }
 0x4a1   : > { %v2883_v51 = vld [vmem:[#allocation2 + $0x8] sm:$0xff] }
 0x4a2   : > { %2875 = vst.msk [vmem:[#allocation2 + $0x15] sm:$0xff] %vm2851_vm14, %v2867_v13  ;;  %v2896_v46 = vpack.c.bf16 %v2883_v51, %v2883_v51 }
 0x4a4   : > { %v9000_v57 = vunpack.c.l.b16 %v2896_v46 }
 0x4a5   : > { %v2833_v9 = vpop.f32.mrf.mxu3  ;;  %v2795_v29 = vpop.f32.mrf.mxu2 }
 0x4a6   : > { %v9002_v19 = vadd.f32 %v2833_v9, %v2793_v20  ;;  %v2937_v31 = vpack.c.b16 %v9000_v57, %v8998_v22  ;;  %v2796_v56 = vadd.f32 %v2795_v29, %v2754_v53 }
 0x4a8   : > { %v2868_v16 = vmax.f32 %v9002_v19, 0.0  ;;  %6798 = vmatmul.msk.bf16.vlgmr.msrb.gmra.mxu2 %vm2851_vm14, %v2937_v31  ;;  %v2945_v25 = vshll.u32 %v2937_v31, 16  ;;  %v3103_v61 = vrot.slane %v2937_v31, 1  ;;  %v2943_v21 = vshrl.u32 %v2937_v31, 16 }
 0x4a9   : > { %v2884_v6 = vld [vmem:[#allocation2 + $0x10] sm:$0xff] }
 0x4aa   : > { %2876 = vst.msk [vmem:[#allocation2 + $0x1f] sm:$0xff] %vm2851_vm14, %v2868_v16  ;;  %v2897_v60 = vpack.c.bf16 %v2884_v6, %v2884_v6  ;;  %v2947_v32 = vrot.slane %v2945_v25, 1 }
 0x4ac   : > { %v9013_v28 = vunpack.c.l.b16 %v2897_v60  ;;  %v2948_v18 = vor.u32 %v2947_v32, %v2943_v21 }
 0x4ad   : > { %v2836_v37 = vpop.f32.mrf.mxu3  ;;  %v2798_v11 = vpop.f32.mrf.mxu2 }
 0x4ae   : > { %v9009_v4 = vadd.f32 %v2836_v37, %v2796_v56  ;;  %v2799_v50 = vadd.f32 %v2798_v11, %v2757_v42 }
 0x4b0   : > { %v2869_v44 = vmax.f32 %v9009_v4, 0.0 }
 0x4b1   : > { %v2885_v41 = vld [vmem:[#allocation2 + $0x18] sm:$0xff]  ;;  %v2886_v62 = vld [vmem:[#allocation2 + $0x20] sm:$0xff] }
 0x4b2   : > { %2877 = vst.msk [vmem:[#allocation2 + $0x29] sm:$0xff] %vm2851_vm14, %v2869_v44  ;;  %v2898_v23 = vpack.c.bf16 %v2885_v41, %v2885_v41  ;;  %v2899_v27 = vpack.c.bf16 %v2886_v62, %v2886_v62  ;;  %v2766_v41 = vpop.f32.mrf.mxu1 }
 0x4b4   : > { %v9015_v17 = vunpack.c.l.b16 %v2898_v23  ;;  %v9027_v15 = vunpack.c.l.b16 %v2899_v27 }
 0x4b5   : > { %v2839_v2 = vpop.f32.mrf.mxu3  ;;  %v2801_v30 = vpop.f32.mrf.mxu2 }
 0x4b6   : > { %v2938_v35 = vpack.c.b16 %v9015_v17, %v9013_v28  ;;  %v9019_v63 = vadd.f32 %v2839_v2, %v2799_v50  ;;  %v2802_v55 = vadd.f32 %v2801_v30, %v2760_v52 }
 0x4b8   : > { %v3104_v34 = vrot.slane %v2938_v35, 1  ;;  %v2870_v3 = vmax.f32 %v9019_v63, 0.0  ;;  %v2950_v36 = vshll.u32 %v2938_v35, 16  ;;  %6799 = vmatmul.msk.bf16.gmra.mxu2 %vm2851_vm14, %v2938_v35  ;;  %v2954_v33 = vshrl.u32 %v2938_v35, 16 }
 0x4b9   : > { %v2887_v47 = vld [vmem:[#allocation2 + $0x28] sm:$0xff]  ;;  %v3695_v51 = vrot.slane %v2938_v35, 3  ;;  %v3499_v46 = vrot.slane %v2938_v35, 2 }
 0x4ba   : > { %v3105_v24 = vsel %vm892_vm2, %v3103_v61, %v3104_v34  ;;  %2878 = vst.msk [vmem:[#allocation2 + $0x33] sm:$0xff] %vm2851_vm14, %v2870_v3  ;;  %v2952_v8 = vrot.slane %v2950_v36, 1  ;;  %v2900_v26 = vpack.c.bf16 %v2887_v47, %v2887_v47  ;;  %v3586_v54 = vrot.slane %v2954_v33, 2  ;;  %v7388_v47 = vld [vmem:[%s10525_s2 + $0x48] sm:$0xff] }
 0x4bb   : > { %6815 = vmatmul.msk.bf16.vlgmr.msrb.gmra.mxu3 %vm2851_vm14, %v3105_v24  ;;  %v3587_v10 = vrot.slane %v2950_v36, 3  ;;  %3365 = vmatpush.bf16.msra.mxu2 %v7388_v47  ;;  %v7385_v47 = vld [vmem:[%s10525_s2 + $0x30] sm:$0xff] }
 0x4bc   : > { %v2953_v38 = vsel %vm439_vm3, %v2948_v18, %v2952_v8  ;;  %v9029_v14 = vunpack.c.l.b16 %v2900_v26  ;;  %v2956_v30 = vor.u32 %v2954_v33, %v2952_v8 }
 0x4bd   : > { %6785 = vmatmul.msk.bf16.vlgmr.msrb.gmra.mxu1 %vm2851_vm14, %v2953_v38  ;;  %v2842_v1 = vpop.f32.mrf.mxu3  ;;  %v2804_v39 = vpop.f32.mrf.mxu2  ;;  %v3588_v43 = vor.u32 %v3587_v10, %v3586_v54 }
 0x4be   : > { %v9032_v0 = vadd.f32 %v2842_v1, %v2802_v55  ;;  %v9036_v58 = vpack.c.b16 %v9029_v14, %v9027_v15  ;;  %v2805_v31 = vadd.f32 %v2804_v39, %v2763_v7 }
 0x4c0   : > { %v2871_v53 = vmax.f32 %v9032_v0, 0.0  ;;  %v2958_v45 = vshll.u32 %v9036_v58, 16  ;;  %v2962_v13 = vshrl.u32 %v9036_v58, 16  ;;  %v3696_v20 = vrot.slane %v9036_v58, 3 }
 0x4c1   : > { %v3500_v9 = vrot.slane %v9036_v58, 2  ;;  %v2888_v6 = vld [vmem:[#allocation2 + $0x30] sm:$0xff]  ;;  %v3106_v44 = vrot.slane %v9036_v58, 1 }
 0x4c2   : > { %2879 = vst.msk [vmem:[#allocation2 + $0x3d] sm:$0xff] %vm2851_vm14, %v2871_v53  ;;  %v3590_v29 = vrot.slane %v2958_v45, 3  ;;  %v3589_v16 = vrot.slane %v2962_v13, 2  ;;  %v9047_v42 = vsel %vm2258_vm6, %v3695_v51, %v3696_v20  ;;  %v2960_v50 = vrot.slane %v2958_v45, 1 }
 0x4c3   : > { %v9050_v56 = vsel %vm643_vm0, %v3499_v46, %v3500_v9  ;;  %v2901_v62 = vpack.c.bf16 %v2888_v6, %v2888_v6  ;;  %v3107_v32 = vsel %vm892_vm2, %v3104_v34, %v3106_v44  ;;  %v7387_v46 = vld [vmem:[%s10525_s2 + $0x40] sm:$0xff] }
 0x4c4   : > { %v3591_v11 = vor.u32 %v3590_v29, %v3589_v16  ;;  %v2961_v21 = vsel %vm439_vm3, %v2956_v30, %v2960_v50  ;;  %3366 = vmatpush.bf16.msra.mxu2 %v7387_v46 }
 0x4c5   : > { %v2845_v37 = vpop.f32.mrf.mxu3  ;;  %v2807_v25 = vpop.f32.mrf.mxu2  ;;  %v9065_v27 = vunpack.c.l.b16 %v2901_v62 }
 0x4c6   : > { %v9053_v60 = vadd.f32 %v2845_v37, %v2805_v31  ;;  %v9056_v23 = vsel %vm1972_vm4, %v3588_v43, %v3591_v11  ;;  %v2808_v61 = vadd.f32 %v2807_v25, %v2766_v41 }
 0x4c8   : > { %v2872_v52 = vmax.f32 %v9053_v60, 0.0  ;;  %6800 = vmatmul.msk.bf16.gmra.mxu2 %vm2851_vm14, %v9036_v58 }
 0x4c9   : > { %v2889_v2 = vld [vmem:[#allocation2 + $0x38] sm:$0xff] }
 0x4ca   : > { %2880 = vst.msk [vmem:[#allocation2 + $0x47] sm:$0xff] %vm2851_vm14, %v2872_v52  ;;  %v2902_v35 = vpack.c.bf16 %v2889_v2, %v2889_v2  ;;  %v2964_v2 = vor.u32 %v2962_v13, %v2960_v50 }
 0x4cb   : > { %6816 = vmatmul.msk.bf16.gmra.mxu3 %vm2851_vm14, %v3107_v32 }
 0x4cc   : > { %v9067_v3 = vunpack.c.l.b16 %v2902_v35 }
 0x4cd   : > { %6786 = vmatmul.msk.bf16.gmra.mxu1 %vm2851_vm14, %v2961_v21  ;;  %v2848_v36 = vpop.f32.mrf.mxu3 }
 0x4ce   : > { %v9072_v18 = vpack.c.b16 %v9067_v3, %v9065_v27  ;;  %v9074_v34 = vadd.f32 %v2848_v36, %v2808_v61  ;;  %v7390_v61 = vld [vmem:[%s10525_s2 + $0x58] sm:$0xff] }
 0x4cf   : > { %3452 = vmatpush.bf16.msra.mxu3 %v7390_v61 }
 0x4d0   : > { %v2966_v33 = vshll.u32 %v9072_v18, 16  ;;  %v2970_v55 = vshrl.u32 %v9072_v18, 16  ;;  %v2873_v24 = vmax.f32 %v9074_v34, 0.0  ;;  %v3698_v54 = vrot.slane %v9072_v18, 3 }
 0x4d1   : > { %v2890_v8 = vld [vmem:[#allocation2 + $0x40] sm:$0xff]  ;;  %v2891_v26 = vld [vmem:[#allocation2 + $0x48] sm:$0xff]  ;;  %v3502_v38 = vrot.slane %v9072_v18, 2  ;;  %v3108_v31 = vrot.slane %v9072_v18, 1 }
 0x4d2   : > { %v2903_v7 = vpack.c.bf16 %v2890_v8, %v2890_v8  ;;  %v2904_v10 = vpack.c.bf16 %v2891_v26, %v2891_v26  ;;  %2881 = vst.msk [vmem:[#allocation2 + $0x51] sm:$0xff] %vm2851_vm14, %v2873_v24  ;;  %v3593_v1 = vrot.slane %v2970_v55, 2  ;;  %v3594_v39 = vrot.slane %v2966_v33, 3 }
 0x4d3   : > { %v9088_v43 = vsel %vm2258_vm6, %v3696_v20, %v3698_v54  ;;  %v9091_v53 = vsel %vm643_vm0, %v3500_v9, %v3502_v38  ;;  %v2968_v9 = vrot.slane %v2966_v33, 1  ;;  %v3109_v62 = vsel %vm892_vm2, %v3106_v44, %v3108_v31  ;;  %v7386_v44 = vld [vmem:[%s10525_s2 + $0x38] sm:$0xff]  ;;  %v7389_v33 = vld [vmem:[%s10525_s2 + $0x50] sm:$0xff] }
 0x4d4   : > { %v9093_v45 = vunpack.c.l.b16 %v2903_v7  ;;  %v9095_v51 = vunpack.c.l.b16 %v2904_v10  ;;  %v3595_v29 = vor.u32 %v3594_v39, %v3593_v1  ;;  %3237 = vmatpush.bf16.msra.mxu1 %v7386_v44  ;;  %3453 = vmatpush.bf16.msra.mxu3 %v7389_v33 }
 0x4d5   : > { %v2969_v30 = vsel %vm439_vm3, %v2964_v2, %v2968_v9 }
 0x4d6   : > { %v9103_v16 = vpack.c.b16 %v9095_v51, %v9093_v45  ;;  %v9106_v20 = vsel %vm1972_vm4, %v3591_v11, %v3595_v29 }
 0x4d8   : > { %6801 = vmatmul.msk.bf16.gmra.mxu2 %vm2851_vm14, %v9072_v18  ;;  %v2974_v37 = vshll.u32 %v9103_v16, 16  ;;  %v2978_v6 = vshrl.u32 %v9103_v16, 16  ;;  %v3700_v52 = vrot.slane %v9103_v16, 3  ;;  %v3504_v36 = vrot.slane %v9103_v16, 2  ;;  %3238 = vmatpush.bf16.msra.mxu1 %v7385_v47 }
 0x4d9   : > { %v2892_v41 = vld [vmem:[#allocation2 + $0x50] sm:$0xff]  ;;  %v2893_v25 = vld [vmem:[#allocation2 + $0x58] sm:$0xff] }
 0x4da   : > { %v2905_v32 = vpack.c.bf16 %v2892_v41, %v2892_v41  ;;  %v2906_v11 = vpack.c.bf16 %v2893_v25, %v2893_v25  ;;  %v3597_v13 = vrot.slane %v2978_v6, 2  ;;  %v3598_v50 = vrot.slane %v2974_v37, 3 }
 0x4db   : > { %6817 = vmatmul.msk.bf16.gmra.mxu3 %vm2851_vm14, %v3109_v62  ;;  %v9132_v21 = vsel %vm2258_vm6, %v3698_v54, %v3700_v52  ;;  %v9146_v26 = vsel %vm643_vm0, %v3502_v38, %v3504_v36  ;;  %v3110_v41 = vrot.slane %v9103_v16, 1  ;;  %v2976_v2 = vrot.slane %v2974_v37, 1 }
 0x4dc   : > { %v9118_v35 = vunpack.c.l.b16 %v2905_v32  ;;  %v9127_v58 = vunpack.c.l.b16 %v2906_v11  ;;  %v3599_v8 = vor.u32 %v3598_v50, %v3597_v13  ;;  %v3190_v11 = vpack.c.b16 %v9013_v28, %v9000_v57 }
 0x4dd   : > { %6787 = vmatmul.msk.bf16.gmra.mxu1 %vm2851_vm14, %v2969_v30  ;;  %v2972_v30 = vor.u32 %v2970_v55, %v2968_v9  ;;  %v2980_v33 = vor.u32 %v2978_v6, %v2976_v2 }
 0x4de   : > { %v9143_v24 = vpack.c.b16 %v9127_v58, %v9118_v35  ;;  %v9149_v54 = vsel %vm1972_vm4, %v3595_v29, %v3599_v8  ;;  %v3191_v29 = vpack.c.b16 %v9027_v15, %v9015_v17  ;;  %v3284_v44 = vshrl.u32 %v3190_v11, 16 }
 0x4df   : > { %v2977_v61 = vsel %vm439_vm3, %v2972_v30, %v2976_v2  ;;  %v3287_v13 = vshll.u32 %v3190_v11, 16  ;;  %v3195_v6 = vrot.slane %v3190_v11, 1 }
 0x4e0   : > { %v3602_v7 = vshrl.u32 %v9143_v24, 16  ;;  %v3605_v10 = vshll.u32 %v9143_v24, 16  ;;  %v3702_v1 = vrot.slane %v9143_v24, 3  ;;  %v3506_v39 = vrot.slane %v9143_v24, 2 }
 0x4e1   : > { %v3292_v15 = vshrl.u32 %v3191_v29, 16  ;;  %v3295_v37 = vshll.u32 %v3191_v29, 16  ;;  %v3289_v50 = vrot.slane %v3287_v13, 2  ;;  %v3196_v30 = vrot.slane %v3191_v29, 1 }
 0x4e2   : > { %v3604_v46 = vrot.slane %v3602_v7, 2  ;;  %v3607_v25 = vrot.slane %v3605_v10, 3  ;;  %v9159_v38 = vsel %vm2258_vm6, %v3700_v52, %v3702_v1  ;;  %v9166_v62 = vsel %vm643_vm0, %v3504_v36, %v3506_v39 }
 0x4e3   : > { %v3111_v52 = vsel %vm892_vm2, %v3108_v31, %v3110_v41  ;;  %v3294_v57 = vrot.slane %v3292_v15, 1  ;;  %v3297_v28 = vrot.slane %v3295_v37, 2  ;;  %v3286_v31 = vrot.slane %v3284_v44, 1 }
 0x4e4   : > { %v9170_v32 = vor.u32 %v3607_v25, %v3604_v46  ;;  %v3192_v36 = vpack.c.b16 %v9065_v27, %v9029_v14  ;;  %v3409_v25 = vrot.slane %v3191_v29, 2  ;;  %v9195_v14 = vpack.c.b16 %v9093_v45, %v9067_v3 }
 0x4e5   : > { %v3298_v18 = vor.u32 %v3297_v28, %v3294_v57  ;;  %v3290_v55 = vor.u32 %v3289_v50, %v3286_v31  ;;  %v3408_v27 = vrot.slane %v3190_v11, 2  ;;  %v3197_v3 = vsel %vm892_vm2, %v3195_v6, %v3196_v30 }
 0x4e6   : > { %v9179_v17 = vsel %vm1972_vm4, %v3599_v8, %v9170_v32  ;;  %v3301_v47 = vshrl.u32 %v3192_v36, 16  ;;  %v3304_v8 = vshll.u32 %v3192_v36, 16  ;;  %v3313_v2 = vshll.u32 %v9195_v14, 16 }
 0x4e7   : > { %v3299_v9 = vsel %vm1290_vm5, %v3290_v55, %v3298_v18  ;;  %v3411_v37 = vrot.slane %v3192_v36, 2  ;;  %v3198_v44 = vrot.slane %v3192_v36, 1  ;;  %v7393_v55 = vld [vmem:[%s10525_s2 + $0x70] sm:$0xff] }
 0x4e8   : > { %6802 = vmatmul.msk.bf16.gmra.mxu2 %vm2851_vm14, %v9103_v16  ;;  %v3303_v7 = vrot.slane %v3301_v47, 1  ;;  %v3306_v10 = vrot.slane %v3304_v8, 2  ;;  %v3410_v16 = vsel %vm643_vm0, %v3408_v27, %v3409_v25  ;;  %v3315_v29 = vrot.slane %v3313_v2, 2  ;;  %v7392_v27 = vld [vmem:[%s10525_s2 + $0x68] sm:$0xff] }
 0x4e9   : > { %v3412_v13 = vsel %vm643_vm0, %v3409_v25, %v3411_v37  ;;  %v3199_v31 = vsel %vm892_vm2, %v3196_v30, %v3198_v44  ;;  %3543 = vmatpush.bf16.msrb.mxu1 %v7392_v27 }
 0x4ea   : > { %v3307_v46 = vor.u32 %v3306_v10, %v3303_v7  ;;  %v3282_v10 = vpack.c.b16 %v9127_v58, %v9127_v58  ;;  %v7395_v58 = vld [vmem:[%s10525_s2 + $0x80] sm:$0xff] }
 0x4eb   : > { %6818 = vmatmul.msk.bf16.gmra.mxu3 %vm2851_vm14, %v3111_v52 }
 0x4ec   : > { %v3308_v52 = vsel %vm1290_vm5, %v3298_v18, %v3307_v46 }
 0x4ed   : > { %6788 = vmatmul.msk.bf16.gmra.mxu1 %vm2851_vm14, %v2977_v61  ;;  %v9209_v61 = vpack.c.b16 %v9118_v35, %v9095_v51  ;;  %v7394_v51 = vld [vmem:[%s10525_s2 + $0x78] sm:$0xff] }
 0x4ee   : > { %3652 = vmatpush.bf16.msrb.mxu2 %v7394_v51 }
 0x4ef   : > { %v3319_v57 = vshrl.u32 %v9209_v61, 16  ;;  %v3322_v28 = vshll.u32 %v9209_v61, 16  ;;  %v3415_v30 = vrot.slane %v9209_v61, 2  ;;  %v3202_v6 = vrot.slane %v9209_v61, 1 }
 0x4f1   : > { %v3321_v50 = vrot.slane %v3319_v57, 1  ;;  %v3324_v18 = vrot.slane %v3322_v28, 2  ;;  %v3417_v28 = vrot.slane %v3282_v10, 2 }
 0x4f2   : > { %3653 = vmatpush.bf16.msrb.mxu2 %v7393_v55 }
 0x4f3   : > { %v3325_v35 = vor.u32 %v3324_v18, %v3321_v50  ;;  %v3418_v18 = vsel %vm643_vm0, %v3415_v30, %v3417_v28 }
 0x4f8   : > { %6849 = vmatmul.msk.bf16.vlgmr.msra.gmra.mxu2 %vm2851_vm14, %v3299_v9  ;;  %v3413_v9 = vrot.slane %v9195_v14, 2 }
 0x4fa   : > { %v3414_v47 = vsel %vm643_vm0, %v3411_v37, %v3413_v9  ;;  %v3416_v2 = vsel %vm643_vm0, %v3413_v9, %v3415_v30 }
 0x4fb   : > { %6819 = vmatmul.msk.bf16.gmra.mxu3 %vm2851_vm14, %v3110_v41  ;;  %v3310_v41 = vshrl.u32 %v9195_v14, 16 }
 0x4fd   : > { %6789 = vmatmul.msk.bf16.gmra.mxu1 %vm2851_vm14, %v2980_v33  ;;  %v3312_v45 = vrot.slane %v3310_v41, 1  ;;  %v3200_v33 = vrot.slane %v9195_v14, 1  ;;  %v7396_v14 = vld [vmem:[%s10525_s2 + $0x88] sm:$0xff] }
 0x4fe   : > { %3739 = vmatpush.bf16.msrb.mxu3 %v7396_v14 }
 0x4ff   : > { %v3316_v15 = vor.u32 %v3315_v29, %v3312_v45  ;;  %v3201_v7 = vsel %vm892_vm2, %v3198_v44, %v3200_v33 }
 0x501   : > { %v3317_v11 = vsel %vm1290_vm5, %v3307_v46, %v3316_v15  ;;  %v3326_v36 = vsel %vm1290_vm5, %v3316_v15, %v3325_v35  ;;  %v3328_v46 = vshll.u32 %v3282_v10, 16  ;;  %v3203_v15 = vsel %vm892_vm2, %v3200_v33, %v3202_v6 }
 0x502   : > { %3740 = vmatpush.bf16.msrb.mxu3 %v7395_v58 }
 0x508   : > { %6850 = vmatmul.msk.bf16.gmra.mxu2 %vm2851_vm14, %v3308_v52  ;;  %v3330_v52 = vrot.slane %v3328_v46, 2 }
 0x50b   : > { %6866 = vmatmul.msk.bf16.vlgmr.msra.gmra.mxu3 %vm2851_vm14, %v3410_v16  ;;  %v3331_v16 = vsel %vm1290_vm5, %v3325_v35, %v3330_v52 }
 0x50d   : > { %6832 = vmatmul.msk.bf16.vlgmr.msra.gmra.mxu1 %vm2851_vm14, %v3197_v3  ;;  %v7391_v3 = vld [vmem:[%s10525_s2 + $0x60] sm:$0xff] }
 0x50e   : > { %3544 = vmatpush.bf16.msrb.mxu1 %v7391_v3 }
 0x518   : > { %6851 = vmatmul.msk.bf16.gmra.mxu2 %vm2851_vm14, %v3317_v11 }
 0x51b   : > { %6867 = vmatmul.msk.bf16.gmra.mxu3 %vm2851_vm14, %v3412_v13 }
 0x51d   : > { %6833 = vmatmul.msk.bf16.gmra.mxu1 %vm2851_vm14, %v3199_v31 }
 0x528   : > { %6852 = vmatmul.msk.bf16.gmra.mxu2 %vm2851_vm14, %v3326_v36 }
 0x52b   : > { %6868 = vmatmul.msk.bf16.gmra.mxu3 %vm2851_vm14, %v3414_v47  ;;  %v3073_v8 = vpop.f32.mrf.mxu2 }
 0x52d   : > { %6834 = vmatmul.msk.bf16.gmra.mxu1 %vm2851_vm14, %v3201_v7 }
 0x533   : > { %v3075_v25 = vpop.f32.mrf.mxu2 }
 0x538   : > { %6853 = vmatmul.msk.bf16.gmra.mxu2 %vm2851_vm14, %v3331_v16 }
 0x53a   : > { %v3017_v41 = vpop.f32.mrf.mxu1 }
 0x53b   : > { %6869 = vmatmul.msk.bf16.gmra.mxu3 %vm2851_vm14, %v3416_v2  ;;  %v3074_v45 = vadd.f32 %v3073_v8, %v3017_v41  ;;  %v3078_v29 = vpop.f32.mrf.mxu2 }
 0x53d   : > { %6835 = vmatmul.msk.bf16.gmra.mxu1 %vm2851_vm14, %v3203_v15 }
 0x53e   : > { %v3148_v37 = vpop.f32.mrf.mxu3 }
 0x53f   : > { %v9254_v11 = vadd.f32 %v3148_v37, %v3074_v45 }
 0x542   : > { %v3019_v61 = vpop.f32.mrf.mxu1 }
 0x543   : > { %v3076_v44 = vadd.f32 %v3075_v25, %v3019_v61  ;;  %v3080_v13 = vpop.f32.mrf.mxu2 }
 0x546   : > { %v3150_v57 = vpop.f32.mrf.mxu3 }
 0x547   : > { %v9256_v31 = vadd.f32 %v3150_v57, %v3076_v44 }
 0x548   : > { %6900 = vmatmul.msk.bf16.vlgmr.msrb.gmra.mxu2 %vm2851_vm14, %v9056_v23 }
 0x54a   : > { %v3022_v50 = vpop.f32.mrf.mxu1 }
 0x54b   : > { %6870 = vmatmul.msk.bf16.gmra.mxu3 %vm2851_vm14, %v3418_v18  ;;  %v3079_v51 = vadd.f32 %v3078_v29, %v3022_v50  ;;  %v3083_v35 = vpop.f32.mrf.mxu2 }
 0x54d   : > { %6836 = vmatmul.msk.bf16.gmra.mxu1 %vm2851_vm14, %v3202_v6 }
 0x54e   : > { %v3153_v55 = vpop.f32.mrf.mxu3 }
 0x54f   : > { %v9263_v9 = vadd.f32 %v3153_v55, %v3079_v51 }
 0x552   : > { %v3024_v36 = vpop.f32.mrf.mxu1 }
 0x553   : > { %v3081_v33 = vadd.f32 %v3080_v13, %v3024_v36  ;;  %v3085_v47 = vpop.f32.mrf.mxu2 }
 0x556   : > { %v3155_v8 = vpop.f32.mrf.mxu3 }
 0x557   : > { %v9265_v7 = vadd.f32 %v3155_v8, %v3081_v33 }
 0x558   : > { %6901 = vmatmul.msk.bf16.gmra.mxu2 %vm2851_vm14, %v9106_v20 }
 0x55a   : > { %v3027_v23 = vpop.f32.mrf.mxu1 }
 0x55b   : > { %6917 = vmatmul.msk.bf16.vlgmr.msrb.gmra.mxu3 %vm2851_vm14, %v9047_v42  ;;  %v3084_v10 = vadd.f32 %v3083_v35, %v3027_v23  ;;  %v3088_v46 = vpop.f32.mrf.mxu2 }
 0x55d   : > { %6883 = vmatmul.msk.bf16.vlgmr.msrb.gmra.mxu1 %vm2851_vm14, %v9050_v56  ;;  %v2894_v56 = vld [vmem:[#allocation2 + $0x60] sm:$0xf] }
 0x55e   : > { %v3158_v25 = vpop.f32.mrf.mxu3  ;;  %v2907_v3 = vpack.c.bf16 %v2894_v56, %v2894_v56 }
 0x55f   : > { %v9273_v52 = vadd.f32 %v3158_v25, %v3084_v10 }
 0x560   : > { %v3496_v15 = vunpack.c.l.b16 %v2907_v3 }
 0x562   : > { %v3029_v14 = vpop.f32.mrf.mxu1 }
 0x563   : > { %v3086_v27 = vadd.f32 %v3085_v47, %v3029_v14  ;;  %v9275_v30 = vpop.f32.mrf.mxu2 }
 0x566   : > { %v3160_v16 = vpop.f32.mrf.mxu3 }
 0x567   : > { %v9277_v58 = vadd.f32 %v3160_v16, %v3086_v27 }
 0x568   : > { %6902 = vmatmul.msk.bf16.gmra.mxu2 %vm2851_vm14, %v9149_v54  ;;  %v3498_v54 = vpack.c.b16 %v3496_v15, %v3496_v15 }
 0x56a   : > { %v3032_v20 = vpop.f32.mrf.mxu1  ;;  %v3611_v44 = vshrl.u32 %v3498_v54, 16  ;;  %v3614_v13 = vshll.u32 %v3498_v54, 16  ;;  %v3508_v14 = vrot.slane %v3498_v54, 2 }
 0x56b   : > { %6918 = vmatmul.msk.bf16.gmra.mxu3 %vm2851_vm14, %v9088_v43  ;;  %v3089_v42 = vadd.f32 %v3088_v46, %v3032_v20  ;;  %v3093_v6 = vpop.f32.mrf.mxu2 }
 0x56c   : > { %v3613_v50 = vrot.slane %v3611_v44, 2  ;;  %v3616_v18 = vrot.slane %v3614_v13, 3 }
 0x56d   : > { %6884 = vmatmul.msk.bf16.gmra.mxu1 %vm2851_vm14, %v9091_v53 }
 0x56e   : > { %v3163_v41 = vpop.f32.mrf.mxu3 }
 0x56f   : > { %v3179_v2 = vadd.f32 %v3163_v41, %v3089_v42 }
 0x572   : > { %v9285_v45 = vpop.f32.mrf.mxu1 }
 0x573   : > { %v9287_v29 = vpop.f32.mrf.mxu2 }
 0x576   : > { %v9289_v37 = vpop.f32.mrf.mxu3 }
 0x578   : > { %6903 = vmatmul.msk.bf16.gmra.mxu2 %vm2851_vm14, %v9179_v17  ;;  %v3617_v17 = vor.u32 %v3616_v18, %v3613_v50 }
 0x57a   : > { %v3037_v43 = vpop.f32.mrf.mxu1 }
 0x57b   : > { %6919 = vmatmul.msk.bf16.gmra.mxu3 %vm2851_vm14, %v9132_v21  ;;  %v3094_v61 = vadd.f32 %v3093_v6, %v3037_v43  ;;  %v3368_v53 = vpop.f32.mrf.mxu2  ;;  %v3618_v21 = vsel %vm1972_vm4, %v9170_v32, %v3617_v17  ;;  %v3704_v32 = vrot.slane %v3498_v54, 3 }
 0x57d   : > { %6885 = vmatmul.msk.bf16.gmra.mxu1 %vm2851_vm14, %v9146_v26 }
 0x57e   : > { %v3168_v57 = vpop.f32.mrf.mxu3 }
 0x57f   : > { %v3181_v28 = vadd.f32 %v3168_v57, %v3094_v61 }
 0x582   : > { %v9297_v51 = vpop.f32.mrf.mxu1 }
 0x583   : > { %v9299_v35 = vpop.f32.mrf.mxu2 }
 0x586   : > { %v9301_v55 = vpop.f32.mrf.mxu3 }
 0x588   : > { %6904 = vmatmul.msk.bf16.gmra.mxu2 %vm2851_vm14, %v3618_v21 }
 0x58a   : > { %v3240_v36 = vpop.f32.mrf.mxu1 }
 0x58b   : > { %v3265_v33 = vadd.f32 %v3240_v36, %v9254_v11  ;;  %6920 = vmatmul.msk.bf16.gmra.mxu3 %vm2851_vm14, %v9159_v38  ;;  %v3373_v26 = vpop.f32.mrf.mxu2  ;;  %v3705_v11 = vsel %vm2258_vm6, %v3702_v1, %v3704_v32  ;;  %v7398_v32 = vld [vmem:[%s10525_s2 + $0x98] sm:$0xff] }
 0x58c   : > { %4007 = vmatpush.bf16.msra.mxu1 %v7398_v32  ;;  %v7399_v32 = vld [vmem:[%s10525_s2 + $0xa0] sm:$0xff] }
 0x58d   : > { %v3393_v47 = vadd.f32 %v3368_v53, %v3265_v33  ;;  %6886 = vmatmul.msk.bf16.gmra.mxu1 %vm2851_vm14, %v9166_v62  ;;  %v3509_v62 = vsel %vm643_vm0, %v3506_v39, %v3508_v14 }
 0x58e   : > { %v3455_v8 = vpop.f32.mrf.mxu3 }
 0x58f   : > { %v3480_v23 = vadd.f32 %v3455_v8, %v3393_v47 }
 0x592   : > { %v3242_v10 = vpop.f32.mrf.mxu1 }
 0x593   : > { %v9311_v46 = vpop.f32.mrf.mxu2 }
 0x596   : > { %v3457_v25 = vpop.f32.mrf.mxu3 }
 0x59a   : > { %v3245_v27 = vpop.f32.mrf.mxu1 }
 0x59b   : > { %v3267_v38 = vadd.f32 %v3245_v27, %v9263_v9  ;;  %6921 = vmatmul.msk.bf16.gmra.mxu3 %vm2851_vm14, %v3705_v11  ;;  %v3378_v16 = vpop.f32.mrf.mxu2  ;;  %v7397_v27 = vld [vmem:[%s10525_s2 + $0x90] sm:$0xff] }
 0x59c   : > { %4008 = vmatpush.bf16.msra.mxu1 %v7397_v27 }
 0x59d   : > { %v3395_v20 = vadd.f32 %v3373_v26, %v3267_v38  ;;  %6887 = vmatmul.msk.bf16.gmra.mxu1 %vm2851_vm14, %v3509_v62  ;;  %v7407_v62 = vld [vmem:[%s10525_s2 + $0xe0] sm:$0xff] }
 0x59e   : > { %v3460_v42 = vpop.f32.mrf.mxu3 }
 0x59f   : > { %v9322_v6 = vadd.f32 %v3460_v42, %v3395_v20  ;;  %v7611_v20 = vmov -1e+30   ;;  %v3266_v42 = vadd.f32 %v3242_v10, %v9256_v31  ;;  %v7400_v10 = vld [vmem:[%s10525_s2 + $0xa8] sm:$0xff] }
 0x5a0   : > { %4726 = vst.msk [vmem:[#allocation2] sm:$0xff] %vm2851_vm14, %v7611_v20  ;;  %3951 = vmatpush.bf16.msrb.mxu0 %v7400_v10 }
 0x5a2   : > { %v9324_v56 = vpop.f32.mrf.mxu1 }
 0x5a3   : > { %v9326_v41 = vpop.f32.mrf.mxu2  ;;  %v3268_v27 = vadd.f32 %v9324_v56, %v9265_v7 }
 0x5a4   : > { %3952 = vmatpush.bf16.msrb.mxu0 %v7399_v32 }
 0x5a6   : > { %v9328_v1 = vpop.f32.mrf.mxu3 }
 0x5aa   : > { %v3250_v9 = vpop.f32.mrf.mxu1 }
 0x5ab   : > { %v3269_v3 = vadd.f32 %v3250_v9, %v9273_v52  ;;  %v3383_v15 = vpop.f32.mrf.mxu2 }
 0x5ad   : > { %v3397_v54 = vadd.f32 %v3378_v16, %v3269_v3 }
 0x5ae   : > { %v3465_v24 = vpop.f32.mrf.mxu3 }
 0x5af   : > { %v9331_v43 = vadd.f32 %v3465_v24, %v3397_v54  ;;  %v9372_v24 = vld [vmem:[%s10527_s4 + $0x1] ss:$0 sm:$0xff] }
 0x5b2   : > { %v9333_v39 = vpop.f32.mrf.mxu1 }
 0x5b3   : > { %v9335_v61 = vpop.f32.mrf.mxu2  ;;  %v3270_v10 = vadd.f32 %v9333_v39, %v9277_v58 }
 0x5b6   : > { %v9337_v53 = vpop.f32.mrf.mxu3 }
 0x5ba   : > { %v3255_v44 = vpop.f32.mrf.mxu1 }
 0x5bb   : > { %v3271_v13 = vadd.f32 %v3255_v44, %v3179_v2  ;;  %v3388_v57 = vpop.f32.mrf.mxu2 }
 0x5bd   : > { %v3399_v50 = vadd.f32 %v3383_v15, %v3271_v13  ;;  %v3394_v15 = vadd.f32 %v9299_v35, %v3266_v42 }
 0x5be   : > { %v3470_v18 = vpop.f32.mrf.mxu3 }
 0x5bf   : > { %v9339_v17 = vadd.f32 %v3470_v18, %v3399_v50  ;;  %v3481_v50 = vadd.f32 %v3457_v25, %v3394_v15  ;;  %v7401_v25 = vld [vmem:[%s10525_s2 + $0xb0] sm:$0xff]  ;;  %v3396_v15 = vadd.f32 %v9311_v46, %v3268_v27 }
 0x5c2   : > { %v9341_v21 = vpop.f32.mrf.mxu1 }
 0x5c3   : > { %v9343_v52 = vpop.f32.mrf.mxu2 }
 0x5c6   : > { %v9345_v36 = vpop.f32.mrf.mxu3 }
 0x5ca   : > { %v3260_v33 = vpop.f32.mrf.mxu1 }
 0x5cb   : > { %v3273_v26 = vadd.f32 %v3260_v33, %v3181_v28  ;;  %v3655_v47 = vpop.f32.mrf.mxu2  ;;  %v7408_v28 = vld [vmem:[%s10525_s2 + $0xe8] sm:$0xff] }
 0x5cc   : > { %4389 = vmatpush.bf16.msrb.mxu1 %v7408_v28 }
 0x5cd   : > { %v3401_v8 = vadd.f32 %v3388_v57, %v3273_v26 }
 0x5ce   : > { %v3475_v2 = vpop.f32.mrf.mxu3 }
 0x5cf   : > { %v9350_v14 = vadd.f32 %v3475_v2, %v3401_v8 }
 0x5d0   : > { %4390 = vmatpush.bf16.msrb.mxu1 %v7407_v62 }
 0x5d2   : > { %v9355_v11 = vpop.f32.mrf.mxu1 }
 0x5d3   : > { %v3657_v38 = vpop.f32.mrf.mxu2 }
 0x5d6   : > { %v9360_v16 = vpop.f32.mrf.mxu3 }
 0x5da   : > { %v3546_v9 = vpop.f32.mrf.mxu1 }
 0x5db   : > { %v3571_v3 = vadd.f32 %v3546_v9, %v3480_v23  ;;  %v3660_v13 = vpop.f32.mrf.mxu2  ;;  %v7402_v23 = vld [vmem:[%s10525_s2 + $0xb8] sm:$0xff] }
 0x5dc   : > { %4082 = vmatpush.bf16.msra.mxu2 %v7402_v23 }
 0x5dd   : > { %v3680_v54 = vadd.f32 %v3655_v47, %v3571_v3  ;;  %v7404_v3 = vld [vmem:[%s10525_s2 + $0xc8] sm:$0xff] }
 0x5de   : > { %v3742_v44 = vpop.f32.mrf.mxu3  ;;  %4174 = vmatpush.bf16.msra.mxu3 %v7404_v3 }
 0x5df   : > { %v3767_v57 = vadd.f32 %v3742_v44, %v3680_v54 }
 0x5e0   : > { %4083 = vmatpush.bf16.msra.mxu2 %v7401_v25 }
 0x5e1   : > { %v3779_v18 = vadd.f32 %v9372_v24, %v3767_v57 }
 0x5e2   : > { %v3548_v33 = vpop.f32.mrf.mxu1 }
 0x5e3   : > { %v3789_v26 = vmax.f32 %v3779_v18, 0.0  ;;  %v3572_v31 = vadd.f32 %v3548_v33, %v3481_v50  ;;  %v3662_v2 = vpop.f32.mrf.mxu2  ;;  %v3483_v50 = vadd.f32 %v9328_v1, %v3396_v15 }
 0x5e5   : > { %3799 = vst.msk [vmem:[#allocation2 + $0xb] sm:$0xff] %vm2851_vm14, %v3789_v26  ;;  %v3681_v35 = vadd.f32 %v3657_v38, %v3572_v31 }
 0x5e6   : > { %v3744_v47 = vpop.f32.mrf.mxu3 }
 0x5e7   : > { %v3768_v8 = vadd.f32 %v3744_v47, %v3681_v35 }
 0x5e9   : > { %v3780_v28 = vadd.f32 %v9372_v24, %v3768_v8 }
 0x5ea   : > { %v3551_v38 = vpop.f32.mrf.mxu1 }
 0x5eb   : > { %v3790_v62 = vmax.f32 %v3780_v28, 0.0  ;;  %v3573_v42 = vadd.f32 %v3551_v38, %v9322_v6  ;;  %v7403_v6 = vld [vmem:[%s10525_s2 + $0xc0] sm:$0xff]  ;;  %v3665_v33 = vpop.f32.mrf.mxu2 }
 0x5ec   : > { %v3819_v9 = vld [vmem:[#allocation2 + $0x8] sm:$0xff]  ;;  %4175 = vmatpush.bf16.msra.mxu3 %v7403_v6  ;;  %v3091_v6 = vadd.f32 %v9275_v30, %v9285_v45 }
 0x5ed   : > { %3801 = vst.msk [vmem:[#allocation2 + $0x13] sm:$0xfc] %vm3800_vm15, %v3790_v62  ;;  %v3682_v54 = vadd.f32 %v3660_v13, %v3573_v42  ;;  %v3832_v7 = vpack.c.bf16 %v3819_v9, %v3819_v9 }
 0x5ee   : > { %v3747_v56 = vpop.f32.mrf.mxu3  ;;  %4727 = vst.msk [vmem:[#allocation2 + $0x8] sm:$0xff] %vm2851_vm14, %v7611_v20  ;;  %v3180_v45 = vadd.f32 %v9289_v37, %v3091_v6 }
 0x5ef   : > { %v3769_v44 = vadd.f32 %v3747_v56, %v3682_v54  ;;  %v3865_v57 = vunpack.c.l.b16 %v3832_v7 }
 0x5f1   : > { %v3781_v18 = vadd.f32 %v9372_v24, %v3769_v44  ;;  %v9405_v46 = vpack.c.b16 %v3865_v57, %v8998_v22 }
 0x5f2   : > { %v3553_v13 = vpop.f32.mrf.mxu1 }
 0x5f3   : > { %v3791_v26 = vmax.f32 %v3781_v18, 0.0  ;;  %v3574_v31 = vadd.f32 %v3553_v13, %v3483_v50  ;;  %6951 = vmatmul.msk.bf16.vlgmr.msra.gmra.mxu1 %vm2851_vm14, %v9405_v46  ;;  %v3667_v32 = vpop.f32.mrf.mxu2  ;;  %v3882_v58 = vshll.u32 %v9405_v46, 16  ;;  %v4040_v15 = vrot.slane %v9405_v46, 1 }
 0x5f4   : > { %5096 = vmatpush.msra.mxu1 %v9074_v34  ;;  %v3820_v23 = vld [vmem:[#allocation2 + $0x10] sm:$0xff]  ;;  %v3880_v54 = vshrl.u32 %v9405_v46, 16 }
 0x5f5   : > { %3803 = vst.msk [vmem:[#allocation2 + $0x1b] sm:$0x3] %vm3802_vm1, %v3791_v26  ;;  %v3683_v1 = vadd.f32 %v3662_v2, %v3574_v31  ;;  %v3833_v8 = vpack.c.bf16 %v3820_v23, %v3820_v23  ;;  %v3398_v2 = vadd.f32 %v9326_v41, %v3270_v10  ;;  %v3884_v62 = vrot.slane %v3882_v58, 1 }
 0x5f6   : > { %3805 = vst.msk [vmem:[#allocation2 + $0x1b] sm:$0xf0] %vm3804_vm7, %v3791_v26  ;;  %5097 = vmatpush.msra.mxu1 %v9053_v60  ;;  %v3749_v22 = vpop.f32.mrf.mxu3 }
 0x5f7   : > { %v3770_v35 = vadd.f32 %v3749_v22, %v3683_v1  ;;  %4728 = vst.msk [vmem:[#allocation2 + $0x10] sm:$0xff] %vm2851_vm14, %v7611_v20  ;;  %v3885_v50 = vor.u32 %v3884_v62, %v3880_v54 }
 0x5f8   : > { %5098 = vmatpush.msra.mxu1 %v9032_v0 }
 0x5f9   : > { %v3782_v34 = vadd.f32 %v9372_v24, %v3770_v35 }
 0x5fa   : > { %5099 = vmatpush.msra.mxu1 %v9019_v63  ;;  %v3556_v47 = vpop.f32.mrf.mxu1 }
 0x5fb   : > { %v3792_v25 = vmax.f32 %v3782_v34, 0.0  ;;  %v3575_v60 = vadd.f32 %v3556_v47, %v9331_v43  ;;  %v3485_v43 = vadd.f32 %v9337_v53, %v3398_v2  ;;  %v3670_v26 = vpop.f32.mrf.mxu2  ;;  %v3272_v34 = vadd.f32 %v9341_v21, %v3180_v45 }
 0x5fc   : > { %5100 = vmatpush.msra.mxu1 %v9009_v4  ;;  %v3866_v4 = vunpack.c.l.b16 %v3833_v8 }
 0x5fd   : > { %3806 = vst.msk [vmem:[#allocation2 + $0x23] sm:$0xf] %vm2864_vm13, %v3792_v25  ;;  %v3684_v0 = vadd.f32 %v3665_v33, %v3575_v60  ;;  %v3821_v27 = vld [vmem:[#allocation2 + $0x18] sm:$0xff] }
 0x5fe   : > { %3808 = vst.msk [vmem:[#allocation2 + $0x23] sm:$0xc0] %vm3807_vm8, %v3792_v25  ;;  %5101 = vmatpush.msra.mxu1 %v9002_v19  ;;  %v3752_v63 = vpop.f32.mrf.mxu3  ;;  %v3834_v39 = vpack.c.bf16 %v3821_v27, %v3821_v27  ;;  %v9441_v56 = vpack.c.b16 %v3866_v4, %v3865_v57 }
 0x5ff   : > { %v3771_v28 = vadd.f32 %v3752_v63, %v3684_v0  ;;  %4729 = vst.msk [vmem:[#allocation2 + $0x18] sm:$0xff] %vm2851_vm14, %v7611_v20 }
 0x600   : > { %5102 = vmatpush.msra.mxu1 %v8994_v5  ;;  %v3867_v41 = vunpack.c.l.b16 %v3834_v39  ;;  %v4221_v23 = vshrl.u32 %v9441_v56, 16  ;;  %v4224_v35 = vshll.u32 %v9441_v56, 16  ;;  %v3400_v39 = vadd.f32 %v9335_v61, %v3272_v34 }
 0x601   : > { %v3783_v38 = vadd.f32 %v9372_v24, %v3771_v28 }
 0x602   : > { %5103 = vmatpush.msra.mxu1 %v8987_v49  ;;  %v3558_v42 = vpop.f32.mrf.mxu1  ;;  %v9433_v19 = vpack.c.b16 %v3867_v41, %v3866_v4  ;;  %v4223_v27 = vrot.slane %v4221_v23, 1  ;;  %v4226_v58 = vrot.slane %v4224_v35, 2 }
 0x603   : > { %v3793_v9 = vmax.f32 %v3783_v38, 0.0  ;;  %v3576_v3 = vadd.f32 %v3558_v42, %v3485_v43 }
 0x604   : > { %6952 = vmatmul.msk.bf16.gmra.mxu1 %vm2851_vm14, %v9433_v19  ;;  %v4041_v5 = vrot.slane %v9433_v19, 1  ;;  %v3887_v53 = vshll.u32 %v9433_v19, 16  ;;  %v3822_v7 = vld [vmem:[#allocation2 + $0x20] sm:$0xff]  ;;  %v3891_v49 = vshrl.u32 %v9433_v19, 16  ;;  %v4227_v61 = vor.u32 %v4226_v58, %v4223_v27 }
 0x605   : > { %3810 = vst.msk [vmem:[#allocation2 + $0x2b] sm:$0x3f] %vm3809_vm9, %v3793_v9  ;;  %v3685_v44 = vadd.f32 %v3667_v32, %v3576_v3  ;;  %v3835_v18 = vpack.c.bf16 %v3822_v7, %v3822_v7  ;;  %v4132_v32 = vrot.slane %v9441_v56, 1  ;;  %v3672_v9 = vpop.f32.mrf.mxu2  ;;  %v3096_v7 = vadd.f32 %v9287_v29, %v9297_v51 }
 0x606   : > { %v3754_v46 = vpop.f32.mrf.mxu3  ;;  %v4042_v13 = vsel %vm892_vm2, %v4040_v15, %v4041_v5  ;;  %v3889_v33 = vrot.slane %v3887_v53, 1  ;;  %4730 = vst.msk [vmem:[#allocation2 + $0x20] sm:$0xff] %vm2851_vm14, %v7611_v20  ;;  %v9454_v57 = vrot.slane %v3891_v49, 2  ;;  %v9456_v30 = vrot.slane %v3887_v53, 3 }
 0x607   : > { %v3772_v31 = vadd.f32 %v3754_v46, %v3685_v44  ;;  %6968 = vmatmul.msk.bf16.vlgmr.msra.gmra.mxu2 %vm2851_vm14, %v4042_v13  ;;  %v3868_v1 = vunpack.c.l.b16 %v3835_v18  ;;  %v3487_v15 = vadd.f32 %v9345_v36, %v3400_v39  ;;  %v4436_v44 = vrot.slane %v9433_v19, 2 }
 0x608   : > { %v3890_v22 = vsel %vm439_vm3, %v3885_v50, %v3889_v33  ;;  %v4525_v10 = vor.u32 %v9456_v30, %v9454_v57  ;;  %v4632_v18 = vrot.slane %v9433_v19, 3  ;;  %v3893_v29 = vor.u32 %v3891_v49, %v3889_v33 }
 0x609   : > { %v3784_v47 = vadd.f32 %v9372_v24, %v3772_v31  ;;  %6938 = vmatmul.msk.bf16.vlgmr.msrb.gmra.mxu0 %vm2851_vm14, %v3890_v22  ;;  %v9468_v37 = vpack.c.b16 %v3868_v1, %v3867_v41  ;;  %v3182_v19 = vadd.f32 %v9301_v55, %v3096_v7 }
 0x60a   : > { %v3561_v25 = vpop.f32.mrf.mxu1 }
 0x60b   : > { %v3794_v60 = vmax.f32 %v3784_v47, 0.0  ;;  %v3577_v8 = vadd.f32 %v3561_v25, %v9339_v17  ;;  %v4133_v2 = vrot.slane %v9468_v37, 1  ;;  %v4229_v63 = vshrl.u32 %v9468_v37, 16 }
 0x60c   : > { %v3823_v0 = vld [vmem:[#allocation2 + $0x28] sm:$0xff]  ;;  %v4232_v21 = vshll.u32 %v9468_v37, 16  ;;  %v3274_v27 = vadd.f32 %v9355_v11, %v3182_v19 }
 0x60d   : > { %3811 = vst.msk [vmem:[#allocation2 + $0x33] sm:$0xff] %vm2851_vm14, %v3794_v60  ;;  %v3686_v28 = vadd.f32 %v3670_v26, %v3577_v8  ;;  %v4134_v17 = vsel %vm892_vm2, %v4132_v32, %v4133_v2  ;;  %v3836_v4 = vpack.c.bf16 %v3823_v0, %v3823_v0  ;;  %v4231_v43 = vrot.slane %v4229_v63, 1 }
 0x60e   : > { %v3757_v41 = vpop.f32.mrf.mxu3  ;;  %6985 = vmatmul.msk.bf16.vlgmr.msra.gmra.mxu3 %vm2851_vm14, %v4134_v17  ;;  %4731 = vst.msk [vmem:[#allocation2 + $0x28] sm:$0xff] %vm2851_vm14, %v7611_v20  ;;  %v4234_v38 = vrot.slane %v4232_v21, 2  ;;  %v3675_v21 = vpop.f32.mrf.mxu2 }
 0x60f   : > { %v3773_v62 = vadd.f32 %v3757_v41, %v3686_v28  ;;  %v3869_v42 = vunpack.c.l.b16 %v3836_v4 }
 0x610   : > { %v9483_v3 = vor.u32 %v4234_v38, %v4231_v43  ;;  %v3402_v38 = vadd.f32 %v9343_v52, %v3274_v27  ;;  %v9556_v52 = vld [vmem:[#allocation2 + $0x60] sm:$0xf] }
 0x611   : > { %v3785_v54 = vadd.f32 %v9372_v24, %v3773_v62  ;;  %v9487_v53 = vpack.c.b16 %v3869_v42, %v3868_v1  ;;  %4738 = vst.msk [vmem:[#allocation2 + $0x60] sm:$0xf] %vm2864_vm13, %v7611_v20 }
 0x612   : > { %v3563_v6 = vpop.f32.mrf.mxu1  ;;  %v9494_v50 = vsel %vm1290_vm5, %v4227_v61, %v9483_v3 }
 0x613   : > { %v3795_v46 = vmax.f32 %v3785_v54, 0.0  ;;  %v3578_v13 = vadd.f32 %v3563_v6, %v3487_v15  ;;  %v4043_v36 = vrot.slane %v9487_v53, 1  ;;  %v3895_v26 = vshll.u32 %v9487_v53, 16 }
 0x614   : > { %6953 = vmatmul.msk.bf16.gmra.mxu1 %vm2851_vm14, %v9487_v53  ;;  %v3824_v51 = vld [vmem:[#allocation2 + $0x30] sm:$0xff]  ;;  %v3899_v45 = vshrl.u32 %v9487_v53, 16  ;;  %v4437_v31 = vrot.slane %v9487_v53, 2  ;;  %v4633_v1 = vrot.slane %v9487_v53, 3  ;;  %v3489_v54 = vadd.f32 %v9360_v16, %v3402_v38 }
 0x615   : > { %3812 = vst.msk [vmem:[#allocation2 + $0x3b] sm:$0xfc] %vm3800_vm15, %v3795_v46  ;;  %v3687_v22 = vadd.f32 %v3672_v9, %v3578_v13  ;;  %v4044_v23 = vsel %vm892_vm2, %v4041_v5, %v4043_v36  ;;  %v3897_v35 = vrot.slane %v3895_v26, 1  ;;  %v4527_v34 = vrot.slane %v3895_v26, 3 }
 0x616   : > { %v3759_v47 = vpop.f32.mrf.mxu3  ;;  %v3837_v49 = vpack.c.bf16 %v3824_v51, %v3824_v51  ;;  %4732 = vst.msk [vmem:[#allocation2 + $0x30] sm:$0xff] %vm2851_vm14, %v7611_v20  ;;  %v4526_v33 = vrot.slane %v3899_v45, 2  ;;  %v9517_v25 = vsel %vm643_vm0, %v4436_v44, %v4437_v31  ;;  %v9522_v60 = vsel %vm2258_vm6, %v4632_v18, %v4633_v1 }
 0x617   : > { %v3774_v5 = vadd.f32 %v3759_v47, %v3687_v22  ;;  %6969 = vmatmul.msk.bf16.gmra.mxu2 %vm2851_vm14, %v4044_v23  ;;  %v3898_v8 = vsel %vm439_vm3, %v3893_v29, %v3897_v35  ;;  %v3677_v29 = vpop.f32.mrf.mxu2  ;;  %v3901_v16 = vor.u32 %v3899_v45, %v3897_v35 }
 0x618   : > { %v3870_v32 = vunpack.c.l.b16 %v3837_v49  ;;  %v9527_v0 = vor.u32 %v4527_v34, %v4526_v33 }
 0x619   : > { %v3786_v58 = vadd.f32 %v9372_v24, %v3774_v5  ;;  %6939 = vmatmul.msk.bf16.gmra.mxu0 %vm2851_vm14, %v3898_v8 }
 0x61a   : > { %v3566_v63 = vpop.f32.mrf.mxu1  ;;  %v9532_v39 = vpack.c.b16 %v3870_v32, %v3869_v42  ;;  %v9539_v55 = vsel %vm1972_vm4, %v4525_v10, %v9527_v0 }
 0x61b   : > { %v3796_v28 = vmax.f32 %v3786_v58, 0.0  ;;  %v3579_v17 = vadd.f32 %v3566_v63, %v9350_v14 }
 0x61c   : > { %v4135_v11 = vrot.slane %v9532_v39, 1  ;;  %v3825_v4 = vld [vmem:[#allocation2 + $0x38] sm:$0xff]  ;;  %v4238_v41 = vshrl.u32 %v9532_v39, 16  ;;  %v4241_v43 = vshll.u32 %v9532_v39, 16 }
 0x61d   : > { %3813 = vst.msk [vmem:[#allocation2 + $0x43] sm:$0x3] %vm3802_vm1, %v3796_v28  ;;  %v3688_v62 = vadd.f32 %v3675_v21, %v3579_v17  ;;  %v3838_v42 = vpack.c.bf16 %v3825_v4, %v3825_v4 }
 0x61e   : > { %3814 = vst.msk [vmem:[#allocation2 + $0x43] sm:$0xf0] %vm3804_vm7, %v3796_v28  ;;  %v3762_v57 = vpop.f32.mrf.mxu3  ;;  %v4136_v14 = vsel %vm892_vm2, %v4133_v2, %v4135_v11  ;;  %v4240_v30 = vrot.slane %v4238_v41, 1  ;;  %v4243_v10 = vrot.slane %v4241_v43, 2 }
 0x61f   : > { %v3775_v9 = vadd.f32 %v3762_v57, %v3688_v62  ;;  %6986 = vmatmul.msk.bf16.gmra.mxu3 %vm2851_vm14, %v4136_v14  ;;  %v3871_v61 = vunpack.c.l.b16 %v3838_v42  ;;  %4733 = vst.msk [vmem:[#allocation2 + $0x38] sm:$0xff] %vm2851_vm14, %v7611_v20  ;;  %v7410_v62 = vld [vmem:[%s10525_s2 + $0xf8] sm:$0xff] }
 0x620   : > { %v4244_v15 = vor.u32 %v4243_v10, %v4240_v30  ;;  %v7406_v42 = vld [vmem:[%s10525_s2 + $0xd8] sm:$0xff]  ;;  %4480 = vmatpush.bf16.msrb.mxu2 %v7410_v62 }
 0x621   : > { %v3787_v7 = vadd.f32 %v9372_v24, %v3775_v9  ;;  %v9562_v2 = vpack.c.b16 %v3871_v61, %v3870_v32  ;;  %4302 = vmatpush.bf16.msra.mxu0 %v7406_v42 }
 0x622   : > { %v3568_v6 = vpop.f32.mrf.mxu1  ;;  %v9566_v44 = vsel %vm1290_vm5, %v9483_v3, %v4244_v15 }
 0x623   : > { %v3797_v18 = vmax.f32 %v3787_v7, 0.0  ;;  %v3580_v46 = vadd.f32 %v3568_v6, %v3489_v54  ;;  %v4045_v13 = vrot.slane %v9562_v2, 1  ;;  %v3903_v26 = vshll.u32 %v9562_v2, 16  ;;  %v7409_v6 = vld [vmem:[%s10525_s2 + $0xf0] sm:$0xff] }
 0x624   : > { %6954 = vmatmul.msk.bf16.gmra.mxu1 %vm2851_vm14, %v9562_v2  ;;  %v3907_v51 = vshrl.u32 %v9562_v2, 16  ;;  %v4439_v22 = vrot.slane %v9562_v2, 2  ;;  %v4635_v27 = vrot.slane %v9562_v2, 3  ;;  %4481 = vmatpush.bf16.msrb.mxu2 %v7409_v6 }
 0x625   : > { %3815 = vst.msk [vmem:[#allocation2 + $0x4b] sm:$0xf] %vm2864_vm13, %v3797_v18  ;;  %v3689_v23 = vadd.f32 %v3677_v29, %v3580_v46  ;;  %v4046_v3 = vsel %vm892_vm2, %v4043_v36, %v4045_v13  ;;  %v3905_v34 = vrot.slane %v3903_v26, 1  ;;  %v3826_v47 = vld [vmem:[#allocation2 + $0x40] sm:$0xff]  ;;  %v4531_v49 = vrot.slane %v3903_v26, 3 }
 0x626   : > { %3816 = vst.msk [vmem:[#allocation2 + $0x4b] sm:$0xc0] %vm3807_vm8, %v3797_v18  ;;  %v3764_v33 = vpop.f32.mrf.mxu3  ;;  %v3839_v45 = vpack.c.bf16 %v3826_v47, %v3826_v47  ;;  %v9584_v35 = vsel %vm643_vm0, %v4437_v31, %v4439_v22  ;;  %v4530_v19 = vrot.slane %v3907_v51, 2  ;;  %v9605_v21 = vsel %vm2258_vm6, %v4633_v1, %v4635_v27 }
 0x627   : > { %v3776_v5 = vadd.f32 %v3764_v33, %v3689_v23  ;;  %6970 = vmatmul.msk.bf16.gmra.mxu2 %vm2851_vm14, %v4046_v3  ;;  %v3906_v8 = vsel %vm439_vm3, %v3901_v16, %v3905_v34  ;;  %4734 = vst.msk [vmem:[#allocation2 + $0x40] sm:$0xff] %vm2851_vm14, %v7611_v20 }
 0x628   : > { %v3872_v36 = vunpack.c.l.b16 %v3839_v45  ;;  %v9590_v32 = vor.u32 %v4531_v49, %v4530_v19  ;;  %v7412_v49 = vld [vmem:[%s10525_s2 + $0x108] sm:$0xff] }
 0x629   : > { %v3788_v58 = vadd.f32 %v9372_v24, %v3776_v5  ;;  %6940 = vmatmul.msk.bf16.gmra.mxu0 %vm2851_vm14, %v3906_v8  ;;  %4589 = vmatpush.bf16.msrb.mxu3 %v7412_v49  ;;  %v7411_v5 = vld [vmem:[%s10525_s2 + $0x100] sm:$0xff] }
 0x62a   : > { %v9595_v31 = vpack.c.b16 %v3872_v36, %v3871_v61  ;;  %v9600_v63 = vsel %vm1972_vm4, %v9527_v0, %v9590_v32 }
 0x62b   : > { %v3798_v28 = vmax.f32 %v3788_v58, 0.0 }
 0x62c   : > { %v4137_v17 = vrot.slane %v9595_v31, 1  ;;  %v3827_v4 = vld [vmem:[#allocation2 + $0x48] sm:$0xff]  ;;  %v4247_v24 = vshrl.u32 %v9595_v31, 16  ;;  %v4250_v41 = vshll.u32 %v9595_v31, 16 }
 0x62d   : > { %3817 = vst.msk [vmem:[#allocation2 + $0x53] sm:$0x3f] %vm3809_vm9, %v3798_v28  ;;  %v3840_v43 = vpack.c.bf16 %v3827_v4, %v3827_v4  ;;  %4590 = vmatpush.bf16.msrb.mxu3 %v7411_v5 }
 0x62e   : > { %v4138_v53 = vsel %vm892_vm2, %v4135_v11, %v4137_v17  ;;  %4735 = vst.msk [vmem:[#allocation2 + $0x48] sm:$0xff] %vm2851_vm14, %v7611_v20  ;;  %v4249_v1 = vrot.slane %v4247_v24, 1  ;;  %v4252_v0 = vrot.slane %v4250_v41, 2  ;;  %v3843_v11 = vpack.c.bf16 %v9556_v52, %v9556_v52 }
 0x62f   : > { %6987 = vmatmul.msk.bf16.gmra.mxu3 %vm2851_vm14, %v4138_v53  ;;  %v3873_v38 = vunpack.c.l.b16 %v3840_v43  ;;  %v3909_v52 = vor.u32 %v3907_v51, %v3905_v34 }
 0x630   : > { %v9625_v57 = vor.u32 %v4252_v0, %v4249_v1  ;;  %v4433_v18 = vunpack.c.l.b16 %v3843_v11 }
 0x631   : > { %v9629_v14 = vpack.c.b16 %v3873_v38, %v3872_v36 }
 0x632   : > { %v9633_v30 = vsel %vm1290_vm5, %v4244_v15, %v9625_v57  ;;  %v7405_v15 = vld [vmem:[%s10525_s2 + $0xd0] sm:$0xff]  ;;  %v9676_v8 = vpack.c.b16 %v4433_v18, %v4433_v18 }
 0x633   : > { %v4047_v10 = vrot.slane %v9629_v14, 1  ;;  %v3911_v9 = vshll.u32 %v9629_v14, 16  ;;  %v3915_v61 = vshrl.u32 %v9629_v14, 16  ;;  %v4441_v54 = vrot.slane %v9629_v14, 2  ;;  %4303 = vmatpush.bf16.msra.mxu0 %v7405_v15 }
 0x634   : > { %6955 = vmatmul.msk.bf16.gmra.mxu1 %vm2851_vm14, %v9629_v14  ;;  %v3828_v7 = vld [vmem:[#allocation2 + $0x50] sm:$0xff]  ;;  %v4637_v46 = vrot.slane %v9629_v14, 3  ;;  %v3829_v23 = vld [vmem:[#allocation2 + $0x58] sm:$0xff]  ;;  %v4350_v14 = vrot.slane %v9595_v31, 2 }
 0x635   : > { %v4048_v26 = vsel %vm892_vm2, %v4045_v13, %v4047_v10  ;;  %v3913_v29 = vrot.slane %v3911_v9, 1  ;;  %v3841_v16 = vpack.c.bf16 %v3828_v7, %v3828_v7  ;;  %4736 = vst.msk [vmem:[#allocation2 + $0x50] sm:$0xff] %vm2851_vm14, %v7611_v20  ;;  %v9656_v51 = vsel %vm643_vm0, %v4439_v22, %v4441_v54  ;;  %v7414_v31 = vld [vmem:[%s10525_s2 + $0x118] sm:$0xff] }
 0x636   : > { %v4534_v3 = vrot.slane %v3915_v61, 2  ;;  %v4535_v34 = vrot.slane %v3911_v9, 3  ;;  %v3842_v47 = vpack.c.bf16 %v3829_v23, %v3829_v23  ;;  %4737 = vst.msk [vmem:[#allocation2 + $0x58] sm:$0xff] %vm2851_vm14, %v7611_v20  ;;  %v9663_v2 = vsel %vm2258_vm6, %v4635_v27, %v4637_v46 }
 0x637   : > { %6971 = vmatmul.msk.bf16.gmra.mxu2 %vm2851_vm14, %v4048_v26  ;;  %v3914_v13 = vsel %vm439_vm3, %v3909_v52, %v3913_v29  ;;  %v4126_v22 = vunpack.c.l.b16 %v3841_v16  ;;  %v4346_v9 = vrot.slane %v9468_v37, 2  ;;  %4676 = vmatpush.bf16.msrb.mxu0 %v7414_v31 }
 0x638   : > { %v4536_v33 = vor.u32 %v4535_v34, %v4534_v3  ;;  %v4218_v45 = vunpack.c.l.b16 %v3842_v47 }
 0x639   : > { %6941 = vmatmul.msk.bf16.gmra.mxu0 %vm2851_vm14, %v3914_v13  ;;  %v9671_v19 = vpack.c.b16 %v4126_v22, %v3873_v38  ;;  %v4641_v38 = vrot.slane %v9676_v8, 3 }
 0x63a   : > { %v4537_v36 = vsel %vm1972_vm4, %v9590_v32, %v4536_v33  ;;  %v9680_v27 = vpack.c.b16 %v4218_v45, %v4126_v22  ;;  %v4219_v28 = vpack.c.b16 %v4218_v45, %v4218_v45  ;;  %v4548_v45 = vshrl.u32 %v9676_v8, 16 }
 0x63b   : > { %v4139_v58 = vrot.slane %v9671_v19, 1  ;;  %v4256_v4 = vshrl.u32 %v9671_v19, 16  ;;  %v4259_v24 = vshll.u32 %v9671_v19, 16 }
 0x63c   : > { %v4443_v41 = vrot.slane %v9680_v27, 2  ;;  %v4539_v43 = vshrl.u32 %v9680_v27, 16  ;;  %v4542_v53 = vshll.u32 %v9680_v27, 16  ;;  %v4265_v7 = vshll.u32 %v4219_v28, 16 }
 0x63d   : > { %v4140_v1 = vsel %vm892_vm2, %v4137_v17, %v4139_v58  ;;  %v4258_v32 = vrot.slane %v4256_v4, 1  ;;  %v4261_v0 = vrot.slane %v4259_v24, 2  ;;  %v4639_v6 = vrot.slane %v9680_v27, 3 }
 0x63e   : > { %v4444_v62 = vsel %vm643_vm0, %v4441_v54, %v4443_v41  ;;  %v4541_v42 = vrot.slane %v4539_v43, 2  ;;  %v4544_v11 = vrot.slane %v4542_v53, 3  ;;  %v4345_v17 = vrot.slane %v9441_v56, 2 }
 0x63f   : > { %6988 = vmatmul.msk.bf16.gmra.mxu3 %vm2851_vm14, %v4140_v1  ;;  %v4262_v52 = vor.u32 %v4261_v0, %v4258_v32  ;;  %v4267_v26 = vrot.slane %v4265_v7, 2  ;;  %v9704_v54 = vsel %vm2258_vm6, %v4637_v46, %v4639_v6  ;;  %v9707_v16 = vsel %vm2258_vm6, %v4639_v6, %v4641_v38 }
 0x640   : > { %v9699_v15 = vor.u32 %v4544_v11, %v4541_v42  ;;  %v4347_v23 = vsel %vm643_vm0, %v4345_v17, %v4346_v9  ;;  %v3917_v56 = vor.u32 %v3915_v61, %v3913_v29 }
 0x641   : > { %v4263_v18 = vsel %vm1290_vm5, %v9625_v57, %v4262_v52  ;;  %v4268_v3 = vsel %vm1290_vm5, %v4262_v52, %v4267_v26  ;;  %v4348_v57 = vrot.slane %v9532_v39, 2 }
 0x642   : > { %v4546_v37 = vsel %vm1972_vm4, %v4536_v33, %v9699_v15  ;;  %v4445_v33 = vrot.slane %v9676_v8, 2 }
 0x643   : > { %v4349_v46 = vsel %vm643_vm0, %v4346_v9, %v4348_v57 }
 0x644   : > { %7019 = vmatmul.msk.bf16.vlgmr.msrb.gmra.mxu1 %vm2851_vm14, %v4347_v23 }
 0x647   : > { %6972 = vmatmul.msk.bf16.gmra.mxu2 %vm2851_vm14, %v4047_v10  ;;  %v4351_v10 = vsel %vm643_vm0, %v4348_v57, %v4350_v14 }
 0x649   : > { %6942 = vmatmul.msk.bf16.gmra.mxu0 %vm2851_vm14, %v3917_v56 }
 0x64f   : > { %6989 = vmatmul.msk.bf16.gmra.mxu3 %vm2851_vm14, %v4139_v58  ;;  %v4446_v58 = vsel %vm643_vm0, %v4443_v41, %v4445_v33  ;;  %v5053_v33 = vshra.s32 %v8783_v59, 2 }
 0x654   : > { %7020 = vmatmul.msk.bf16.gmra.mxu1 %vm2851_vm14, %v4349_v46 }
 0x657   : > { %7036 = vmatmul.msk.bf16.vlgmr.msrb.gmra.mxu2 %vm2851_vm14, %v9517_v25 }
 0x659   : > { %7002 = vmatmul.msk.bf16.vlgmr.msra.gmra.mxu0 %vm2851_vm14, %v9494_v50  ;;  %v4352_v50 = vrot.slane %v9671_v19, 2  ;;  %v4551_v19 = vshll.u32 %v9676_v8, 16 }
 0x65b   : > { %v4353_v25 = vsel %vm643_vm0, %v4350_v14, %v4352_v50  ;;  %v4553_v4 = vrot.slane %v4551_v19, 3 }
 0x65f   : > { %7053 = vmatmul.msk.bf16.vlgmr.msrb.gmra.mxu3 %vm2851_vm14, %v9539_v55 }
 0x664   : > { %7021 = vmatmul.msk.bf16.gmra.mxu1 %vm2851_vm14, %v4351_v10 }
 0x667   : > { %7037 = vmatmul.msk.bf16.gmra.mxu2 %vm2851_vm14, %v9584_v35 }
 0x669   : > { %7003 = vmatmul.msk.bf16.gmra.mxu0 %vm2851_vm14, %v9566_v44  ;;  %v4354_v44 = vrot.slane %v4219_v28, 2  ;;  %v4550_v28 = vrot.slane %v4548_v45, 2  ;;  %v5055_v45 = vand.u32 3, %v8783_v59 }
 0x66b   : > { %v4355_v35 = vsel %vm643_vm0, %v4352_v50, %v4354_v44  ;;  %v4554_v1 = vor.u32 %v4553_v4, %v4550_v28  ;;  %v9817_v19 = vmul.u32 2, %v5055_v45 }
 0x66d   : > { %v4555_v27 = vsel %vm1972_vm4, %v9699_v15, %v4554_v1 }
 0x66f   : > { %7054 = vmatmul.msk.bf16.gmra.mxu3 %vm2851_vm14, %v9600_v63 }
 0x670   : > { %v4010_v39 = vpop.f32.mrf.mxu1 }
 0x674   : > { %7022 = vmatmul.msk.bf16.gmra.mxu1 %vm2851_vm14, %v4353_v25 }
 0x677   : > { %7038 = vmatmul.msk.bf16.gmra.mxu2 %vm2851_vm14, %v9656_v51 }
 0x678   : > { %v9746_v55 = vpop.f32.mrf.mxu1 }
 0x679   : > { %7004 = vmatmul.msk.bf16.gmra.mxu0 %vm2851_vm14, %v9633_v30  ;;  %v7413_v30 = vld [vmem:[%s10525_s2 + $0x110] sm:$0xff] }
 0x67a   : > { %4677 = vmatpush.bf16.msrb.mxu0 %v7413_v30 }
 0x67f   : > { %7055 = vmatmul.msk.bf16.gmra.mxu3 %vm2851_vm14, %v4537_v36 }
 0x681   : > { %v4015_v29 = vpop.f32.mrf.mxu1 }
 0x684   : > { %7023 = vmatmul.msk.bf16.gmra.mxu1 %vm2851_vm14, %v4355_v35 }
 0x686   : > { %v3954_v63 = vpop.f32.mrf.mxu0 }
 0x687   : > { %v4011_v61 = vadd.f32 %v4010_v39, %v3954_v63  ;;  %7039 = vmatmul.msk.bf16.gmra.mxu2 %vm2851_vm14, %v4444_v62 }
 0x689   : > { %7005 = vmatmul.msk.bf16.gmra.mxu0 %vm2851_vm14, %v4263_v18  ;;  %v9767_v5 = vpop.f32.mrf.mxu1 }
 0x68a   : > { %v4085_v51 = vpop.f32.mrf.mxu2 }
 0x68b   : > { %v4110_v34 = vadd.f32 %v4085_v51, %v4011_v61 }
 0x68e   : > { %v9759_v47 = vpop.f32.mrf.mxu0 }
 0x68f   : > { %7056 = vmatmul.msk.bf16.gmra.mxu3 %vm2851_vm14, %v4546_v37 }
 0x691   : > { %v4177_v13 = vpop.f32.mrf.mxu3  ;;  %v4020_v8 = vpop.f32.mrf.mxu1 }
 0x692   : > { %v9762_v22 = vpop.f32.mrf.mxu2  ;;  %v4202_v49 = vadd.f32 %v4177_v13, %v4110_v34 }
 0x696   : > { %v3959_v36 = vpop.f32.mrf.mxu0 }
 0x697   : > { %v4016_v24 = vadd.f32 %v4015_v29, %v3959_v36  ;;  %7040 = vmatmul.msk.bf16.gmra.mxu2 %vm2851_vm14, %v4446_v58 }
 0x699   : > { %7006 = vmatmul.msk.bf16.gmra.mxu0 %vm2851_vm14, %v4268_v3  ;;  %v9774_v43 = vpop.f32.mrf.mxu3  ;;  %v9783_v11 = vpop.f32.mrf.mxu1 }
 0x69a   : > { %v4090_v53 = vpop.f32.mrf.mxu2 }
 0x69b   : > { %v4112_v32 = vadd.f32 %v4090_v53, %v4016_v24  ;;  %v5056_v24 = vand.u32 3, %v8806_v48 }
 0x69d   : > { %v9829_v1 = vmul.u32 2, %v5056_v24 }
 0x69e   : > { %v9776_v0 = vpop.f32.mrf.mxu0 }
 0x69f   : > { %7057 = vmatmul.msk.bf16.gmra.mxu3 %vm2851_vm14, %v4555_v27 }
 0x6a1   : > { %v4025_v15 = vpop.f32.mrf.mxu1 }
 0x6a2   : > { %v9781_v41 = vpop.f32.mrf.mxu2  ;;  %v4182_v38 = vpop.f32.mrf.mxu3 }
 0x6a3   : > { %v4204_v62 = vadd.f32 %v4182_v38, %v4112_v32 }
 0x6a6   : > { %v3964_v42 = vpop.f32.mrf.mxu0 }
 0x6a7   : > { %v4021_v9 = vadd.f32 %v4020_v8, %v3964_v42 }
 0x6a9   : > { %7070 = vmatmul.msk.bf16.vlgmr.msrb.gmra.mxu0 %vm2851_vm14, %v9522_v60  ;;  %v9797_v46 = vpop.f32.mrf.mxu1 }
 0x6aa   : > { %v4095_v52 = vpop.f32.mrf.mxu2  ;;  %v9787_v7 = vpop.f32.mrf.mxu3 }
 0x6ab   : > { %v4114_v6 = vadd.f32 %v4095_v52, %v4021_v9 }
 0x6ae   : > { %v9789_v17 = vpop.f32.mrf.mxu0 }
 0x6b1   : > { %v4030_v39 = vpop.f32.mrf.mxu1 }
 0x6b2   : > { %v9791_v18 = vpop.f32.mrf.mxu2  ;;  %v4187_v26 = vpop.f32.mrf.mxu3 }
 0x6b3   : > { %v4206_v37 = vadd.f32 %v4187_v26, %v4114_v6 }
 0x6b6   : > { %v3969_v23 = vpop.f32.mrf.mxu0 }
 0x6b7   : > { %v4026_v3 = vadd.f32 %v4025_v15, %v3969_v23 }
 0x6b9   : > { %7071 = vmatmul.msk.bf16.gmra.mxu0 %vm2851_vm14, %v9605_v21 }
 0x6ba   : > { %v4100_v56 = vpop.f32.mrf.mxu2  ;;  %v9795_v57 = vpop.f32.mrf.mxu3 }
 0x6bb   : > { %v4116_v60 = vadd.f32 %v4100_v56, %v4026_v3 }
 0x6be   : > { %v9799_v14 = vpop.f32.mrf.mxu0 }
 0x6c2   : > { %v9801_v10 = vpop.f32.mrf.mxu2  ;;  %v4192_v50 = vpop.f32.mrf.mxu3 }
 0x6c3   : > { %v4208_v25 = vadd.f32 %v4192_v50, %v4116_v60 }
 0x6c6   : > { %v3974_v44 = vpop.f32.mrf.mxu0 }
 0x6c7   : > { %v4031_v35 = vadd.f32 %v4030_v39, %v3974_v44 }
 0x6c9   : > { %7072 = vmatmul.msk.bf16.gmra.mxu0 %vm2851_vm14, %v9663_v2  ;;  %v9815_v2 = vmul.u32 2, %v5053_v33 }
 0x6ca   : > { %v4105_v31 = vpop.f32.mrf.mxu2  ;;  %v9805_v21 = vpop.f32.mrf.mxu3 }
 0x6cb   : > { %v4118_v63 = vadd.f32 %v4105_v31, %v4031_v35  ;;  %v5071_v36 = vmul.u32 8, %v9815_v2  ;;  %v4753_v35 = vld [vmem:[#allocation2] sm:$0xff]  ;;  %v4013_v31 = vadd.f32 %v9746_v55, %v9759_v47 }
 0x6cc   : > { %5182 = vst.msk [vmem:[#allocation2] sm:$0xff] %vm2851_vm14, %v7610_v40  ;;  %v9862_v55 = vld [vmem:[%s10527_s4 + $0x2] ss:$0 sm:$0xff] }
 0x6cd   : > { %v5073_v58 = vadd.s32 %v5071_v36, %v9817_v19 }
 0x6ce   : > { %v9807_v61 = vpop.f32.mrf.mxu0 }
 0x6cf   : > { %vm5075_vm5 = vcmp.eq.s32.totalorder %v8811_v12, %v5073_v58 }
 0x6d2   : > { %v4197_v30 = vpop.f32.mrf.mxu3 }
 0x6d3   : > { %v9809_v29 = vadd.f32 %v4197_v30, %v4118_v63 }
 0x6d6   : > { %v4305_v51 = vpop.f32.mrf.mxu0 }
 0x6d7   : > { %v4330_v34 = vadd.f32 %v4305_v51, %v4202_v49  ;;  %v5054_v49 = vshra.s32 %v8806_v48, 2  ;;  %v9837_v48 = vpop.f32.mrf.mxu1 }
 0x6d9   : > { %7073 = vmatmul.msk.bf16.gmra.mxu0 %vm2851_vm14, %v9704_v54  ;;  %v7077_v54 = vsel %vm5075_vm5, 1.0, %v7610_v40  ;;  %v9825_v53 = vmul.u32 2, %v5054_v49  ;;  %vm4969_vm5 = vcmask 1042432  }
 0x6da   : > { %7079 = vmatmul.msk.f32.vlgmr.msra.gmra.mxu1 %vm5081_vm10, %v7077_v54  ;;  %v9843_v6 = vpop.f32.mrf.mxu3 }
 0x6db   : > { %v5072_v32 = vmul.u32 8, %v9825_v53 }
 0x6dd   : > { %v5074_v8 = vadd.s32 %v5072_v32, %v9829_v1 }
 0x6de   : > { %v4307_v13 = vpop.f32.mrf.mxu0 }
 0x6df   : > { %vm5076_vm11 = vcmp.eq.s32.totalorder %v8811_v12, %v5074_v8  ;;  %v4392_v52 = vpop.f32.mrf.mxu1 }
 0x6e0   : > { %v7078_v38 = vsel %vm5076_vm11, 1.0, %v7610_v40  ;;  %v4417_v30 = vadd.f32 %v4392_v52, %v4330_v34  ;;  %v4018_v34 = vadd.f32 %v9767_v5, %v9776_v0 }
 0x6e2   : > { %7080 = vmatmul.msk.f32.gmra.mxu1 %vm5081_vm10, %v7078_v38  ;;  %v4592_v60 = vpop.f32.mrf.mxu3  ;;  %v4113_v52 = vadd.f32 %v9781_v41, %v4018_v34  ;;  %vm5011_vm10 = vcmask 1041408  }
 0x6e6   : > { %v4310_v28 = vpop.f32.mrf.mxu0 }
 0x6e7   : > { %v4332_v4 = vadd.f32 %v4310_v28, %v4204_v62  ;;  %v4394_v56 = vpop.f32.mrf.mxu1 }
 0x6e9   : > { %7074 = vmatmul.msk.bf16.gmra.mxu0 %vm2851_vm14, %v9707_v16  ;;  %v9841_v16 = vpop.f32.mrf.mxu2 }
 0x6ea   : > { %v4594_v44 = vpop.f32.mrf.mxu3 }
 0x6ee   : > { %v4312_v27 = vpop.f32.mrf.mxu0 }
 0x6ef   : > { %v4397_v39 = vpop.f32.mrf.mxu1 }
 0x6f1   : > { %v4483_v23 = vpop.f32.mrf.mxu2 }
 0x6f2   : > { %v4508_v36 = vadd.f32 %v4483_v23, %v4417_v30  ;;  %v4597_v28 = vpop.f32.mrf.mxu3 }
 0x6f4   : > { %v4617_v49 = vadd.f32 %v4592_v60, %v4508_v36 }
 0x6f6   : > { %v4315_v62 = vpop.f32.mrf.mxu0 }
 0x6f7   : > { %v9835_v42 = vadd.f32 %v4315_v62, %v4206_v37  ;;  %v4399_v45 = vpop.f32.mrf.mxu1 }
 0x6f9   : > { %v4485_v37 = vpop.f32.mrf.mxu2 }
 0x6fa   : > { %v4599_v38 = vpop.f32.mrf.mxu3 }
 0x6fe   : > { %v9839_v9 = vpop.f32.mrf.mxu0 }
 0x701   : > { %v4488_v33 = vpop.f32.mrf.mxu2 }
 0x706   : > { %v4320_v15 = vpop.f32.mrf.mxu0 }
 0x707   : > { %v9845_v26 = vadd.f32 %v4320_v15, %v4208_v25  ;;  %v4111_v25 = vadd.f32 %v9762_v22, %v4013_v31  ;;  %v4419_v15 = vadd.f32 %v4397_v39, %v4332_v4  ;;  %v4777_v31 = vrot.slane %v4753_v35, 1 }
 0x709   : > { %v4203_v51 = vadd.f32 %v9774_v43, %v4111_v25  ;;  %v4490_v43 = vpop.f32.mrf.mxu2  ;;  %v4510_v30 = vadd.f32 %v4488_v33, %v4419_v15 }
 0x70b   : > { %v4331_v58 = vadd.f32 %v4307_v13, %v4203_v51  ;;  %v4402_v13 = vpop.f32.mrf.mxu1 }
 0x70d   : > { %v4418_v54 = vadd.f32 %v4394_v56, %v4331_v58  ;;  %v4205_v56 = vadd.f32 %v9787_v7, %v4113_v52  ;;  %v4023_v7 = vadd.f32 %v9783_v11, %v9789_v17 }
 0x70e   : > { %v9847_v3 = vpop.f32.mrf.mxu0 }
 0x70f   : > { %v4509_v22 = vadd.f32 %v4485_v37, %v4418_v54  ;;  %v4816_v37 = vrot.slane %v4753_v35, 2  ;;  %v4333_v51 = vadd.f32 %v4312_v27, %v4205_v56  ;;  %v4602_v54 = vpop.f32.mrf.mxu3 }
 0x711   : > { %v4618_v8 = vadd.f32 %v4594_v44, %v4509_v22  ;;  %v4619_v44 = vadd.f32 %v4597_v28, %v4510_v30  ;;  %v4493_v39 = vpop.f32.mrf.mxu2  ;;  %v4420_v27 = vadd.f32 %v4399_v45, %v4333_v51 }
 0x713   : > { %v4404_v33 = vpop.f32.mrf.mxu1  ;;  %v4511_v22 = vadd.f32 %v4490_v43, %v4420_v27 }
 0x715   : > { %v4620_v52 = vadd.f32 %v4599_v38, %v4511_v22 }
 0x716   : > { %v9849_v50 = vpop.f32.mrf.mxu0 }
 0x719   : > { %v4495_v51 = vpop.f32.mrf.mxu2 }
 0x71e   : > { %v9855_v63 = vpop.f32.mrf.mxu0 }
 0x726   : > { %v4679_v47 = vpop.f32.mrf.mxu0 }
 0x727   : > { %v4704_v24 = vadd.f32 %v4679_v47, %v4617_v49  ;;  %v4115_v47 = vadd.f32 %v9791_v18, %v4023_v7  ;;  %v4421_v18 = vadd.f32 %v4402_v13, %v9835_v42  ;;  %v9891_v42 = vpop.f32.mrf.mxu1 }
 0x729   : > { %v4716_v32 = vadd.f32 %v9862_v55, %v4704_v24  ;;  %v4207_v28 = vadd.f32 %v9795_v57, %v4115_v47  ;;  %v4512_v13 = vadd.f32 %v4493_v39, %v4421_v18 }
 0x72b   : > { %4739 = vst.msk [vmem:[#allocation2 + $0xb] sm:$0xff] %vm2851_vm14, %v4716_v32  ;;  %v4335_v15 = vadd.f32 %v9839_v9, %v4207_v28 }
 0x72e   : > { %v4681_v62 = vpop.f32.mrf.mxu0 }
 0x72f   : > { %v4705_v23 = vadd.f32 %v4681_v62, %v4618_v8 }
 0x731   : > { %v4717_v60 = vadd.f32 %v9862_v55, %v4705_v23 }
 0x732   : > { %v4754_v25 = vld [vmem:[#allocation2 + $0x8] sm:$0xff] }
 0x733   : > { %5183 = vst.msk [vmem:[#allocation2 + $0x8] sm:$0xff] %vm2851_vm14, %v7610_v40  ;;  %v4778_v5 = vrot.slane %v4754_v25, 1  ;;  %v4817_v0 = vrot.slane %v4754_v25, 2  ;;  %v4872_v11 = vrot.slane %v4754_v25, 3  ;;  %v4914_v17 = vrot.slane %v4754_v25, 4 }
 0x734   : > { %4740 = vst.msk [vmem:[#allocation2 + $0x13] sm:$0xfc] %vm3800_vm15, %v4717_v60 }
 0x735   : > { %v4779_v41 = vsel %vm892_vm2, %v4777_v31, %v4778_v5  ;;  %v4818_v4 = vsel %vm643_vm0, %v4816_v37, %v4817_v0 }
 0x736   : > { %v4684_v36 = vpop.f32.mrf.mxu0  ;;  %v4806_v58 = vmax.f32 %v4753_v35, %v4779_v41  ;;  %v4422_v41 = vadd.f32 %v4404_v33, %v4335_v15 }
 0x737   : > { %v4706_v49 = vadd.f32 %v4684_v36, %v4619_v44 }
 0x738   : > { %v4845_v24 = vmax.f32 %v4806_v58, %v4818_v4  ;;  %v4604_v4 = vpop.f32.mrf.mxu3 }
 0x739   : > { %v4718_v32 = vadd.f32 %v9862_v55, %v4706_v49 }
 0x73b   : > { %4741 = vst.msk [vmem:[#allocation2 + $0x1b] sm:$0x3] %vm3802_vm1, %v4718_v32  ;;  %v4755_v34 = vld [vmem:[#allocation2 + $0x10] sm:$0xff] }
 0x73c   : > { %4742 = vst.msk [vmem:[#allocation2 + $0x1b] sm:$0xf0] %vm3804_vm7, %v4718_v32  ;;  %v4780_v35 = vrot.slane %v4755_v34, 1  ;;  %v4819_v45 = vrot.slane %v4755_v34, 2  ;;  %v4873_v8 = vrot.slane %v4755_v34, 3  ;;  %v4915_v62 = vrot.slane %v4755_v34, 4 }
 0x73d   : > { %5184 = vst.msk [vmem:[#allocation2 + $0x10] sm:$0xff] %vm2851_vm14, %v7610_v40  ;;  %v4970_v49 = vrot.slane %v4755_v34, 5  ;;  %v5012_v47 = vrot.slane %v4755_v34, 6 }
 0x73e   : > { %v4686_v57 = vpop.f32.mrf.mxu0  ;;  %v4781_v43 = vsel %vm892_vm2, %v4778_v5, %v4780_v35  ;;  %v4820_v23 = vsel %vm643_vm0, %v4817_v0, %v4819_v45  ;;  %v4874_v56 = vsel %vm2258_vm6, %v4872_v11, %v4873_v8  ;;  %v4916_v60 = vsel %vm4913_vm12, %v4914_v17, %v4915_v62 }
 0x73f   : > { %v4707_v31 = vadd.f32 %v4686_v57, %v4620_v52  ;;  %v4807_v37 = vmax.f32 %v4754_v25, %v4781_v43  ;;  %v4860_v30 = vmax.f32 %v4845_v24, %v4820_v23  ;;  %v4621_v5 = vadd.f32 %v4602_v54, %v4512_v13 }
 0x741   : > { %v4719_v9 = vadd.f32 %v9862_v55, %v4707_v31  ;;  %v4846_v38 = vmax.f32 %v4807_v37, %v4820_v23  ;;  %v4903_v44 = vmax.f32 %v4860_v30, %v4874_v56 }
 0x743   : > { %4743 = vst.msk [vmem:[#allocation2 + $0x23] sm:$0xf] %vm2864_vm13, %v4719_v9  ;;  %v9895_v0 = vld [vmem:[#allocation2 + $0x18] sm:$0xff]  ;;  %v4945_v7 = vmax.f32 %v4903_v44, %v4916_v60 }
 0x744   : > { %4744 = vst.msk [vmem:[#allocation2 + $0x23] sm:$0xc0] %vm3807_vm8, %v4719_v9  ;;  %v4782_v25 = vrot.slane %v9895_v0, 1  ;;  %v4821_v39 = vrot.slane %v9895_v0, 2  ;;  %v4875_v36 = vrot.slane %v9895_v0, 3  ;;  %v4917_v58 = vrot.slane %v9895_v0, 4  ;;  %v4607_v9 = vpop.f32.mrf.mxu3 }
 0x745   : > { %5185 = vst.msk [vmem:[#allocation2 + $0x18] sm:$0xff] %vm2851_vm14, %v7610_v40  ;;  %v4971_v33 = vrot.slane %v9895_v0, 5  ;;  %v5013_v27 = vrot.slane %v9895_v0, 6 }
 0x746   : > { %v4689_v54 = vpop.f32.mrf.mxu0  ;;  %v4783_v24 = vsel %vm892_vm2, %v4780_v35, %v4782_v25  ;;  %v4822_v32 = vsel %vm643_vm0, %v4819_v45, %v4821_v39  ;;  %v4876_v28 = vsel %vm2258_vm6, %v4873_v8, %v4875_v36  ;;  %v4918_v22 = vsel %vm4913_vm12, %v4915_v62, %v4917_v58  ;;  %v4498_v8 = vpop.f32.mrf.mxu2 }
 0x747   : > { %v4708_v11 = vadd.f32 %v4689_v54, %v4621_v5  ;;  %v4808_v17 = vmax.f32 %v4755_v34, %v4783_v24  ;;  %v4861_v18 = vmax.f32 %v4846_v38, %v4822_v32  ;;  %v4959_v52 = vmax.f32 %v4945_v7, %v4918_v22  ;;  %v4409_v62 = vpop.f32.mrf.mxu1 }
 0x748   : > { %v4972_v15 = vsel %vm4969_vm5, %v4970_v49, %v4971_v33  ;;  %v5014_v57 = vsel %vm5011_vm10, %v5012_v47, %v5013_v27  ;;  %v4028_v35 = vadd.f32 %v9797_v46, %v9799_v14  ;;  %v4513_v45 = vadd.f32 %v4495_v51, %v4422_v41 }
 0x749   : > { %v4720_v43 = vadd.f32 %v9862_v55, %v4708_v11  ;;  %v4847_v23 = vmax.f32 %v4808_v17, %v4822_v32  ;;  %v4904_v56 = vmax.f32 %v4861_v18, %v4876_v28  ;;  %v5001_v60 = vmax.f32 %v4959_v52, %v4972_v15 }
 0x74a   : > { %v9915_v31 = vld [vmem:[#allocation2 + $0x20] sm:$0xff]  ;;  %v4117_v44 = vadd.f32 %v9801_v10, %v4028_v35  ;;  %v4622_v41 = vadd.f32 %v4604_v4, %v4513_v45  ;;  %v4423_v28 = vadd.f32 %v9891_v42, %v9845_v26 }
 0x74b   : > { %5186 = vst.msk [vmem:[#allocation2 + $0x20] sm:$0xff] %vm2851_vm14, %v7610_v40  ;;  %v4784_v34 = vrot.slane %v9915_v31, 1  ;;  %v4823_v37 = vrot.slane %v9915_v31, 2  ;;  %v4877_v30 = vrot.slane %v9915_v31, 3  ;;  %v4919_v13 = vrot.slane %v9915_v31, 4 }
 0x74c   : > { %4745 = vst.msk [vmem:[#allocation2 + $0x2b] sm:$0x3f] %vm3809_vm9, %v4720_v43  ;;  %v4973_v46 = vrot.slane %v9915_v31, 5  ;;  %v5015_v14 = vrot.slane %v9915_v31, 6  ;;  %v4946_v51 = vmax.f32 %v4904_v56, %v4918_v22  ;;  %v9926_v38 = vmax.f32 %v5001_v60, %v5014_v57  ;;  %v4609_v56 = vpop.f32.mrf.mxu3 }
 0x74d   : > { %v4824_v5 = vsel %vm643_vm0, %v4821_v39, %v4823_v37  ;;  %v4920_v7 = vsel %vm4913_vm12, %v4917_v58, %v4919_v13  ;;  %v4785_v47 = vsel %vm892_vm2, %v4782_v25, %v4784_v34  ;;  %v4878_v10 = vsel %vm2258_vm6, %v4875_v36, %v4877_v30 }
 0x74e   : > { %v4691_v49 = vpop.f32.mrf.mxu0  ;;  %v4862_v54 = vmax.f32 %v4847_v23, %v4824_v5  ;;  %v4960_v24 = vmax.f32 %v4946_v51, %v4920_v7  ;;  %v4974_v32 = vsel %vm4969_vm5, %v4971_v33, %v4973_v46  ;;  %v5016_v4 = vsel %vm5011_vm10, %v5013_v27, %v5015_v14  ;;  %v4500_v36 = vpop.f32.mrf.mxu2 }
 0x74f   : > { %v4709_v22 = vadd.f32 %v4691_v49, %v4622_v41  ;;  %v4209_v58 = vadd.f32 %v9805_v21, %v4117_v44  ;;  %v4809_v17 = vmax.f32 %v9895_v0, %v4785_v47  ;;  %v4514_v15 = vadd.f32 %v4498_v8, %v4423_v28  ;;  %v4412_v57 = vpop.f32.mrf.mxu1 }
 0x750   : > { %v4905_v39 = vmax.f32 %v4862_v54, %v4878_v10  ;;  %v5002_v11 = vmax.f32 %v4960_v24, %v4974_v32  ;;  %v4338_v54 = vadd.f32 %v9849_v50, %v9809_v29 }
 0x751   : > { %v4721_v25 = vadd.f32 %v9862_v55, %v4709_v22  ;;  %v4337_v26 = vadd.f32 %v9847_v3, %v4209_v58  ;;  %v4623_v43 = vadd.f32 %v4607_v9, %v4514_v15  ;;  %v4848_v3 = vmax.f32 %v4809_v17, %v4824_v5 }
 0x752   : > { %v9941_v18 = vld [vmem:[#allocation2 + $0x20] sm:$0xff]  ;;  %v4947_v52 = vmax.f32 %v4905_v39, %v4920_v7  ;;  %v9944_v33 = vmax.f32 %v5002_v11, %v5016_v4  ;;  %v4425_v10 = vadd.f32 %v4412_v57, %v4338_v54 }
 0x753   : > { %6163 = vst.msk [vmem:[#allocation2 + $0x20] sm:$0xff] %vm2851_vm14, %v7611_v20  ;;  %v9949_v42 = vld [vmem:[#allocation2 + $0x28] sm:$0xff]  ;;  %v4424_v9 = vadd.f32 %v4409_v62, %v4337_v26  ;;  %v10001_v11 = vld [vmem:[#allocation2 + $0x60] sm:$0xf] }
 0x754   : > { %5187 = vst.msk [vmem:[#allocation2 + $0x28] sm:$0xff] %vm2851_vm14, %v7610_v40  ;;  %v4825_v21 = vrot.slane %v9949_v42, 2  ;;  %v4879_v0 = vrot.slane %v9949_v42, 3  ;;  %v4921_v27 = vrot.slane %v9949_v42, 4  ;;  %v4975_v23 = vrot.slane %v9949_v42, 5  ;;  %v4612_v39 = vpop.f32.mrf.mxu3 }
 0x755   : > { %6164 = vst.msk [vmem:[#allocation2 + $0x28] sm:$0xff] %vm2851_vm14, %v7611_v20  ;;  %v5017_v8 = vrot.slane %v9949_v42, 6  ;;  %v4515_v47 = vadd.f32 %v4500_v36, %v4424_v9 }
 0x756   : > { %4746 = vst.msk [vmem:[#allocation2 + $0x33] sm:$0xff] %vm2851_vm14, %v4721_v25  ;;  %v4694_v60 = vpop.f32.mrf.mxu0  ;;  %v9963_v35 = vsel %vm643_vm0, %v4823_v37, %v4825_v21  ;;  %v9968_v45 = vsel %vm4913_vm12, %v4919_v13, %v4921_v27  ;;  %v4880_v5 = vsel %vm2258_vm6, %v4877_v30, %v4879_v0  ;;  %v4976_v37 = vsel %vm4969_vm5, %v4973_v46, %v4975_v23  ;;  %v4503_v22 = vpop.f32.mrf.mxu2 }
 0x757   : > { %v4710_v51 = vadd.f32 %v4694_v60, %v4623_v43  ;;  %v4863_v44 = vmax.f32 %v4848_v3, %v9963_v35  ;;  %v4961_v41 = vmax.f32 %v4947_v52, %v9968_v45  ;;  %v5018_v62 = vsel %vm5011_vm10, %v5015_v14, %v5017_v8  ;;  %v4414_v50 = vpop.f32.mrf.mxu1  ;;  %5194 = vst.msk [vmem:[#allocation2 + $0x60] sm:$0xf] %vm2864_vm13, %v7610_v40 }
 0x758   : > { %v4033_v46 = vadd.f32 %v9837_v48, %v9807_v61  ;;  %v4624_v32 = vadd.f32 %v4609_v56, %v4515_v47  ;;  %6171 = vst.msk [vmem:[#allocation2 + $0x60] sm:$0xf] %vm2864_vm13, %v7611_v20  ;;  %v4786_v3 = vrot.slane %v9949_v42, 1 }
 0x759   : > { %v4722_v7 = vadd.f32 %v9862_v55, %v4710_v51  ;;  %v9980_v13 = vmax.f32 %v4863_v44, %v4880_v5  ;;  %v5003_v49 = vmax.f32 %v4961_v41, %v4976_v37 }
 0x75a   : > { %v4119_v29 = vadd.f32 %v9841_v16, %v4033_v46  ;;  %v4516_v16 = vadd.f32 %v4503_v22, %v4425_v10  ;;  %v4787_v5 = vsel %vm892_vm2, %v4784_v34, %v4786_v3 }
 0x75b   : > { %4747 = vst.msk [vmem:[#allocation2 + $0x3b] sm:$0xfc] %vm3800_vm15, %v4722_v7  ;;  %v4948_v30 = vmax.f32 %v9980_v13, %v9968_v45  ;;  %v9990_v24 = vmax.f32 %v5003_v49, %v5018_v62  ;;  %v7415_v49 = vld [vmem:[%s10526_s3] sm:$0xff]  ;;  %v4810_v47 = vmax.f32 %v9915_v31, %v4787_v5  ;;  %v5059_v45 = vmul.u32 10, %v9815_v2 }
 0x75c   : > { %v4211_v61 = vadd.f32 %v9843_v6, %v4119_v29  ;;  %v4625_v6 = vadd.f32 %v4612_v39, %v4516_v16  ;;  %v4614_v43 = vpop.f32.mrf.mxu3  ;;  %v5060_v2 = vmul.u32 10, %v9825_v53  ;;  %v7418_v53 = vld [vmem:[%s10525_s2 + $0x128] sm:$0xff] }
 0x75d   : > { %v9994_v28 = vld [vmem:[#allocation2 + $0x30] sm:$0xff] }
 0x75e   : > { %5188 = vst.msk [vmem:[#allocation2 + $0x30] sm:$0xff] %vm2851_vm14, %v7610_v40  ;;  %v4696_v14 = vpop.f32.mrf.mxu0  ;;  %v4339_v17 = vadd.f32 %v9855_v63, %v4211_v61  ;;  %v4505_v36 = vpop.f32.mrf.mxu2  ;;  %v7416_v63 = vld [vmem:[%s10526_s3 + $0x8] sm:$0xff]  ;;  %v4788_v41 = vrot.slane %v9994_v28, 1  ;;  %v4881_v31 = vrot.slane %v9994_v28, 3 }
 0x75f   : > { %6165 = vst.msk [vmem:[#allocation2 + $0x30] sm:$0xff] %vm2851_vm14, %v7611_v20  ;;  %v4711_v4 = vadd.f32 %v4696_v14, %v4624_v32  ;;  %v5105_v26 = vpop.f32.mrf.mxu1  ;;  %5139 = vmatpush.bf16.msra.mxu2 %v7416_v63  ;;  %v4827_v32 = vrot.slane %v9994_v28, 2 }
 0x760   : > { %v4426_v52 = vadd.f32 %v4414_v50, %v4339_v17  ;;  %v4789_v22 = vsel %vm892_vm2, %v4786_v3, %v4788_v41  ;;  %v4923_v50 = vrot.slane %v9994_v28, 4 }
 0x761   : > { %v4723_v48 = vadd.f32 %v9862_v55, %v4711_v4  ;;  %v4828_v17 = vsel %vm643_vm0, %v4825_v21, %v4827_v32 }
 0x762   : > { %v10007_v58 = vld [vmem:[#allocation2 + $0x38] sm:$0xff]  ;;  %v4517_v56 = vadd.f32 %v4505_v36, %v4426_v52  ;;  %v4989_v36 = vrot.slane %v10001_v11, 5 }
 0x763   : > { %5189 = vst.msk [vmem:[#allocation2 + $0x38] sm:$0xff] %vm2851_vm14, %v7610_v40  ;;  %v4790_v7 = vrot.slane %v10007_v58, 1  ;;  %5140 = vmatpush.bf16.msra.mxu2 %v7415_v49  ;;  %v4829_v39 = vrot.slane %v10007_v58, 2  ;;  %v4925_v5 = vrot.slane %v10007_v58, 4 }
 0x764   : > { %6166 = vst.msk [vmem:[#allocation2 + $0x38] sm:$0xff] %vm2851_vm14, %v7611_v20  ;;  %v4626_v60 = vadd.f32 %v4614_v43, %v4517_v56  ;;  %v5031_v43 = vrot.slane %v10001_v11, 6 }
 0x765   : > { %4748 = vst.msk [vmem:[#allocation2 + $0x43] sm:$0x3] %vm3802_vm1, %v4723_v48 }
 0x766   : > { %4749 = vst.msk [vmem:[#allocation2 + $0x43] sm:$0xf0] %vm3804_vm7, %v4723_v48  ;;  %v4699_v25 = vpop.f32.mrf.mxu0  ;;  %v4811_v48 = vmax.f32 %v9949_v42, %v4789_v22  ;;  %v5064_v42 = vadd.s32 %v9829_v1, %v5060_v2  ;;  %v7417_v1 = vld [vmem:[%s10525_s2 + $0x120] sm:$0xff] }
 0x767   : > { %v4712_v15 = vadd.f32 %v4699_v25, %v4625_v6  ;;  %v5108_v54 = vpop.f32.mrf.mxu1  ;;  %v4849_v6 = vmax.f32 %v4810_v47, %v9963_v35  ;;  %v4956_v25 = vrot.slane %v10001_v11, 4  ;;  %v4830_v35 = vsel %vm643_vm0, %v4827_v32, %v4829_v39  ;;  %5302 = vmatpush.bf16.msrb.mxu2 %v7418_v53 }
 0x768   : > { %v5111_v14 = vpack.c.bf16 %v5108_v54, %v5105_v26  ;;  %v10075_v26 = vsel %vm4913_vm12, %v4921_v27, %v4923_v50  ;;  %v4850_v56 = vmax.f32 %v4811_v48, %v4828_v17  ;;  %v4979_v11 = vrot.slane %v10007_v58, 5 }
 0x769   : > { %v4724_v57 = vadd.f32 %v9862_v55, %v4712_v15  ;;  %v4882_v15 = vsel %vm2258_vm6, %v4879_v0, %v4881_v31  ;;  %vm5066_vm11 = vcmp.eq.s32.totalorder %v8811_v12, %v5064_v42 }
 0x76a   : > { %7089 = vmatmul.msk.bf16.vlgmr.msra.gmra.mxu2 %vm2851_vm14, %v5111_v14 }
 0x76b   : > { %4750 = vst.msk [vmem:[#allocation2 + $0x4b] sm:$0xf] %vm2864_vm13, %v4724_v57  ;;  %5303 = vmatpush.bf16.msrb.mxu2 %v7417_v1 }
 0x76c   : > { %4751 = vst.msk [vmem:[#allocation2 + $0x4b] sm:$0xc0] %vm3807_vm8, %v4724_v57 }
 0x76d   : > { %v10025_v9 = vld [vmem:[#allocation2 + $0x40] sm:$0xff] }
 0x76e   : > { %5190 = vst.msk [vmem:[#allocation2 + $0x40] sm:$0xff] %vm2851_vm14, %v7610_v40  ;;  %v4701_v51 = vpop.f32.mrf.mxu0  ;;  %v4792_v44 = vrot.slane %v10025_v9, 1  ;;  %v4831_v4 = vrot.slane %v10025_v9, 2  ;;  %v4885_v47 = vrot.slane %v10025_v9, 3  ;;  %v4927_v54 = vrot.slane %v10025_v9, 4 }
 0x76f   : > { %6167 = vst.msk [vmem:[#allocation2 + $0x40] sm:$0xff] %vm2851_vm14, %v7611_v20  ;;  %v4713_v37 = vadd.f32 %v4701_v51, %v4626_v60  ;;  %v4864_v51 = vmax.f32 %v4849_v6, %v4828_v17 }
 0x770   : > { %v4793_v34 = vsel %vm892_vm2, %v4790_v7, %v4792_v44  ;;  %v4832_v21 = vsel %vm643_vm0, %v4829_v39, %v4831_v4 }
 0x771   : > { %v4725_v62 = vadd.f32 %v9862_v55, %v4713_v37  ;;  %v4791_v55 = vsel %vm892_vm2, %v4788_v41, %v4790_v7  ;;  %v4813_v61 = vmax.f32 %v10007_v58, %v4793_v34  ;;  %v4883_v41 = vrot.slane %v10007_v58, 3 }
 0x772   : > { %v10042_v46 = vld [vmem:[#allocation2 + $0x48] sm:$0xff]  ;;  %v4812_v16 = vmax.f32 %v9994_v28, %v4791_v55  ;;  %v4865_v37 = vmax.f32 %v4850_v56, %v4830_v35 }
 0x773   : > { %5191 = vst.msk [vmem:[#allocation2 + $0x48] sm:$0xff] %vm2851_vm14, %v7610_v40  ;;  %v4794_v29 = vrot.slane %v10042_v46, 1  ;;  %v4833_v10 = vrot.slane %v10042_v46, 2  ;;  %v4852_v3 = vmax.f32 %v4813_v61, %v4832_v21  ;;  %v4887_v60 = vrot.slane %v10042_v46, 3 }
 0x774   : > { %6168 = vst.msk [vmem:[#allocation2 + $0x48] sm:$0xff] %vm2851_vm14, %v7611_v20  ;;  %v4851_v27 = vmax.f32 %v4812_v16, %v4830_v35  ;;  %v4907_v35 = vmax.f32 %v4864_v51, %v4882_v15 }
 0x775   : > { %4752 = vst.msk [vmem:[#allocation2 + $0x53] sm:$0x3f] %vm3809_vm9, %v4725_v62  ;;  %v4795_v52 = vsel %vm892_vm2, %v4792_v44, %v4794_v29  ;;  %v4834_v63 = vsel %vm643_vm0, %v4831_v4, %v4833_v10  ;;  %v4815_v57 = vmax.f32 %v10042_v46, %v4794_v29  ;;  %v4929_v62 = vrot.slane %v10042_v46, 4 }
 0x776   : > { %v4814_v0 = vmax.f32 %v10025_v9, %v4795_v52  ;;  %v4867_v44 = vmax.f32 %v4852_v3, %v4834_v63  ;;  %v4866_v34 = vmax.f32 %v4851_v27, %v4832_v21  ;;  %v4888_v61 = vsel %vm2258_vm6, %v4885_v47, %v4887_v60 }
 0x777   : > { %v4854_v32 = vmax.f32 %v4815_v57, %v4833_v10  ;;  %v4886_v52 = vsel %vm2258_vm6, %v4883_v41, %v4885_v47  ;;  %v4884_v21 = vsel %vm2258_vm6, %v4881_v31, %v4883_v41  ;;  %v4930_v56 = vsel %vm4913_vm12, %v4927_v54, %v4929_v62 }
 0x778   : > { %v4853_v39 = vmax.f32 %v4814_v0, %v4834_v63  ;;  %v4910_v6 = vmax.f32 %v4867_v44, %v4888_v61  ;;  %v4926_v63 = vsel %vm4913_vm12, %v4923_v50, %v4925_v5  ;;  %v4909_v0 = vmax.f32 %v4866_v34, %v4886_v52 }
 0x779   : > { %v4908_v31 = vmax.f32 %v4865_v37, %v4884_v21  ;;  %v4928_v41 = vsel %vm4913_vm12, %v4925_v5, %v4927_v54  ;;  %v4983_v37 = vrot.slane %v10042_v46, 5  ;;  %vm5147_vm9 = vcmask 637952  }
 0x77c   : > { %v10087_v7 = vld [vmem:[#allocation2 + $0x50] sm:$0xff]  ;;  %v10089_v49 = vld [vmem:[#allocation2 + $0x58] sm:$0xff] }
 0x77d   : > { %5192 = vst.msk [vmem:[#allocation2 + $0x50] sm:$0xff] %vm2851_vm14, %v7610_v40  ;;  %v4856_v22 = vrot.slane %v10087_v7, 2  ;;  %v4889_v14 = vrot.slane %v10087_v7, 3  ;;  %v4891_v29 = vrot.slane %v10089_v49, 3  ;;  %v4931_v55 = vrot.slane %v10087_v7, 4 }
 0x77e   : > { %5193 = vst.msk [vmem:[#allocation2 + $0x58] sm:$0xff] %vm2851_vm14, %v7610_v40  ;;  %v4933_v4 = vrot.slane %v10089_v49, 4  ;;  %v5029_v15 = vrot.slane %v10089_v49, 6  ;;  %v4985_v51 = vrot.slane %v10087_v7, 5 }
 0x77f   : > { %6169 = vst.msk [vmem:[#allocation2 + $0x50] sm:$0xff] %vm2851_vm14, %v7611_v20  ;;  %v4869_v48 = vmax.f32 %v4854_v32, %v4856_v22  ;;  %v4892_v16 = vsel %vm2258_vm6, %v4889_v14, %v4891_v29  ;;  %v4857_v17 = vsel %vm643_vm0, %v4833_v10, %v4856_v22  ;;  %v4987_v10 = vrot.slane %v10089_v49, 5 }
 0x780   : > { %6170 = vst.msk [vmem:[#allocation2 + $0x58] sm:$0xff] %vm2851_vm14, %v7611_v20  ;;  %v4868_v3 = vmax.f32 %v4853_v39, %v4857_v17  ;;  %v4934_v27 = vsel %vm4913_vm12, %v4931_v55, %v4933_v4  ;;  %v4890_v44 = vsel %vm2258_vm6, %v4887_v60, %v4889_v14  ;;  %v4932_v32 = vsel %vm4913_vm12, %v4929_v62, %v4931_v55 }
 0x781   : > { %v4912_v57 = vmax.f32 %v4869_v48, %v4892_v16  ;;  %v4952_v29 = vmax.f32 %v4910_v6, %v4930_v56  ;;  %v4957_v50 = vsel %vm4913_vm12, %v4933_v4, %v4956_v25  ;;  %v4951_v48 = vmax.f32 %v4909_v0, %v4928_v41 }
 0x782   : > { %v4911_v47 = vmax.f32 %v4868_v3, %v4890_v44  ;;  %v4990_v60 = vsel %vm4969_vm5, %v4987_v10, %v4989_v36  ;;  %v5027_v62 = vrot.slane %v10087_v7, 6  ;;  %v4949_v25 = vmax.f32 %v4907_v35, %v10075_v26 }
 0x783   : > { %v4954_v22 = vmax.f32 %v4912_v57, %v4934_v27  ;;  %v4966_v61 = vmax.f32 %v4952_v29, %v4932_v32  ;;  %v4965_v55 = vmax.f32 %v4951_v48, %v4930_v56  ;;  %v4950_v4 = vmax.f32 %v4908_v31, %v4926_v63 }
 0x784   : > { %v4953_v39 = vmax.f32 %v4911_v47, %v4932_v32  ;;  %v5032_v5 = vsel %vm5011_vm10, %v5029_v15, %v5031_v43  ;;  %v4988_v54 = vsel %vm4969_vm5, %v4985_v51, %v4987_v10  ;;  %v4986_v16 = vsel %vm4969_vm5, %v4983_v37, %v4985_v51 }
 0x785   : > { %v4968_v34 = vmax.f32 %v4954_v22, %v4957_v50  ;;  %v4981_v36 = vrot.slane %v10025_v9, 5  ;;  %v5008_v6 = vmax.f32 %v4966_v61, %v4986_v16  ;;  %v4964_v52 = vmax.f32 %v4950_v4, %v4928_v41  ;;  %v7430_v61 = vld [vmem:[%s10525_s2 + $0x188] sm:$0xff] }
 0x786   : > { %v4967_v49 = vmax.f32 %v4953_v39, %v4934_v27  ;;  %v5030_v21 = vsel %vm5011_vm10, %v5027_v62, %v5029_v15  ;;  %v5025_v35 = vrot.slane %v10042_v46, 6  ;;  %v4963_v56 = vmax.f32 %v4949_v25, %v4926_v63  ;;  %v7422_v39 = vld [vmem:[%s10525_s2 + $0x148] sm:$0xff]  ;;  %5549 = vmatpush.bf16.msra.mxu0 %v7430_v61  ;;  %v7429_v25 = vld [vmem:[%s10525_s2 + $0x180] sm:$0xff]  ;;  %v7432_v61 = vld [vmem:[%s10525_s2 + $0x198] sm:$0xff] }
 0x787   : > { %v5010_v14 = vmax.f32 %v4968_v34, %v4990_v60  ;;  %v4984_v57 = vsel %vm4969_vm5, %v4981_v36, %v4983_v37  ;;  %v5023_v27 = vrot.slane %v10025_v9, 6  ;;  %v4982_v10 = vsel %vm4969_vm5, %v4979_v11, %v4981_v36  ;;  %v7421_v37 = vld [vmem:[%s10525_s2 + $0x140] sm:$0xff] }
 0x788   : > { %v5009_v7 = vmax.f32 %v4967_v49, %v4988_v54  ;;  %v5007_v3 = vmax.f32 %v4965_v55, %v4984_v57  ;;  %v5028_v0 = vsel %vm5011_vm10, %v5025_v35, %v5027_v62  ;;  %v4977_v44 = vrot.slane %v9994_v28, 5 }
 0x789   : > { %v5052_v17 = vmax.f32 %v5010_v14, %v5032_v5  ;;  %v5050_v32 = vmax.f32 %v5008_v6, %v5028_v0  ;;  %v5006_v46 = vmax.f32 %v4964_v52, %v4982_v10  ;;  %v4962_v22 = vmax.f32 %v4948_v30, %v10075_v26  ;;  %v7423_v0 = vld [vmem:[%s10525_s2 + $0x150] sm:$0xff] }
 0x78a   : > { %v5051_v43 = vmax.f32 %v5009_v7, %v5030_v21  ;;  %v5026_v47 = vsel %vm5011_vm10, %v5023_v27, %v5025_v35  ;;  %v5021_v63 = vrot.slane %v10007_v58, 6  ;;  %v4980_v29 = vsel %vm4969_vm5, %v4977_v44, %v4979_v11  ;;  %5550 = vmatpush.bf16.msra.mxu0 %v7429_v25  ;;  %v7426_v21 = vld [vmem:[%s10525_s2 + $0x168] sm:$0xff]  ;;  %v7424_v35 = vld [vmem:[%s10525_s2 + $0x158] sm:$0xff]  ;;  %v7425_v11 = vld [vmem:[%s10525_s2 + $0x160] sm:$0xff] }
 0x78b   : > { %7090 = vmatpush.msk.msra.mxu3 %vm643_vm0, %v5052_v17  ;;  %v5049_v9 = vmax.f32 %v5007_v3, %v5026_v47  ;;  %v5005_v31 = vmax.f32 %v4963_v56, %v4980_v29  ;;  %v5019_v15 = vrot.slane %v9994_v28, 6  ;;  %v4978_v51 = vsel %vm4969_vm5, %v4975_v23, %v4977_v44  ;;  %5453 = vmatpush.bf16.msra.mxu2 %v7426_v21  ;;  %v7431_v25 = vld [vmem:[%s10525_s2 + $0x190] sm:$0xff] }
 0x78c   : > { %v5024_v50 = vsel %vm5011_vm10, %v5021_v63, %v5023_v27  ;;  %v5004_v30 = vmax.f32 %v4962_v22, %v4978_v51  ;;  %v5063_v34 = vadd.s32 %v9817_v19, %v5059_v45  ;;  %v7076_v19 = vsel %vm5066_vm11, 1.0, %v7610_v40 }
 0x78d   : > { %5164 = vmatpush.msra.mxu3 %v5051_v43  ;;  %v5048_v13 = vmax.f32 %v5006_v46, %v5024_v50  ;;  %v5022_v58 = vsel %vm5011_vm10, %v5019_v15, %v5021_v63  ;;  %v5020_v41 = vsel %vm5011_vm10, %v5017_v8, %v5019_v15  ;;  %v5210_v43 = vpack.c.bf16 %v9941_v18, %v9941_v18 }
 0x78e   : > { %v5047_v26 = vmax.f32 %v5005_v31, %v5022_v58  ;;  %v5046_v28 = vmax.f32 %v5004_v30, %v5020_v41  ;;  %vm5065_vm15 = vcmp.eq.s32.totalorder %v8811_v12, %v5063_v34  ;;  %v7428_v30 = vld [vmem:[%s10525_s2 + $0x178] sm:$0xff] }
 0x78f   : > { %5165 = vmatpush.msra.mxu3 %v5050_v32  ;;  %v7075_v23 = vsel %vm5065_vm15, 1.0, %v7610_v40  ;;  %5454 = vmatpush.bf16.msra.mxu2 %v7425_v11  ;;  %v10238_v32 = vunpack.c.l.b16 %v5210_v43  ;;  %vm5416_vm15 = vsmask.f32 4352 }
 0x791   : > { %5166 = vmatpush.msra.mxu3 %v5049_v9 }
 0x793   : > { %5167 = vmatpush.msra.mxu3 %v5048_v13 }
 0x795   : > { %5168 = vmatpush.msra.mxu3 %v5047_v26 }
 0x797   : > { %5169 = vmatpush.msra.mxu3 %v5046_v28  ;;  %v7427_v28 = vld [vmem:[%s10525_s2 + $0x170] sm:$0xff] }
 0x799   : > { %5170 = vmatpush.msra.mxu3 %v9990_v24  ;;  %v7509_v24 = vld [vmem:[%s10527_s4 + $0x3] ss:$0 sm:$0xff] }
 0x79b   : > { %5171 = vmatpush.msra.mxu3 %v9944_v33  ;;  %v7420_v33 = vld [vmem:[%s10525_s2 + $0x138] sm:$0xff] }
 0x79c   : > { %5268 = vmatpush.bf16.msrb.mxu1 %v7420_v33 }
 0x79d   : > { %5172 = vmatpush.msra.mxu3 %v9926_v38  ;;  %v7419_v38 = vld [vmem:[%s10525_s2 + $0x130] sm:$0xff] }
 0x79e   : > { %7091 = vmatmul.msk.f32.vlgmr.msra.gmra.mxu3 %vm5147_vm9, %v7075_v23 }
 0x79f   : > { %5346 = vmatpush.bf16.msrb.mxu3 %v7422_v39  ;;  %v7434_v39 = vld [vmem:[%s10525_s2 + $0x1a8] sm:$0xff] }
 0x7a0   : > { %5269 = vmatpush.bf16.msrb.mxu1 %v7419_v38 }
 0x7a3   : > { %5347 = vmatpush.bf16.msrb.mxu3 %v7421_v37 }
 0x7a4   : > { %5396 = vmatpush.bf16.msra.mxu1 %v7424_v35 }
 0x7a6   : > { %7092 = vmatmul.msk.f32.gmra.mxu3 %vm5147_vm9, %v7076_v19  ;;  %vm5683_vm9 = vcmask 259074  }
 0x7a7   : > { %5499 = vmatpush.bf16.msra.mxu3 %v7428_v30 }
 0x7a8   : > { %5397 = vmatpush.bf16.msra.mxu1 %v7423_v0 }
 0x7ab   : > { %5500 = vmatpush.bf16.msra.mxu3 %v7427_v28 }
 0x7ed   : > { %v5142_v8 = vpop.f32.mrf.mxu2 }
 0x7ee   : > { %v5143_v48 = vadd.f32 %v7509_v24, %v5142_v8 }
 0x7f5   : > { %v5144_v49 = vpop.f32.mrf.mxu2 }
 0x7f6   : > { %v5145_v55 = vadd.f32 %v7509_v24, %v5144_v49 }
 0x821   : > { %v5174_v60 = vpop.f32.mrf.mxu3 }
 0x822   : > { %v10195_v62 = vadd.f32 %v5174_v60, %v5143_v48  ;;  %v7433_v60 = vld [vmem:[%s10525_s2 + $0x1a0] sm:$0xff] }
 0x824   : > { %5180 = vst.msk [vmem:[%s10203_s17] sm:$0xff] %vm2851_vm14, %v10195_v62  ;;  %v5195_v14 = vmax.f32 %v10195_v62, 0.0 }
 0x826   : > { %5197 = vst.msk [vmem:[#allocation2 + $0x7] sm:$0xf] %vm2864_vm13, %v5195_v14 }
 0x827   : > { %5198 = vst.msk [vmem:[#allocation2 + $0x9] sm:$0xf0] %vm3804_vm7, %v5195_v14 }
 0x829   : > { %v5177_v4 = vpop.f32.mrf.mxu3 }
 0x82a   : > { %v10211_v5 = vadd.f32 %v5177_v4, %v5145_v55 }
 0x82c   : > { %5181 = vst.msk [vmem:[%s10203_s17 + $0x8] sm:$0xff] %vm2851_vm14, %v10211_v5  ;;  %v5196_v54 = vmax.f32 %v10211_v5, 0.0  ;;  %s6393_s17 = sshll.u32 %s6390_s28, 4  ;;  %s6394_s17 = int_to_ptr.hbm [resolvable:$true] %s6393_s17 }
 0x82d   : > { %v5201_v16 = vld [vmem:[#allocation2] sm:$0xff]  ;;  %s7527_s9 = sshra.s32 %s6394_s17, 4  ;;  %s7528_s9 = int_to_ptr.hbm [resolvable:$true] %s7527_s9 }
 0x82e   : > { %5199 = vst.msk [vmem:[#allocation2 + $0x13] sm:$0xf] %vm2864_vm13, %v5196_v54  ;;  %v5202_v36 = vld [vmem:[#allocation2 + $0x8] sm:$0xff]  ;;  %v5206_v17 = vpack.c.bf16 %v5201_v16, %v5201_v16  ;;  %s7529_s10 = scalar_lea.hbm %s7528_s9, 16  ;;  %p7534_p0 = scmp.lt.s32.totalorder %s7528_s9, %s10528_s5 }
 0x82f   : > { %5200 = vst.msk [vmem:[#allocation2 + $0x15] sm:$0xf0] %vm3804_vm7, %v5196_v54  ;;  %v5207_v7 = vpack.c.bf16 %v5202_v36, %v5202_v36  ;;  %p7530_p11 = scmp.ne.s32.totalorder %s7528_s9, %s7529_s10  ;;  %p7535_p1 = scmp.lt.s32.totalorder %s7533_s13, %s7529_s10 }
 0x830   : > { %v5224_v6 = vunpack.c.l.b16 %v5206_v17 }
 0x831   : > { %v5225_v52 = vunpack.c.l.b16 %v5207_v7  ;;  %p7531_p12 = pnand %p7530_p11, %p7687_p5  ;;  %p7536_p2 = por %p7535_p1, %p7534_p0 }
 0x833   : > { %v10225_v57 = vpack.c.b16 %v5225_v52, %v5224_v6  ;;  %p7532_p13 = pneg %p7531_p12 }
 0x835   : > { %7119 = vmatmul.msk.bf16.vlgmr.msrb.gmra.mxu2 %vm2851_vm14, %v10225_v57  ;;  %v5203_v3 = vld [vmem:[#allocation2 + $0x10] sm:$0xff]  ;;  %v5232_v56 = vshll.u32 %v10225_v57, 16  ;;  %v5230_v29 = vshrl.u32 %v10225_v57, 16  ;;  %v5319_v50 = vrot.slane %v10225_v57, 1  ;;  %v5369_v49 = vrot.slane %v10225_v57, 3  ;;  %p7537_p3 = pnand %p7536_p2, %p7532_p13 }
 0x836   : > { %v5208_v27 = vpack.c.bf16 %v5203_v3, %v5203_v3  ;;  %v5204_v10 = vld [vmem:[#allocation2 + $0x18] sm:$0xff]  ;;  %5656 = vmatpush.bf16.msrb.mxu2 %v7434_v39 }
 0x837   : > { %v5209_v44 = vpack.c.bf16 %v5204_v10, %v5204_v10  ;;  %v5234_v22 = vrot.slane %v5232_v56, 1  ;;  %v5417_v1 = vrot.slane %v5230_v29, 3  ;;  %v5418_v38 = vrot.slane %v5232_v56, 4 }
 0x838   : > { %v5226_v46 = vunpack.c.l.b16 %v5208_v27 }
 0x839   : > { %v5367_v18 = vunpack.c.l.b16 %v5209_v44  ;;  %v5235_v51 = vor.u32 %v5234_v22, %v5230_v29  ;;  %v5419_v48 = vor.u32 %v5418_v38, %v5417_v1  ;;  %v7435_v1 = vld [vmem:[%s10525_s2 + $0x1b0] sm:$0xff] }
 0x83a   : > { %v5228_v47 = vpack.c.b16 %v5226_v46, %v5226_v46  ;;  %v10240_v63 = vpack.c.b16 %v5226_v46, %v5225_v52  ;;  %5657 = vmatpush.bf16.msrb.mxu2 %v7433_v60  ;;  %v7445_v60 = vld [vmem:[%s10525_s2 + $0x200] sm:$0xff] }
 0x83b   : > { %v10244_v9 = vpack.c.b16 %v10238_v32, %v5367_v18  ;;  %v5368_v2 = vpack.c.b16 %v5367_v18, %v5226_v46  ;;  %v5474_v4 = vpack.c.b16 %v5367_v18, %v5367_v18 }
 0x83c   : > { %v5237_v31 = vshll.u32 %v5228_v47, 16  ;;  %v5320_v15 = vrot.slane %v5228_v47, 1  ;;  %v5522_v58 = vrot.slane %v10240_v63, 2  ;;  %v5241_v33 = vshrl.u32 %v5228_v47, 16 }
 0x83d   : > { %v5523_v26 = vrot.slane %v10244_v9, 2  ;;  %v5421_v23 = vshrl.u32 %v5368_v2, 16  ;;  %v5424_v42 = vshll.u32 %v5368_v2, 16  ;;  %v5370_v14 = vrot.slane %v5368_v2, 3 }
 0x83e   : > { %v5239_v45 = vrot.slane %v5237_v31, 1  ;;  %v5321_v13 = vsel %vm892_vm2, %v5319_v50, %v5320_v15  ;;  %v5629_v54 = vrot.slane %v10240_v63, 3  ;;  %v5630_v16 = vrot.slane %v10244_v9, 3 }
 0x83f   : > { %7133 = vmatmul.msk.bf16.vlgmr.msrb.gmra.mxu3 %vm2851_vm14, %v5321_v13  ;;  %v5524_v34 = vsel %vm643_vm0, %v5522_v58, %v5523_v26  ;;  %v5423_v19 = vrot.slane %v5421_v23, 3  ;;  %v5426_v53 = vrot.slane %v5424_v42, 4  ;;  %v5371_v55 = vsel %vm2258_vm6, %v5369_v49, %v5370_v14 }
 0x840   : > { %v5240_v41 = vsel %vm439_vm3, %v5235_v51, %v5239_v45  ;;  %7189 = vmatmul.msk.bf16.vlgmr.msra.gmra.mxu0 %vm2851_vm14, %v5524_v34  ;;  %v5243_v8 = vor.u32 %v5241_v33, %v5239_v45  ;;  %v5631_v36 = vsel %vm2258_vm6, %v5629_v54, %v5630_v16  ;;  %v5569_v17 = vshrl.u32 %v10240_v63, 16 }
 0x841   : > { %7109 = vmatmul.msk.bf16.vlgmr.msrb.gmra.mxu1 %vm2851_vm14, %v5240_v41  ;;  %v5427_v24 = vor.u32 %v5426_v53, %v5423_v19  ;;  %v5572_v7 = vshll.u32 %v10240_v63, 16  ;;  %v5577_v6 = vshrl.u32 %v10244_v9, 16  ;;  %v5580_v52 = vshll.u32 %v10244_v9, 16  ;;  %v7436_v53 = vld [vmem:[%s10525_s2 + $0x1b8] sm:$0xff] }
 0x842   : > { %5609 = vmatpush.bf16.msrb.mxu1 %v7432_v61  ;;  %v5571_v21 = vrot.slane %v5569_v17, 2  ;;  %5786 = vmatpush.bf16.msrb.mxu0 %v7436_v53 }
 0x843   : > { %v5428_v37 = vsel %vm5416_vm15, %v5419_v48, %v5427_v24  ;;  %v5574_v35 = vrot.slane %v5572_v7, 3  ;;  %v5579_v57 = vrot.slane %v5577_v6, 2  ;;  %v5582_v11 = vrot.slane %v5580_v52, 3  ;;  %v7510_v7 = vld [vmem:[%s10527_s4 + $0x4] ss:$0 sm:$0xff]  ;;  %v7440_v6 = vld [vmem:[%s10525_s2 + $0x1d8] sm:$0xff] }
 0x845   : > { %7120 = vmatmul.msk.bf16.gmra.mxu2 %vm2851_vm14, %v5228_v47  ;;  %v5575_v43 = vor.u32 %v5574_v35, %v5571_v21  ;;  %v5583_v3 = vor.u32 %v5582_v11, %v5579_v57  ;;  %v7438_v21 = vld [vmem:[%s10525_s2 + $0x1c8] sm:$0xff] }
 0x846   : > { %5610 = vmatpush.bf16.msrb.mxu1 %v7431_v25  ;;  %5787 = vmatpush.bf16.msrb.mxu0 %v7435_v1 }
 0x847   : > { %v5584_v56 = vsel %vm1972_vm4, %v5575_v43, %v5583_v3  ;;  %5752 = vmatpush.bf16.msrb.mxu3 %v7438_v21  ;;  %v7437_v43 = vld [vmem:[%s10525_s2 + $0x1c0] sm:$0xff] }
 0x848   : > { %v7449_v21 = vld [vmem:[%s10525_s2 + $0x220] sm:$0xff] }
 0x84b   : > { %5753 = vmatpush.bf16.msrb.mxu3 %v7437_v43  ;;  %v7451_v43 = vld [vmem:[%s10525_s2 + $0x230] sm:$0xff] }
 0x84f   : > { %7134 = vmatmul.msk.bf16.gmra.mxu3 %vm2851_vm14, %v5320_v15 }
 0x850   : > { %7190 = vmatmul.msk.bf16.gmra.mxu0 %vm2851_vm14, %v5523_v26 }
 0x851   : > { %7110 = vmatmul.msk.bf16.gmra.mxu1 %vm2851_vm14, %v5243_v8  ;;  %v7446_v8 = vld [vmem:[%s10525_s2 + $0x208] sm:$0xff] }
 0x852   : > { %5982 = vmatpush.bf16.msra.mxu0 %v7446_v8 }
 0x855   : > { %7161 = vmatmul.msk.bf16.vlgmr.msra.gmra.mxu2 %vm2851_vm14, %v5428_v37 }
 0x856   : > { %5983 = vmatpush.bf16.msra.mxu0 %v7445_v60 }
 0x85f   : > { %7175 = vmatmul.msk.bf16.vlgmr.msra.gmra.mxu3 %vm2851_vm14, %v10240_v63 }
 0x861   : > { %7147 = vmatmul.msk.bf16.vlgmr.msra.gmra.mxu1 %vm2851_vm14, %v5371_v55 }
 0x862   : > { %5830 = vmatpush.bf16.msra.mxu1 %v7440_v6 }
 0x865   : > { %7162 = vmatmul.msk.bf16.gmra.mxu2 %vm2851_vm14, %v5427_v24 }
 0x86f   : > { %7176 = vmatmul.msk.bf16.gmra.mxu3 %vm2851_vm14, %v5474_v4 }
 0x871   : > { %7148 = vmatmul.msk.bf16.gmra.mxu1 %vm2851_vm14, %v5370_v14 }
 0x875   : > { %7217 = vmatmul.msk.bf16.vlgmr.msrb.gmra.mxu2 %vm2851_vm14, %v5631_v36 }
 0x881   : > { %7203 = vmatmul.msk.bf16.vlgmr.msrb.gmra.mxu1 %vm2851_vm14, %v5584_v56  ;;  %v7439_v56 = vld [vmem:[%s10525_s2 + $0x1d0] sm:$0xff] }
 0x882   : > { %5831 = vmatpush.bf16.msra.mxu1 %v7439_v56 }
 0x885   : > { %7218 = vmatmul.msk.bf16.gmra.mxu2 %vm2851_vm14, %v5630_v16 }
 0x891   : > { %7204 = vmatmul.msk.bf16.gmra.mxu1 %vm2851_vm14, %v5583_v3 }
 0x8b8   : > { %v5305_v0 = vpop.f32.mrf.mxu2 }
 0x8bd   : > { %v5552_v10 = vpop.f32.mrf.mxu0 }
 0x8be   : > { %v5271_v27 = vpop.f32.mrf.mxu1 }
 0x8bf   : > { %v5306_v2 = vadd.f32 %v5305_v0, %v5271_v27 }
 0x8c0   : > { %v5307_v44 = vpop.f32.mrf.mxu2 }
 0x8c2   : > { %v5349_v46 = vpop.f32.mrf.mxu3 }
 0x8c3   : > { %v5358_v42 = vadd.f32 %v5349_v46, %v5306_v2  ;;  %v7443_v2 = vld [vmem:[%s10525_s2 + $0x1f0] sm:$0xff] }
 0x8c5   : > { %v5554_v18 = vpop.f32.mrf.mxu0 }
 0x8c6   : > { %v5273_v22 = vpop.f32.mrf.mxu1 }
 0x8c7   : > { %v5308_v24 = vadd.f32 %v5307_v44, %v5273_v22  ;;  %v7442_v22 = vld [vmem:[%s10525_s2 + $0x1e8] sm:$0xff] }
 0x8c8   : > { %v5310_v47 = vpop.f32.mrf.mxu2  ;;  %5880 = vmatpush.bf16.msra.mxu2 %v7442_v22 }
 0x8ca   : > { %v5351_v63 = vpop.f32.mrf.mxu3 }
 0x8cb   : > { %v5359_v48 = vadd.f32 %v5351_v63, %v5308_v24 }
 0x8cd   : > { %v10299_v9 = vpop.f32.mrf.mxu0 }
 0x8ce   : > { %v5276_v29 = vpop.f32.mrf.mxu1 }
 0x8cf   : > { %v5311_v55 = vadd.f32 %v5310_v47, %v5276_v29 }
 0x8d0   : > { %v5312_v31 = vpop.f32.mrf.mxu2 }
 0x8d2   : > { %v5354_v50 = vpop.f32.mrf.mxu3 }
 0x8d3   : > { %v5360_v36 = vadd.f32 %v5354_v50, %v5311_v55 }
 0x8d5   : > { %v5559_v51 = vpop.f32.mrf.mxu0 }
 0x8d6   : > { %v5278_v15 = vpop.f32.mrf.mxu1 }
 0x8d8   : > { %v5456_v45 = vpop.f32.mrf.mxu2 }
 0x8da   : > { %v5356_v13 = vpop.f32.mrf.mxu3 }
 0x8de   : > { %v5399_v30 = vpop.f32.mrf.mxu1 }
 0x8df   : > { %v5408_v33 = vadd.f32 %v5399_v30, %v5358_v42 }
 0x8e0   : > { %v5458_v58 = vpop.f32.mrf.mxu2 }
 0x8e1   : > { %v5465_v39 = vadd.f32 %v5456_v45, %v5408_v33 }
 0x8e2   : > { %v5502_v26 = vpop.f32.mrf.mxu3 }
 0x8e3   : > { %v5511_v14 = vadd.f32 %v5502_v26, %v5465_v39 }
 0x8e5   : > { %v5561_v54 = vadd.f32 %v5552_v10, %v5511_v14  ;;  %v7448_v14 = vld [vmem:[%s10525_s2 + $0x218] sm:$0xff] }
 0x8e6   : > { %v5401_v41 = vpop.f32.mrf.mxu1  ;;  %6032 = vmatpush.bf16.msrb.mxu1 %v7448_v14 }
 0x8e7   : > { %v5409_v25 = vadd.f32 %v5401_v41, %v5359_v48  ;;  %v7444_v41 = vld [vmem:[%s10525_s2 + $0x1f8] sm:$0xff] }
 0x8e8   : > { %v5461_v34 = vpop.f32.mrf.mxu2  ;;  %5936 = vmatpush.bf16.msra.mxu3 %v7444_v41 }
 0x8e9   : > { %v5466_v4 = vadd.f32 %v5458_v58, %v5409_v25 }
 0x8ea   : > { %v5504_v28 = vpop.f32.mrf.mxu3 }
 0x8eb   : > { %v5512_v11 = vadd.f32 %v5504_v28, %v5466_v4 }
 0x8ec   : > { %5937 = vmatpush.bf16.msra.mxu3 %v7443_v2 }
 0x8ed   : > { %v5562_v10 = vadd.f32 %v5554_v18, %v5512_v11  ;;  %v7441_v18 = vld [vmem:[%s10525_s2 + $0x1e0] sm:$0xff]  ;;  %v7452_v11 = vld [vmem:[%s10525_s2 + $0x238] sm:$0xff] }
 0x8ee   : > { %v5404_v23 = vpop.f32.mrf.mxu1  ;;  %5881 = vmatpush.bf16.msra.mxu2 %v7441_v18 }
 0x8ef   : > { %v5410_v35 = vadd.f32 %v5404_v23, %v5360_v36 }
 0x8f0   : > { %v5463_v19 = vpop.f32.mrf.mxu2 }
 0x8f1   : > { %v5467_v0 = vadd.f32 %v5461_v34, %v5410_v35 }
 0x8f2   : > { %v5507_v38 = vpop.f32.mrf.mxu3 }
 0x8f3   : > { %v5513_v29 = vadd.f32 %v5507_v38, %v5467_v0 }
 0x8f5   : > { %v5563_v15 = vadd.f32 %v10299_v9, %v5513_v29 }
 0x8f6   : > { %v5406_v61 = vpop.f32.mrf.mxu1 }
 0x8f8   : > { %v5659_v37 = vpop.f32.mrf.mxu2 }
 0x8fa   : > { %v5509_v49 = vpop.f32.mrf.mxu3 }
 0x8fe   : > { %v5612_v16 = vpop.f32.mrf.mxu1 }
 0x8ff   : > { %v5621_v17 = vadd.f32 %v5612_v16, %v5561_v54 }
 0x900   : > { %v5661_v52 = vpop.f32.mrf.mxu2 }
 0x901   : > { %v5668_v57 = vadd.f32 %v5659_v37, %v5621_v17  ;;  %v7447_v17 = vld [vmem:[%s10525_s2 + $0x210] sm:$0xff] }
 0x902   : > { %6033 = vmatpush.bf16.msrb.mxu1 %v7447_v17 }
 0x903   : > { %v5673_v3 = vadd.f32 %v7510_v7, %v5668_v57 }
 0x905   : > { %v5676_v27 = vmax.f32 %v5673_v3, 0.0 }
 0x906   : > { %v5614_v44 = vpop.f32.mrf.mxu1 }
 0x907   : > { %5679 = vst.msk [vmem:[#allocation2 + $0x7] sm:$0xf] %vm2864_vm13, %v5676_v27  ;;  %v5622_v46 = vadd.f32 %v5614_v44, %v5562_v10 }
 0x908   : > { %5680 = vst.msk [vmem:[#allocation2 + $0x7] sm:$0xc0] %vm3807_vm8, %v5676_v27  ;;  %v5664_v47 = vpop.f32.mrf.mxu2 }
 0x909   : > { %v5669_v63 = vadd.f32 %v5661_v52, %v5622_v46 }
 0x90b   : > { %v5674_v31 = vadd.f32 %v7510_v7, %v5669_v63 }
 0x90d   : > { %v5677_v50 = vmax.f32 %v5674_v31, 0.0 }
 0x90e   : > { %v5617_v51 = vpop.f32.mrf.mxu1  ;;  %v5685_v13 = vld [vmem:[#allocation2] sm:$0xff] }
 0x90f   : > { %5681 = vst.msk [vmem:[#allocation2 + $0xf] sm:$0x3] %vm3802_vm1, %v5677_v50  ;;  %v5623_v45 = vadd.f32 %v5617_v51, %v5563_v15  ;;  %v5690_v34 = vpack.c.bf16 %v5685_v13, %v5685_v13 }
 0x910   : > { %5682 = vst.msk [vmem:[#allocation2 + $0xf] sm:$0xf0] %vm3804_vm7, %v5677_v50  ;;  %v5666_v30 = vpop.f32.mrf.mxu2 }
 0x911   : > { %6159 = vst.msk [vmem:[#allocation2] sm:$0xff] %vm2851_vm14, %v7611_v20  ;;  %v5670_v58 = vadd.f32 %v5664_v47, %v5623_v45  ;;  %v5708_v33 = vunpack.c.l.b16 %v5690_v34 }
 0x913   : > { %v5675_v26 = vadd.f32 %v7510_v7, %v5670_v58 }
 0x915   : > { %v5678_v9 = vmax.f32 %v5675_v26, 0.0 }
 0x916   : > { %v5686_v28 = vld [vmem:[#allocation2 + $0x8] sm:$0xff]  ;;  %v5619_v23 = vpop.f32.mrf.mxu1 }
 0x917   : > { %v5687_v42 = vld [vmem:[#allocation2 + $0x10] sm:$0xff]  ;;  %v5691_v19 = vpack.c.bf16 %v5686_v28, %v5686_v28  ;;  %6160 = vst.msk [vmem:[#allocation2 + $0x8] sm:$0xff] %vm2851_vm14, %v7611_v20 }
 0x918   : > { %v5692_v53 = vpack.c.bf16 %v5687_v42, %v5687_v42  ;;  %6161 = vst.msk [vmem:[#allocation2 + $0x10] sm:$0xff] %vm2851_vm14, %v7611_v20 }
 0x919   : > { %v5709_v1 = vunpack.c.l.b16 %v5691_v19  ;;  %5684 = vst.msk [vmem:[#allocation2 + $0x17] sm:$0x3c] %vm5683_vm9, %v5678_v9  ;;  %v6271_v19 = vshra.s32 %v8783_v59, 1 }
 0x91a   : > { %v5710_v38 = vunpack.c.l.b16 %v5692_v53  ;;  %v6272_v53 = vand.u32 1, %v8783_v59 }
 0x91b   : > { %v5711_v8 = vpack.c.b16 %v5709_v1, %v5708_v33  ;;  %v10401_v33 = vmul.u32 2, %v6271_v19 }
 0x91c   : > { %v5712_v24 = vpack.c.b16 %v5710_v38, %v5710_v38  ;;  %v5956_v27 = vpack.c.b16 %v5710_v38, %v5709_v1  ;;  %v10403_v1 = vmul.u32 2, %v6272_v53 }
 0x91d   : > { %7245 = vmatmul.msk.bf16.vlgmr.msrb.gmra.mxu0 %vm2851_vm14, %v5711_v8  ;;  %v5716_v39 = vshll.u32 %v5711_v8, 16  ;;  %v5803_v61 = vrot.slane %v5711_v8, 1  ;;  %v5714_v37 = vshrl.u32 %v5711_v8, 16  ;;  %v5853_v7 = vrot.slane %v5711_v8, 3 }
 0x91e   : > { %6303 = vmatpush.msrb.mxu0 %v10211_v5  ;;  %v5721_v48 = vshll.u32 %v5712_v24, 16  ;;  %v5804_v60 = vrot.slane %v5712_v24, 1  ;;  %v5725_v35 = vshrl.u32 %v5712_v24, 16  ;;  %v6005_v31 = vrot.slane %v5956_v27, 2 }
 0x91f   : > { %v5718_v25 = vrot.slane %v5716_v39, 1  ;;  %v5900_v22 = vrot.slane %v5714_v37, 3  ;;  %v5901_v47 = vrot.slane %v5716_v39, 4  ;;  %v6052_v50 = vshrl.u32 %v5956_v27, 16 }
 0x920   : > { %6304 = vmatpush.msrb.mxu0 %v10195_v62  ;;  %v5688_v49 = vld [vmem:[#allocation2 + $0x18] sm:$0xff]  ;;  %v5805_v55 = vsel %vm892_vm2, %v5803_v61, %v5804_v60  ;;  %v5723_v54 = vrot.slane %v5721_v48, 1  ;;  %v6055_v15 = vshll.u32 %v5956_v27, 16  ;;  %v6112_v23 = vrot.slane %v5956_v27, 3 }
 0x921   : > { %v5719_v4 = vor.u32 %v5718_v25, %v5714_v37  ;;  %v5693_v16 = vpack.c.bf16 %v5688_v49, %v5688_v49  ;;  %6162 = vst.msk [vmem:[#allocation2 + $0x18] sm:$0xff] %vm2851_vm14, %v7611_v20  ;;  %7259 = vmatmul.msk.bf16.vlgmr.msra.gmra.mxu1 %vm2851_vm14, %v5805_v55  ;;  %v7450_v20 = vld [vmem:[%s10525_s2 + $0x228] sm:$0xff]  ;;  %v6054_v58 = vrot.slane %v6052_v50, 2 }
 0x922   : > { %6092 = vmatpush.bf16.msrb.mxu2 %v7450_v20  ;;  %v5727_v57 = vor.u32 %v5725_v35, %v5723_v54  ;;  %v6057_v26 = vrot.slane %v6055_v15, 3 }
 0x923   : > { %v5724_v5 = vsel %vm439_vm3, %v5719_v4, %v5723_v54  ;;  %v5851_v36 = vunpack.c.l.b16 %v5693_v16 }
 0x924   : > { %7235 = vmatmul.msk.bf16.vlgmr.msrb.gmra.mxu3 %vm2851_vm14, %v5724_v5  ;;  %v6058_v34 = vor.u32 %v6057_v26, %v6054_v58 }
 0x925   : > { %v5852_v62 = vpack.c.b16 %v5851_v36, %v5710_v38  ;;  %6139 = vmatpush.bf16.msrb.mxu3 %v7452_v11  ;;  %v6004_v0 = vpack.c.b16 %v10238_v32, %v5851_v36  ;;  %v5902_v32 = vor.u32 %v5901_v47, %v5900_v22  ;;  %v5957_v28 = vpack.c.b16 %v5851_v36, %v5851_v36 }
 0x926   : > { %6093 = vmatpush.bf16.msrb.mxu2 %v7449_v21  ;;  %v6280_v38 = vmul.u32 4, %v10401_v33 }
 0x927   : > { %v5854_v6 = vrot.slane %v5852_v62, 3  ;;  %v5904_v3 = vshrl.u32 %v5852_v62, 16  ;;  %v5907_v56 = vshll.u32 %v5852_v62, 16  ;;  %v6006_v46 = vrot.slane %v6004_v0, 2 }
 0x928   : > { %v6060_v63 = vshrl.u32 %v6004_v0, 16  ;;  %v6063_v29 = vshll.u32 %v6004_v0, 16  ;;  %v6113_v2 = vrot.slane %v6004_v0, 3  ;;  %v6281_v8 = vadd.s32 %v6280_v38, %v10403_v1  ;;  %v7453_v38 = vld [vmem:[%s10526_s3 + $0x10] sm:$0xff] }
 0x929   : > { %v5855_v52 = vsel %vm2258_vm6, %v5853_v7, %v5854_v6  ;;  %6140 = vmatpush.bf16.msrb.mxu3 %v7451_v43  ;;  %v5906_v10 = vrot.slane %v5904_v3, 3  ;;  %v5909_v44 = vrot.slane %v5907_v56, 4  ;;  %v6007_v51 = vsel %vm643_vm0, %v6005_v31, %v6006_v46 }
 0x92a   : > { %7273 = vmatmul.msk.bf16.vlgmr.msra.gmra.mxu2 %vm2851_vm14, %v5855_v52  ;;  %v6062_v45 = vrot.slane %v6060_v63, 2  ;;  %v6065_v13 = vrot.slane %v6063_v29, 3  ;;  %v6114_v42 = vsel %vm2258_vm6, %v6112_v23, %v6113_v2  ;;  %vm6282_vm3 = vcmp.eq.s32.totalorder %v8811_v12, %v6281_v8  ;;  %v7454_v23 = vld [vmem:[%s10526_s3 + $0x18] sm:$0xff] }
 0x92b   : > { %v5910_v18 = vor.u32 %v5909_v44, %v5906_v10 }
 0x92c   : > { %v6066_v41 = vor.u32 %v6065_v13, %v6062_v45 }
 0x92d   : > { %7246 = vmatmul.msk.bf16.gmra.mxu0 %vm2851_vm14, %v5712_v24  ;;  %v5911_v30 = vsel %vm5416_vm15, %v5902_v32, %v5910_v18  ;;  %v7346_v24 = vsel %vm6282_vm3, 1.0, %v7610_v40 }
 0x92e   : > { %v6067_v9 = vsel %vm1972_vm4, %v6058_v34, %v6066_v41  ;;  %vm6285_vm4 = vcmask 130048  }
 0x931   : > { %7260 = vmatmul.msk.bf16.gmra.mxu1 %vm2851_vm14, %v5804_v60 }
 0x934   : > { %7236 = vmatmul.msk.bf16.gmra.mxu3 %vm2851_vm14, %v5727_v57 }
 0x93a   : > { %7274 = vmatmul.msk.bf16.gmra.mxu2 %vm2851_vm14, %v5854_v6 }
 0x93d   : > { %7301 = vmatmul.msk.bf16.vlgmr.msra.gmra.mxu0 %vm2851_vm14, %v5956_v27 }
 0x93e   : > { %6338 = vmatpush.bf16.msra.mxu0 %v7454_v23 }
 0x941   : > { %7315 = vmatmul.msk.bf16.vlgmr.msrb.gmra.mxu1 %vm2851_vm14, %v6007_v51 }
 0x942   : > { %6339 = vmatpush.bf16.msra.mxu0 %v7453_v38 }
 0x944   : > { %7287 = vmatmul.msk.bf16.vlgmr.msra.gmra.mxu3 %vm2851_vm14, %v5911_v30  ;;  %v7511_v30 = vld [vmem:[%s10527_s4 + $0x5] ss:$0 sm:$0xff] }
 0x94a   : > { %7329 = vmatmul.msk.bf16.vlgmr.msrb.gmra.mxu2 %vm2851_vm14, %v6067_v9 }
 0x94d   : > { %7302 = vmatmul.msk.bf16.gmra.mxu0 %vm2851_vm14, %v5957_v28 }
 0x951   : > { %7316 = vmatmul.msk.bf16.gmra.mxu1 %vm2851_vm14, %v6006_v46 }
 0x954   : > { %7288 = vmatmul.msk.bf16.gmra.mxu3 %vm2851_vm14, %v5910_v18 }
 0x95a   : > { %7330 = vmatmul.msk.bf16.gmra.mxu2 %vm2851_vm14, %v6066_v41 }
 0x95d   : > { %7347 = vmatmul.msk.f32.vlgmr.msrb.gmra.mxu0 %vm6285_vm4, %v7346_v24 }
 0x964   : > { %7343 = vmatmul.msk.bf16.vlgmr.msrb.gmra.mxu3 %vm2851_vm14, %v6114_v42 }
 0x974   : > { %7344 = vmatmul.msk.bf16.gmra.mxu3 %vm2851_vm14, %v6113_v2 }
 0x99a   : > { %v5789_v39 = vpop.f32.mrf.mxu0 }
 0x99e   : > { %v5833_v61 = vpop.f32.mrf.mxu1 }
 0x9a2   : > { %v5791_v48 = vpop.f32.mrf.mxu0 }
 0x9a6   : > { %v5835_v59 = vpop.f32.mrf.mxu1 }
 0x9a7   : > { %v5755_v60 = vpop.f32.mrf.mxu3 }
 0x9a8   : > { %v5790_v43 = vadd.f32 %v5789_v39, %v5755_v60 }
 0x9aa   : > { %v5794_v37 = vpop.f32.mrf.mxu0  ;;  %v5842_v56 = vadd.f32 %v5833_v61, %v5790_v43 }
 0x9ad   : > { %v5883_v25 = vpop.f32.mrf.mxu2 }
 0x9ae   : > { %v5838_v14 = vpop.f32.mrf.mxu1  ;;  %v5892_v44 = vadd.f32 %v5883_v25, %v5842_v56 }
 0x9af   : > { %v5757_v49 = vpop.f32.mrf.mxu3 }
 0x9b0   : > { %v5792_v46 = vadd.f32 %v5791_v48, %v5757_v49 }
 0x9b2   : > { %v5796_v55 = vpop.f32.mrf.mxu0  ;;  %v5843_v47 = vadd.f32 %v5835_v59, %v5792_v46  ;;  %v6181_v46 = vld [vmem:[#allocation2 + $0x20] sm:$0xff] }
 0x9b3   : > { %v6257_v23 = vrot.slane %v6181_v46, 5 }
 0x9b5   : > { %v5885_v4 = vpop.f32.mrf.mxu2 }
 0x9b6   : > { %v5840_v54 = vpop.f32.mrf.mxu1  ;;  %v5893_v18 = vadd.f32 %v5885_v4, %v5843_v47 }
 0x9b7   : > { %v5760_v16 = vpop.f32.mrf.mxu3 }
 0x9b8   : > { %v5795_v50 = vadd.f32 %v5794_v37, %v5760_v16 }
 0x9ba   : > { %v5985_v5 = vpop.f32.mrf.mxu0  ;;  %v5844_v32 = vadd.f32 %v5838_v14, %v5795_v50 }
 0x9bd   : > { %v5888_v36 = vpop.f32.mrf.mxu2 }
 0x9be   : > { %v6035_v17 = vpop.f32.mrf.mxu1  ;;  %v5894_v41 = vadd.f32 %v5888_v36, %v5844_v32 }
 0x9bf   : > { %v5762_v62 = vpop.f32.mrf.mxu3 }
 0x9c2   : > { %v5987_v7 = vpop.f32.mrf.mxu0 }
 0x9c5   : > { %v5890_v6 = vpop.f32.mrf.mxu2 }
 0x9c6   : > { %v6037_v20 = vpop.f32.mrf.mxu1 }
 0x9c7   : > { %v5939_v52 = vpop.f32.mrf.mxu3 }
 0x9c8   : > { %v5948_v22 = vadd.f32 %v5939_v52, %v5892_v44 }
 0x9ca   : > { %v5990_v21 = vpop.f32.mrf.mxu0  ;;  %v5994_v29 = vadd.f32 %v5985_v5, %v5948_v22 }
 0x9cc   : > { %v6044_v51 = vadd.f32 %v6035_v17, %v5994_v29 }
 0x9cd   : > { %v6095_v35 = vpop.f32.mrf.mxu2 }
 0x9ce   : > { %v6040_v57 = vpop.f32.mrf.mxu1  ;;  %v6104_v13 = vadd.f32 %v6095_v35, %v6044_v51 }
 0x9cf   : > { %v5941_v11 = vpop.f32.mrf.mxu3 }
 0x9d0   : > { %v5949_v15 = vadd.f32 %v5941_v11, %v5893_v18 }
 0x9d2   : > { %v5992_v3 = vpop.f32.mrf.mxu0  ;;  %v5995_v58 = vadd.f32 %v5987_v7, %v5949_v15 }
 0x9d4   : > { %v6045_v2 = vadd.f32 %v6037_v20, %v5995_v58 }
 0x9d5   : > { %v6097_v0 = vpop.f32.mrf.mxu2 }
 0x9d6   : > { %v6042_v27 = vpop.f32.mrf.mxu1  ;;  %v6105_v42 = vadd.f32 %v6097_v0, %v6045_v2 }
 0x9d7   : > { %v5944_v10 = vpop.f32.mrf.mxu3 }
 0x9d8   : > { %v5950_v9 = vadd.f32 %v5944_v10, %v5894_v41 }
 0x9da   : > { %v5996_v19 = vadd.f32 %v5990_v21, %v5950_v9  ;;  %v6306_v24 = vpop.f32.mrf.mxu0 }
 0x9db   : > { %v6309_v48 = vpack.c.bf16 %v6306_v24, %v6306_v24 }
 0x9dc   : > { %v6046_v61 = vadd.f32 %v6040_v57, %v5996_v19 }
 0x9dd   : > { %v6100_v63 = vpop.f32.mrf.mxu2  ;;  %7360 = vmatmul.msk.bf16.vlgmr.msra.gmra.mxu0 %vm2851_vm14, %v6309_v48  ;;  %vm6345_vm14 = vcmask 179200  }
 0x9de   : > { %v6106_v59 = vadd.f32 %v6100_v63, %v6046_v61 }
 0x9df   : > { %v5946_v31 = vpop.f32.mrf.mxu3 }
 0x9e5   : > { %v6102_v45 = vpop.f32.mrf.mxu2 }
 0x9e7   : > { %v6142_v26 = vpop.f32.mrf.mxu3 }
 0x9e8   : > { %v6151_v34 = vadd.f32 %v6142_v26, %v6104_v13 }
 0x9ea   : > { %v6156_v28 = vadd.f32 %v7511_v30, %v6151_v34 }
 0x9ec   : > { %6172 = vst.msk [vmem:[#allocation2 + $0x7] sm:$0xf] %vm2864_vm13, %v6156_v28 }
 0x9ed   : > { %6173 = vst.msk [vmem:[#allocation2 + $0x7] sm:$0xc0] %vm3807_vm8, %v6156_v28 }
 0x9ef   : > { %v6144_v53 = vpop.f32.mrf.mxu3 }
 0x9f0   : > { %v6152_v8 = vadd.f32 %v6144_v53, %v6105_v42 }
 0x9f2   : > { %v6157_v39 = vadd.f32 %v7511_v30, %v6152_v8  ;;  %v6274_v8 = vmul.u32 6, %v10401_v33 }
 0x9f3   : > { %v6177_v25 = vld [vmem:[#allocation2] sm:$0xff] }
 0x9f4   : > { %6174 = vst.msk [vmem:[#allocation2 + $0xf] sm:$0x3] %vm3802_vm1, %v6157_v39  ;;  %v6185_v54 = vrot.slane %v6177_v25, 1  ;;  %v6196_v6 = vrot.slane %v6177_v25, 2  ;;  %v6208_v3 = vrot.slane %v6177_v25, 6  ;;  %v6222_v15 = vrot.slane %v6177_v25, 7 }
 0x9f5   : > { %6175 = vst.msk [vmem:[#allocation2 + $0xf] sm:$0xf0] %vm3804_vm7, %v6157_v39  ;;  %v6265_v39 = vrot.slane %v6181_v46, 6  ;;  %v6276_v33 = vadd.s32 %v10403_v1, %v6274_v8 }
 0x9f7   : > { %v6147_v60 = vpop.f32.mrf.mxu3  ;;  %vm6277_vm6 = vcmp.eq.s32.totalorder %v8811_v12, %v6276_v33 }
 0x9f8   : > { %v6153_v37 = vadd.f32 %v6147_v60, %v6106_v59 }
 0x9fa   : > { %v6158_v14 = vadd.f32 %v7511_v30, %v6153_v37  ;;  %v6244_v30 = vrot.slane %v6181_v46, 4 }
 0x9fb   : > { %v10424_v49 = vld [vmem:[#allocation2 + $0x8] sm:$0xff] }
 0x9fc   : > { %v10426_v55 = vld [vmem:[#allocation2 + $0x10] sm:$0xff]  ;;  %6176 = vst.msk [vmem:[#allocation2 + $0x17] sm:$0x3c] %vm5683_vm9, %v6158_v14  ;;  %v6186_v4 = vrot.slane %v10424_v49, 1  ;;  %v6197_v36 = vrot.slane %v10424_v49, 2  ;;  %v6209_v21 = vrot.slane %v10424_v49, 6 }
 0x9fd   : > { %v6188_v16 = vrot.slane %v10426_v55, 1  ;;  %v6199_v5 = vrot.slane %v10426_v55, 2  ;;  %v6211_v20 = vrot.slane %v10426_v55, 6  ;;  %v6225_v56 = vrot.slane %v10426_v55, 7 }
 0x9fe   : > { %v6187_v17 = vsel %vm892_vm2, %v6185_v54, %v6186_v4  ;;  %v6198_v43 = vsel %vm643_vm0, %v6196_v6, %v6197_v36  ;;  %v6223_v27 = vrot.slane %v10424_v49, 7  ;;  %v6210_v29 = vsel %vm5011_vm10, %v6208_v3, %v6209_v21 }
 0x9ff   : > { %v6149_v62 = vpop.f32.mrf.mxu3  ;;  %v6189_v7 = vsel %vm892_vm2, %v6186_v4, %v6188_v16  ;;  %v6193_v35 = vmax.f32 %v6177_v25, %v6187_v17  ;;  %v6195_v57 = vmax.f32 %v10426_v55, %v6188_v16  ;;  %v6200_v11 = vsel %vm643_vm0, %v6197_v36, %v6199_v5 }
 0xa00   : > { %v6194_v52 = vmax.f32 %v10424_v49, %v6189_v7  ;;  %vm6221_vm2 = vcmask 1040384   ;;  %v6212_v63 = vsel %vm5011_vm10, %v6209_v21, %v6211_v20  ;;  %v6240_v34 = vrot.slane %v10426_v55, 4 }
 0xa01   : > { %v6204_v10 = vmax.f32 %v6193_v35, %v6198_v43  ;;  %v6206_v31 = vmax.f32 %v6195_v57, %v6199_v5  ;;  %v6226_v45 = vsel %vm6221_vm2, %v6223_v27, %v6225_v56  ;;  %v6224_v26 = vsel %vm6221_vm2, %v6222_v15, %v6223_v27 }
 0xa02   : > { %v6205_v0 = vmax.f32 %v6194_v52, %v6200_v11  ;;  %v6239_v28 = vrot.slane %v10424_v49, 4  ;;  %v6253_v59 = vrot.slane %v10426_v55, 5  ;;  %v6252_v37 = vrot.slane %v10424_v49, 5 }
 0xa03   : > { %v6180_v44 = vld [vmem:[#allocation2 + $0x18] sm:$0xff]  ;;  %v6218_v50 = vmax.f32 %v6204_v10, %v6210_v29  ;;  %v7345_v7 = vsel %vm6277_vm6, 1.0, %v7610_v40 }
 0xa04   : > { %v6213_v22 = vrot.slane %v6180_v44, 6  ;;  %v6227_v47 = vrot.slane %v6180_v44, 7  ;;  %v6219_v18 = vmax.f32 %v6205_v0, %v6212_v63  ;;  %v6242_v32 = vrot.slane %v6180_v44, 4 }
 0xa05   : > { %v6232_v9 = vmax.f32 %v6218_v50, %v6224_v26  ;;  %v6255_v19 = vrot.slane %v6180_v44, 5  ;;  %v6241_v60 = vsel %vm4913_vm12, %v6239_v28, %v6240_v34  ;;  %v6254_v17 = vsel %vm4969_vm5, %v6252_v37, %v6253_v59 }
 0xa06   : > { %v6214_v51 = vsel %vm5011_vm10, %v6211_v20, %v6213_v22  ;;  %v6233_v58 = vmax.f32 %v6219_v18, %v6226_v45  ;;  %v6228_v41 = vsel %vm6221_vm2, %v6225_v56, %v6227_v47  ;;  %v6243_v53 = vsel %vm4913_vm12, %v6240_v34, %v6242_v32 }
 0xa07   : > { %v6220_v13 = vmax.f32 %v6206_v31, %v6214_v51  ;;  %v6235_v38 = vmax.f32 %v6232_v9, %v10424_v49  ;;  %v6245_v48 = vsel %vm4913_vm12, %v6242_v32, %v6244_v30  ;;  %v6258_v4 = vsel %vm4969_vm5, %v6255_v19, %v6257_v23 }
 0xa08   : > { %v6236_v42 = vmax.f32 %v6233_v58, %v10426_v55  ;;  %v6256_v54 = vsel %vm4969_vm5, %v6253_v59, %v6255_v19  ;;  %v6266_v36 = vsel %vm5011_vm10, %v6213_v22, %v6265_v39 }
 0xa09   : > { %v6234_v2 = vmax.f32 %v6220_v13, %v6228_v41  ;;  %v6249_v14 = vmax.f32 %v6235_v38, %v6241_v60 }
 0xa0a   : > { %v6250_v61 = vmax.f32 %v6236_v42, %v6243_v53 }
 0xa0b   : > { %v6237_v24 = vmax.f32 %v6234_v2, %v6180_v44  ;;  %v6262_v62 = vmax.f32 %v6249_v14, %v6254_v17 }
 0xa0c   : > { %v6263_v5 = vmax.f32 %v6250_v61, %v6256_v54 }
 0xa0d   : > { %v6251_v25 = vmax.f32 %v6237_v24, %v6245_v48  ;;  %v6268_v1 = vmax.f32 %v6262_v62, %v6212_v63 }
 0xa0e   : > { %v6269_v49 = vmax.f32 %v6263_v5, %v6214_v51 }
 0xa0f   : > { %v6264_v16 = vmax.f32 %v6251_v25, %v6258_v4 }
 0xa11   : > { %v6270_v55 = vmax.f32 %v6264_v16, %v6266_v36 }
 0xa13   : > { %7361 = vmatpush.msk.msra.mxu1 %vm643_vm0, %v6270_v55 }
 0xa15   : > { %6366 = vmatpush.msra.mxu1 %v6269_v49 }
 0xa17   : > { %6367 = vmatpush.msra.mxu1 %v6268_v1 }
 0xa18   : > { %7362 = vmatmul.msk.f32.vlgmr.msra.gmra.mxu1 %vm6345_vm14, %v7345_v7 }
 0xa19   : > { %7540 = shalt.err (!%p7537_p3)
}
 0xa1a   : > { %s7612_s18 = smov 128   ;;  %s7613_s19 = smov 8   ;;  %v7512_v6 = vld [vmem:[%s10527_s4 + $0x6] ss:$0 sm:$0xff] }
 0xa1b   : > { %7457 = dma.vmem_to_hbm [thread:$0]  (%p7687_p5), %s10467_s14, 256, %s6394_s17, %s6374_s29, %s7612_s18, %s7612_s18, %s7613_s19  }
 0xa1c   : > { %s6508_s26 = sshll.u32 %s10183_s20, 2  ;;  %s7367_s28 = sshll.u32 %s7670_s25, 2 }
 0xa1d   : > { %s6406_s13 = scalar_lea.hbm %s10529_s6, %s7367_s28  ;;  %s255_s15 = scalar_lea.vmem [#allocation5], %s6508_s26 }
 0xa1e   : > { %s6408_s16 = sshll.u32 %s255_s15, 4  ;;  %s6410_s0 = sshll.u32 %s6406_s13, 4  ;;  %s6409_s16 = int_to_ptr.vmem [resolvable:$true] %s6408_s16  ;;  %s6411_s0 = int_to_ptr.hbm [resolvable:$true] %s6410_s0 }
 0xa1f   : > { %s6379_s25 = scalar_lea.sflag [#allocation6], %s10183_s20  ;;  %s7555_s14 = sshra.s32 %s6411_s0, 4  ;;  %s7556_s14 = int_to_ptr.hbm [resolvable:$true] %s7555_s14 }
 0xa20   : > { %s7557_s17 = scalar_lea.hbm %s7556_s14, 4  ;;  %s7561_s19 = scalar_lea.hbm %s10529_s6, 8 }
 0xa21   : > { %p7558_p4 = scmp.ne.s32.totalorder %s7556_s14, %s7557_s17  ;;  %p7562_p9 = scmp.lt.s32.totalorder %s7556_s14, %s10529_s6 }
 0xa22   : > { %p7563_p10 = scmp.lt.s32.totalorder %s7561_s19, %s7557_s17 }
 0xa23   : > { %p7559_p7 = pnand %p7558_p4, %p7687_p5 }
 0xa24   : > { %p7564_p11 = por %p7563_p10, %p7562_p9 }
 0xa25   : > { %p7560_p8 = pneg %p7559_p7 }
 0xa27   : > { %p7565_p12 = pnand %p7564_p11, %p7560_p8 }
 0xa5a   : > { %v6341_v12 = vpop.f32.mrf.mxu0 }
 0xa5b   : > { %v6342_v20 = vadd.f32 %v7512_v6, %v6341_v12 }
 0xa62   : > { %v6343_v40 = vpop.f32.mrf.mxu0 }
 0xa95   : > { %v6369_v52 = vpop.f32.mrf.mxu1 }
 0xa96   : > { %v6370_v21 = vadd.f32 %v6369_v52, %v6342_v20 }
 0xa98   : > { %6372 = vst.msk [vmem:[%s255_s15] sm:$0xf] %vm2864_vm13, %v6370_v21 }
 0xa99   : > { %7568 = shalt.err (!%p7565_p12)
}
 0xa9a   : > { %7458 = dma.vmem_to_hbm [thread:$0]  (%p7687_p5), %s6409_s16, 64, %s6411_s0, %s6379_s25  }
 0xa9b PF: > { %p7468_p13 = scmp.ge.s32.totalorder %s7607_s24, 2  ;;  %s6422_s20 = sand.u32 1, %s7595_s21  }
 0xa9c   : > { %s6423_s11 = scalar_lea.sflag [#allocation4], %s6422_s20 }
 0xa9d   : > { %p7462_p0 = pnand %p7468_p13, %p7691_p6 }
 0xa9f   : > { %p7463_p1 = pneg %p7462_p0 }
 0xaa1   : > { %7586 = dma.done.wait (%p7463_p1), %s6423_s11, 256  }
 0xaa2   : > { %7588 = vsyncadd (%p7463_p1), %s6423_s11, 4294967040  ;;  %s6433_s12 = scalar_lea.sflag [#allocation6], %s6422_s20 }
 0xaa3   : > { %7590 = dma.done.wait (%p7463_p1), %s6433_s12, 64  }
 0xaa4   : > { %7592 = vsyncadd (%p7463_p1), %s6433_s12, 4294967232  ;;  %p20_p5 = scmp.ge.s32.totalorder %s7674_s27, 4   ;;  %s10691_s21 = smov %s7599_s22 }
 0xaa5   : > { %s10692_s22 = smov %s7603_s23  ;;  %s10693_s23 = smov %s7685_s30 }
 0xaa6   : > { %s10694_s24 = smov %s7674_s27  ;;  %22 = sbr.rel (!%p20_p5) target bundleno = 7 (0x7), region = 136 }
 0xaab   :  { %6439 = vsyncpa [#allocation4], 1 }
 0xaac   :  { %6441 = vsyncpa [#allocation4 + $0x1], 1 }
 0xaad   :  { %6442 = vsyncpa [#allocation6], 1 }
 0xaae   :  { %6444 = vsyncpa [#allocation6 + $0x1], 1 }

</bundles_post_ra>
